<compile_context>
chip_gen: v7x
topology: tpu7x:2x2x1
jax: 0.10.0
libtpu: 0.0.40
codegen_flags: <defaults>
</compile_context>

<pallas_src>
import functools

import numpy as np
import jax
import jax.numpy as jnp
from jax import lax
from jax.experimental import pallas as pl
from jax.experimental.pallas import tpu as pltpu

_BN_EPS = 1e-5


# ----------------------------------------------------------------------------
# Host-side (numpy, lru_cached) one-hot positioning constants.
# ----------------------------------------------------------------------------
def _geometry(H, W, upsample):
    Ho, Wo = (2 * H, 2 * W) if upsample else (H, W)
    Wpp = Wo + 2
    return dict(Min=H * W, Ho=Ho, Wo=Wo, Wpp=Wpp,
                Mp=(Ho + 2) * Wpp, Qmax=(Ho - 1) * Wpp + Wo, Mout=Ho * Wo)


@functools.lru_cache(maxsize=None)
def _scatter_np(H, W, upsample):
    """(H*W, (Ho+2)*(Wo+2)): compact pixels -> zero-padded (optionally 2x-nearest) grid."""
    g = _geometry(H, W, upsample)
    Wp = g["Wpp"]
    m = np.zeros((H * W, g["Mp"]), np.float32)
    idx = np.arange(H * W)
    i, j = idx // W, idx % W
    if upsample:
        for a in (0, 1):
            for b in (0, 1):
                m[idx, (2 * i + a + 1) * Wp + (2 * j + b + 1)] = 1.0
    else:
        m[idx, (i + 1) * Wp + (j + 1)] = 1.0
    return m


@functools.lru_cache(maxsize=None)
def _gather_np(Ho, Wo):
    """(Qmax, Ho*Wo): inflated conv-window positions -> compact row-major output."""
    Wpp = Wo + 2
    Qmax = (Ho - 1) * Wpp + Wo
    m = np.zeros((Qmax, Ho * Wo), np.float32)
    q = np.arange(Qmax)
    y, x = q // Wpp, q % Wpp
    keep = x < Wo
    m[q[keep], (y * Wo + x)[keep]] = 1.0
    return m


# ----------------------------------------------------------------------------
# Plan builder: flattens weights/constants into one operand list + static plan
# ----------------------------------------------------------------------------
def _max_cin(params):
    m = 1
    for stage in params:
        for rb in stage["res_layers"]:
            m = max(m, int(rb["cb1"]["conv"]["w"].shape[2]),
                    int(rb["cb2"]["conv"]["w"].shape[2]))
            if rb["skip"] is not None:
                m = max(m, int(rb["skip"]["w"].shape[2]))
        if stage["upsample"] is not None:
            m = max(m, int(stage["upsample"]["w"].shape[2]))
    return m


def _build_plan(params, N, H0, W0):
    Cpad = ((_max_cin(params) + 7) // 8) * 8          # sublane-aligned channel padding
    operands = []

    def add(a):
        operands.append(a)
        return len(operands) - 1

    scat_cache, gath_cache = {}, {}

    def conv_plan(conv_p, H, W, upsample, with_bias):
        g = _geometry(H, W, upsample)
        if g["Mout"] > 1024:
            # TODO(synk): large-resolution path (host-side padding, parity-split upsample).
            raise NotImplementedError("one-hot conv path only supports small spatial dims")
        w = conv_p["w"]                                # (3, 3, Cin, Cout) HWIO
        Cin, Cout = int(w.shape[2]), int(w.shape[3])
        wt = jnp.transpose(w, (3, 0, 1, 2)).astype(jnp.float32)    # (Cout, 3, 3, Cin)
        if Cin < Cpad:                                 # zero-pad channels so K = 9*Cpad always
            wt = jnp.concatenate(
                [wt, jnp.zeros((Cout, 3, 3, Cpad - Cin), jnp.float32)], axis=-1)
        wflat = wt.reshape(Cout, 9 * Cpad)
        skey = (H, W, upsample)
        if skey not in scat_cache:
            scat_cache[skey] = add(jnp.asarray(_scatter_np(H, W, upsample),
                                               dtype=jnp.bfloat16))
        gkey = (g["Ho"], g["Wo"])
        if gkey not in gath_cache:
            gath_cache[gkey] = add(jnp.asarray(_gather_np(*gkey), dtype=jnp.bfloat16))
        p = dict(g)
        p.update(Cin=Cin, Cout=Cout, w=add(wflat),
                 b=(add(conv_p["b"].reshape(Cout, 1).astype(jnp.float32))
                    if with_bias else None),
                 scat=scat_cache[skey], gath=gath_cache[gkey])
        return p

    plan = []
    H, W = H0, W0
    C_out = None
    for stage in params:
        st = {"res": [], "up": None}
        for rb in stage["res_layers"]:
            rp = {
                "conv1": conv_plan(rb["cb1"]["conv"], H, W, False, False),
                "g1": add(rb["cb1"]["gamma"].reshape(-1, 1).astype(jnp.float32)),
                "b1": add(rb["cb1"]["beta"].reshape(-1, 1).astype(jnp.float32)),
                "conv2": conv_plan(rb["cb2"]["conv"], H, W, False, False),
                "g2": add(rb["cb2"]["gamma"].reshape(-1, 1).astype(jnp.float32)),
                "b2": add(rb["cb2"]["beta"].reshape(-1, 1).astype(jnp.float32)),
                "skip": (conv_plan(rb["skip"], H, W, False, True)
                         if rb["skip"] is not None else None),
                "count": N * H * W,
            }
            st["res"].append(rp)
            C_out = rp["conv1"]["Cout"]
        if stage["upsample"] is not None:
            st["up"] = conv_plan(stage["upsample"], H, W, True, True)
            C_out = st["up"]["Cout"]
            H, W = 2 * H, 2 * W
        plan.append(st)
    return operands, plan, Cpad, (C_out, H, W)


# ----------------------------------------------------------------------------
# Fused whole-decoder kernel
# ----------------------------------------------------------------------------
def _make_kernel(plan, n_ops, N, Cpad):
    def conv(wrefs, xs, cp, xpad_scr, patch_scr):
        Cin, Mp, Qmax, Wpp = cp["Cin"], cp["Mp"], cp["Qmax"], cp["Wpp"]
        wflat = wrefs[cp["w"]][...]                               # (Cout, 9*Cpad) f32
        scat = wrefs[cp["scat"]][...].astype(jnp.float32)         # (Min, Mp)  (bf16 0/1 -> f32)
        gath = wrefs[cp["gath"]][...].astype(jnp.float32)         # (Qmax, Mout)
        bias = wrefs[cp["b"]][...] if cp["b"] is not None else None
        if Cin < Cpad:                                            # keep pad channels exactly 0
            xpad_scr[...] = jnp.zeros_like(xpad_scr)
        ys = []
        for xi in xs:                                             # static unroll over batch
            # zero-pad (and optionally 2x-nearest-upsample) via one MXU scatter matmul
            xpad_scr[0:Cin, 0:Mp] = jnp.dot(xi, scat, preferred_element_type=jnp.float32)
            # pack the 9 shifted windows -> (9*Cpad, Qmax) im2col operand (VMEM only)
            for t in range(9):
                off = (t // 3) * Wpp + (t % 3)
                patch_scr[t * Cpad:(t + 1) * Cpad, 0:Qmax] = xpad_scr[0:Cpad, off:off + Qmax]
            # single K = 9*Cpad matmul, then window->compact-output gather matmul
            y = jnp.dot(wflat, patch_scr[0:9 * Cpad, 0:Qmax],
                        preferred_element_type=jnp.float32)       # (Cout, Qmax)
            y = jnp.dot(y, gath, preferred_element_type=jnp.float32)  # (Cout, Mout)
            if bias is not None:
                y = y + bias
            ys.append(y)
        return ys

    def bn_relu(wrefs, ys, gi, bi, count):
        gamma = wrefs[gi][...]                                    # (C, 1)
        beta = wrefs[bi][...]
        inv = 1.0 / float(count)
        mean = sum(jnp.sum(y, axis=1, keepdims=True) for y in ys) * inv
        var = sum(jnp.sum(jnp.square(y - mean), axis=1, keepdims=True) for y in ys) * inv
        scale = gamma * lax.rsqrt(var + _BN_EPS)
        shift = beta - mean * scale
        return [jnp.maximum(y * scale + shift, 0.0) for y in ys]

    def kernel(*args):
        x_ref = args[0]
        wrefs = args[1:1 + n_ops]
        out_ref = args[1 + n_ops]
        xpad_scr, patch_scr = args[2 + n_ops], args[3 + n_ops]

        xs = [x_ref[n] for n in range(N)]                         # per-image (C, H*W) values
        for st in plan:
            for rp in st["res"]:
                ys = conv(wrefs, xs, rp["conv1"], xpad_scr, patch_scr)
                ys = bn_relu(wrefs, ys, rp["g1"], rp["b1"], rp["count"])
                ys = conv(wrefs, ys, rp["conv2"], xpad_scr, patch_scr)
                ys = bn_relu(wrefs, ys, rp["g2"], rp["b2"], rp["count"])
                rs = (conv(wrefs, xs, rp["skip"], xpad_scr, patch_scr)
                      if rp["skip"] is not None else xs)
                xs = [y + r for y, r in zip(ys, rs)]
            if st["up"] is not None:
                xs = conv(wrefs, xs, st["up"], xpad_scr, patch_scr)
        for n in range(N):
            out_ref[n] = xs[n]

    return kernel


# ----------------------------------------------------------------------------
# Wrapper: single pallas_call for the whole decoder
# ----------------------------------------------------------------------------
def _full_spec(shape):
    nd = len(shape)
    return pl.BlockSpec(tuple(int(d) for d in shape), lambda i, _nd=nd: (0,) * _nd)


@jax.jit
def decoder_pallas(x_nchw, params):
    N, C0, H0, W0 = (int(d) for d in x_nchw.shape)
    operands, plan, Cpad, (Cl, Hl, Wl) = _build_plan(params, N, H0, W0)

    convs = []
    for st in plan:
        for rp in st["res"]:
            convs += [rp["conv1"], rp["conv2"]]
            if rp["skip"] is not None:
                convs.append(rp["skip"])
        if st["up"] is not None:
            convs.append(st["up"])
    max_mp = max(c["Mp"] for c in convs)
    max_q = max(c["Qmax"] for c in convs)

    x = x_nchw.astype(jnp.float32).reshape(N, C0, H0 * W0)
    kernel = _make_kernel(plan, len(operands), N, Cpad)
    out = pl.pallas_call(
        kernel,
        out_shape=jax.ShapeDtypeStruct((N, Cl, Hl * Wl), jnp.float32),
        grid=(1,),
        in_specs=[_full_spec(x.shape)] + [_full_spec(op.shape) for op in operands],
        out_specs=_full_spec((N, Cl, Hl * Wl)),
        scratch_shapes=[pltpu.VMEM((Cpad, max_mp), jnp.float32),       # padded activation
                        pltpu.VMEM((9 * Cpad, max_q), jnp.float32)],   # im2col staging
        compiler_params=pltpu.CompilerParams(dimension_semantics=("arbitrary",)),
    )(x, *operands)
    return out.reshape(N, Cl, Hl, Wl)


# ----------------------------------------------------------------------------
# Parameter construction (deterministic)
# ----------------------------------------------------------------------------
def _init_conv(key, cin, cout, bias):
    k1, k2 = jax.random.split(key)
    w = 0.1 * jax.random.normal(k1, (3, 3, cin, cout), jnp.float32)   # HWIO
    b = (0.1 * jax.random.normal(k2, (cout,), jnp.float32)
         if bias else jnp.zeros((cout,), jnp.float32))
    return {"w": w, "b": b}


def _init_conv_block(key, cin, cout):
    return {"conv": _init_conv(key, cin, cout, bias=False),
            "gamma": jnp.ones((cout,), jnp.float32),
            "beta": jnp.zeros((cout,), jnp.float32)}


def _init_residual_block(key, cin, cout):
    k1, k2, k3 = jax.random.split(key, 3)
    return {"cb1": _init_conv_block(k1, cin, cout),
            "cb2": _init_conv_block(k2, cout, cout),
            "skip": _init_conv(k3, cin, cout, bias=True) if cin != cout else None}


def init_decoder_params(key, channels, num_res_block_per_stage):
    num_stages = len(channels) - 1
    if isinstance(num_res_block_per_stage, int):
        num_res_block_per_stage = [num_res_block_per_stage] * num_stages
    assert len(channels) == len(num_res_block_per_stage) + 1

    params = []
    for i in range(num_stages):
        key, k_res, k_up = jax.random.split(key, 3)
        res_blocks = []
        ks = jax.random.split(k_res, num_res_block_per_stage[i])
        res_blocks.append(_init_residual_block(ks[0], channels[i], channels[i + 1]))
        for j in range(num_res_block_per_stage[i] - 1):
            res_blocks.append(_init_residual_block(ks[j + 1], channels[i + 1], channels[i + 1]))
        upsample = (_init_conv(k_up, channels[i + 1], channels[i + 1], bias=True)
                    if i != num_stages - 1 else None)
        params.append({"res_layers": res_blocks, "upsample": upsample})
    return params


# ----------------------------------------------------------------------------
# Pure-JAX reference (PyTorch training-mode semantics) for the correctness check
# ----------------------------------------------------------------------------
def _conv3x3_ref(x, w_hwio, bias):
    y = lax.conv_general_dilated(x, w_hwio, (1, 1), "SAME",
                                 dimension_numbers=("NCHW", "HWIO", "NCHW"))
    return y + bias.reshape(1, -1, 1, 1)


def _bn_relu_ref(x, gamma, beta, eps=_BN_EPS):
    mean = jnp.mean(x, axis=(0, 2, 3), keepdims=True)
    var = jnp.mean(jnp.square(x - mean), axis=(0, 2, 3), keepdims=True)
    y = (x - mean) / jnp.sqrt(var + eps) * gamma.reshape(1, -1, 1, 1) + beta.reshape(1, -1, 1, 1)
    return jnp.maximum(y, 0.0)


def _residual_block_ref(x, p):
    y = _bn_relu_ref(_conv3x3_ref(x, p["cb1"]["conv"]["w"], p["cb1"]["conv"]["b"]),
                     p["cb1"]["gamma"], p["cb1"]["beta"])
    y = _bn_relu_ref(_conv3x3_ref(y, p["cb2"]["conv"]["w"], p["cb2"]["conv"]["b"]),
                     p["cb2"]["gamma"], p["cb2"]["beta"])
    r = x if p["skip"] is None else _conv3x3_ref(x, p["skip"]["w"], p["skip"]["b"])
    return y + r


def decoder_ref(x, params):
    x = x.astype(jnp.float32)
    for stage in params:
        for rb in stage["res_layers"]:
            x = _residual_block_ref(x, rb)
        if stage["upsample"] is not None:
            x = jnp.repeat(jnp.repeat(x, 2, axis=2), 2, axis=3)
            x = _conv3x3_ref(x, stage["upsample"]["w"], stage["upsample"]["b"])
    return x


# ----------------------------------------------------------------------------
if __name__ == "__main__":
    key = jax.random.PRNGKey(0)
    k_params, k_x = jax.random.split(key)

    # Decoder(channels=[8, 8, 4], num_res_block_per_stage=1)
    channels = [8, 8, 4]
    num_res_block_per_stage = 1
    params = init_decoder_params(k_params, channels, num_res_block_per_stage)

    # Input: NCHW (batch=2, C=channels[0]=8, H=8, W=8)  ->  output (2, 4, 16, 16)
    x = jax.random.normal(k_x, (2, channels[0], 8, 8), jnp.float32)

    out = jax.block_until_ready(decoder_pallas(x, params))
    assert out.shape == (2, channels[-1], 16, 16), out.shape

    ref = jax.block_until_ready(decoder_ref(x, params))
    max_err = float(jnp.max(jnp.abs(out - ref)))
    assert jnp.allclose(out, ref, rtol=1e-3, atol=1e-3), max_err

    print("KERNEL_OK")
</pallas_src>

<mosaic_0001>
module attributes {stable_mosaic.version = 11 : i64} {
  func.func @kernel(%arg0: i32, %arg1: memref<2x8x64xf32, #tpu.memory_space<vmem>>, %arg2: memref<64x100xbf16, #tpu.memory_space<vmem>>, %arg3: memref<78x64xbf16, #tpu.memory_space<vmem>>, %arg4: memref<8x72xf32, #tpu.memory_space<vmem>>, %arg5: memref<8x1xf32, #tpu.memory_space<vmem>>, %arg6: memref<8x1xf32, #tpu.memory_space<vmem>>, %arg7: memref<8x72xf32, #tpu.memory_space<vmem>>, %arg8: memref<8x1xf32, #tpu.memory_space<vmem>>, %arg9: memref<8x1xf32, #tpu.memory_space<vmem>>, %arg10: memref<64x324xbf16, #tpu.memory_space<vmem>>, %arg11: memref<286x256xbf16, #tpu.memory_space<vmem>>, %arg12: memref<8x72xf32, #tpu.memory_space<vmem>>, %arg13: memref<8x1xf32, #tpu.memory_space<vmem>>, %arg14: memref<256x324xbf16, #tpu.memory_space<vmem>>, %arg15: memref<4x72xf32, #tpu.memory_space<vmem>>, %arg16: memref<4x1xf32, #tpu.memory_space<vmem>>, %arg17: memref<4x1xf32, #tpu.memory_space<vmem>>, %arg18: memref<4x72xf32, #tpu.memory_space<vmem>>, %arg19: memref<4x1xf32, #tpu.memory_space<vmem>>, %arg20: memref<4x1xf32, #tpu.memory_space<vmem>>, %arg21: memref<4x72xf32, #tpu.memory_space<vmem>>, %arg22: memref<4x1xf32, #tpu.memory_space<vmem>>, %arg23: memref<2x4x256xf32, #tpu.memory_space<vmem>>, %arg24: memref<8x324xf32, #tpu.memory_space<vmem>>, %arg25: memref<72x286xf32, #tpu.memory_space<vmem>>) attributes {dimension_semantics = [#tpu.dimension_semantics<arbitrary>], iteration_bounds = array<i64: 1>, scalar_prefetch = 0 : i64, scratch_operands = 2 : i64, tpu.core_type = #tpu.core_type<tc>, window_params = [{pipeline_mode = #tpu.pipeline_mode<synchronous>, transform_indices = @transform_0, window_bounds = array<i64: 2, 8, 64>}, {pipeline_mode = #tpu.pipeline_mode<synchronous>, transform_indices = @transform_1, window_bounds = array<i64: 64, 100>}, {pipeline_mode = #tpu.pipeline_mode<synchronous>, transform_indices = @transform_2, window_bounds = array<i64: 78, 64>}, {pipeline_mode = #tpu.pipeline_mode<synchronous>, transform_indices = @transform_3, window_bounds = array<i64: 8, 72>}, {pipeline_mode = #tpu.pipeline_mode<synchronous>, transform_indices = @transform_4, window_bounds = array<i64: 8, 1>}, {pipeline_mode = #tpu.pipeline_mode<synchronous>, transform_indices = @transform_5, window_bounds = array<i64: 8, 1>}, {pipeline_mode = #tpu.pipeline_mode<synchronous>, transform_indices = @transform_6, window_bounds = array<i64: 8, 72>}, {pipeline_mode = #tpu.pipeline_mode<synchronous>, transform_indices = @transform_7, window_bounds = array<i64: 8, 1>}, {pipeline_mode = #tpu.pipeline_mode<synchronous>, transform_indices = @transform_8, window_bounds = array<i64: 8, 1>}, {pipeline_mode = #tpu.pipeline_mode<synchronous>, transform_indices = @transform_9, window_bounds = array<i64: 64, 324>}, {pipeline_mode = #tpu.pipeline_mode<synchronous>, transform_indices = @transform_10, window_bounds = array<i64: 286, 256>}, {pipeline_mode = #tpu.pipeline_mode<synchronous>, transform_indices = @transform_11, window_bounds = array<i64: 8, 72>}, {pipeline_mode = #tpu.pipeline_mode<synchronous>, transform_indices = @transform_12, window_bounds = array<i64: 8, 1>}, {pipeline_mode = #tpu.pipeline_mode<synchronous>, transform_indices = @transform_13, window_bounds = array<i64: 256, 324>}, {pipeline_mode = #tpu.pipeline_mode<synchronous>, transform_indices = @transform_14, window_bounds = array<i64: 4, 72>}, {pipeline_mode = #tpu.pipeline_mode<synchronous>, transform_indices = @transform_15, window_bounds = array<i64: 4, 1>}, {pipeline_mode = #tpu.pipeline_mode<synchronous>, transform_indices = @transform_16, window_bounds = array<i64: 4, 1>}, {pipeline_mode = #tpu.pipeline_mode<synchronous>, transform_indices = @transform_17, window_bounds = array<i64: 4, 72>}, {pipeline_mode = #tpu.pipeline_mode<synchronous>, transform_indices = @transform_18, window_bounds = array<i64: 4, 1>}, {pipeline_mode = #tpu.pipeline_mode<synchronous>, transform_indices = @transform_19, window_bounds = array<i64: 4, 1>}, {pipeline_mode = #tpu.pipeline_mode<synchronous>, transform_indices = @transform_20, window_bounds = array<i64: 4, 72>}, {pipeline_mode = #tpu.pipeline_mode<synchronous>, transform_indices = @transform_21, window_bounds = array<i64: 4, 1>}, {pipeline_mode = #tpu.pipeline_mode<synchronous>, transform_indices = @transform_22, window_bounds = array<i64: 2, 4, 256>}]} {
    %c0 = arith.constant 0 : index
    %c0_0 = arith.constant 0 : index
    %c0_1 = arith.constant 0 : index
    %0 = vector.load %arg1[%c0, %c0_0, %c0_1] : memref<2x8x64xf32, #tpu.memory_space<vmem>>, vector<1x8x64xf32>
    %1 = vector.shape_cast %0 : vector<1x8x64xf32> to vector<8x64xf32>
    %c1 = arith.constant 1 : index
    %c0_2 = arith.constant 0 : index
    %c0_3 = arith.constant 0 : index
    %2 = vector.load %arg1[%c1, %c0_2, %c0_3] : memref<2x8x64xf32, #tpu.memory_space<vmem>>, vector<1x8x64xf32>
    %3 = vector.shape_cast %2 : vector<1x8x64xf32> to vector<8x64xf32>
    %c0_4 = arith.constant 0 : index
    %c0_5 = arith.constant 0 : index
    %4 = vector.load %arg4[%c0_4, %c0_5] : memref<8x72xf32, #tpu.memory_space<vmem>>, vector<8x72xf32>
    %c0_6 = arith.constant 0 : index
    %c0_7 = arith.constant 0 : index
    %5 = vector.load %arg2[%c0_6, %c0_7] : memref<64x100xbf16, #tpu.memory_space<vmem>>, vector<64x100xbf16>
    %6 = arith.extf %5 : vector<64x100xbf16> to vector<64x100xf32>
    %c0_8 = arith.constant 0 : index
    %c0_9 = arith.constant 0 : index
    %7 = vector.load %arg3[%c0_8, %c0_9] : memref<78x64xbf16, #tpu.memory_space<vmem>>, vector<78x64xbf16>
    %8 = arith.extf %7 : vector<78x64xbf16> to vector<78x64xf32>
    %cst = arith.constant dense<0.000000e+00> : vector<8x100xf32>
    %9 = tpu.matmul %1, %6, %cst {dimension_numbers = #tpu.dot_dimension_numbers<[1], [0], [0], [1], [0, 0, 1, 1], [], []>} : vector<8x64xf32>, vector<64x100xf32>, vector<8x100xf32> -> vector<8x100xf32>
    %c0_10 = arith.constant 0 : index
    %c0_11 = arith.constant 0 : index
    %10 = vector.load %arg24[%c0_10, %c0_11] : memref<8x324xf32, #tpu.memory_space<vmem>>, vector<8x100xf32>
    tpu.vector_store %arg24[%c0_10, %c0_11], %9 {strides = array<i32>} : memref<8x324xf32, #tpu.memory_space<vmem>>, vector<8x100xf32>,
    %c0_12 = arith.constant 0 : index
    %c0_13 = arith.constant 0 : index
    %11 = vector.load %arg24[%c0_12, %c0_13] : memref<8x324xf32, #tpu.memory_space<vmem>>, vector<8x78xf32>
    %c0_14 = arith.constant 0 : index
    %c0_15 = arith.constant 0 : index
    %12 = vector.load %arg25[%c0_14, %c0_15] : memref<72x286xf32, #tpu.memory_space<vmem>>, vector<8x78xf32>
    tpu.vector_store %arg25[%c0_14, %c0_15], %11 {strides = array<i32>} : memref<72x286xf32, #tpu.memory_space<vmem>>, vector<8x78xf32>,
    %c0_16 = arith.constant 0 : index
    %c1_17 = arith.constant 1 : index
    %13 = vector.load %arg24[%c0_16, %c1_17] : memref<8x324xf32, #tpu.memory_space<vmem>>, vector<8x78xf32>
    %c8 = arith.constant 8 : index
    %c0_18 = arith.constant 0 : index
    %14 = vector.load %arg25[%c8, %c0_18] : memref<72x286xf32, #tpu.memory_space<vmem>>, vector<8x78xf32>
    tpu.vector_store %arg25[%c8, %c0_18], %13 {strides = array<i32>} : memref<72x286xf32, #tpu.memory_space<vmem>>, vector<8x78xf32>,
    %c0_19 = arith.constant 0 : index
    %c2 = arith.constant 2 : index
    %15 = vector.load %arg24[%c0_19, %c2] : memref<8x324xf32, #tpu.memory_space<vmem>>, vector<8x78xf32>
    %c16 = arith.constant 16 : index
    %c0_20 = arith.constant 0 : index
    %16 = vector.load %arg25[%c16, %c0_20] : memref<72x286xf32, #tpu.memory_space<vmem>>, vector<8x78xf32>
    tpu.vector_store %arg25[%c16, %c0_20], %15 {strides = array<i32>} : memref<72x286xf32, #tpu.memory_space<vmem>>, vector<8x78xf32>,
    %c0_21 = arith.constant 0 : index
    %c10 = arith.constant 10 : index
    %17 = vector.load %arg24[%c0_21, %c10] : memref<8x324xf32, #tpu.memory_space<vmem>>, vector<8x78xf32>
    %c24 = arith.constant 24 : index
    %c0_22 = arith.constant 0 : index
    %18 = vector.load %arg25[%c24, %c0_22] : memref<72x286xf32, #tpu.memory_space<vmem>>, vector<8x78xf32>
    tpu.vector_store %arg25[%c24, %c0_22], %17 {strides = array<i32>} : memref<72x286xf32, #tpu.memory_space<vmem>>, vector<8x78xf32>,
    %c0_23 = arith.constant 0 : index
    %c11 = arith.constant 11 : index
    %19 = vector.load %arg24[%c0_23, %c11] : memref<8x324xf32, #tpu.memory_space<vmem>>, vector<8x78xf32>
    %c32 = arith.constant 32 : index
    %c0_24 = arith.constant 0 : index
    %20 = vector.load %arg25[%c32, %c0_24] : memref<72x286xf32, #tpu.memory_space<vmem>>, vector<8x78xf32>
    tpu.vector_store %arg25[%c32, %c0_24], %19 {strides = array<i32>} : memref<72x286xf32, #tpu.memory_space<vmem>>, vector<8x78xf32>,
    %c0_25 = arith.constant 0 : index
    %c12 = arith.constant 12 : index
    %21 = vector.load %arg24[%c0_25, %c12] : memref<8x324xf32, #tpu.memory_space<vmem>>, vector<8x78xf32>
    %c40 = arith.constant 40 : index
    %c0_26 = arith.constant 0 : index
    %22 = vector.load %arg25[%c40, %c0_26] : memref<72x286xf32, #tpu.memory_space<vmem>>, vector<8x78xf32>
    tpu.vector_store %arg25[%c40, %c0_26], %21 {strides = array<i32>} : memref<72x286xf32, #tpu.memory_space<vmem>>, vector<8x78xf32>,
    %c0_27 = arith.constant 0 : index
    %c20 = arith.constant 20 : index
    %23 = vector.load %arg24[%c0_27, %c20] : memref<8x324xf32, #tpu.memory_space<vmem>>, vector<8x78xf32>
    %c48 = arith.constant 48 : index
    %c0_28 = arith.constant 0 : index
    %24 = vector.load %arg25[%c48, %c0_28] : memref<72x286xf32, #tpu.memory_space<vmem>>, vector<8x78xf32>
    tpu.vector_store %arg25[%c48, %c0_28], %23 {strides = array<i32>} : memref<72x286xf32, #tpu.memory_space<vmem>>, vector<8x78xf32>,
    %c0_29 = arith.constant 0 : index
    %c21 = arith.constant 21 : index
    %25 = vector.load %arg24[%c0_29, %c21] : memref<8x324xf32, #tpu.memory_space<vmem>>, vector<8x78xf32>
    %c56 = arith.constant 56 : index
    %c0_30 = arith.constant 0 : index
    %26 = vector.load %arg25[%c56, %c0_30] : memref<72x286xf32, #tpu.memory_space<vmem>>, vector<8x78xf32>
    tpu.vector_store %arg25[%c56, %c0_30], %25 {strides = array<i32>} : memref<72x286xf32, #tpu.memory_space<vmem>>, vector<8x78xf32>,
    %c0_31 = arith.constant 0 : index
    %c22 = arith.constant 22 : index
    %27 = vector.load %arg24[%c0_31, %c22] : memref<8x324xf32, #tpu.memory_space<vmem>>, vector<8x78xf32>
    %c64 = arith.constant 64 : index
    %c0_32 = arith.constant 0 : index
    %28 = vector.load %arg25[%c64, %c0_32] : memref<72x286xf32, #tpu.memory_space<vmem>>, vector<8x78xf32>
    tpu.vector_store %arg25[%c64, %c0_32], %27 {strides = array<i32>} : memref<72x286xf32, #tpu.memory_space<vmem>>, vector<8x78xf32>,
    %c0_33 = arith.constant 0 : index
    %c0_34 = arith.constant 0 : index
    %29 = vector.load %arg25[%c0_33, %c0_34] : memref<72x286xf32, #tpu.memory_space<vmem>>, vector<72x78xf32>
    %cst_35 = arith.constant dense<0.000000e+00> : vector<8x78xf32>
    %30 = tpu.matmul %4, %29, %cst_35 {dimension_numbers = #tpu.dot_dimension_numbers<[1], [0], [0], [1], [0, 0, 1, 1], [], []>} : vector<8x72xf32>, vector<72x78xf32>, vector<8x78xf32> -> vector<8x78xf32>
    %cst_36 = arith.constant dense<0.000000e+00> : vector<8x64xf32>
    %31 = tpu.matmul %30, %8, %cst_36 {dimension_numbers = #tpu.dot_dimension_numbers<[1], [0], [0], [1], [0, 0, 1, 1], [], []>} : vector<8x78xf32>, vector<78x64xf32>, vector<8x64xf32> -> vector<8x64xf32>
    %cst_37 = arith.constant dense<0.000000e+00> : vector<8x100xf32>
    %32 = tpu.matmul %3, %6, %cst_37 {dimension_numbers = #tpu.dot_dimension_numbers<[1], [0], [0], [1], [0, 0, 1, 1], [], []>} : vector<8x64xf32>, vector<64x100xf32>, vector<8x100xf32> -> vector<8x100xf32>
    %c0_38 = arith.constant 0 : index
    %c0_39 = arith.constant 0 : index
    %33 = vector.load %arg24[%c0_38, %c0_39] : memref<8x324xf32, #tpu.memory_space<vmem>>, vector<8x100xf32>
    tpu.vector_store %arg24[%c0_38, %c0_39], %32 {strides = array<i32>} : memref<8x324xf32, #tpu.memory_space<vmem>>, vector<8x100xf32>,
    %c0_40 = arith.constant 0 : index
    %c0_41 = arith.constant 0 : index
    %34 = vector.load %arg24[%c0_40, %c0_41] : memref<8x324xf32, #tpu.memory_space<vmem>>, vector<8x78xf32>
    %c0_42 = arith.constant 0 : index
    %c0_43 = arith.constant 0 : index
    %35 = vector.load %arg25[%c0_42, %c0_43] : memref<72x286xf32, #tpu.memory_space<vmem>>, vector<8x78xf32>
    tpu.vector_store %arg25[%c0_42, %c0_43], %34 {strides = array<i32>} : memref<72x286xf32, #tpu.memory_space<vmem>>, vector<8x78xf32>,
    %c0_44 = arith.constant 0 : index
    %c1_45 = arith.constant 1 : index
    %36 = vector.load %arg24[%c0_44, %c1_45] : memref<8x324xf32, #tpu.memory_space<vmem>>, vector<8x78xf32>
    %c8_46 = arith.constant 8 : index
    %c0_47 = arith.constant 0 : index
    %37 = vector.load %arg25[%c8_46, %c0_47] : memref<72x286xf32, #tpu.memory_space<vmem>>, vector<8x78xf32>
    tpu.vector_store %arg25[%c8_46, %c0_47], %36 {strides = array<i32>} : memref<72x286xf32, #tpu.memory_space<vmem>>, vector<8x78xf32>,
    %c0_48 = arith.constant 0 : index
    %c2_49 = arith.constant 2 : index
    %38 = vector.load %arg24[%c0_48, %c2_49] : memref<8x324xf32, #tpu.memory_space<vmem>>, vector<8x78xf32>
    %c16_50 = arith.constant 16 : index
    %c0_51 = arith.constant 0 : index
    %39 = vector.load %arg25[%c16_50, %c0_51] : memref<72x286xf32, #tpu.memory_space<vmem>>, vector<8x78xf32>
    tpu.vector_store %arg25[%c16_50, %c0_51], %38 {strides = array<i32>} : memref<72x286xf32, #tpu.memory_space<vmem>>, vector<8x78xf32>,
    %c0_52 = arith.constant 0 : index
    %c10_53 = arith.constant 10 : index
    %40 = vector.load %arg24[%c0_52, %c10_53] : memref<8x324xf32, #tpu.memory_space<vmem>>, vector<8x78xf32>
    %c24_54 = arith.constant 24 : index
    %c0_55 = arith.constant 0 : index
    %41 = vector.load %arg25[%c24_54, %c0_55] : memref<72x286xf32, #tpu.memory_space<vmem>>, vector<8x78xf32>
    tpu.vector_store %arg25[%c24_54, %c0_55], %40 {strides = array<i32>} : memref<72x286xf32, #tpu.memory_space<vmem>>, vector<8x78xf32>,
    %c0_56 = arith.constant 0 : index
    %c11_57 = arith.constant 11 : index
    %42 = vector.load %arg24[%c0_56, %c11_57] : memref<8x324xf32, #tpu.memory_space<vmem>>, vector<8x78xf32>
    %c32_58 = arith.constant 32 : index
    %c0_59 = arith.constant 0 : index
    %43 = vector.load %arg25[%c32_58, %c0_59] : memref<72x286xf32, #tpu.memory_space<vmem>>, vector<8x78xf32>
    tpu.vector_store %arg25[%c32_58, %c0_59], %42 {strides = array<i32>} : memref<72x286xf32, #tpu.memory_space<vmem>>, vector<8x78xf32>,
    %c0_60 = arith.constant 0 : index
    %c12_61 = arith.constant 12 : index
    %44 = vector.load %arg24[%c0_60, %c12_61] : memref<8x324xf32, #tpu.memory_space<vmem>>, vector<8x78xf32>
    %c40_62 = arith.constant 40 : index
    %c0_63 = arith.constant 0 : index
    %45 = vector.load %arg25[%c40_62, %c0_63] : memref<72x286xf32, #tpu.memory_space<vmem>>, vector<8x78xf32>
    tpu.vector_store %arg25[%c40_62, %c0_63], %44 {strides = array<i32>} : memref<72x286xf32, #tpu.memory_space<vmem>>, vector<8x78xf32>,
    %c0_64 = arith.constant 0 : index
    %c20_65 = arith.constant 20 : index
    %46 = vector.load %arg24[%c0_64, %c20_65] : memref<8x324xf32, #tpu.memory_space<vmem>>, vector<8x78xf32>
    %c48_66 = arith.constant 48 : index
    %c0_67 = arith.constant 0 : index
    %47 = vector.load %arg25[%c48_66, %c0_67] : memref<72x286xf32, #tpu.memory_space<vmem>>, vector<8x78xf32>
    tpu.vector_store %arg25[%c48_66, %c0_67], %46 {strides = array<i32>} : memref<72x286xf32, #tpu.memory_space<vmem>>, vector<8x78xf32>,
    %c0_68 = arith.constant 0 : index
    %c21_69 = arith.constant 21 : index
    %48 = vector.load %arg24[%c0_68, %c21_69] : memref<8x324xf32, #tpu.memory_space<vmem>>, vector<8x78xf32>
    %c56_70 = arith.constant 56 : index
    %c0_71 = arith.constant 0 : index
    %49 = vector.load %arg25[%c56_70, %c0_71] : memref<72x286xf32, #tpu.memory_space<vmem>>, vector<8x78xf32>
    tpu.vector_store %arg25[%c56_70, %c0_71], %48 {strides = array<i32>} : memref<72x286xf32, #tpu.memory_space<vmem>>, vector<8x78xf32>,
    %c0_72 = arith.constant 0 : index
    %c22_73 = arith.constant 22 : index
    %50 = vector.load %arg24[%c0_72, %c22_73] : memref<8x324xf32, #tpu.memory_space<vmem>>, vector<8x78xf32>
    %c64_74 = arith.constant 64 : index
    %c0_75 = arith.constant 0 : index
    %51 = vector.load %arg25[%c64_74, %c0_75] : memref<72x286xf32, #tpu.memory_space<vmem>>, vector<8x78xf32>
    tpu.vector_store %arg25[%c64_74, %c0_75], %50 {strides = array<i32>} : memref<72x286xf32, #tpu.memory_space<vmem>>, vector<8x78xf32>,
    %c0_76 = arith.constant 0 : index
    %c0_77 = arith.constant 0 : index
    %52 = vector.load %arg25[%c0_76, %c0_77] : memref<72x286xf32, #tpu.memory_space<vmem>>, vector<72x78xf32>
    %cst_78 = arith.constant dense<0.000000e+00> : vector<8x78xf32>
    %53 = tpu.matmul %4, %52, %cst_78 {dimension_numbers = #tpu.dot_dimension_numbers<[1], [0], [0], [1], [0, 0, 1, 1], [], []>} : vector<8x72xf32>, vector<72x78xf32>, vector<8x78xf32> -> vector<8x78xf32>
    %cst_79 = arith.constant dense<0.000000e+00> : vector<8x64xf32>
    %54 = tpu.matmul %53, %8, %cst_79 {dimension_numbers = #tpu.dot_dimension_numbers<[1], [0], [0], [1], [0, 0, 1, 1], [], []>} : vector<8x78xf32>, vector<78x64xf32>, vector<8x64xf32> -> vector<8x64xf32>
    %c0_80 = arith.constant 0 : index
    %c0_81 = arith.constant 0 : index
    %55 = vector.load %arg5[%c0_80, %c0_81] : memref<8x1xf32, #tpu.memory_space<vmem>>, vector<8x1xf32>
    %c0_82 = arith.constant 0 : index
    %c0_83 = arith.constant 0 : index
    %56 = vector.load %arg6[%c0_82, %c0_83] : memref<8x1xf32, #tpu.memory_space<vmem>>, vector<8x1xf32>
    %cst_84 = arith.constant dense<0.000000e+00> : vector<8xf32>
    %57 = vector.multi_reduction <add>, %31, %cst_84 [1] : vector<8x64xf32> to vector<8xf32>
    %58 = vector.shape_cast %57 : vector<8xf32> to vector<8x1xf32>
    %cst_85 = arith.constant 0.000000e+00 : f32
    %59 = vector.broadcast %cst_85 : f32 to vector<8x1xf32>
    %60 = arith.addf %59, %58 : vector<8x1xf32>
    %cst_86 = arith.constant dense<0.000000e+00> : vector<8xf32>
    %61 = vector.multi_reduction <add>, %54, %cst_86 [1] : vector<8x64xf32> to vector<8xf32>
    %62 = vector.shape_cast %61 : vector<8xf32> to vector<8x1xf32>
    %63 = arith.addf %60, %62 : vector<8x1xf32>
    %cst_87 = arith.constant 7.812500e-03 : f32
    %64 = vector.broadcast %cst_87 : f32 to vector<8x1xf32>
    %65 = arith.mulf %63, %64 : vector<8x1xf32>
    %66 = vector.broadcast %65 : vector<8x1xf32> to vector<8x64xf32>
    %67 = arith.subf %31, %66 : vector<8x64xf32>
    %68 = arith.mulf %67, %67 : vector<8x64xf32>
    %cst_88 = arith.constant dense<0.000000e+00> : vector<8xf32>
    %69 = vector.multi_reduction <add>, %68, %cst_88 [1] : vector<8x64xf32> to vector<8xf32>
    %70 = vector.shape_cast %69 : vector<8xf32> to vector<8x1xf32>
    %cst_89 = arith.constant 0.000000e+00 : f32
    %71 = vector.broadcast %cst_89 : f32 to vector<8x1xf32>
    %72 = arith.addf %71, %70 : vector<8x1xf32>
    %73 = vector.broadcast %65 : vector<8x1xf32> to vector<8x64xf32>
    %74 = arith.subf %54, %73 : vector<8x64xf32>
    %75 = arith.mulf %74, %74 : vector<8x64xf32>
    %cst_90 = arith.constant dense<0.000000e+00> : vector<8xf32>
    %76 = vector.multi_reduction <add>, %75, %cst_90 [1] : vector<8x64xf32> to vector<8xf32>
    %77 = vector.shape_cast %76 : vector<8xf32> to vector<8x1xf32>
    %78 = arith.addf %72, %77 : vector<8x1xf32>
    %cst_91 = arith.constant 7.812500e-03 : f32
    %79 = vector.broadcast %cst_91 : f32 to vector<8x1xf32>
    %80 = arith.mulf %78, %79 : vector<8x1xf32>
    %cst_92 = arith.constant 9.99999974E-6 : f32
    %81 = vector.broadcast %cst_92 : f32 to vector<8x1xf32>
    %82 = arith.addf %80, %81 : vector<8x1xf32>
    %83 = math.rsqrt %82 : vector<8x1xf32>
    %84 = arith.mulf %55, %83 : vector<8x1xf32>
    %85 = arith.mulf %65, %84 : vector<8x1xf32>
    %86 = arith.subf %56, %85 : vector<8x1xf32>
    %87 = vector.broadcast %84 : vector<8x1xf32> to vector<8x64xf32>
    %88 = arith.mulf %31, %87 : vector<8x64xf32>
    %89 = vector.broadcast %86 : vector<8x1xf32> to vector<8x64xf32>
    %90 = arith.addf %88, %89 : vector<8x64xf32>
    %cst_93 = arith.constant 0.000000e+00 : f32
    %91 = vector.broadcast %cst_93 : f32 to vector<8x64xf32>
    %92 = arith.maximumf %90, %91 : vector<8x64xf32>
    %93 = vector.broadcast %84 : vector<8x1xf32> to vector<8x64xf32>
    %94 = arith.mulf %54, %93 : vector<8x64xf32>
    %95 = vector.broadcast %86 : vector<8x1xf32> to vector<8x64xf32>
    %96 = arith.addf %94, %95 : vector<8x64xf32>
    %cst_94 = arith.constant 0.000000e+00 : f32
    %97 = vector.broadcast %cst_94 : f32 to vector<8x64xf32>
    %98 = arith.maximumf %96, %97 : vector<8x64xf32>
    %c0_95 = arith.constant 0 : index
    %c0_96 = arith.constant 0 : index
    %99 = vector.load %arg7[%c0_95, %c0_96] : memref<8x72xf32, #tpu.memory_space<vmem>>, vector<8x72xf32>
    %c0_97 = arith.constant 0 : index
    %c0_98 = arith.constant 0 : index
    %100 = vector.load %arg2[%c0_97, %c0_98] : memref<64x100xbf16, #tpu.memory_space<vmem>>, vector<64x100xbf16>
    %101 = arith.extf %100 : vector<64x100xbf16> to vector<64x100xf32>
    %c0_99 = arith.constant 0 : index
    %c0_100 = arith.constant 0 : index
    %102 = vector.load %arg3[%c0_99, %c0_100] : memref<78x64xbf16, #tpu.memory_space<vmem>>, vector<78x64xbf16>
    %103 = arith.extf %102 : vector<78x64xbf16> to vector<78x64xf32>
    %cst_101 = arith.constant dense<0.000000e+00> : vector<8x100xf32>
    %104 = tpu.matmul %92, %101, %cst_101 {dimension_numbers = #tpu.dot_dimension_numbers<[1], [0], [0], [1], [0, 0, 1, 1], [], []>} : vector<8x64xf32>, vector<64x100xf32>, vector<8x100xf32> -> vector<8x100xf32>
    %c0_102 = arith.constant 0 : index
    %c0_103 = arith.constant 0 : index
    %105 = vector.load %arg24[%c0_102, %c0_103] : memref<8x324xf32, #tpu.memory_space<vmem>>, vector<8x100xf32>
    tpu.vector_store %arg24[%c0_102, %c0_103], %104 {strides = array<i32>} : memref<8x324xf32, #tpu.memory_space<vmem>>, vector<8x100xf32>,
    %c0_104 = arith.constant 0 : index
    %c0_105 = arith.constant 0 : index
    %106 = vector.load %arg24[%c0_104, %c0_105] : memref<8x324xf32, #tpu.memory_space<vmem>>, vector<8x78xf32>
    %c0_106 = arith.constant 0 : index
    %c0_107 = arith.constant 0 : index
    %107 = vector.load %arg25[%c0_106, %c0_107] : memref<72x286xf32, #tpu.memory_space<vmem>>, vector<8x78xf32>
    tpu.vector_store %arg25[%c0_106, %c0_107], %106 {strides = array<i32>} : memref<72x286xf32, #tpu.memory_space<vmem>>, vector<8x78xf32>,
    %c0_108 = arith.constant 0 : index
    %c1_109 = arith.constant 1 : index
    %108 = vector.load %arg24[%c0_108, %c1_109] : memref<8x324xf32, #tpu.memory_space<vmem>>, vector<8x78xf32>
    %c8_110 = arith.constant 8 : index
    %c0_111 = arith.constant 0 : index
    %109 = vector.load %arg25[%c8_110, %c0_111] : memref<72x286xf32, #tpu.memory_space<vmem>>, vector<8x78xf32>
    tpu.vector_store %arg25[%c8_110, %c0_111], %108 {strides = array<i32>} : memref<72x286xf32, #tpu.memory_space<vmem>>, vector<8x78xf32>,
    %c0_112 = arith.constant 0 : index
    %c2_113 = arith.constant 2 : index
    %110 = vector.load %arg24[%c0_112, %c2_113] : memref<8x324xf32, #tpu.memory_space<vmem>>, vector<8x78xf32>
    %c16_114 = arith.constant 16 : index
    %c0_115 = arith.constant 0 : index
    %111 = vector.load %arg25[%c16_114, %c0_115] : memref<72x286xf32, #tpu.memory_space<vmem>>, vector<8x78xf32>
    tpu.vector_store %arg25[%c16_114, %c0_115], %110 {strides = array<i32>} : memref<72x286xf32, #tpu.memory_space<vmem>>, vector<8x78xf32>,
    %c0_116 = arith.constant 0 : index
    %c10_117 = arith.constant 10 : index
    %112 = vector.load %arg24[%c0_116, %c10_117] : memref<8x324xf32, #tpu.memory_space<vmem>>, vector<8x78xf32>
    %c24_118 = arith.constant 24 : index
    %c0_119 = arith.constant 0 : index
    %113 = vector.load %arg25[%c24_118, %c0_119] : memref<72x286xf32, #tpu.memory_space<vmem>>, vector<8x78xf32>
    tpu.vector_store %arg25[%c24_118, %c0_119], %112 {strides = array<i32>} : memref<72x286xf32, #tpu.memory_space<vmem>>, vector<8x78xf32>,
    %c0_120 = arith.constant 0 : index
    %c11_121 = arith.constant 11 : index
    %114 = vector.load %arg24[%c0_120, %c11_121] : memref<8x324xf32, #tpu.memory_space<vmem>>, vector<8x78xf32>
    %c32_122 = arith.constant 32 : index
    %c0_123 = arith.constant 0 : index
    %115 = vector.load %arg25[%c32_122, %c0_123] : memref<72x286xf32, #tpu.memory_space<vmem>>, vector<8x78xf32>
    tpu.vector_store %arg25[%c32_122, %c0_123], %114 {strides = array<i32>} : memref<72x286xf32, #tpu.memory_space<vmem>>, vector<8x78xf32>,
    %c0_124 = arith.constant 0 : index
    %c12_125 = arith.constant 12 : index
    %116 = vector.load %arg24[%c0_124, %c12_125] : memref<8x324xf32, #tpu.memory_space<vmem>>, vector<8x78xf32>
    %c40_126 = arith.constant 40 : index
    %c0_127 = arith.constant 0 : index
    %117 = vector.load %arg25[%c40_126, %c0_127] : memref<72x286xf32, #tpu.memory_space<vmem>>, vector<8x78xf32>
    tpu.vector_store %arg25[%c40_126, %c0_127], %116 {strides = array<i32>} : memref<72x286xf32, #tpu.memory_space<vmem>>, vector<8x78xf32>,
    %c0_128 = arith.constant 0 : index
    %c20_129 = arith.constant 20 : index
    %118 = vector.load %arg24[%c0_128, %c20_129] : memref<8x324xf32, #tpu.memory_space<vmem>>, vector<8x78xf32>
    %c48_130 = arith.constant 48 : index
    %c0_131 = arith.constant 0 : index
    %119 = vector.load %arg25[%c48_130, %c0_131] : memref<72x286xf32, #tpu.memory_space<vmem>>, vector<8x78xf32>
    tpu.vector_store %arg25[%c48_130, %c0_131], %118 {strides = array<i32>} : memref<72x286xf32, #tpu.memory_space<vmem>>, vector<8x78xf32>,
    %c0_132 = arith.constant 0 : index
    %c21_133 = arith.constant 21 : index
    %120 = vector.load %arg24[%c0_132, %c21_133] : memref<8x324xf32, #tpu.memory_space<vmem>>, vector<8x78xf32>
    %c56_134 = arith.constant 56 : index
    %c0_135 = arith.constant 0 : index
    %121 = vector.load %arg25[%c56_134, %c0_135] : memref<72x286xf32, #tpu.memory_space<vmem>>, vector<8x78xf32>
    tpu.vector_store %arg25[%c56_134, %c0_135], %120 {strides = array<i32>} : memref<72x286xf32, #tpu.memory_space<vmem>>, vector<8x78xf32>,
    %c0_136 = arith.constant 0 : index
    %c22_137 = arith.constant 22 : index
    %122 = vector.load %arg24[%c0_136, %c22_137] : memref<8x324xf32, #tpu.memory_space<vmem>>, vector<8x78xf32>
    %c64_138 = arith.constant 64 : index
    %c0_139 = arith.constant 0 : index
    %123 = vector.load %arg25[%c64_138, %c0_139] : memref<72x286xf32, #tpu.memory_space<vmem>>, vector<8x78xf32>
    tpu.vector_store %arg25[%c64_138, %c0_139], %122 {strides = array<i32>} : memref<72x286xf32, #tpu.memory_space<vmem>>, vector<8x78xf32>,
    %c0_140 = arith.constant 0 : index
    %c0_141 = arith.constant 0 : index
    %124 = vector.load %arg25[%c0_140, %c0_141] : memref<72x286xf32, #tpu.memory_space<vmem>>, vector<72x78xf32>
    %cst_142 = arith.constant dense<0.000000e+00> : vector<8x78xf32>
    %125 = tpu.matmul %99, %124, %cst_142 {dimension_numbers = #tpu.dot_dimension_numbers<[1], [0], [0], [1], [0, 0, 1, 1], [], []>} : vector<8x72xf32>, vector<72x78xf32>, vector<8x78xf32> -> vector<8x78xf32>
    %cst_143 = arith.constant dense<0.000000e+00> : vector<8x64xf32>
    %126 = tpu.matmul %125, %103, %cst_143 {dimension_numbers = #tpu.dot_dimension_numbers<[1], [0], [0], [1], [0, 0, 1, 1], [], []>} : vector<8x78xf32>, vector<78x64xf32>, vector<8x64xf32> -> vector<8x64xf32>
    %cst_144 = arith.constant dense<0.000000e+00> : vector<8x100xf32>
    %127 = tpu.matmul %98, %101, %cst_144 {dimension_numbers = #tpu.dot_dimension_numbers<[1], [0], [0], [1], [0, 0, 1, 1], [], []>} : vector<8x64xf32>, vector<64x100xf32>, vector<8x100xf32> -> vector<8x100xf32>
    %c0_145 = arith.constant 0 : index
    %c0_146 = arith.constant 0 : index
    %128 = vector.load %arg24[%c0_145, %c0_146] : memref<8x324xf32, #tpu.memory_space<vmem>>, vector<8x100xf32>
    tpu.vector_store %arg24[%c0_145, %c0_146], %127 {strides = array<i32>} : memref<8x324xf32, #tpu.memory_space<vmem>>, vector<8x100xf32>,
    %c0_147 = arith.constant 0 : index
    %c0_148 = arith.constant 0 : index
    %129 = vector.load %arg24[%c0_147, %c0_148] : memref<8x324xf32, #tpu.memory_space<vmem>>, vector<8x78xf32>
    %c0_149 = arith.constant 0 : index
    %c0_150 = arith.constant 0 : index
    %130 = vector.load %arg25[%c0_149, %c0_150] : memref<72x286xf32, #tpu.memory_space<vmem>>, vector<8x78xf32>
    tpu.vector_store %arg25[%c0_149, %c0_150], %129 {strides = array<i32>} : memref<72x286xf32, #tpu.memory_space<vmem>>, vector<8x78xf32>,
    %c0_151 = arith.constant 0 : index
    %c1_152 = arith.constant 1 : index
    %131 = vector.load %arg24[%c0_151, %c1_152] : memref<8x324xf32, #tpu.memory_space<vmem>>, vector<8x78xf32>
    %c8_153 = arith.constant 8 : index
    %c0_154 = arith.constant 0 : index
    %132 = vector.load %arg25[%c8_153, %c0_154] : memref<72x286xf32, #tpu.memory_space<vmem>>, vector<8x78xf32>
    tpu.vector_store %arg25[%c8_153, %c0_154], %131 {strides = array<i32>} : memref<72x286xf32, #tpu.memory_space<vmem>>, vector<8x78xf32>,
    %c0_155 = arith.constant 0 : index
    %c2_156 = arith.constant 2 : index
    %133 = vector.load %arg24[%c0_155, %c2_156] : memref<8x324xf32, #tpu.memory_space<vmem>>, vector<8x78xf32>
    %c16_157 = arith.constant 16 : index
    %c0_158 = arith.constant 0 : index
    %134 = vector.load %arg25[%c16_157, %c0_158] : memref<72x286xf32, #tpu.memory_space<vmem>>, vector<8x78xf32>
    tpu.vector_store %arg25[%c16_157, %c0_158], %133 {strides = array<i32>} : memref<72x286xf32, #tpu.memory_space<vmem>>, vector<8x78xf32>,
    %c0_159 = arith.constant 0 : index
    %c10_160 = arith.constant 10 : index
    %135 = vector.load %arg24[%c0_159, %c10_160] : memref<8x324xf32, #tpu.memory_space<vmem>>, vector<8x78xf32>
    %c24_161 = arith.constant 24 : index
    %c0_162 = arith.constant 0 : index
    %136 = vector.load %arg25[%c24_161, %c0_162] : memref<72x286xf32, #tpu.memory_space<vmem>>, vector<8x78xf32>
    tpu.vector_store %arg25[%c24_161, %c0_162], %135 {strides = array<i32>} : memref<72x286xf32, #tpu.memory_space<vmem>>, vector<8x78xf32>,
    %c0_163 = arith.constant 0 : index
    %c11_164 = arith.constant 11 : index
    %137 = vector.load %arg24[%c0_163, %c11_164] : memref<8x324xf32, #tpu.memory_space<vmem>>, vector<8x78xf32>
    %c32_165 = arith.constant 32 : index
    %c0_166 = arith.constant 0 : index
    %138 = vector.load %arg25[%c32_165, %c0_166] : memref<72x286xf32, #tpu.memory_space<vmem>>, vector<8x78xf32>
    tpu.vector_store %arg25[%c32_165, %c0_166], %137 {strides = array<i32>} : memref<72x286xf32, #tpu.memory_space<vmem>>, vector<8x78xf32>,
    %c0_167 = arith.constant 0 : index
    %c12_168 = arith.constant 12 : index
    %139 = vector.load %arg24[%c0_167, %c12_168] : memref<8x324xf32, #tpu.memory_space<vmem>>, vector<8x78xf32>
    %c40_169 = arith.constant 40 : index
    %c0_170 = arith.constant 0 : index
    %140 = vector.load %arg25[%c40_169, %c0_170] : memref<72x286xf32, #tpu.memory_space<vmem>>, vector<8x78xf32>
    tpu.vector_store %arg25[%c40_169, %c0_170], %139 {strides = array<i32>} : memref<72x286xf32, #tpu.memory_space<vmem>>, vector<8x78xf32>,
    %c0_171 = arith.constant 0 : index
    %c20_172 = arith.constant 20 : index
    %141 = vector.load %arg24[%c0_171, %c20_172] : memref<8x324xf32, #tpu.memory_space<vmem>>, vector<8x78xf32>
    %c48_173 = arith.constant 48 : index
    %c0_174 = arith.constant 0 : index
    %142 = vector.load %arg25[%c48_173, %c0_174] : memref<72x286xf32, #tpu.memory_space<vmem>>, vector<8x78xf32>
    tpu.vector_store %arg25[%c48_173, %c0_174], %141 {strides = array<i32>} : memref<72x286xf32, #tpu.memory_space<vmem>>, vector<8x78xf32>,
    %c0_175 = arith.constant 0 : index
    %c21_176 = arith.constant 21 : index
    %143 = vector.load %arg24[%c0_175, %c21_176] : memref<8x324xf32, #tpu.memory_space<vmem>>, vector<8x78xf32>
    %c56_177 = arith.constant 56 : index
    %c0_178 = arith.constant 0 : index
    %144 = vector.load %arg25[%c56_177, %c0_178] : memref<72x286xf32, #tpu.memory_space<vmem>>, vector<8x78xf32>
    tpu.vector_store %arg25[%c56_177, %c0_178], %143 {strides = array<i32>} : memref<72x286xf32, #tpu.memory_space<vmem>>, vector<8x78xf32>,
    %c0_179 = arith.constant 0 : index
    %c22_180 = arith.constant 22 : index
    %145 = vector.load %arg24[%c0_179, %c22_180] : memref<8x324xf32, #tpu.memory_space<vmem>>, vector<8x78xf32>
    %c64_181 = arith.constant 64 : index
    %c0_182 = arith.constant 0 : index
    %146 = vector.load %arg25[%c64_181, %c0_182] : memref<72x286xf32, #tpu.memory_space<vmem>>, vector<8x78xf32>
    tpu.vector_store %arg25[%c64_181, %c0_182], %145 {strides = array<i32>} : memref<72x286xf32, #tpu.memory_space<vmem>>, vector<8x78xf32>,
    %c0_183 = arith.constant 0 : index
    %c0_184 = arith.constant 0 : index
    %147 = vector.load %arg25[%c0_183, %c0_184] : memref<72x286xf32, #tpu.memory_space<vmem>>, vector<72x78xf32>
    %cst_185 = arith.constant dense<0.000000e+00> : vector<8x78xf32>
    %148 = tpu.matmul %99, %147, %cst_185 {dimension_numbers = #tpu.dot_dimension_numbers<[1], [0], [0], [1], [0, 0, 1, 1], [], []>} : vector<8x72xf32>, vector<72x78xf32>, vector<8x78xf32> -> vector<8x78xf32>
    %cst_186 = arith.constant dense<0.000000e+00> : vector<8x64xf32>
    %149 = tpu.matmul %148, %103, %cst_186 {dimension_numbers = #tpu.dot_dimension_numbers<[1], [0], [0], [1], [0, 0, 1, 1], [], []>} : vector<8x78xf32>, vector<78x64xf32>, vector<8x64xf32> -> vector<8x64xf32>
    %c0_187 = arith.constant 0 : index
    %c0_188 = arith.constant 0 : index
    %150 = vector.load %arg8[%c0_187, %c0_188] : memref<8x1xf32, #tpu.memory_space<vmem>>, vector<8x1xf32>
    %c0_189 = arith.constant 0 : index
    %c0_190 = arith.constant 0 : index
    %151 = vector.load %arg9[%c0_189, %c0_190] : memref<8x1xf32, #tpu.memory_space<vmem>>, vector<8x1xf32>
    %cst_191 = arith.constant dense<0.000000e+00> : vector<8xf32>
    %152 = vector.multi_reduction <add>, %126, %cst_191 [1] : vector<8x64xf32> to vector<8xf32>
    %153 = vector.shape_cast %152 : vector<8xf32> to vector<8x1xf32>
    %cst_192 = arith.constant 0.000000e+00 : f32
    %154 = vector.broadcast %cst_192 : f32 to vector<8x1xf32>
    %155 = arith.addf %154, %153 : vector<8x1xf32>
    %cst_193 = arith.constant dense<0.000000e+00> : vector<8xf32>
    %156 = vector.multi_reduction <add>, %149, %cst_193 [1] : vector<8x64xf32> to vector<8xf32>
    %157 = vector.shape_cast %156 : vector<8xf32> to vector<8x1xf32>
    %158 = arith.addf %155, %157 : vector<8x1xf32>
    %cst_194 = arith.constant 7.812500e-03 : f32
    %159 = vector.broadcast %cst_194 : f32 to vector<8x1xf32>
    %160 = arith.mulf %158, %159 : vector<8x1xf32>
    %161 = vector.broadcast %160 : vector<8x1xf32> to vector<8x64xf32>
    %162 = arith.subf %126, %161 : vector<8x64xf32>
    %163 = arith.mulf %162, %162 : vector<8x64xf32>
    %cst_195 = arith.constant dense<0.000000e+00> : vector<8xf32>
    %164 = vector.multi_reduction <add>, %163, %cst_195 [1] : vector<8x64xf32> to vector<8xf32>
    %165 = vector.shape_cast %164 : vector<8xf32> to vector<8x1xf32>
    %cst_196 = arith.constant 0.000000e+00 : f32
    %166 = vector.broadcast %cst_196 : f32 to vector<8x1xf32>
    %167 = arith.addf %166, %165 : vector<8x1xf32>
    %168 = vector.broadcast %160 : vector<8x1xf32> to vector<8x64xf32>
    %169 = arith.subf %149, %168 : vector<8x64xf32>
    %170 = arith.mulf %169, %169 : vector<8x64xf32>
    %cst_197 = arith.constant dense<0.000000e+00> : vector<8xf32>
    %171 = vector.multi_reduction <add>, %170, %cst_197 [1] : vector<8x64xf32> to vector<8xf32>
    %172 = vector.shape_cast %171 : vector<8xf32> to vector<8x1xf32>
    %173 = arith.addf %167, %172 : vector<8x1xf32>
    %cst_198 = arith.constant 7.812500e-03 : f32
    %174 = vector.broadcast %cst_198 : f32 to vector<8x1xf32>
    %175 = arith.mulf %173, %174 : vector<8x1xf32>
    %cst_199 = arith.constant 9.99999974E-6 : f32
    %176 = vector.broadcast %cst_199 : f32 to vector<8x1xf32>
    %177 = arith.addf %175, %176 : vector<8x1xf32>
    %178 = math.rsqrt %177 : vector<8x1xf32>
    %179 = arith.mulf %150, %178 : vector<8x1xf32>
    %180 = arith.mulf %160, %179 : vector<8x1xf32>
    %181 = arith.subf %151, %180 : vector<8x1xf32>
    %182 = vector.broadcast %179 : vector<8x1xf32> to vector<8x64xf32>
    %183 = arith.mulf %126, %182 : vector<8x64xf32>
    %184 = vector.broadcast %181 : vector<8x1xf32> to vector<8x64xf32>
    %185 = arith.addf %183, %184 : vector<8x64xf32>
    %cst_200 = arith.constant 0.000000e+00 : f32
    %186 = vector.broadcast %cst_200 : f32 to vector<8x64xf32>
    %187 = arith.maximumf %185, %186 : vector<8x64xf32>
    %188 = vector.broadcast %179 : vector<8x1xf32> to vector<8x64xf32>
    %189 = arith.mulf %149, %188 : vector<8x64xf32>
    %190 = vector.broadcast %181 : vector<8x1xf32> to vector<8x64xf32>
    %191 = arith.addf %189, %190 : vector<8x64xf32>
    %cst_201 = arith.constant 0.000000e+00 : f32
    %192 = vector.broadcast %cst_201 : f32 to vector<8x64xf32>
    %193 = arith.maximumf %191, %192 : vector<8x64xf32>
    %194 = arith.addf %187, %1 : vector<8x64xf32>
    %195 = arith.addf %193, %3 : vector<8x64xf32>
    %c0_202 = arith.constant 0 : index
    %c0_203 = arith.constant 0 : index
    %196 = vector.load %arg12[%c0_202, %c0_203] : memref<8x72xf32, #tpu.memory_space<vmem>>, vector<8x72xf32>
    %c0_204 = arith.constant 0 : index
    %c0_205 = arith.constant 0 : index
    %197 = vector.load %arg10[%c0_204, %c0_205] : memref<64x324xbf16, #tpu.memory_space<vmem>>, vector<64x324xbf16>
    %198 = arith.extf %197 : vector<64x324xbf16> to vector<64x324xf32>
    %c0_206 = arith.constant 0 : index
    %c0_207 = arith.constant 0 : index
    %199 = vector.load %arg11[%c0_206, %c0_207] : memref<286x256xbf16, #tpu.memory_space<vmem>>, vector<286x256xbf16>
    %200 = arith.extf %199 : vector<286x256xbf16> to vector<286x256xf32>
    %c0_208 = arith.constant 0 : index
    %c0_209 = arith.constant 0 : index
    %201 = vector.load %arg13[%c0_208, %c0_209] : memref<8x1xf32, #tpu.memory_space<vmem>>, vector<8x1xf32>
    %cst_210 = arith.constant dense<0.000000e+00> : vector<8x324xf32>
    %202 = tpu.matmul %194, %198, %cst_210 {dimension_numbers = #tpu.dot_dimension_numbers<[1], [0], [0], [1], [0, 0, 1, 1], [], []>} : vector<8x64xf32>, vector<64x324xf32>, vector<8x324xf32> -> vector<8x324xf32>
    %c0_211 = arith.constant 0 : index
    %c0_212 = arith.constant 0 : index
    %203 = vector.load %arg24[%c0_211, %c0_212] : memref<8x324xf32, #tpu.memory_space<vmem>>, vector<8x324xf32>
    tpu.vector_store %arg24[%c0_211, %c0_212], %202 {strides = array<i32>} : memref<8x324xf32, #tpu.memory_space<vmem>>, vector<8x324xf32>,
    %c0_213 = arith.constant 0 : index
    %c0_214 = arith.constant 0 : index
    %204 = vector.load %arg24[%c0_213, %c0_214] : memref<8x324xf32, #tpu.memory_space<vmem>>, vector<8x286xf32>
    %c0_215 = arith.constant 0 : index
    %c0_216 = arith.constant 0 : index
    %205 = vector.load %arg25[%c0_215, %c0_216] : memref<72x286xf32, #tpu.memory_space<vmem>>, vector<8x286xf32>
    tpu.vector_store %arg25[%c0_215, %c0_216], %204 {strides = array<i32>} : memref<72x286xf32, #tpu.memory_space<vmem>>, vector<8x286xf32>,
    %c0_217 = arith.constant 0 : index
    %c1_218 = arith.constant 1 : index
    %206 = vector.load %arg24[%c0_217, %c1_218] : memref<8x324xf32, #tpu.memory_space<vmem>>, vector<8x286xf32>
    %c8_219 = arith.constant 8 : index
    %c0_220 = arith.constant 0 : index
    %207 = vector.load %arg25[%c8_219, %c0_220] : memref<72x286xf32, #tpu.memory_space<vmem>>, vector<8x286xf32>
    tpu.vector_store %arg25[%c8_219, %c0_220], %206 {strides = array<i32>} : memref<72x286xf32, #tpu.memory_space<vmem>>, vector<8x286xf32>,
    %c0_221 = arith.constant 0 : index
    %c2_222 = arith.constant 2 : index
    %208 = vector.load %arg24[%c0_221, %c2_222] : memref<8x324xf32, #tpu.memory_space<vmem>>, vector<8x286xf32>
    %c16_223 = arith.constant 16 : index
    %c0_224 = arith.constant 0 : index
    %209 = vector.load %arg25[%c16_223, %c0_224] : memref<72x286xf32, #tpu.memory_space<vmem>>, vector<8x286xf32>
    tpu.vector_store %arg25[%c16_223, %c0_224], %208 {strides = array<i32>} : memref<72x286xf32, #tpu.memory_space<vmem>>, vector<8x286xf32>,
    %c0_225 = arith.constant 0 : index
    %c18 = arith.constant 18 : index
    %210 = vector.load %arg24[%c0_225, %c18] : memref<8x324xf32, #tpu.memory_space<vmem>>, vector<8x286xf32>
    %c24_226 = arith.constant 24 : index
    %c0_227 = arith.constant 0 : index
    %211 = vector.load %arg25[%c24_226, %c0_227] : memref<72x286xf32, #tpu.memory_space<vmem>>, vector<8x286xf32>
    tpu.vector_store %arg25[%c24_226, %c0_227], %210 {strides = array<i32>} : memref<72x286xf32, #tpu.memory_space<vmem>>, vector<8x286xf32>,
    %c0_228 = arith.constant 0 : index
    %c19 = arith.constant 19 : index
    %212 = vector.load %arg24[%c0_228, %c19] : memref<8x324xf32, #tpu.memory_space<vmem>>, vector<8x286xf32>
    %c32_229 = arith.constant 32 : index
    %c0_230 = arith.constant 0 : index
    %213 = vector.load %arg25[%c32_229, %c0_230] : memref<72x286xf32, #tpu.memory_space<vmem>>, vector<8x286xf32>
    tpu.vector_store %arg25[%c32_229, %c0_230], %212 {strides = array<i32>} : memref<72x286xf32, #tpu.memory_space<vmem>>, vector<8x286xf32>,
    %c0_231 = arith.constant 0 : index
    %c20_232 = arith.constant 20 : index
    %214 = vector.load %arg24[%c0_231, %c20_232] : memref<8x324xf32, #tpu.memory_space<vmem>>, vector<8x286xf32>
    %c40_233 = arith.constant 40 : index
    %c0_234 = arith.constant 0 : index
    %215 = vector.load %arg25[%c40_233, %c0_234] : memref<72x286xf32, #tpu.memory_space<vmem>>, vector<8x286xf32>
    tpu.vector_store %arg25[%c40_233, %c0_234], %214 {strides = array<i32>} : memref<72x286xf32, #tpu.memory_space<vmem>>, vector<8x286xf32>,
    %c0_235 = arith.constant 0 : index
    %c36 = arith.constant 36 : index
    %216 = vector.load %arg24[%c0_235, %c36] : memref<8x324xf32, #tpu.memory_space<vmem>>, vector<8x286xf32>
    %c48_236 = arith.constant 48 : index
    %c0_237 = arith.constant 0 : index
    %217 = vector.load %arg25[%c48_236, %c0_237] : memref<72x286xf32, #tpu.memory_space<vmem>>, vector<8x286xf32>
    tpu.vector_store %arg25[%c48_236, %c0_237], %216 {strides = array<i32>} : memref<72x286xf32, #tpu.memory_space<vmem>>, vector<8x286xf32>,
    %c0_238 = arith.constant 0 : index
    %c37 = arith.constant 37 : index
    %218 = vector.load %arg24[%c0_238, %c37] : memref<8x324xf32, #tpu.memory_space<vmem>>, vector<8x286xf32>
    %c56_239 = arith.constant 56 : index
    %c0_240 = arith.constant 0 : index
    %219 = vector.load %arg25[%c56_239, %c0_240] : memref<72x286xf32, #tpu.memory_space<vmem>>, vector<8x286xf32>
    tpu.vector_store %arg25[%c56_239, %c0_240], %218 {strides = array<i32>} : memref<72x286xf32, #tpu.memory_space<vmem>>, vector<8x286xf32>,
    %c0_241 = arith.constant 0 : index
    %c38 = arith.constant 38 : index
    %220 = vector.load %arg24[%c0_241, %c38] : memref<8x324xf32, #tpu.memory_space<vmem>>, vector<8x286xf32>
    %c64_242 = arith.constant 64 : index
    %c0_243 = arith.constant 0 : index
    %221 = vector.load %arg25[%c64_242, %c0_243] : memref<72x286xf32, #tpu.memory_space<vmem>>, vector<8x286xf32>
    tpu.vector_store %arg25[%c64_242, %c0_243], %220 {strides = array<i32>} : memref<72x286xf32, #tpu.memory_space<vmem>>, vector<8x286xf32>,
    %c0_244 = arith.constant 0 : index
    %c0_245 = arith.constant 0 : index
    %222 = vector.load %arg25[%c0_244, %c0_245] : memref<72x286xf32, #tpu.memory_space<vmem>>, vector<72x286xf32>
    %cst_246 = arith.constant dense<0.000000e+00> : vector<8x286xf32>
    %223 = tpu.matmul %196, %222, %cst_246 {dimension_numbers = #tpu.dot_dimension_numbers<[1], [0], [0], [1], [0, 0, 1, 1], [], []>} : vector<8x72xf32>, vector<72x286xf32>, vector<8x286xf32> -> vector<8x286xf32>
    %cst_247 = arith.constant dense<0.000000e+00> : vector<8x256xf32>
    %224 = tpu.matmul %223, %200, %cst_247 {dimension_numbers = #tpu.dot_dimension_numbers<[1], [0], [0], [1], [0, 0, 1, 1], [], []>} : vector<8x286xf32>, vector<286x256xf32>, vector<8x256xf32> -> vector<8x256xf32>
    %225 = vector.broadcast %201 : vector<8x1xf32> to vector<8x256xf32>
    %226 = arith.addf %224, %225 : vector<8x256xf32>
    %cst_248 = arith.constant dense<0.000000e+00> : vector<8x324xf32>
    %227 = tpu.matmul %195, %198, %cst_248 {dimension_numbers = #tpu.dot_dimension_numbers<[1], [0], [0], [1], [0, 0, 1, 1], [], []>} : vector<8x64xf32>, vector<64x324xf32>, vector<8x324xf32> -> vector<8x324xf32>
    %c0_249 = arith.constant 0 : index
    %c0_250 = arith.constant 0 : index
    %228 = vector.load %arg24[%c0_249, %c0_250] : memref<8x324xf32, #tpu.memory_space<vmem>>, vector<8x324xf32>
    tpu.vector_store %arg24[%c0_249, %c0_250], %227 {strides = array<i32>} : memref<8x324xf32, #tpu.memory_space<vmem>>, vector<8x324xf32>,
    %c0_251 = arith.constant 0 : index
    %c0_252 = arith.constant 0 : index
    %229 = vector.load %arg24[%c0_251, %c0_252] : memref<8x324xf32, #tpu.memory_space<vmem>>, vector<8x286xf32>
    %c0_253 = arith.constant 0 : index
    %c0_254 = arith.constant 0 : index
    %230 = vector.load %arg25[%c0_253, %c0_254] : memref<72x286xf32, #tpu.memory_space<vmem>>, vector<8x286xf32>
    tpu.vector_store %arg25[%c0_253, %c0_254], %229 {strides = array<i32>} : memref<72x286xf32, #tpu.memory_space<vmem>>, vector<8x286xf32>,
    %c0_255 = arith.constant 0 : index
    %c1_256 = arith.constant 1 : index
    %231 = vector.load %arg24[%c0_255, %c1_256] : memref<8x324xf32, #tpu.memory_space<vmem>>, vector<8x286xf32>
    %c8_257 = arith.constant 8 : index
    %c0_258 = arith.constant 0 : index
    %232 = vector.load %arg25[%c8_257, %c0_258] : memref<72x286xf32, #tpu.memory_space<vmem>>, vector<8x286xf32>
    tpu.vector_store %arg25[%c8_257, %c0_258], %231 {strides = array<i32>} : memref<72x286xf32, #tpu.memory_space<vmem>>, vector<8x286xf32>,
    %c0_259 = arith.constant 0 : index
    %c2_260 = arith.constant 2 : index
    %233 = vector.load %arg24[%c0_259, %c2_260] : memref<8x324xf32, #tpu.memory_space<vmem>>, vector<8x286xf32>
    %c16_261 = arith.constant 16 : index
    %c0_262 = arith.constant 0 : index
    %234 = vector.load %arg25[%c16_261, %c0_262] : memref<72x286xf32, #tpu.memory_space<vmem>>, vector<8x286xf32>
    tpu.vector_store %arg25[%c16_261, %c0_262], %233 {strides = array<i32>} : memref<72x286xf32, #tpu.memory_space<vmem>>, vector<8x286xf32>,
    %c0_263 = arith.constant 0 : index
    %c18_264 = arith.constant 18 : index
    %235 = vector.load %arg24[%c0_263, %c18_264] : memref<8x324xf32, #tpu.memory_space<vmem>>, vector<8x286xf32>
    %c24_265 = arith.constant 24 : index
    %c0_266 = arith.constant 0 : index
    %236 = vector.load %arg25[%c24_265, %c0_266] : memref<72x286xf32, #tpu.memory_space<vmem>>, vector<8x286xf32>
    tpu.vector_store %arg25[%c24_265, %c0_266], %235 {strides = array<i32>} : memref<72x286xf32, #tpu.memory_space<vmem>>, vector<8x286xf32>,
    %c0_267 = arith.constant 0 : index
    %c19_268 = arith.constant 19 : index
    %237 = vector.load %arg24[%c0_267, %c19_268] : memref<8x324xf32, #tpu.memory_space<vmem>>, vector<8x286xf32>
    %c32_269 = arith.constant 32 : index
    %c0_270 = arith.constant 0 : index
    %238 = vector.load %arg25[%c32_269, %c0_270] : memref<72x286xf32, #tpu.memory_space<vmem>>, vector<8x286xf32>
    tpu.vector_store %arg25[%c32_269, %c0_270], %237 {strides = array<i32>} : memref<72x286xf32, #tpu.memory_space<vmem>>, vector<8x286xf32>,
    %c0_271 = arith.constant 0 : index
    %c20_272 = arith.constant 20 : index
    %239 = vector.load %arg24[%c0_271, %c20_272] : memref<8x324xf32, #tpu.memory_space<vmem>>, vector<8x286xf32>
    %c40_273 = arith.constant 40 : index
    %c0_274 = arith.constant 0 : index
    %240 = vector.load %arg25[%c40_273, %c0_274] : memref<72x286xf32, #tpu.memory_space<vmem>>, vector<8x286xf32>
    tpu.vector_store %arg25[%c40_273, %c0_274], %239 {strides = array<i32>} : memref<72x286xf32, #tpu.memory_space<vmem>>, vector<8x286xf32>,
    %c0_275 = arith.constant 0 : index
    %c36_276 = arith.constant 36 : index
    %241 = vector.load %arg24[%c0_275, %c36_276] : memref<8x324xf32, #tpu.memory_space<vmem>>, vector<8x286xf32>
    %c48_277 = arith.constant 48 : index
    %c0_278 = arith.constant 0 : index
    %242 = vector.load %arg25[%c48_277, %c0_278] : memref<72x286xf32, #tpu.memory_space<vmem>>, vector<8x286xf32>
    tpu.vector_store %arg25[%c48_277, %c0_278], %241 {strides = array<i32>} : memref<72x286xf32, #tpu.memory_space<vmem>>, vector<8x286xf32>,
    %c0_279 = arith.constant 0 : index
    %c37_280 = arith.constant 37 : index
    %243 = vector.load %arg24[%c0_279, %c37_280] : memref<8x324xf32, #tpu.memory_space<vmem>>, vector<8x286xf32>
    %c56_281 = arith.constant 56 : index
    %c0_282 = arith.constant 0 : index
    %244 = vector.load %arg25[%c56_281, %c0_282] : memref<72x286xf32, #tpu.memory_space<vmem>>, vector<8x286xf32>
    tpu.vector_store %arg25[%c56_281, %c0_282], %243 {strides = array<i32>} : memref<72x286xf32, #tpu.memory_space<vmem>>, vector<8x286xf32>,
    %c0_283 = arith.constant 0 : index
    %c38_284 = arith.constant 38 : index
    %245 = vector.load %arg24[%c0_283, %c38_284] : memref<8x324xf32, #tpu.memory_space<vmem>>, vector<8x286xf32>
    %c64_285 = arith.constant 64 : index
    %c0_286 = arith.constant 0 : index
    %246 = vector.load %arg25[%c64_285, %c0_286] : memref<72x286xf32, #tpu.memory_space<vmem>>, vector<8x286xf32>
    tpu.vector_store %arg25[%c64_285, %c0_286], %245 {strides = array<i32>} : memref<72x286xf32, #tpu.memory_space<vmem>>, vector<8x286xf32>,
    %c0_287 = arith.constant 0 : index
    %c0_288 = arith.constant 0 : index
    %247 = vector.load %arg25[%c0_287, %c0_288] : memref<72x286xf32, #tpu.memory_space<vmem>>, vector<72x286xf32>
    %cst_289 = arith.constant dense<0.000000e+00> : vector<8x286xf32>
    %248 = tpu.matmul %196, %247, %cst_289 {dimension_numbers = #tpu.dot_dimension_numbers<[1], [0], [0], [1], [0, 0, 1, 1], [], []>} : vector<8x72xf32>, vector<72x286xf32>, vector<8x286xf32> -> vector<8x286xf32>
    %cst_290 = arith.constant dense<0.000000e+00> : vector<8x256xf32>
    %249 = tpu.matmul %248, %200, %cst_290 {dimension_numbers = #tpu.dot_dimension_numbers<[1], [0], [0], [1], [0, 0, 1, 1], [], []>} : vector<8x286xf32>, vector<286x256xf32>, vector<8x256xf32> -> vector<8x256xf32>
    %250 = vector.broadcast %201 : vector<8x1xf32> to vector<8x256xf32>
    %251 = arith.addf %249, %250 : vector<8x256xf32>
    %c0_291 = arith.constant 0 : index
    %c0_292 = arith.constant 0 : index
    %252 = vector.load %arg15[%c0_291, %c0_292] : memref<4x72xf32, #tpu.memory_space<vmem>>, vector<4x72xf32>
    %c0_293 = arith.constant 0 : index
    %c0_294 = arith.constant 0 : index
    %253 = vector.load %arg14[%c0_293, %c0_294] : memref<256x324xbf16, #tpu.memory_space<vmem>>, vector<256x324xbf16>
    %254 = arith.extf %253 : vector<256x324xbf16> to vector<256x324xf32>
    %c0_295 = arith.constant 0 : index
    %c0_296 = arith.constant 0 : index
    %255 = vector.load %arg11[%c0_295, %c0_296] : memref<286x256xbf16, #tpu.memory_space<vmem>>, vector<286x256xbf16>
    %256 = arith.extf %255 : vector<286x256xbf16> to vector<286x256xf32>
    %cst_297 = arith.constant dense<0.000000e+00> : vector<8x324xf32>
    %257 = tpu.matmul %226, %254, %cst_297 {dimension_numbers = #tpu.dot_dimension_numbers<[1], [0], [0], [1], [0, 0, 1, 1], [], []>} : vector<8x256xf32>, vector<256x324xf32>, vector<8x324xf32> -> vector<8x324xf32>
    %c0_298 = arith.constant 0 : index
    %c0_299 = arith.constant 0 : index
    %258 = vector.load %arg24[%c0_298, %c0_299] : memref<8x324xf32, #tpu.memory_space<vmem>>, vector<8x324xf32>
    tpu.vector_store %arg24[%c0_298, %c0_299], %257 {strides = array<i32>} : memref<8x324xf32, #tpu.memory_space<vmem>>, vector<8x324xf32>,
    %c0_300 = arith.constant 0 : index
    %c0_301 = arith.constant 0 : index
    %259 = vector.load %arg24[%c0_300, %c0_301] : memref<8x324xf32, #tpu.memory_space<vmem>>, vector<8x286xf32>
    %c0_302 = arith.constant 0 : index
    %c0_303 = arith.constant 0 : index
    %260 = vector.load %arg25[%c0_302, %c0_303] : memref<72x286xf32, #tpu.memory_space<vmem>>, vector<8x286xf32>
    tpu.vector_store %arg25[%c0_302, %c0_303], %259 {strides = array<i32>} : memref<72x286xf32, #tpu.memory_space<vmem>>, vector<8x286xf32>,
    %c0_304 = arith.constant 0 : index
    %c1_305 = arith.constant 1 : index
    %261 = vector.load %arg24[%c0_304, %c1_305] : memref<8x324xf32, #tpu.memory_space<vmem>>, vector<8x286xf32>
    %c8_306 = arith.constant 8 : index
    %c0_307 = arith.constant 0 : index
    %262 = vector.load %arg25[%c8_306, %c0_307] : memref<72x286xf32, #tpu.memory_space<vmem>>, vector<8x286xf32>
    tpu.vector_store %arg25[%c8_306, %c0_307], %261 {strides = array<i32>} : memref<72x286xf32, #tpu.memory_space<vmem>>, vector<8x286xf32>,
    %c0_308 = arith.constant 0 : index
    %c2_309 = arith.constant 2 : index
    %263 = vector.load %arg24[%c0_308, %c2_309] : memref<8x324xf32, #tpu.memory_space<vmem>>, vector<8x286xf32>
    %c16_310 = arith.constant 16 : index
    %c0_311 = arith.constant 0 : index
    %264 = vector.load %arg25[%c16_310, %c0_311] : memref<72x286xf32, #tpu.memory_space<vmem>>, vector<8x286xf32>
    tpu.vector_store %arg25[%c16_310, %c0_311], %263 {strides = array<i32>} : memref<72x286xf32, #tpu.memory_space<vmem>>, vector<8x286xf32>,
    %c0_312 = arith.constant 0 : index
    %c18_313 = arith.constant 18 : index
    %265 = vector.load %arg24[%c0_312, %c18_313] : memref<8x324xf32, #tpu.memory_space<vmem>>, vector<8x286xf32>
    %c24_314 = arith.constant 24 : index
    %c0_315 = arith.constant 0 : index
    %266 = vector.load %arg25[%c24_314, %c0_315] : memref<72x286xf32, #tpu.memory_space<vmem>>, vector<8x286xf32>
    tpu.vector_store %arg25[%c24_314, %c0_315], %265 {strides = array<i32>} : memref<72x286xf32, #tpu.memory_space<vmem>>, vector<8x286xf32>,
    %c0_316 = arith.constant 0 : index
    %c19_317 = arith.constant 19 : index
    %267 = vector.load %arg24[%c0_316, %c19_317] : memref<8x324xf32, #tpu.memory_space<vmem>>, vector<8x286xf32>
    %c32_318 = arith.constant 32 : index
    %c0_319 = arith.constant 0 : index
    %268 = vector.load %arg25[%c32_318, %c0_319] : memref<72x286xf32, #tpu.memory_space<vmem>>, vector<8x286xf32>
    tpu.vector_store %arg25[%c32_318, %c0_319], %267 {strides = array<i32>} : memref<72x286xf32, #tpu.memory_space<vmem>>, vector<8x286xf32>,
    %c0_320 = arith.constant 0 : index
    %c20_321 = arith.constant 20 : index
    %269 = vector.load %arg24[%c0_320, %c20_321] : memref<8x324xf32, #tpu.memory_space<vmem>>, vector<8x286xf32>
    %c40_322 = arith.constant 40 : index
    %c0_323 = arith.constant 0 : index
    %270 = vector.load %arg25[%c40_322, %c0_323] : memref<72x286xf32, #tpu.memory_space<vmem>>, vector<8x286xf32>
    tpu.vector_store %arg25[%c40_322, %c0_323], %269 {strides = array<i32>} : memref<72x286xf32, #tpu.memory_space<vmem>>, vector<8x286xf32>,
    %c0_324 = arith.constant 0 : index
    %c36_325 = arith.constant 36 : index
    %271 = vector.load %arg24[%c0_324, %c36_325] : memref<8x324xf32, #tpu.memory_space<vmem>>, vector<8x286xf32>
    %c48_326 = arith.constant 48 : index
    %c0_327 = arith.constant 0 : index
    %272 = vector.load %arg25[%c48_326, %c0_327] : memref<72x286xf32, #tpu.memory_space<vmem>>, vector<8x286xf32>
    tpu.vector_store %arg25[%c48_326, %c0_327], %271 {strides = array<i32>} : memref<72x286xf32, #tpu.memory_space<vmem>>, vector<8x286xf32>,
    %c0_328 = arith.constant 0 : index
    %c37_329 = arith.constant 37 : index
    %273 = vector.load %arg24[%c0_328, %c37_329] : memref<8x324xf32, #tpu.memory_space<vmem>>, vector<8x286xf32>
    %c56_330 = arith.constant 56 : index
    %c0_331 = arith.constant 0 : index
    %274 = vector.load %arg25[%c56_330, %c0_331] : memref<72x286xf32, #tpu.memory_space<vmem>>, vector<8x286xf32>
    tpu.vector_store %arg25[%c56_330, %c0_331], %273 {strides = array<i32>} : memref<72x286xf32, #tpu.memory_space<vmem>>, vector<8x286xf32>,
    %c0_332 = arith.constant 0 : index
    %c38_333 = arith.constant 38 : index
    %275 = vector.load %arg24[%c0_332, %c38_333] : memref<8x324xf32, #tpu.memory_space<vmem>>, vector<8x286xf32>
    %c64_334 = arith.constant 64 : index
    %c0_335 = arith.constant 0 : index
    %276 = vector.load %arg25[%c64_334, %c0_335] : memref<72x286xf32, #tpu.memory_space<vmem>>, vector<8x286xf32>
    tpu.vector_store %arg25[%c64_334, %c0_335], %275 {strides = array<i32>} : memref<72x286xf32, #tpu.memory_space<vmem>>, vector<8x286xf32>,
    %c0_336 = arith.constant 0 : index
    %c0_337 = arith.constant 0 : index
    %277 = vector.load %arg25[%c0_336, %c0_337] : memref<72x286xf32, #tpu.memory_space<vmem>>, vector<72x286xf32>
    %cst_338 = arith.constant dense<0.000000e+00> : vector<4x286xf32>
    %278 = tpu.matmul %252, %277, %cst_338 {dimension_numbers = #tpu.dot_dimension_numbers<[1], [0], [0], [1], [0, 0, 1, 1], [], []>} : vector<4x72xf32>, vector<72x286xf32>, vector<4x286xf32> -> vector<4x286xf32>
    %cst_339 = arith.constant dense<0.000000e+00> : vector<4x256xf32>
    %279 = tpu.matmul %278, %256, %cst_339 {dimension_numbers = #tpu.dot_dimension_numbers<[1], [0], [0], [1], [0, 0, 1, 1], [], []>} : vector<4x286xf32>, vector<286x256xf32>, vector<4x256xf32> -> vector<4x256xf32>
    %cst_340 = arith.constant dense<0.000000e+00> : vector<8x324xf32>
    %280 = tpu.matmul %251, %254, %cst_340 {dimension_numbers = #tpu.dot_dimension_numbers<[1], [0], [0], [1], [0, 0, 1, 1], [], []>} : vector<8x256xf32>, vector<256x324xf32>, vector<8x324xf32> -> vector<8x324xf32>
    %c0_341 = arith.constant 0 : index
    %c0_342 = arith.constant 0 : index
    %281 = vector.load %arg24[%c0_341, %c0_342] : memref<8x324xf32, #tpu.memory_space<vmem>>, vector<8x324xf32>
    tpu.vector_store %arg24[%c0_341, %c0_342], %280 {strides = array<i32>} : memref<8x324xf32, #tpu.memory_space<vmem>>, vector<8x324xf32>,
    %c0_343 = arith.constant 0 : index
    %c0_344 = arith.constant 0 : index
    %282 = vector.load %arg24[%c0_343, %c0_344] : memref<8x324xf32, #tpu.memory_space<vmem>>, vector<8x286xf32>
    %c0_345 = arith.constant 0 : index
    %c0_346 = arith.constant 0 : index
    %283 = vector.load %arg25[%c0_345, %c0_346] : memref<72x286xf32, #tpu.memory_space<vmem>>, vector<8x286xf32>
    tpu.vector_store %arg25[%c0_345, %c0_346], %282 {strides = array<i32>} : memref<72x286xf32, #tpu.memory_space<vmem>>, vector<8x286xf32>,
    %c0_347 = arith.constant 0 : index
    %c1_348 = arith.constant 1 : index
    %284 = vector.load %arg24[%c0_347, %c1_348] : memref<8x324xf32, #tpu.memory_space<vmem>>, vector<8x286xf32>
    %c8_349 = arith.constant 8 : index
    %c0_350 = arith.constant 0 : index
    %285 = vector.load %arg25[%c8_349, %c0_350] : memref<72x286xf32, #tpu.memory_space<vmem>>, vector<8x286xf32>
    tpu.vector_store %arg25[%c8_349, %c0_350], %284 {strides = array<i32>} : memref<72x286xf32, #tpu.memory_space<vmem>>, vector<8x286xf32>,
    %c0_351 = arith.constant 0 : index
    %c2_352 = arith.constant 2 : index
    %286 = vector.load %arg24[%c0_351, %c2_352] : memref<8x324xf32, #tpu.memory_space<vmem>>, vector<8x286xf32>
    %c16_353 = arith.constant 16 : index
    %c0_354 = arith.constant 0 : index
    %287 = vector.load %arg25[%c16_353, %c0_354] : memref<72x286xf32, #tpu.memory_space<vmem>>, vector<8x286xf32>
    tpu.vector_store %arg25[%c16_353, %c0_354], %286 {strides = array<i32>} : memref<72x286xf32, #tpu.memory_space<vmem>>, vector<8x286xf32>,
    %c0_355 = arith.constant 0 : index
    %c18_356 = arith.constant 18 : index
    %288 = vector.load %arg24[%c0_355, %c18_356] : memref<8x324xf32, #tpu.memory_space<vmem>>, vector<8x286xf32>
    %c24_357 = arith.constant 24 : index
    %c0_358 = arith.constant 0 : index
    %289 = vector.load %arg25[%c24_357, %c0_358] : memref<72x286xf32, #tpu.memory_space<vmem>>, vector<8x286xf32>
    tpu.vector_store %arg25[%c24_357, %c0_358], %288 {strides = array<i32>} : memref<72x286xf32, #tpu.memory_space<vmem>>, vector<8x286xf32>,
    %c0_359 = arith.constant 0 : index
    %c19_360 = arith.constant 19 : index
    %290 = vector.load %arg24[%c0_359, %c19_360] : memref<8x324xf32, #tpu.memory_space<vmem>>, vector<8x286xf32>
    %c32_361 = arith.constant 32 : index
    %c0_362 = arith.constant 0 : index
    %291 = vector.load %arg25[%c32_361, %c0_362] : memref<72x286xf32, #tpu.memory_space<vmem>>, vector<8x286xf32>
    tpu.vector_store %arg25[%c32_361, %c0_362], %290 {strides = array<i32>} : memref<72x286xf32, #tpu.memory_space<vmem>>, vector<8x286xf32>,
    %c0_363 = arith.constant 0 : index
    %c20_364 = arith.constant 20 : index
    %292 = vector.load %arg24[%c0_363, %c20_364] : memref<8x324xf32, #tpu.memory_space<vmem>>, vector<8x286xf32>
    %c40_365 = arith.constant 40 : index
    %c0_366 = arith.constant 0 : index
    %293 = vector.load %arg25[%c40_365, %c0_366] : memref<72x286xf32, #tpu.memory_space<vmem>>, vector<8x286xf32>
    tpu.vector_store %arg25[%c40_365, %c0_366], %292 {strides = array<i32>} : memref<72x286xf32, #tpu.memory_space<vmem>>, vector<8x286xf32>,
    %c0_367 = arith.constant 0 : index
    %c36_368 = arith.constant 36 : index
    %294 = vector.load %arg24[%c0_367, %c36_368] : memref<8x324xf32, #tpu.memory_space<vmem>>, vector<8x286xf32>
    %c48_369 = arith.constant 48 : index
    %c0_370 = arith.constant 0 : index
    %295 = vector.load %arg25[%c48_369, %c0_370] : memref<72x286xf32, #tpu.memory_space<vmem>>, vector<8x286xf32>
    tpu.vector_store %arg25[%c48_369, %c0_370], %294 {strides = array<i32>} : memref<72x286xf32, #tpu.memory_space<vmem>>, vector<8x286xf32>,
    %c0_371 = arith.constant 0 : index
    %c37_372 = arith.constant 37 : index
    %296 = vector.load %arg24[%c0_371, %c37_372] : memref<8x324xf32, #tpu.memory_space<vmem>>, vector<8x286xf32>
    %c56_373 = arith.constant 56 : index
    %c0_374 = arith.constant 0 : index
    %297 = vector.load %arg25[%c56_373, %c0_374] : memref<72x286xf32, #tpu.memory_space<vmem>>, vector<8x286xf32>
    tpu.vector_store %arg25[%c56_373, %c0_374], %296 {strides = array<i32>} : memref<72x286xf32, #tpu.memory_space<vmem>>, vector<8x286xf32>,
    %c0_375 = arith.constant 0 : index
    %c38_376 = arith.constant 38 : index
    %298 = vector.load %arg24[%c0_375, %c38_376] : memref<8x324xf32, #tpu.memory_space<vmem>>, vector<8x286xf32>
    %c64_377 = arith.constant 64 : index
    %c0_378 = arith.constant 0 : index
    %299 = vector.load %arg25[%c64_377, %c0_378] : memref<72x286xf32, #tpu.memory_space<vmem>>, vector<8x286xf32>
    tpu.vector_store %arg25[%c64_377, %c0_378], %298 {strides = array<i32>} : memref<72x286xf32, #tpu.memory_space<vmem>>, vector<8x286xf32>,
    %c0_379 = arith.constant 0 : index
    %c0_380 = arith.constant 0 : index
    %300 = vector.load %arg25[%c0_379, %c0_380] : memref<72x286xf32, #tpu.memory_space<vmem>>, vector<72x286xf32>
    %cst_381 = arith.constant dense<0.000000e+00> : vector<4x286xf32>
    %301 = tpu.matmul %252, %300, %cst_381 {dimension_numbers = #tpu.dot_dimension_numbers<[1], [0], [0], [1], [0, 0, 1, 1], [], []>} : vector<4x72xf32>, vector<72x286xf32>, vector<4x286xf32> -> vector<4x286xf32>
    %cst_382 = arith.constant dense<0.000000e+00> : vector<4x256xf32>
    %302 = tpu.matmul %301, %256, %cst_382 {dimension_numbers = #tpu.dot_dimension_numbers<[1], [0], [0], [1], [0, 0, 1, 1], [], []>} : vector<4x286xf32>, vector<286x256xf32>, vector<4x256xf32> -> vector<4x256xf32>
    %c0_383 = arith.constant 0 : index
    %c0_384 = arith.constant 0 : index
    %303 = vector.load %arg16[%c0_383, %c0_384] : memref<4x1xf32, #tpu.memory_space<vmem>>, vector<4x1xf32>
    %c0_385 = arith.constant 0 : index
    %c0_386 = arith.constant 0 : index
    %304 = vector.load %arg17[%c0_385, %c0_386] : memref<4x1xf32, #tpu.memory_space<vmem>>, vector<4x1xf32>
    %cst_387 = arith.constant dense<0.000000e+00> : vector<4xf32>
    %305 = vector.multi_reduction <add>, %279, %cst_387 [1] : vector<4x256xf32> to vector<4xf32>
    %306 = vector.shape_cast %305 : vector<4xf32> to vector<4x1xf32>
    %cst_388 = arith.constant 0.000000e+00 : f32
    %307 = vector.broadcast %cst_388 : f32 to vector<4x1xf32>
    %308 = arith.addf %307, %306 : vector<4x1xf32>
    %cst_389 = arith.constant dense<0.000000e+00> : vector<4xf32>
    %309 = vector.multi_reduction <add>, %302, %cst_389 [1] : vector<4x256xf32> to vector<4xf32>
    %310 = vector.shape_cast %309 : vector<4xf32> to vector<4x1xf32>
    %311 = arith.addf %308, %310 : vector<4x1xf32>
    %cst_390 = arith.constant 0.001953125 : f32
    %312 = vector.broadcast %cst_390 : f32 to vector<4x1xf32>
    %313 = arith.mulf %311, %312 : vector<4x1xf32>
    %314 = vector.broadcast %313 : vector<4x1xf32> to vector<4x256xf32>
    %315 = arith.subf %279, %314 : vector<4x256xf32>
    %316 = arith.mulf %315, %315 : vector<4x256xf32>
    %cst_391 = arith.constant dense<0.000000e+00> : vector<4xf32>
    %317 = vector.multi_reduction <add>, %316, %cst_391 [1] : vector<4x256xf32> to vector<4xf32>
    %318 = vector.shape_cast %317 : vector<4xf32> to vector<4x1xf32>
    %cst_392 = arith.constant 0.000000e+00 : f32
    %319 = vector.broadcast %cst_392 : f32 to vector<4x1xf32>
    %320 = arith.addf %319, %318 : vector<4x1xf32>
    %321 = vector.broadcast %313 : vector<4x1xf32> to vector<4x256xf32>
    %322 = arith.subf %302, %321 : vector<4x256xf32>
    %323 = arith.mulf %322, %322 : vector<4x256xf32>
    %cst_393 = arith.constant dense<0.000000e+00> : vector<4xf32>
    %324 = vector.multi_reduction <add>, %323, %cst_393 [1] : vector<4x256xf32> to vector<4xf32>
    %325 = vector.shape_cast %324 : vector<4xf32> to vector<4x1xf32>
    %326 = arith.addf %320, %325 : vector<4x1xf32>
    %cst_394 = arith.constant 0.001953125 : f32
    %327 = vector.broadcast %cst_394 : f32 to vector<4x1xf32>
    %328 = arith.mulf %326, %327 : vector<4x1xf32>
    %cst_395 = arith.constant 9.99999974E-6 : f32
    %329 = vector.broadcast %cst_395 : f32 to vector<4x1xf32>
    %330 = arith.addf %328, %329 : vector<4x1xf32>
    %331 = math.rsqrt %330 : vector<4x1xf32>
    %332 = arith.mulf %303, %331 : vector<4x1xf32>
    %333 = arith.mulf %313, %332 : vector<4x1xf32>
    %334 = arith.subf %304, %333 : vector<4x1xf32>
    %335 = vector.broadcast %332 : vector<4x1xf32> to vector<4x256xf32>
    %336 = arith.mulf %279, %335 : vector<4x256xf32>
    %337 = vector.broadcast %334 : vector<4x1xf32> to vector<4x256xf32>
    %338 = arith.addf %336, %337 : vector<4x256xf32>
    %cst_396 = arith.constant 0.000000e+00 : f32
    %339 = vector.broadcast %cst_396 : f32 to vector<4x256xf32>
    %340 = arith.maximumf %338, %339 : vector<4x256xf32>
    %341 = vector.broadcast %332 : vector<4x1xf32> to vector<4x256xf32>
    %342 = arith.mulf %302, %341 : vector<4x256xf32>
    %343 = vector.broadcast %334 : vector<4x1xf32> to vector<4x256xf32>
    %344 = arith.addf %342, %343 : vector<4x256xf32>
    %cst_397 = arith.constant 0.000000e+00 : f32
    %345 = vector.broadcast %cst_397 : f32 to vector<4x256xf32>
    %346 = arith.maximumf %344, %345 : vector<4x256xf32>
    %c0_398 = arith.constant 0 : index
    %c0_399 = arith.constant 0 : index
    %347 = vector.load %arg18[%c0_398, %c0_399] : memref<4x72xf32, #tpu.memory_space<vmem>>, vector<4x72xf32>
    %c0_400 = arith.constant 0 : index
    %c0_401 = arith.constant 0 : index
    %348 = vector.load %arg14[%c0_400, %c0_401] : memref<256x324xbf16, #tpu.memory_space<vmem>>, vector<256x324xbf16>
    %349 = arith.extf %348 : vector<256x324xbf16> to vector<256x324xf32>
    %c0_402 = arith.constant 0 : index
    %c0_403 = arith.constant 0 : index
    %350 = vector.load %arg11[%c0_402, %c0_403] : memref<286x256xbf16, #tpu.memory_space<vmem>>, vector<286x256xbf16>
    %351 = arith.extf %350 : vector<286x256xbf16> to vector<286x256xf32>
    %cst_404 = arith.constant 0.000000e+00 : f32
    %352 = vector.broadcast %cst_404 : f32 to vector<8x324xf32>
    %c0_405 = arith.constant 0 : index
    %c0_406 = arith.constant 0 : index
    %353 = vector.load %arg24[%c0_405, %c0_406] : memref<8x324xf32, #tpu.memory_space<vmem>>, vector<8x324xf32>
    tpu.vector_store %arg24[%c0_405, %c0_406], %352 {strides = array<i32>} : memref<8x324xf32, #tpu.memory_space<vmem>>, vector<8x324xf32>,
    %cst_407 = arith.constant dense<0.000000e+00> : vector<4x324xf32>
    %354 = tpu.matmul %340, %349, %cst_407 {dimension_numbers = #tpu.dot_dimension_numbers<[1], [0], [0], [1], [0, 0, 1, 1], [], []>} : vector<4x256xf32>, vector<256x324xf32>, vector<4x324xf32> -> vector<4x324xf32>
    %c0_408 = arith.constant 0 : index
    %c0_409 = arith.constant 0 : index
    %355 = vector.load %arg24[%c0_408, %c0_409] : memref<8x324xf32, #tpu.memory_space<vmem>>, vector<4x324xf32>
    tpu.vector_store %arg24[%c0_408, %c0_409], %354 {strides = array<i32>} : memref<8x324xf32, #tpu.memory_space<vmem>>, vector<4x324xf32>,
    %c0_410 = arith.constant 0 : index
    %c0_411 = arith.constant 0 : index
    %356 = vector.load %arg24[%c0_410, %c0_411] : memref<8x324xf32, #tpu.memory_space<vmem>>, vector<8x286xf32>
    %c0_412 = arith.constant 0 : index
    %c0_413 = arith.constant 0 : index
    %357 = vector.load %arg25[%c0_412, %c0_413] : memref<72x286xf32, #tpu.memory_space<vmem>>, vector<8x286xf32>
    tpu.vector_store %arg25[%c0_412, %c0_413], %356 {strides = array<i32>} : memref<72x286xf32, #tpu.memory_space<vmem>>, vector<8x286xf32>,
    %c0_414 = arith.constant 0 : index
    %c1_415 = arith.constant 1 : index
    %358 = vector.load %arg24[%c0_414, %c1_415] : memref<8x324xf32, #tpu.memory_space<vmem>>, vector<8x286xf32>
    %c8_416 = arith.constant 8 : index
    %c0_417 = arith.constant 0 : index
    %359 = vector.load %arg25[%c8_416, %c0_417] : memref<72x286xf32, #tpu.memory_space<vmem>>, vector<8x286xf32>
    tpu.vector_store %arg25[%c8_416, %c0_417], %358 {strides = array<i32>} : memref<72x286xf32, #tpu.memory_space<vmem>>, vector<8x286xf32>,
    %c0_418 = arith.constant 0 : index
    %c2_419 = arith.constant 2 : index
    %360 = vector.load %arg24[%c0_418, %c2_419] : memref<8x324xf32, #tpu.memory_space<vmem>>, vector<8x286xf32>
    %c16_420 = arith.constant 16 : index
    %c0_421 = arith.constant 0 : index
    %361 = vector.load %arg25[%c16_420, %c0_421] : memref<72x286xf32, #tpu.memory_space<vmem>>, vector<8x286xf32>
    tpu.vector_store %arg25[%c16_420, %c0_421], %360 {strides = array<i32>} : memref<72x286xf32, #tpu.memory_space<vmem>>, vector<8x286xf32>,
    %c0_422 = arith.constant 0 : index
    %c18_423 = arith.constant 18 : index
    %362 = vector.load %arg24[%c0_422, %c18_423] : memref<8x324xf32, #tpu.memory_space<vmem>>, vector<8x286xf32>
    %c24_424 = arith.constant 24 : index
    %c0_425 = arith.constant 0 : index
    %363 = vector.load %arg25[%c24_424, %c0_425] : memref<72x286xf32, #tpu.memory_space<vmem>>, vector<8x286xf32>
    tpu.vector_store %arg25[%c24_424, %c0_425], %362 {strides = array<i32>} : memref<72x286xf32, #tpu.memory_space<vmem>>, vector<8x286xf32>,
    %c0_426 = arith.constant 0 : index
    %c19_427 = arith.constant 19 : index
    %364 = vector.load %arg24[%c0_426, %c19_427] : memref<8x324xf32, #tpu.memory_space<vmem>>, vector<8x286xf32>
    %c32_428 = arith.constant 32 : index
    %c0_429 = arith.constant 0 : index
    %365 = vector.load %arg25[%c32_428, %c0_429] : memref<72x286xf32, #tpu.memory_space<vmem>>, vector<8x286xf32>
    tpu.vector_store %arg25[%c32_428, %c0_429], %364 {strides = array<i32>} : memref<72x286xf32, #tpu.memory_space<vmem>>, vector<8x286xf32>,
    %c0_430 = arith.constant 0 : index
    %c20_431 = arith.constant 20 : index
    %366 = vector.load %arg24[%c0_430, %c20_431] : memref<8x324xf32, #tpu.memory_space<vmem>>, vector<8x286xf32>
    %c40_432 = arith.constant 40 : index
    %c0_433 = arith.constant 0 : index
    %367 = vector.load %arg25[%c40_432, %c0_433] : memref<72x286xf32, #tpu.memory_space<vmem>>, vector<8x286xf32>
    tpu.vector_store %arg25[%c40_432, %c0_433], %366 {strides = array<i32>} : memref<72x286xf32, #tpu.memory_space<vmem>>, vector<8x286xf32>,
    %c0_434 = arith.constant 0 : index
    %c36_435 = arith.constant 36 : index
    %368 = vector.load %arg24[%c0_434, %c36_435] : memref<8x324xf32, #tpu.memory_space<vmem>>, vector<8x286xf32>
    %c48_436 = arith.constant 48 : index
    %c0_437 = arith.constant 0 : index
    %369 = vector.load %arg25[%c48_436, %c0_437] : memref<72x286xf32, #tpu.memory_space<vmem>>, vector<8x286xf32>
    tpu.vector_store %arg25[%c48_436, %c0_437], %368 {strides = array<i32>} : memref<72x286xf32, #tpu.memory_space<vmem>>, vector<8x286xf32>,
    %c0_438 = arith.constant 0 : index
    %c37_439 = arith.constant 37 : index
    %370 = vector.load %arg24[%c0_438, %c37_439] : memref<8x324xf32, #tpu.memory_space<vmem>>, vector<8x286xf32>
    %c56_440 = arith.constant 56 : index
    %c0_441 = arith.constant 0 : index
    %371 = vector.load %arg25[%c56_440, %c0_441] : memref<72x286xf32, #tpu.memory_space<vmem>>, vector<8x286xf32>
    tpu.vector_store %arg25[%c56_440, %c0_441], %370 {strides = array<i32>} : memref<72x286xf32, #tpu.memory_space<vmem>>, vector<8x286xf32>,
    %c0_442 = arith.constant 0 : index
    %c38_443 = arith.constant 38 : index
    %372 = vector.load %arg24[%c0_442, %c38_443] : memref<8x324xf32, #tpu.memory_space<vmem>>, vector<8x286xf32>
    %c64_444 = arith.constant 64 : index
    %c0_445 = arith.constant 0 : index
    %373 = vector.load %arg25[%c64_444, %c0_445] : memref<72x286xf32, #tpu.memory_space<vmem>>, vector<8x286xf32>
    tpu.vector_store %arg25[%c64_444, %c0_445], %372 {strides = array<i32>} : memref<72x286xf32, #tpu.memory_space<vmem>>, vector<8x286xf32>,
    %c0_446 = arith.constant 0 : index
    %c0_447 = arith.constant 0 : index
    %374 = vector.load %arg25[%c0_446, %c0_447] : memref<72x286xf32, #tpu.memory_space<vmem>>, vector<72x286xf32>
    %cst_448 = arith.constant dense<0.000000e+00> : vector<4x286xf32>
    %375 = tpu.matmul %347, %374, %cst_448 {dimension_numbers = #tpu.dot_dimension_numbers<[1], [0], [0], [1], [0, 0, 1, 1], [], []>} : vector<4x72xf32>, vector<72x286xf32>, vector<4x286xf32> -> vector<4x286xf32>
    %cst_449 = arith.constant dense<0.000000e+00> : vector<4x256xf32>
    %376 = tpu.matmul %375, %351, %cst_449 {dimension_numbers = #tpu.dot_dimension_numbers<[1], [0], [0], [1], [0, 0, 1, 1], [], []>} : vector<4x286xf32>, vector<286x256xf32>, vector<4x256xf32> -> vector<4x256xf32>
    %cst_450 = arith.constant dense<0.000000e+00> : vector<4x324xf32>
    %377 = tpu.matmul %346, %349, %cst_450 {dimension_numbers = #tpu.dot_dimension_numbers<[1], [0], [0], [1], [0, 0, 1, 1], [], []>} : vector<4x256xf32>, vector<256x324xf32>, vector<4x324xf32> -> vector<4x324xf32>
    %c0_451 = arith.constant 0 : index
    %c0_452 = arith.constant 0 : index
    %378 = vector.load %arg24[%c0_451, %c0_452] : memref<8x324xf32, #tpu.memory_space<vmem>>, vector<4x324xf32>
    tpu.vector_store %arg24[%c0_451, %c0_452], %377 {strides = array<i32>} : memref<8x324xf32, #tpu.memory_space<vmem>>, vector<4x324xf32>,
    %c0_453 = arith.constant 0 : index
    %c0_454 = arith.constant 0 : index
    %379 = vector.load %arg24[%c0_453, %c0_454] : memref<8x324xf32, #tpu.memory_space<vmem>>, vector<8x286xf32>
    %c0_455 = arith.constant 0 : index
    %c0_456 = arith.constant 0 : index
    %380 = vector.load %arg25[%c0_455, %c0_456] : memref<72x286xf32, #tpu.memory_space<vmem>>, vector<8x286xf32>
    tpu.vector_store %arg25[%c0_455, %c0_456], %379 {strides = array<i32>} : memref<72x286xf32, #tpu.memory_space<vmem>>, vector<8x286xf32>,
    %c0_457 = arith.constant 0 : index
    %c1_458 = arith.constant 1 : index
    %381 = vector.load %arg24[%c0_457, %c1_458] : memref<8x324xf32, #tpu.memory_space<vmem>>, vector<8x286xf32>
    %c8_459 = arith.constant 8 : index
    %c0_460 = arith.constant 0 : index
    %382 = vector.load %arg25[%c8_459, %c0_460] : memref<72x286xf32, #tpu.memory_space<vmem>>, vector<8x286xf32>
    tpu.vector_store %arg25[%c8_459, %c0_460], %381 {strides = array<i32>} : memref<72x286xf32, #tpu.memory_space<vmem>>, vector<8x286xf32>,
    %c0_461 = arith.constant 0 : index
    %c2_462 = arith.constant 2 : index
    %383 = vector.load %arg24[%c0_461, %c2_462] : memref<8x324xf32, #tpu.memory_space<vmem>>, vector<8x286xf32>
    %c16_463 = arith.constant 16 : index
    %c0_464 = arith.constant 0 : index
    %384 = vector.load %arg25[%c16_463, %c0_464] : memref<72x286xf32, #tpu.memory_space<vmem>>, vector<8x286xf32>
    tpu.vector_store %arg25[%c16_463, %c0_464], %383 {strides = array<i32>} : memref<72x286xf32, #tpu.memory_space<vmem>>, vector<8x286xf32>,
    %c0_465 = arith.constant 0 : index
    %c18_466 = arith.constant 18 : index
    %385 = vector.load %arg24[%c0_465, %c18_466] : memref<8x324xf32, #tpu.memory_space<vmem>>, vector<8x286xf32>
    %c24_467 = arith.constant 24 : index
    %c0_468 = arith.constant 0 : index
    %386 = vector.load %arg25[%c24_467, %c0_468] : memref<72x286xf32, #tpu.memory_space<vmem>>, vector<8x286xf32>
    tpu.vector_store %arg25[%c24_467, %c0_468], %385 {strides = array<i32>} : memref<72x286xf32, #tpu.memory_space<vmem>>, vector<8x286xf32>,
    %c0_469 = arith.constant 0 : index
    %c19_470 = arith.constant 19 : index
    %387 = vector.load %arg24[%c0_469, %c19_470] : memref<8x324xf32, #tpu.memory_space<vmem>>, vector<8x286xf32>
    %c32_471 = arith.constant 32 : index
    %c0_472 = arith.constant 0 : index
    %388 = vector.load %arg25[%c32_471, %c0_472] : memref<72x286xf32, #tpu.memory_space<vmem>>, vector<8x286xf32>
    tpu.vector_store %arg25[%c32_471, %c0_472], %387 {strides = array<i32>} : memref<72x286xf32, #tpu.memory_space<vmem>>, vector<8x286xf32>,
    %c0_473 = arith.constant 0 : index
    %c20_474 = arith.constant 20 : index
    %389 = vector.load %arg24[%c0_473, %c20_474] : memref<8x324xf32, #tpu.memory_space<vmem>>, vector<8x286xf32>
    %c40_475 = arith.constant 40 : index
    %c0_476 = arith.constant 0 : index
    %390 = vector.load %arg25[%c40_475, %c0_476] : memref<72x286xf32, #tpu.memory_space<vmem>>, vector<8x286xf32>
    tpu.vector_store %arg25[%c40_475, %c0_476], %389 {strides = array<i32>} : memref<72x286xf32, #tpu.memory_space<vmem>>, vector<8x286xf32>,
    %c0_477 = arith.constant 0 : index
    %c36_478 = arith.constant 36 : index
    %391 = vector.load %arg24[%c0_477, %c36_478] : memref<8x324xf32, #tpu.memory_space<vmem>>, vector<8x286xf32>
    %c48_479 = arith.constant 48 : index
    %c0_480 = arith.constant 0 : index
    %392 = vector.load %arg25[%c48_479, %c0_480] : memref<72x286xf32, #tpu.memory_space<vmem>>, vector<8x286xf32>
    tpu.vector_store %arg25[%c48_479, %c0_480], %391 {strides = array<i32>} : memref<72x286xf32, #tpu.memory_space<vmem>>, vector<8x286xf32>,
    %c0_481 = arith.constant 0 : index
    %c37_482 = arith.constant 37 : index
    %393 = vector.load %arg24[%c0_481, %c37_482] : memref<8x324xf32, #tpu.memory_space<vmem>>, vector<8x286xf32>
    %c56_483 = arith.constant 56 : index
    %c0_484 = arith.constant 0 : index
    %394 = vector.load %arg25[%c56_483, %c0_484] : memref<72x286xf32, #tpu.memory_space<vmem>>, vector<8x286xf32>
    tpu.vector_store %arg25[%c56_483, %c0_484], %393 {strides = array<i32>} : memref<72x286xf32, #tpu.memory_space<vmem>>, vector<8x286xf32>,
    %c0_485 = arith.constant 0 : index
    %c38_486 = arith.constant 38 : index
    %395 = vector.load %arg24[%c0_485, %c38_486] : memref<8x324xf32, #tpu.memory_space<vmem>>, vector<8x286xf32>
    %c64_487 = arith.constant 64 : index
    %c0_488 = arith.constant 0 : index
    %396 = vector.load %arg25[%c64_487, %c0_488] : memref<72x286xf32, #tpu.memory_space<vmem>>, vector<8x286xf32>
    tpu.vector_store %arg25[%c64_487, %c0_488], %395 {strides = array<i32>} : memref<72x286xf32, #tpu.memory_space<vmem>>, vector<8x286xf32>,
    %c0_489 = arith.constant 0 : index
    %c0_490 = arith.constant 0 : index
    %397 = vector.load %arg25[%c0_489, %c0_490] : memref<72x286xf32, #tpu.memory_space<vmem>>, vector<72x286xf32>
    %cst_491 = arith.constant dense<0.000000e+00> : vector<4x286xf32>
    %398 = tpu.matmul %347, %397, %cst_491 {dimension_numbers = #tpu.dot_dimension_numbers<[1], [0], [0], [1], [0, 0, 1, 1], [], []>} : vector<4x72xf32>, vector<72x286xf32>, vector<4x286xf32> -> vector<4x286xf32>
    %cst_492 = arith.constant dense<0.000000e+00> : vector<4x256xf32>
    %399 = tpu.matmul %398, %351, %cst_492 {dimension_numbers = #tpu.dot_dimension_numbers<[1], [0], [0], [1], [0, 0, 1, 1], [], []>} : vector<4x286xf32>, vector<286x256xf32>, vector<4x256xf32> -> vector<4x256xf32>
    %c0_493 = arith.constant 0 : index
    %c0_494 = arith.constant 0 : index
    %400 = vector.load %arg19[%c0_493, %c0_494] : memref<4x1xf32, #tpu.memory_space<vmem>>, vector<4x1xf32>
    %c0_495 = arith.constant 0 : index
    %c0_496 = arith.constant 0 : index
    %401 = vector.load %arg20[%c0_495, %c0_496] : memref<4x1xf32, #tpu.memory_space<vmem>>, vector<4x1xf32>
    %cst_497 = arith.constant dense<0.000000e+00> : vector<4xf32>
    %402 = vector.multi_reduction <add>, %376, %cst_497 [1] : vector<4x256xf32> to vector<4xf32>
    %403 = vector.shape_cast %402 : vector<4xf32> to vector<4x1xf32>
    %cst_498 = arith.constant 0.000000e+00 : f32
    %404 = vector.broadcast %cst_498 : f32 to vector<4x1xf32>
    %405 = arith.addf %404, %403 : vector<4x1xf32>
    %cst_499 = arith.constant dense<0.000000e+00> : vector<4xf32>
    %406 = vector.multi_reduction <add>, %399, %cst_499 [1] : vector<4x256xf32> to vector<4xf32>
    %407 = vector.shape_cast %406 : vector<4xf32> to vector<4x1xf32>
    %408 = arith.addf %405, %407 : vector<4x1xf32>
    %cst_500 = arith.constant 0.001953125 : f32
    %409 = vector.broadcast %cst_500 : f32 to vector<4x1xf32>
    %410 = arith.mulf %408, %409 : vector<4x1xf32>
    %411 = vector.broadcast %410 : vector<4x1xf32> to vector<4x256xf32>
    %412 = arith.subf %376, %411 : vector<4x256xf32>
    %413 = arith.mulf %412, %412 : vector<4x256xf32>
    %cst_501 = arith.constant dense<0.000000e+00> : vector<4xf32>
    %414 = vector.multi_reduction <add>, %413, %cst_501 [1] : vector<4x256xf32> to vector<4xf32>
    %415 = vector.shape_cast %414 : vector<4xf32> to vector<4x1xf32>
    %cst_502 = arith.constant 0.000000e+00 : f32
    %416 = vector.broadcast %cst_502 : f32 to vector<4x1xf32>
    %417 = arith.addf %416, %415 : vector<4x1xf32>
    %418 = vector.broadcast %410 : vector<4x1xf32> to vector<4x256xf32>
    %419 = arith.subf %399, %418 : vector<4x256xf32>
    %420 = arith.mulf %419, %419 : vector<4x256xf32>
    %cst_503 = arith.constant dense<0.000000e+00> : vector<4xf32>
    %421 = vector.multi_reduction <add>, %420, %cst_503 [1] : vector<4x256xf32> to vector<4xf32>
    %422 = vector.shape_cast %421 : vector<4xf32> to vector<4x1xf32>
    %423 = arith.addf %417, %422 : vector<4x1xf32>
    %cst_504 = arith.constant 0.001953125 : f32
    %424 = vector.broadcast %cst_504 : f32 to vector<4x1xf32>
    %425 = arith.mulf %423, %424 : vector<4x1xf32>
    %cst_505 = arith.constant 9.99999974E-6 : f32
    %426 = vector.broadcast %cst_505 : f32 to vector<4x1xf32>
    %427 = arith.addf %425, %426 : vector<4x1xf32>
    %428 = math.rsqrt %427 : vector<4x1xf32>
    %429 = arith.mulf %400, %428 : vector<4x1xf32>
    %430 = arith.mulf %410, %429 : vector<4x1xf32>
    %431 = arith.subf %401, %430 : vector<4x1xf32>
    %432 = vector.broadcast %429 : vector<4x1xf32> to vector<4x256xf32>
    %433 = arith.mulf %376, %432 : vector<4x256xf32>
    %434 = vector.broadcast %431 : vector<4x1xf32> to vector<4x256xf32>
    %435 = arith.addf %433, %434 : vector<4x256xf32>
    %cst_506 = arith.constant 0.000000e+00 : f32
    %436 = vector.broadcast %cst_506 : f32 to vector<4x256xf32>
    %437 = arith.maximumf %435, %436 : vector<4x256xf32>
    %438 = vector.broadcast %429 : vector<4x1xf32> to vector<4x256xf32>
    %439 = arith.mulf %399, %438 : vector<4x256xf32>
    %440 = vector.broadcast %431 : vector<4x1xf32> to vector<4x256xf32>
    %441 = arith.addf %439, %440 : vector<4x256xf32>
    %cst_507 = arith.constant 0.000000e+00 : f32
    %442 = vector.broadcast %cst_507 : f32 to vector<4x256xf32>
    %443 = arith.maximumf %441, %442 : vector<4x256xf32>
    %c0_508 = arith.constant 0 : index
    %c0_509 = arith.constant 0 : index
    %444 = vector.load %arg21[%c0_508, %c0_509] : memref<4x72xf32, #tpu.memory_space<vmem>>, vector<4x72xf32>
    %c0_510 = arith.constant 0 : index
    %c0_511 = arith.constant 0 : index
    %445 = vector.load %arg14[%c0_510, %c0_511] : memref<256x324xbf16, #tpu.memory_space<vmem>>, vector<256x324xbf16>
    %446 = arith.extf %445 : vector<256x324xbf16> to vector<256x324xf32>
    %c0_512 = arith.constant 0 : index
    %c0_513 = arith.constant 0 : index
    %447 = vector.load %arg11[%c0_512, %c0_513] : memref<286x256xbf16, #tpu.memory_space<vmem>>, vector<286x256xbf16>
    %448 = arith.extf %447 : vector<286x256xbf16> to vector<286x256xf32>
    %c0_514 = arith.constant 0 : index
    %c0_515 = arith.constant 0 : index
    %449 = vector.load %arg22[%c0_514, %c0_515] : memref<4x1xf32, #tpu.memory_space<vmem>>, vector<4x1xf32>
    %cst_516 = arith.constant dense<0.000000e+00> : vector<8x324xf32>
    %450 = tpu.matmul %226, %446, %cst_516 {dimension_numbers = #tpu.dot_dimension_numbers<[1], [0], [0], [1], [0, 0, 1, 1], [], []>} : vector<8x256xf32>, vector<256x324xf32>, vector<8x324xf32> -> vector<8x324xf32>
    %c0_517 = arith.constant 0 : index
    %c0_518 = arith.constant 0 : index
    %451 = vector.load %arg24[%c0_517, %c0_518] : memref<8x324xf32, #tpu.memory_space<vmem>>, vector<8x324xf32>
    tpu.vector_store %arg24[%c0_517, %c0_518], %450 {strides = array<i32>} : memref<8x324xf32, #tpu.memory_space<vmem>>, vector<8x324xf32>,
    %c0_519 = arith.constant 0 : index
    %c0_520 = arith.constant 0 : index
    %452 = vector.load %arg24[%c0_519, %c0_520] : memref<8x324xf32, #tpu.memory_space<vmem>>, vector<8x286xf32>
    %c0_521 = arith.constant 0 : index
    %c0_522 = arith.constant 0 : index
    %453 = vector.load %arg25[%c0_521, %c0_522] : memref<72x286xf32, #tpu.memory_space<vmem>>, vector<8x286xf32>
    tpu.vector_store %arg25[%c0_521, %c0_522], %452 {strides = array<i32>} : memref<72x286xf32, #tpu.memory_space<vmem>>, vector<8x286xf32>,
    %c0_523 = arith.constant 0 : index
    %c1_524 = arith.constant 1 : index
    %454 = vector.load %arg24[%c0_523, %c1_524] : memref<8x324xf32, #tpu.memory_space<vmem>>, vector<8x286xf32>
    %c8_525 = arith.constant 8 : index
    %c0_526 = arith.constant 0 : index
    %455 = vector.load %arg25[%c8_525, %c0_526] : memref<72x286xf32, #tpu.memory_space<vmem>>, vector<8x286xf32>
    tpu.vector_store %arg25[%c8_525, %c0_526], %454 {strides = array<i32>} : memref<72x286xf32, #tpu.memory_space<vmem>>, vector<8x286xf32>,
    %c0_527 = arith.constant 0 : index
    %c2_528 = arith.constant 2 : index
    %456 = vector.load %arg24[%c0_527, %c2_528] : memref<8x324xf32, #tpu.memory_space<vmem>>, vector<8x286xf32>
    %c16_529 = arith.constant 16 : index
    %c0_530 = arith.constant 0 : index
    %457 = vector.load %arg25[%c16_529, %c0_530] : memref<72x286xf32, #tpu.memory_space<vmem>>, vector<8x286xf32>
    tpu.vector_store %arg25[%c16_529, %c0_530], %456 {strides = array<i32>} : memref<72x286xf32, #tpu.memory_space<vmem>>, vector<8x286xf32>,
    %c0_531 = arith.constant 0 : index
    %c18_532 = arith.constant 18 : index
    %458 = vector.load %arg24[%c0_531, %c18_532] : memref<8x324xf32, #tpu.memory_space<vmem>>, vector<8x286xf32>
    %c24_533 = arith.constant 24 : index
    %c0_534 = arith.constant 0 : index
    %459 = vector.load %arg25[%c24_533, %c0_534] : memref<72x286xf32, #tpu.memory_space<vmem>>, vector<8x286xf32>
    tpu.vector_store %arg25[%c24_533, %c0_534], %458 {strides = array<i32>} : memref<72x286xf32, #tpu.memory_space<vmem>>, vector<8x286xf32>,
    %c0_535 = arith.constant 0 : index
    %c19_536 = arith.constant 19 : index
    %460 = vector.load %arg24[%c0_535, %c19_536] : memref<8x324xf32, #tpu.memory_space<vmem>>, vector<8x286xf32>
    %c32_537 = arith.constant 32 : index
    %c0_538 = arith.constant 0 : index
    %461 = vector.load %arg25[%c32_537, %c0_538] : memref<72x286xf32, #tpu.memory_space<vmem>>, vector<8x286xf32>
    tpu.vector_store %arg25[%c32_537, %c0_538], %460 {strides = array<i32>} : memref<72x286xf32, #tpu.memory_space<vmem>>, vector<8x286xf32>,
    %c0_539 = arith.constant 0 : index
    %c20_540 = arith.constant 20 : index
    %462 = vector.load %arg24[%c0_539, %c20_540] : memref<8x324xf32, #tpu.memory_space<vmem>>, vector<8x286xf32>
    %c40_541 = arith.constant 40 : index
    %c0_542 = arith.constant 0 : index
    %463 = vector.load %arg25[%c40_541, %c0_542] : memref<72x286xf32, #tpu.memory_space<vmem>>, vector<8x286xf32>
    tpu.vector_store %arg25[%c40_541, %c0_542], %462 {strides = array<i32>} : memref<72x286xf32, #tpu.memory_space<vmem>>, vector<8x286xf32>,
    %c0_543 = arith.constant 0 : index
    %c36_544 = arith.constant 36 : index
    %464 = vector.load %arg24[%c0_543, %c36_544] : memref<8x324xf32, #tpu.memory_space<vmem>>, vector<8x286xf32>
    %c48_545 = arith.constant 48 : index
    %c0_546 = arith.constant 0 : index
    %465 = vector.load %arg25[%c48_545, %c0_546] : memref<72x286xf32, #tpu.memory_space<vmem>>, vector<8x286xf32>
    tpu.vector_store %arg25[%c48_545, %c0_546], %464 {strides = array<i32>} : memref<72x286xf32, #tpu.memory_space<vmem>>, vector<8x286xf32>,
    %c0_547 = arith.constant 0 : index
    %c37_548 = arith.constant 37 : index
    %466 = vector.load %arg24[%c0_547, %c37_548] : memref<8x324xf32, #tpu.memory_space<vmem>>, vector<8x286xf32>
    %c56_549 = arith.constant 56 : index
    %c0_550 = arith.constant 0 : index
    %467 = vector.load %arg25[%c56_549, %c0_550] : memref<72x286xf32, #tpu.memory_space<vmem>>, vector<8x286xf32>
    tpu.vector_store %arg25[%c56_549, %c0_550], %466 {strides = array<i32>} : memref<72x286xf32, #tpu.memory_space<vmem>>, vector<8x286xf32>,
    %c0_551 = arith.constant 0 : index
    %c38_552 = arith.constant 38 : index
    %468 = vector.load %arg24[%c0_551, %c38_552] : memref<8x324xf32, #tpu.memory_space<vmem>>, vector<8x286xf32>
    %c64_553 = arith.constant 64 : index
    %c0_554 = arith.constant 0 : index
    %469 = vector.load %arg25[%c64_553, %c0_554] : memref<72x286xf32, #tpu.memory_space<vmem>>, vector<8x286xf32>
    tpu.vector_store %arg25[%c64_553, %c0_554], %468 {strides = array<i32>} : memref<72x286xf32, #tpu.memory_space<vmem>>, vector<8x286xf32>,
    %c0_555 = arith.constant 0 : index
    %c0_556 = arith.constant 0 : index
    %470 = vector.load %arg25[%c0_555, %c0_556] : memref<72x286xf32, #tpu.memory_space<vmem>>, vector<72x286xf32>
    %cst_557 = arith.constant dense<0.000000e+00> : vector<4x286xf32>
    %471 = tpu.matmul %444, %470, %cst_557 {dimension_numbers = #tpu.dot_dimension_numbers<[1], [0], [0], [1], [0, 0, 1, 1], [], []>} : vector<4x72xf32>, vector<72x286xf32>, vector<4x286xf32> -> vector<4x286xf32>
    %cst_558 = arith.constant dense<0.000000e+00> : vector<4x256xf32>
    %472 = tpu.matmul %471, %448, %cst_558 {dimension_numbers = #tpu.dot_dimension_numbers<[1], [0], [0], [1], [0, 0, 1, 1], [], []>} : vector<4x286xf32>, vector<286x256xf32>, vector<4x256xf32> -> vector<4x256xf32>
    %473 = vector.broadcast %449 : vector<4x1xf32> to vector<4x256xf32>
    %474 = arith.addf %472, %473 : vector<4x256xf32>
    %cst_559 = arith.constant dense<0.000000e+00> : vector<8x324xf32>
    %475 = tpu.matmul %251, %446, %cst_559 {dimension_numbers = #tpu.dot_dimension_numbers<[1], [0], [0], [1], [0, 0, 1, 1], [], []>} : vector<8x256xf32>, vector<256x324xf32>, vector<8x324xf32> -> vector<8x324xf32>
    %c0_560 = arith.constant 0 : index
    %c0_561 = arith.constant 0 : index
    %476 = vector.load %arg24[%c0_560, %c0_561] : memref<8x324xf32, #tpu.memory_space<vmem>>, vector<8x324xf32>
    tpu.vector_store %arg24[%c0_560, %c0_561], %475 {strides = array<i32>} : memref<8x324xf32, #tpu.memory_space<vmem>>, vector<8x324xf32>,
    %c0_562 = arith.constant 0 : index
    %c0_563 = arith.constant 0 : index
    %477 = vector.load %arg24[%c0_562, %c0_563] : memref<8x324xf32, #tpu.memory_space<vmem>>, vector<8x286xf32>
    %c0_564 = arith.constant 0 : index
    %c0_565 = arith.constant 0 : index
    %478 = vector.load %arg25[%c0_564, %c0_565] : memref<72x286xf32, #tpu.memory_space<vmem>>, vector<8x286xf32>
    tpu.vector_store %arg25[%c0_564, %c0_565], %477 {strides = array<i32>} : memref<72x286xf32, #tpu.memory_space<vmem>>, vector<8x286xf32>,
    %c0_566 = arith.constant 0 : index
    %c1_567 = arith.constant 1 : index
    %479 = vector.load %arg24[%c0_566, %c1_567] : memref<8x324xf32, #tpu.memory_space<vmem>>, vector<8x286xf32>
    %c8_568 = arith.constant 8 : index
    %c0_569 = arith.constant 0 : index
    %480 = vector.load %arg25[%c8_568, %c0_569] : memref<72x286xf32, #tpu.memory_space<vmem>>, vector<8x286xf32>
    tpu.vector_store %arg25[%c8_568, %c0_569], %479 {strides = array<i32>} : memref<72x286xf32, #tpu.memory_space<vmem>>, vector<8x286xf32>,
    %c0_570 = arith.constant 0 : index
    %c2_571 = arith.constant 2 : index
    %481 = vector.load %arg24[%c0_570, %c2_571] : memref<8x324xf32, #tpu.memory_space<vmem>>, vector<8x286xf32>
    %c16_572 = arith.constant 16 : index
    %c0_573 = arith.constant 0 : index
    %482 = vector.load %arg25[%c16_572, %c0_573] : memref<72x286xf32, #tpu.memory_space<vmem>>, vector<8x286xf32>
    tpu.vector_store %arg25[%c16_572, %c0_573], %481 {strides = array<i32>} : memref<72x286xf32, #tpu.memory_space<vmem>>, vector<8x286xf32>,
    %c0_574 = arith.constant 0 : index
    %c18_575 = arith.constant 18 : index
    %483 = vector.load %arg24[%c0_574, %c18_575] : memref<8x324xf32, #tpu.memory_space<vmem>>, vector<8x286xf32>
    %c24_576 = arith.constant 24 : index
    %c0_577 = arith.constant 0 : index
    %484 = vector.load %arg25[%c24_576, %c0_577] : memref<72x286xf32, #tpu.memory_space<vmem>>, vector<8x286xf32>
    tpu.vector_store %arg25[%c24_576, %c0_577], %483 {strides = array<i32>} : memref<72x286xf32, #tpu.memory_space<vmem>>, vector<8x286xf32>,
    %c0_578 = arith.constant 0 : index
    %c19_579 = arith.constant 19 : index
    %485 = vector.load %arg24[%c0_578, %c19_579] : memref<8x324xf32, #tpu.memory_space<vmem>>, vector<8x286xf32>
    %c32_580 = arith.constant 32 : index
    %c0_581 = arith.constant 0 : index
    %486 = vector.load %arg25[%c32_580, %c0_581] : memref<72x286xf32, #tpu.memory_space<vmem>>, vector<8x286xf32>
    tpu.vector_store %arg25[%c32_580, %c0_581], %485 {strides = array<i32>} : memref<72x286xf32, #tpu.memory_space<vmem>>, vector<8x286xf32>,
    %c0_582 = arith.constant 0 : index
    %c20_583 = arith.constant 20 : index
    %487 = vector.load %arg24[%c0_582, %c20_583] : memref<8x324xf32, #tpu.memory_space<vmem>>, vector<8x286xf32>
    %c40_584 = arith.constant 40 : index
    %c0_585 = arith.constant 0 : index
    %488 = vector.load %arg25[%c40_584, %c0_585] : memref<72x286xf32, #tpu.memory_space<vmem>>, vector<8x286xf32>
    tpu.vector_store %arg25[%c40_584, %c0_585], %487 {strides = array<i32>} : memref<72x286xf32, #tpu.memory_space<vmem>>, vector<8x286xf32>,
    %c0_586 = arith.constant 0 : index
    %c36_587 = arith.constant 36 : index
    %489 = vector.load %arg24[%c0_586, %c36_587] : memref<8x324xf32, #tpu.memory_space<vmem>>, vector<8x286xf32>
    %c48_588 = arith.constant 48 : index
    %c0_589 = arith.constant 0 : index
    %490 = vector.load %arg25[%c48_588, %c0_589] : memref<72x286xf32, #tpu.memory_space<vmem>>, vector<8x286xf32>
    tpu.vector_store %arg25[%c48_588, %c0_589], %489 {strides = array<i32>} : memref<72x286xf32, #tpu.memory_space<vmem>>, vector<8x286xf32>,
    %c0_590 = arith.constant 0 : index
    %c37_591 = arith.constant 37 : index
    %491 = vector.load %arg24[%c0_590, %c37_591] : memref<8x324xf32, #tpu.memory_space<vmem>>, vector<8x286xf32>
    %c56_592 = arith.constant 56 : index
    %c0_593 = arith.constant 0 : index
    %492 = vector.load %arg25[%c56_592, %c0_593] : memref<72x286xf32, #tpu.memory_space<vmem>>, vector<8x286xf32>
    tpu.vector_store %arg25[%c56_592, %c0_593], %491 {strides = array<i32>} : memref<72x286xf32, #tpu.memory_space<vmem>>, vector<8x286xf32>,
    %c0_594 = arith.constant 0 : index
    %c38_595 = arith.constant 38 : index
    %493 = vector.load %arg24[%c0_594, %c38_595] : memref<8x324xf32, #tpu.memory_space<vmem>>, vector<8x286xf32>
    %c64_596 = arith.constant 64 : index
    %c0_597 = arith.constant 0 : index
    %494 = vector.load %arg25[%c64_596, %c0_597] : memref<72x286xf32, #tpu.memory_space<vmem>>, vector<8x286xf32>
    tpu.vector_store %arg25[%c64_596, %c0_597], %493 {strides = array<i32>} : memref<72x286xf32, #tpu.memory_space<vmem>>, vector<8x286xf32>,
    %c0_598 = arith.constant 0 : index
    %c0_599 = arith.constant 0 : index
    %495 = vector.load %arg25[%c0_598, %c0_599] : memref<72x286xf32, #tpu.memory_space<vmem>>, vector<72x286xf32>
    %cst_600 = arith.constant dense<0.000000e+00> : vector<4x286xf32>
    %496 = tpu.matmul %444, %495, %cst_600 {dimension_numbers = #tpu.dot_dimension_numbers<[1], [0], [0], [1], [0, 0, 1, 1], [], []>} : vector<4x72xf32>, vector<72x286xf32>, vector<4x286xf32> -> vector<4x286xf32>
    %cst_601 = arith.constant dense<0.000000e+00> : vector<4x256xf32>
    %497 = tpu.matmul %496, %448, %cst_601 {dimension_numbers = #tpu.dot_dimension_numbers<[1], [0], [0], [1], [0, 0, 1, 1], [], []>} : vector<4x286xf32>, vector<286x256xf32>, vector<4x256xf32> -> vector<4x256xf32>
    %498 = vector.broadcast %449 : vector<4x1xf32> to vector<4x256xf32>
    %499 = arith.addf %497, %498 : vector<4x256xf32>
    %500 = arith.addf %437, %474 : vector<4x256xf32>
    %501 = arith.addf %443, %499 : vector<4x256xf32>
    %c0_602 = arith.constant 0 : index
    %c0_603 = arith.constant 0 : index
    %c0_604 = arith.constant 0 : index
    %502 = vector.load %arg23[%c0_602, %c0_603, %c0_604] : memref<2x4x256xf32, #tpu.memory_space<vmem>>, vector<1x4x256xf32>
    %503 = vector.shape_cast %502 : vector<1x4x256xf32> to vector<4x256xf32>
    %504 = vector.shape_cast %500 : vector<4x256xf32> to vector<1x4x256xf32>
    tpu.vector_store %arg23[%c0_602, %c0_603, %c0_604], %504 {strides = array<i32>} : memref<2x4x256xf32, #tpu.memory_space<vmem>>, vector<1x4x256xf32>,
    %c1_605 = arith.constant 1 : index
    %c0_606 = arith.constant 0 : index
    %c0_607 = arith.constant 0 : index
    %505 = vector.load %arg23[%c1_605, %c0_606, %c0_607] : memref<2x4x256xf32, #tpu.memory_space<vmem>>, vector<1x4x256xf32>
    %506 = vector.shape_cast %505 : vector<1x4x256xf32> to vector<4x256xf32>
    %507 = vector.shape_cast %501 : vector<4x256xf32> to vector<1x4x256xf32>
    tpu.vector_store %arg23[%c1_605, %c0_606, %c0_607], %507 {strides = array<i32>} : memref<2x4x256xf32, #tpu.memory_space<vmem>>, vector<1x4x256xf32>,
    return
  }
  func.func @transform_0(%arg0: i32) -> (i32, i32, i32) {
    %c0_i32 = arith.constant 0 : i32
    %c0_i32_0 = arith.constant 0 : i32
    %c0_i32_1 = arith.constant 0 : i32
    %c0_i32_2 = arith.constant 0 : i32
    return %c0_i32, %c0_i32_0, %c0_i32_1 : i32, i32, i32
  }
  func.func @transform_1(%arg0: i32) -> (i32, i32) {
    %c0_i32 = arith.constant 0 : i32
    %c0_i32_0 = arith.constant 0 : i32
    %c0_i32_1 = arith.constant 0 : i32
    return %c0_i32, %c0_i32_0 : i32, i32
  }
  func.func @transform_2(%arg0: i32) -> (i32, i32) {
    %c0_i32 = arith.constant 0 : i32
    %c0_i32_0 = arith.constant 0 : i32
    %c0_i32_1 = arith.constant 0 : i32
    return %c0_i32, %c0_i32_0 : i32, i32
  }
  func.func @transform_3(%arg0: i32) -> (i32, i32) {
    %c0_i32 = arith.constant 0 : i32
    %c0_i32_0 = arith.constant 0 : i32
    %c0_i32_1 = arith.constant 0 : i32
    return %c0_i32, %c0_i32_0 : i32, i32
  }
  func.func @transform_4(%arg0: i32) -> (i32, i32) {
    %c0_i32 = arith.constant 0 : i32
    %c0_i32_0 = arith.constant 0 : i32
    %c0_i32_1 = arith.constant 0 : i32
    return %c0_i32, %c0_i32_0 : i32, i32
  }
  func.func @transform_5(%arg0: i32) -> (i32, i32) {
    %c0_i32 = arith.constant 0 : i32
    %c0_i32_0 = arith.constant 0 : i32
    %c0_i32_1 = arith.constant 0 : i32
    return %c0_i32, %c0_i32_0 : i32, i32
  }
  func.func @transform_6(%arg0: i32) -> (i32, i32) {
    %c0_i32 = arith.constant 0 : i32
    %c0_i32_0 = arith.constant 0 : i32
    %c0_i32_1 = arith.constant 0 : i32
    return %c0_i32, %c0_i32_0 : i32, i32
  }
  func.func @transform_7(%arg0: i32) -> (i32, i32) {
    %c0_i32 = arith.constant 0 : i32
    %c0_i32_0 = arith.constant 0 : i32
    %c0_i32_1 = arith.constant 0 : i32
    return %c0_i32, %c0_i32_0 : i32, i32
  }
  func.func @transform_8(%arg0: i32) -> (i32, i32) {
    %c0_i32 = arith.constant 0 : i32
    %c0_i32_0 = arith.constant 0 : i32
    %c0_i32_1 = arith.constant 0 : i32
    return %c0_i32, %c0_i32_0 : i32, i32
  }
  func.func @transform_9(%arg0: i32) -> (i32, i32) {
    %c0_i32 = arith.constant 0 : i32
    %c0_i32_0 = arith.constant 0 : i32
    %c0_i32_1 = arith.constant 0 : i32
    return %c0_i32, %c0_i32_0 : i32, i32
  }
  func.func @transform_10(%arg0: i32) -> (i32, i32) {
    %c0_i32 = arith.constant 0 : i32
    %c0_i32_0 = arith.constant 0 : i32
    %c0_i32_1 = arith.constant 0 : i32
    return %c0_i32, %c0_i32_0 : i32, i32
  }
  func.func @transform_11(%arg0: i32) -> (i32, i32) {
    %c0_i32 = arith.constant 0 : i32
    %c0_i32_0 = arith.constant 0 : i32
    %c0_i32_1 = arith.constant 0 : i32
    return %c0_i32, %c0_i32_0 : i32, i32
  }
  func.func @transform_12(%arg0: i32) -> (i32, i32) {
    %c0_i32 = arith.constant 0 : i32
    %c0_i32_0 = arith.constant 0 : i32
    %c0_i32_1 = arith.constant 0 : i32
    return %c0_i32, %c0_i32_0 : i32, i32
  }
  func.func @transform_13(%arg0: i32) -> (i32, i32) {
    %c0_i32 = arith.constant 0 : i32
    %c0_i32_0 = arith.constant 0 : i32
    %c0_i32_1 = arith.constant 0 : i32
    return %c0_i32, %c0_i32_0 : i32, i32
  }
  func.func @transform_14(%arg0: i32) -> (i32, i32) {
    %c0_i32 = arith.constant 0 : i32
    %c0_i32_0 = arith.constant 0 : i32
    %c0_i32_1 = arith.constant 0 : i32
    return %c0_i32, %c0_i32_0 : i32, i32
  }
  func.func @transform_15(%arg0: i32) -> (i32, i32) {
    %c0_i32 = arith.constant 0 : i32
    %c0_i32_0 = arith.constant 0 : i32
    %c0_i32_1 = arith.constant 0 : i32
    return %c0_i32, %c0_i32_0 : i32, i32
  }
  func.func @transform_16(%arg0: i32) -> (i32, i32) {
    %c0_i32 = arith.constant 0 : i32
    %c0_i32_0 = arith.constant 0 : i32
    %c0_i32_1 = arith.constant 0 : i32
    return %c0_i32, %c0_i32_0 : i32, i32
  }
  func.func @transform_17(%arg0: i32) -> (i32, i32) {
    %c0_i32 = arith.constant 0 : i32
    %c0_i32_0 = arith.constant 0 : i32
    %c0_i32_1 = arith.constant 0 : i32
    return %c0_i32, %c0_i32_0 : i32, i32
  }
  func.func @transform_18(%arg0: i32) -> (i32, i32) {
    %c0_i32 = arith.constant 0 : i32
    %c0_i32_0 = arith.constant 0 : i32
    %c0_i32_1 = arith.constant 0 : i32
    return %c0_i32, %c0_i32_0 : i32, i32
  }
  func.func @transform_19(%arg0: i32) -> (i32, i32) {
    %c0_i32 = arith.constant 0 : i32
    %c0_i32_0 = arith.constant 0 : i32
    %c0_i32_1 = arith.constant 0 : i32
    return %c0_i32, %c0_i32_0 : i32, i32
  }
  func.func @transform_20(%arg0: i32) -> (i32, i32) {
    %c0_i32 = arith.constant 0 : i32
    %c0_i32_0 = arith.constant 0 : i32
    %c0_i32_1 = arith.constant 0 : i32
    return %c0_i32, %c0_i32_0 : i32, i32
  }
  func.func @transform_21(%arg0: i32) -> (i32, i32) {
    %c0_i32 = arith.constant 0 : i32
    %c0_i32_0 = arith.constant 0 : i32
    %c0_i32_1 = arith.constant 0 : i32
    return %c0_i32, %c0_i32_0 : i32, i32
  }
  func.func @transform_22(%arg0: i32) -> (i32, i32, i32) {
    %c0_i32 = arith.constant 0 : i32
    %c0_i32_0 = arith.constant 0 : i32
    %c0_i32_1 = arith.constant 0 : i32
    %c0_i32_2 = arith.constant 0 : i32
    return %c0_i32, %c0_i32_0, %c0_i32_1 : i32, i32, i32
  }
}

</mosaic_0001>

<bundles_post_ra>
// kernel: decoder_pallas.1
= control target key start
LH: loop header
LB: loop body
LE: loop exit
PB: predicated region body
PF: predicated region fallthrough
CT: control target
= control target key end

     0   :  { %v14720_v0 = vmov 0.0|0.0   ;;  %vm11259_vm0 = vmmov 0   ;;  %v11260_v2 = vmov 0.0   ;;  %vm111_vm1 = vcmask 523264   ;;  %s11261_s26 = smov 118   ;;  %s11263_s27 = smov 117   ;;  %s14690_s1 = inlined_call_operand.vmem [shape: bf16[64,100], index: 1, kind: input, shape index: {}]   ;;  %s14691_s0 = inlined_call_operand.vmem [shape: f32[2,8,64], index: 0, kind: input, shape index: {}]   ;;  %s14692_s2 = inlined_call_operand.vmem [shape: bf16[78,64], index: 2, kind: input, shape index: {}]   ;;  %s14693_s3 = inlined_call_operand.vmem [shape: f32[8,72], index: 3, kind: input, shape index: {}]   ;;  %s14694_s4 = inlined_call_operand.vmem [shape: f32[8,1], index: 4, kind: input, shape index: {}]   ;;  %s14695_s5 = inlined_call_operand.vmem [shape: f32[8,1], index: 5, kind: input, shape index: {}]   ;;  %s14696_s6 = inlined_call_operand.vmem [shape: f32[8,72], index: 6, kind: input, shape index: {}]   ;;  %s14697_s9 = inlined_call_operand.vmem [shape: bf16[64,324], index: 9, kind: input, shape index: {}]   ;;  %s14698_s7 = inlined_call_operand.vmem [shape: f32[8,1], index: 7, kind: input, shape index: {}]   ;;  %s14699_s8 = inlined_call_operand.vmem [shape: f32[8,1], index: 8, kind: input, shape index: {}]   ;;  %s14700_s10 = inlined_call_operand.vmem [shape: bf16[286,256], index: 10, kind: input, shape index: {}]   ;;  %s14701_s11 = inlined_call_operand.vmem [shape: f32[8,72], index: 11, kind: input, shape index: {}]   ;;  %s14702_s13 = inlined_call_operand.vmem [shape: bf16[256,324], index: 13, kind: input, shape index: {}]   ;;  %s14703_s12 = inlined_call_operand.vmem [shape: f32[8,1], index: 12, kind: input, shape index: {}]   ;;  %s14704_s14 = inlined_call_operand.vmem [shape: f32[4,72], index: 14, kind: input, shape index: {}]   ;;  %s14705_s15 = inlined_call_operand.vmem [shape: f32[4,1], index: 15, kind: input, shape index: {}]   ;;  %s14706_s16 = inlined_call_operand.vmem [shape: f32[4,1], index: 16, kind: input, shape index: {}]   ;;  %s14707_s17 = inlined_call_operand.vmem [shape: f32[4,72], index: 17, kind: input, shape index: {}]   ;;  %s14708_s20 = inlined_call_operand.vmem [shape: f32[4,72], index: 20, kind: input, shape index: {}]   ;;  %s14709_s18 = inlined_call_operand.vmem [shape: f32[4,1], index: 18, kind: input, shape index: {}]   ;;  %s14710_s19 = inlined_call_operand.vmem [shape: f32[4,1], index: 19, kind: input, shape index: {}]   ;;  %s14711_s21 = inlined_call_operand.vmem [shape: f32[4,1], index: 21, kind: input, shape index: {}]   ;;  %s14712_s22 = inlined_call_operand.vmem [shape: f32[2,4,256], index: 22, kind: output, shape index: {}]  }
   0x1   :  { %14773 = sst [smem:[#allocation24_spill]] %s14690_s1  ;;  %8539 = vmatprep.subr.bf16.mxu0 %v14720_v0  ;;  %8097 = vmatprep.mubr.msk.f32.mxu0 %vm11259_vm0, %v11260_v2  ;;  %4645 = vst [vmem:[#allocation2 + $0x8] sm:$0xff] %v11260_v2  ;;  %vm185_vm2 = vcmask 818176   ;;  %vm188_vm3 = vcmask 637952   ;;  %s11265_s28 = smov 108   ;;  %vm324_vm4 = vcmask 1045504  }
   0x2   :  { %14774 = sst [smem:[#allocation25_spill]] %s14691_s0  ;;  %s14780_s29 = sld [smem:[#allocation24_spill]]  ;;  %8551 = vmatprep.subr.bf16.mxu1 %v14720_v0  ;;  %8118 = vmatprep.mubr.msk.f32.mxu1 %vm11259_vm0, %v11260_v2  ;;  %vm11269_vm5 = vmmov 1   ;;  %v14783_v15 = vmov 0  ;;  %vm247_vm7 = vcmask 588800   ;;  %vm1657_vm8 = vcmask 556032  }
   0x3   :  { %14775 = sst [smem:[#allocation26_spill]] %s14692_s2  ;;  %s14781_s25 = sld [smem:[#allocation25_spill]]  ;;  %vm11478_vm6 = vmpackc.low %vm324_vm4, %vm11269_vm5  ;;  %vm1664_vm9 = vcmask 244736   ;;  %vm1678_vm10 = vcmask 1039360   ;;  %vm1699_vm11 = vcmask 1031168   ;;  %vm1720_vm12 = vcmask 900096  }
   0x4   :  { %14776 = sst [smem:[#allocation27_spill]] %s14693_s3  ;;  %s11262_s2 = smov 127   ;;  %v14784_v15 = vsel %vm11478_vm6, 4294967295, %v14783_v15  ;;  %vm1741_vm13 = vcmask 891904   ;;  %vm1762_vm14 = vcmask 883712   ;;  %vm1783_vm15 = vcmask 752640  }
   0x5   :  { %14777 = sst [smem:[#allocation28_spill]] %s14694_s4  ;;  %s11264_s3 = smov 126   ;;  %14785 = vst [vmem:[#allocation4_spill] sm:$0xff] %v14784_v15  ;;  %vm4790_vm4 = vcmask 551936  }
   0x6   :  { %14778 = sst [smem:[#allocation29_spill]] %s14695_s5  ;;  %s14718_s30 = smov 106  }
   0x7   :  { %14779 = sst [smem:[#allocation30_spill]] %s14696_s6  ;;  %s14716_s4 = smov 107  }
   0x8   :  { %v11395_v1 = vld [vmem:[%s14780_s29] sm:$0xff]   ;;  %v11406_v3 = vld [vmem:[%s14780_s29 + $0x8] sm:$0xff]   ;;  %v11415_v4 = vld [vmem:[%s14780_s29 + $0x10] sm:$0xff]   ;;  %s14782_s0 = sld [smem:[#allocation26_spill]]  ;;  %s14786_s1 = sld [smem:[#allocation27_spill]] }
   0x9   :  { %8541 = vmatpush3.bf16.msra.mxu0 %v11395_v1  ;;  %v11422_v5 = vld [vmem:[%s14780_s29 + $0x18] sm:$0xff]   ;;  %v11428_v6 = vld [vmem:[%s14781_s25] sm:$0xff]  ;;  %s11266_s29 = smov 116   ;;  %v7515_v38 = vld [vmem:[%s14781_s25 + $0x8] sm:$0xff]  ;;  %s14787_s24 = smov 107  }
   0xa   :  { %8542 = vmatprep.subr.bf16.mxu0 %v14720_v0  ;;  %s14791_s23 = sld [smem:[#allocation30_spill]]  ;;  %s11272_s5 = smov 91  }
   0xb   :  { %s11275_s6 = smov 90  }
   0xd   :  { %8544 = vmatpush3.bf16.msra.mxu0 %v11406_v3 }
   0xe   :  { %8545 = vmatprep.subr.bf16.mxu0 %v14720_v0  ;;  %v11448_v10 = vld [vmem:[%s14782_s0] sm:$0xff]   ;;  %v11455_v11 = vld [vmem:[%s14782_s0 + $0x8] sm:$0xff]   ;;  %v11462_v12 = vld [vmem:[%s14782_s0 + $0x10] sm:$0xff]  }
   0xf   :  { %v11469_v13 = vld [vmem:[%s14782_s0 + $0x18] sm:$0xff]   ;;  %v11475_v14 = vld [vmem:[%s14782_s0 + $0x20] sm:$0x7f]  }
  0x10   :  { %v11501_v36 = vld [vmem:[%s14786_s1] sm:$0xff]  ;;  %s14788_s1 = sld [smem:[#allocation28_spill]] }
  0x11   :  { %8547 = vmatpush3.bf16.msra.mxu0 %v11415_v4 }
  0x12   :  { %8548 = vmatprep.subr.bf16.mxu0 %v14720_v0 }
  0x15   :  { %8550 = vmatpush3.bf16.msra.mxu0 %v11422_v5 }
  0x16   :  { %8563 = vmatprep.subr.bf16.mxu0 %v14720_v0 }
  0x18   :  { %8098 = vmatmul.mubr.msk.f32.vlgmr.msra.gmra.mrb[0].mxu0 %vm111_vm1, %v11428_v6 }
  0x19   :  { %8141 = vmatprep.mubr.msk.f32.mxu0 %vm11259_vm0, %v11260_v2  ;;  %8565 = vmatpush3.bf16.msra.mxu0 %v11448_v10 }
  0x1a   :  { %8566 = vmatprep.subr.bf16.mxu0 %v14720_v0 }
  0x1d   :  { %8568 = vmatpush3.bf16.msra.mxu0 %v11455_v11 }
  0x1e   :  { %8569 = vmatprep.subr.bf16.mxu0 %v14720_v0 }
  0x21   :  { %8571 = vmatpush3.bf16.msra.mxu0 %v11462_v12 }
  0x22   :  { %8572 = vmatprep.subr.bf16.mxu0 %v14720_v0 }
  0x25   :  { %8574 = vmatpush3.bf16.msra.mxu0 %v11469_v13 }
  0x26   :  { %8575 = vmatprep.subr.bf16.mxu0 %v14720_v0 }
  0x29   :  { %8578 = vmatpush3.bf16.msk.msra.mxu0 %vm11478_vm6, %v11475_v14 }
  0x2a   :  { %8603 = vmatprep.subr.bf16.mxu0 %v14720_v0 }
  0xeb   :  { %v181_v7 = vpop.f32.mrb[0].mxu0 }
  0xec   :  { %186 = vst.msk [vmem:[#allocation2] sm:$0xff] %vm185_vm2, %v181_v7  ;;  %v8099_v8 = vpop.f32.mrb[1].mxu0 }
  0xf3   :  { %v187_v9 = vld [vmem:[#allocation2] sm:$0xff] }
  0xf4   :  { %189 = vst.msk [vmem:[#allocation3] sm:$0xff] %vm188_vm3, %v187_v9  ;;  %204 = vrot.lane.b32.xlu1 %v187_v9, %s11261_s26  ;;  %192 = vrot.lane.b32.xlu0 %v187_v9, %s11262_s2 }
  0xf8   :  { %210 = vrot.lane.b32.xlu1 %v187_v9, %s11263_s27  ;;  %198 = vrot.lane.b32.xlu0 %v187_v9, %s11264_s3 }
  0xfb   :  { %v238_v22 = vld [vmem:[#allocation3] sm:$0xff] }
  0xfc   :  { %222 = vrot.lane.b32.xlu1 %v187_v9, %s11265_s28  ;;  %216 = vrot.lane.b32.xlu0 %v187_v9, %s11266_s29 }
 0x100   :  { %234 = vrot.lane.b32.xlu1 %v187_v9, %s14718_s30  ;;  %228 = vrot.lane.b32.xlu0 %v187_v9, %s14716_s4  ;;  %s11274_s4 = smov 92  }
 0x166   :  { %v205_v16 = vpop.permute.xlu1 %204  ;;  %v193_v17 = vpop.permute.xlu0 %192 }
 0x167   :  { %207 = vst.msk [vmem:[#allocation3 + $0x48] sm:$0xff] %vm188_vm3, %v205_v16  ;;  %195 = vst.msk [vmem:[#allocation3 + $0x18] sm:$0xff] %vm188_vm3, %v193_v17 }
 0x16a   :  { %v211_v18 = vpop.permute.xlu1 %210  ;;  %v199_v19 = vpop.permute.xlu0 %198 }
 0x16b   :  { %213 = vst.msk [vmem:[#allocation3 + $0x60] sm:$0xff] %vm188_vm3, %v211_v18  ;;  %201 = vst.msk [vmem:[#allocation3 + $0x30] sm:$0xff] %vm188_vm3, %v199_v19 }
 0x16e   :  { %v223_v20 = vpop.permute.xlu1 %222  ;;  %v217_v21 = vpop.permute.xlu0 %216  ;;  %v239_v23 = vld [vmem:[#allocation3 + $0x18] sm:$0xff]  ;;  %v241_v28 = vld [vmem:[#allocation3 + $0x48] sm:$0xff] }
 0x16f   :  { %225 = vst.msk [vmem:[#allocation3 + $0x90] sm:$0xff] %vm188_vm3, %v223_v20  ;;  %219 = vst.msk [vmem:[#allocation3 + $0x78] sm:$0xff] %vm188_vm3, %v217_v21  ;;  %v8552_v24 = vpack.c.bf16 %v239_v23, %v238_v22 }
 0x171   :  { %8553 = vmatpush3.bf16.msra.mxu1 %v8552_v24 }
 0x172   :  { %v235_v25 = vpop.permute.xlu1 %234  ;;  %v229_v26 = vpop.permute.xlu0 %228  ;;  %8554 = vmatprep.subr.bf16.mxu1 %v14720_v0  ;;  %v240_v27 = vld [vmem:[#allocation3 + $0x30] sm:$0xff]  ;;  %v242_v30 = vld [vmem:[#allocation3 + $0x60] sm:$0xff] }
 0x173   :  { %237 = vst.msk [vmem:[#allocation3 + $0xc0] sm:$0xff] %vm188_vm3, %v235_v25  ;;  %231 = vst.msk [vmem:[#allocation3 + $0xa8] sm:$0xff] %vm188_vm3, %v229_v26  ;;  %v8555_v29 = vpack.c.bf16 %v241_v28, %v240_v27 }
 0x175   :  { %8556 = vmatpush3.bf16.msra.mxu1 %v8555_v29 }
 0x176   :  { %8557 = vmatprep.subr.bf16.mxu1 %v14720_v0  ;;  %v243_v31 = vld [vmem:[#allocation3 + $0x78] sm:$0xff]  ;;  %v244_v33 = vld [vmem:[#allocation3 + $0x90] sm:$0xff] }
 0x177   :  { %v8558_v32 = vpack.c.bf16 %v243_v31, %v242_v30  ;;  %v11270_v31 = vmov 0  }
 0x178   :  { %10793 = vset.pattern.permute.xlu1 %v11270_v31  ;;  %10794 = vset.pattern.permute.xlu0 %v11270_v31 }
 0x179   :  { %8559 = vmatpush3.bf16.msra.mxu1 %v8558_v32 }
 0x17a   :  { %8560 = vmatprep.subr.bf16.mxu1 %v14720_v0  ;;  %v245_v34 = vld [vmem:[#allocation3 + $0xa8] sm:$0xff]  ;;  %v246_v37 = vld [vmem:[#allocation3 + $0xc0] sm:$0xff] }
 0x17b   :  { %v8561_v35 = vpack.c.bf16 %v245_v34, %v244_v33 }
 0x17d   :  { %8562 = vmatpush3.bf16.msra.mxu1 %v8561_v35 }
 0x17e   :  { %8116 = vmatprep.subr.mxu1 %v11260_v2 }
 0x181   :  { %8117 = vmatpush3.msra.mxu1 %v246_v37  ;;  %v674_v37 = vld [vmem:[%s14788_s1] sm:$0xff] }
 0x182   :  { %8119 = vmatmul.mubr.msk.f32.vlgmr.msra.gmra.mrb[0].mxu1 %vm247_vm7, %v11501_v36  ;;  %8579 = vmatprep.subr.bf16.mxu1 %v14720_v0 }
 0x183   :  { %8581 = vmatpush3.bf16.msra.mxu1 %v11395_v1  ;;  %8160 = vmatprep.mubr.msk.f32.mxu1 %vm11259_vm0, %v11260_v2 }
 0x184   :  { %8582 = vmatprep.subr.bf16.mxu1 %v14720_v0 }
 0x187   :  { %8584 = vmatpush3.bf16.msra.mxu1 %v11406_v3 }
 0x188   :  { %8585 = vmatprep.subr.bf16.mxu1 %v14720_v0 }
 0x18b   :  { %8587 = vmatpush3.bf16.msra.mxu1 %v11415_v4 }
 0x18c   :  { %8588 = vmatprep.subr.bf16.mxu1 %v14720_v0 }
 0x18f   :  { %8590 = vmatpush3.bf16.msra.mxu1 %v11422_v5 }
 0x190   :  { %8591 = vmatprep.subr.bf16.mxu1 %v14720_v0 }
 0x192   :  { %8161 = vmatmul.mubr.msk.f32.vlgmr.msra.gmra.mrb[2].mxu1 %vm111_vm1, %v7515_v38 }
 0x193   :  { %8181 = vmatprep.mubr.msk.f32.mxu1 %vm11259_vm0, %v11260_v2 }
 0x255   :  { %v317_v39 = vpop.f32.mrb[0].mxu1 }
 0x256   :  { %v8120_v40 = vpop.f32.mrb[1].mxu1  ;;  %8142 = vmatmul.mubr.msk.f32.vlgmr.msra.gmra.mrb[2].mxu0 %vm188_vm3, %v317_v39 }
 0x257   :  { %8605 = vmatpush3.bf16.msra.mxu0 %v11448_v10  ;;  %8204 = vmatprep.mubr.msk.f32.mxu0 %vm11259_vm0, %v11260_v2 }
 0x258   :  { %8606 = vmatprep.subr.bf16.mxu0 %v14720_v0 }
 0x25b   :  { %8608 = vmatpush3.bf16.msra.mxu0 %v11455_v11 }
 0x25c   :  { %8609 = vmatprep.subr.bf16.mxu0 %v14720_v0 }
 0x25f   :  { %8611 = vmatpush3.bf16.msra.mxu0 %v11462_v12 }
 0x260   :  { %8612 = vmatprep.subr.bf16.mxu0 %v14720_v0 }
 0x263   :  { %8614 = vmatpush3.bf16.msra.mxu0 %v11469_v13 }
 0x264   :  { %8615 = vmatprep.subr.bf16.mxu0 %v14720_v0 }
 0x265   :  { %v467_v41 = vpop.f32.mrb[2].mxu1 }
 0x266   :  { %471 = vst.msk [vmem:[#allocation2] sm:$0xff] %vm185_vm2, %v467_v41  ;;  %v8162_v42 = vpop.f32.mrb[3].mxu1 }
 0x267   :  { %8618 = vmatpush3.bf16.msk.msra.mxu0 %vm11478_vm6, %v11475_v14 }
 0x268   :  { %8631 = vmatprep.subr.bf16.mxu0 %v14720_v0 }
 0x26d   :  { %v480_v43 = vld [vmem:[#allocation2] sm:$0xff] }
 0x26e   :  { %482 = vrot.lane.b32.xlu1 %v480_v43, %s11264_s3  ;;  %476 = vrot.lane.b32.xlu0 %v480_v43, %s11262_s2  ;;  %473 = vst.msk [vmem:[#allocation3] sm:$0xff] %vm188_vm3, %v480_v43 }
 0x272   :  { %494 = vrot.lane.b32.xlu1 %v480_v43, %s11263_s27  ;;  %488 = vrot.lane.b32.xlu0 %v480_v43, %s11261_s26 }
 0x275   :  { %v522_v50 = vld [vmem:[#allocation3] sm:$0xff] }
 0x276   :  { %506 = vrot.lane.b32.xlu1 %v480_v43, %s11265_s28  ;;  %500 = vrot.lane.b32.xlu0 %v480_v43, %s11266_s29 }
 0x27a   :  { %518 = vrot.lane.b32.xlu1 %v480_v43, %s14718_s30  ;;  %512 = vrot.lane.b32.xlu0 %v480_v43, %s14787_s24  ;;  %s14789_s30 = sld [smem:[#allocation29_spill]] }
 0x280   :  { %v675_v40 = vld [vmem:[%s14789_s30] sm:$0xff]  ;;  %s14790_s30 = smov 106  }
 0x2e0   :  { %v483_v44 = vpop.permute.xlu1 %482  ;;  %v477_v45 = vpop.permute.xlu0 %476 }
 0x2e1   :  { %485 = vst.msk [vmem:[#allocation3 + $0x30] sm:$0xff] %vm188_vm3, %v483_v44  ;;  %479 = vst.msk [vmem:[#allocation3 + $0x18] sm:$0xff] %vm188_vm3, %v477_v45 }
 0x2e4   :  { %v495_v46 = vpop.permute.xlu1 %494  ;;  %v489_v47 = vpop.permute.xlu0 %488 }
 0x2e5   :  { %497 = vst.msk [vmem:[#allocation3 + $0x60] sm:$0xff] %vm188_vm3, %v495_v46  ;;  %491 = vst.msk [vmem:[#allocation3 + $0x48] sm:$0xff] %vm188_vm3, %v489_v47 }
 0x2e8   :  { %v507_v48 = vpop.permute.xlu1 %506  ;;  %v501_v49 = vpop.permute.xlu0 %500  ;;  %v523_v51 = vld [vmem:[#allocation3 + $0x18] sm:$0xff]  ;;  %v524_v55 = vld [vmem:[#allocation3 + $0x30] sm:$0xff] }
 0x2e9   :  { %509 = vst.msk [vmem:[#allocation3 + $0x90] sm:$0xff] %vm188_vm3, %v507_v48  ;;  %503 = vst.msk [vmem:[#allocation3 + $0x78] sm:$0xff] %vm188_vm3, %v501_v49  ;;  %v8592_v52 = vpack.c.bf16 %v523_v51, %v522_v50  ;;  %v11619_v51 = vld [vmem:[%s14782_s0 + $0x20] sm:$0x7f]  }
 0x2eb   :  { %8593 = vmatpush3.bf16.msra.mxu1 %v8592_v52 }
 0x2ec   :  { %v519_v53 = vpop.permute.xlu1 %518  ;;  %v513_v54 = vpop.permute.xlu0 %512  ;;  %8594 = vmatprep.subr.bf16.mxu1 %v14720_v0  ;;  %v525_v56 = vld [vmem:[#allocation3 + $0x48] sm:$0xff]  ;;  %v526_v58 = vld [vmem:[#allocation3 + $0x60] sm:$0xff] }
 0x2ed   :  { %521 = vst.msk [vmem:[#allocation3 + $0xc0] sm:$0xff] %vm188_vm3, %v519_v53  ;;  %515 = vst.msk [vmem:[#allocation3 + $0xa8] sm:$0xff] %vm188_vm3, %v513_v54  ;;  %v8595_v57 = vpack.c.bf16 %v525_v56, %v524_v55 }
 0x2ef   :  { %8596 = vmatpush3.bf16.msra.mxu1 %v8595_v57 }
 0x2f0   :  { %8597 = vmatprep.subr.bf16.mxu1 %v14720_v0  ;;  %v527_v59 = vld [vmem:[#allocation3 + $0x78] sm:$0xff]  ;;  %v528_v61 = vld [vmem:[#allocation3 + $0x90] sm:$0xff] }
 0x2f1   :  { %v8598_v60 = vpack.c.bf16 %v527_v59, %v526_v58 }
 0x2f3   :  { %8599 = vmatpush3.bf16.msra.mxu1 %v8598_v60 }
 0x2f4   :  { %8600 = vmatprep.subr.bf16.mxu1 %v14720_v0  ;;  %v529_v62 = vld [vmem:[#allocation3 + $0xa8] sm:$0xff]  ;;  %v530_v7 = vld [vmem:[#allocation3 + $0xc0] sm:$0xff] }
 0x2f5   :  { %v8601_v63 = vpack.c.bf16 %v529_v62, %v528_v61 }
 0x2f7   :  { %8602 = vmatpush3.bf16.msra.mxu1 %v8601_v63 }
 0x2f8   :  { %8179 = vmatprep.subr.mxu1 %v11260_v2 }
 0x2fb   :  { %8180 = vmatpush3.msra.mxu1 %v530_v7 }
 0x2fc   :  { %8182 = vmatmul.mubr.msk.f32.vlgmr.msra.gmra.mrb[4].mxu1 %vm247_vm7, %v11501_v36  ;;  %8619 = vmatprep.subr.bf16.mxu1 %v14720_v0 }
 0x2fd   :  { %8621 = vmatpush3.bf16.msra.mxu1 %v11395_v1  ;;  %8223 = vmatprep.mubr.msk.f32.mxu1 %vm11259_vm0, %v11260_v2 }
 0x2fe   :  { %8622 = vmatprep.subr.bf16.mxu1 %v14720_v0 }
 0x301   :  { %8624 = vmatpush3.bf16.msra.mxu1 %v11406_v3 }
 0x302   :  { %8625 = vmatprep.subr.bf16.mxu1 %v14720_v0 }
 0x305   :  { %8627 = vmatpush3.bf16.msra.mxu1 %v11415_v4 }
 0x306   :  { %8628 = vmatprep.subr.bf16.mxu1 %v14720_v0 }
 0x309   :  { %8630 = vmatpush3.bf16.msra.mxu1 %v11422_v5 }
 0x30a   :  { %8643 = vmatprep.subr.bf16.mxu1 %v14720_v0 }
 0x329   :  { %v394_v8 = vpop.f32.mrb[2].mxu0 }
 0x32a   :  { %v8143_v9 = vpop.f32.mrb[3].mxu0  ;;  %v676_v14 = vsel %vm111_vm1, %v394_v8, 0.0 }
 0x32b   :  { %677 = vadd.xlane.f32.xlu0 %v676_v14 }
 0x3b8   :  { %v678_v21 = vpop.xlane.xlu0 %677 }
 0x3cf   :  { %v597_v16 = vpop.f32.mrb[4].mxu1 }
 0x3d0   :  { %v8183_v17 = vpop.f32.mrb[5].mxu1  ;;  %8205 = vmatmul.mubr.msk.f32.vlgmr.msra.gmra.mrb[4].mxu0 %vm188_vm3, %v597_v16 }
 0x3d1   :  { %8244 = vmatprep.mubr.msk.f32.mxu0 %vm11259_vm0, %v11260_v2 }
 0x4a3   :  { %v11576_v18 = vpop.f32.mrb[4].mxu0 }
 0x4a4   :  { %v8206_v19 = vpop.f32.mrb[5].mxu0  ;;  %v680_v20 = vsel %vm111_vm1, %v11576_v18, 0.0 }
 0x4a5   :  { %681 = vadd.xlane.f32.xlu1 %v680_v20 }
 0x532   :  { %v682_v22 = vpop.xlane.xlu1 %681 }
 0x533   :  { %v683_v23 = vadd.f32 %v682_v22, %v678_v21  ;;  %v11640_v21 = vld [vmem:[%s14791_s23] sm:$0xff] }
 0x535   :  { %v684_v24 = vmul.f32 0.0078125, %v683_v23 }
 0x537   :  { %v685_v25 = vsub.f32 %v394_v8, %v684_v24  ;;  %v691_v26 = vsub.f32 %v11576_v18, %v684_v24 }
 0x539   :  { %v686_v27 = vmul.f32 %v685_v25, %v685_v25  ;;  %v692_v29 = vmul.f32 %v691_v26, %v691_v26 }
 0x53b   :  { %v687_v28 = vsel %vm111_vm1, %v686_v27, 0.0  ;;  %v693_v30 = vsel %vm111_vm1, %v692_v29, 0.0 }
 0x53c   :  { %688 = vadd.xlane.f32.xlu0 %v687_v28 }
 0x540   :  { %694 = vadd.xlane.f32.xlu0 %v693_v30 }
 0x5c9   :  { %v689_v32 = vpop.xlane.xlu0 %688 }
 0x5cd   :  { %v695_v33 = vpop.xlane.xlu0 %694 }
 0x5ce   :  { %v696_v34 = vadd.f32 %v695_v33, %v689_v32 }
 0x5d0   :  { %v697_v35 = vmul.f32 0.0078125, %v696_v34 }
 0x5d2   :  { %v698_v36 = vadd.f32 1e-05, %v697_v35 }
 0x5d4   :  { %11221 = vrsqrt.f32 %v698_v36 }
 0x5de   :  { %v11222_v38 = vpop.eup %11221 }
 0x5df   :  { %v700_v39 = vmul.f32 %v11222_v38, %v674_v37 }
 0x5e1   :  { %705 = vperm.xlu1 %10793, %v700_v39   ;;  %v701_v41 = vmul.f32 %v700_v39, %v684_v24 }
 0x5e3   :  { %v702_v42 = vsub.f32 %v675_v40, %v701_v41 }
 0x5e5   :  { %711 = vperm.xlu0 %10794, %v702_v42  }
 0x660   :  { %v11589_v43 = vpop.permute.xlu1 %705 }
 0x661   :  { %v708_v44 = vmul.f32 %v11589_v43, %v394_v8  ;;  %v716_v23 = vmul.f32 %v11589_v43, %v11576_v18 }
 0x664   :  { %v11592_v45 = vpop.permute.xlu0 %711 }
 0x665   :  { %v714_v46 = vadd.f32 %v11592_v45, %v708_v44  ;;  %v717_v24 = vadd.f32 %v716_v23, %v11592_v45 }
 0x667   :  { %v715_v47 = vmax.f32 %v714_v46, 0.0 }
 0x669   :  { %8224 = vmatmul.mubr.msk.f32.vlgmr.msra.gmra.mrb[6].mxu1 %vm111_vm1, %v715_v47 }
 0x66a   :  { %8645 = vmatpush3.bf16.msra.mxu1 %v11448_v10  ;;  %8267 = vmatprep.mubr.msk.f32.mxu1 %vm11259_vm0, %v11260_v2 }
 0x66b   :  { %8646 = vmatprep.subr.bf16.mxu1 %v14720_v0 }
 0x66e   :  { %8648 = vmatpush3.bf16.msra.mxu1 %v11455_v11 }
 0x66f   :  { %8649 = vmatprep.subr.bf16.mxu1 %v14720_v0 }
 0x672   :  { %8651 = vmatpush3.bf16.msra.mxu1 %v11462_v12 }
 0x673   :  { %8652 = vmatprep.subr.bf16.mxu1 %v14720_v0 }
 0x676   :  { %8654 = vmatpush3.bf16.msra.mxu1 %v11469_v13 }
 0x677   :  { %8655 = vmatprep.subr.bf16.mxu1 %v14720_v0 }
 0x67a   :  { %8658 = vmatpush3.bf16.msk.msra.mxu1 %vm11478_vm6, %v11619_v51 }
 0x67b   :  { %8671 = vmatprep.subr.bf16.mxu1 %v14720_v0 }
 0x73c   :  { %v825_v48 = vpop.f32.mrb[6].mxu1 }
 0x73d   :  { %829 = vst.msk [vmem:[#allocation2] sm:$0xff] %vm185_vm2, %v825_v48  ;;  %v8225_v49 = vpop.f32.mrb[7].mxu1 }
 0x744   :  { %v832_v50 = vld [vmem:[#allocation2] sm:$0xff] }
 0x745   :  { %834 = vrot.lane.b32.xlu1 %v832_v50, %s11262_s2  ;;  %831 = vst.msk [vmem:[#allocation3] sm:$0xff] %vm188_vm3, %v832_v50 }
 0x749   :  { %840 = vrot.lane.b32.xlu1 %v832_v50, %s11264_s3 }
 0x74c   :  { %v880_v55 = vld [vmem:[#allocation3] sm:$0xff] }
 0x74d   :  { %846 = vrot.lane.b32.xlu1 %v832_v50, %s11261_s26 }
 0x751   :  { %852 = vrot.lane.b32.xlu1 %v832_v50, %s11263_s27 }
 0x755   :  { %858 = vrot.lane.b32.xlu1 %v832_v50, %s11266_s29 }
 0x759   :  { %864 = vrot.lane.b32.xlu1 %v832_v50, %s11265_s28 }
 0x75d   :  { %870 = vrot.lane.b32.xlu1 %v832_v50, %s14787_s24 }
 0x761   :  { %876 = vrot.lane.b32.xlu1 %v832_v50, %s14790_s30 }
 0x7b7   :  { %v835_v52 = vpop.permute.xlu1 %834 }
 0x7b8   :  { %837 = vst.msk [vmem:[#allocation3 + $0x18] sm:$0xff] %vm188_vm3, %v835_v52 }
 0x7bb   :  { %v841_v53 = vpop.permute.xlu1 %840 }
 0x7bc   :  { %843 = vst.msk [vmem:[#allocation3 + $0x30] sm:$0xff] %vm188_vm3, %v841_v53 }
 0x7bf   :  { %v847_v54 = vpop.permute.xlu1 %846  ;;  %v881_v56 = vld [vmem:[#allocation3 + $0x18] sm:$0xff] }
 0x7c0   :  { %849 = vst.msk [vmem:[#allocation3 + $0x48] sm:$0xff] %vm188_vm3, %v847_v54  ;;  %v8632_v57 = vpack.c.bf16 %v881_v56, %v880_v55 }
 0x7c2   :  { %8633 = vmatpush3.bf16.msra.mxu0 %v8632_v57 }
 0x7c3   :  { %v853_v58 = vpop.permute.xlu1 %852  ;;  %8634 = vmatprep.subr.bf16.mxu0 %v14720_v0  ;;  %v882_v60 = vld [vmem:[#allocation3 + $0x30] sm:$0xff] }
 0x7c4   :  { %855 = vst.msk [vmem:[#allocation3 + $0x60] sm:$0xff] %vm188_vm3, %v853_v58 }
 0x7c7   :  { %v859_v59 = vpop.permute.xlu1 %858  ;;  %v883_v61 = vld [vmem:[#allocation3 + $0x48] sm:$0xff] }
 0x7c8   :  { %861 = vst.msk [vmem:[#allocation3 + $0x78] sm:$0xff] %vm188_vm3, %v859_v59  ;;  %v8635_v62 = vpack.c.bf16 %v883_v61, %v882_v60  ;;  %v11720_v61 = vld [vmem:[%s14697_s9 + $0x4] ss:$12 sps:$4 sm:$0xff]  }
 0x7ca   :  { %8636 = vmatpush3.bf16.msra.mxu0 %v8635_v62  ;;  %v11725_v62 = vld [vmem:[%s14697_s9] ss:$12 sps:$4 sm:$0xff]  }
 0x7cb   :  { %v865_v63 = vpop.permute.xlu1 %864  ;;  %8637 = vmatprep.subr.bf16.mxu0 %v14720_v0  ;;  %v884_v8 = vld [vmem:[#allocation3 + $0x60] sm:$0xff] }
 0x7cc   :  { %867 = vst.msk [vmem:[#allocation3 + $0x90] sm:$0xff] %vm188_vm3, %v865_v63  ;;  %v11731_v63 = vld [vmem:[%s14697_s9 + $0x8] ss:$12 sps:$4 sm:$0xff]  }
 0x7cf   :  { %v871_v7 = vpop.permute.xlu1 %870  ;;  %v885_v9 = vld [vmem:[#allocation3 + $0x78] sm:$0xff] }
 0x7d0   :  { %873 = vst.msk [vmem:[#allocation3 + $0xa8] sm:$0xff] %vm188_vm3, %v871_v7  ;;  %v8638_v14 = vpack.c.bf16 %v885_v9, %v884_v8  ;;  %v11737_v7 = vld [vmem:[%s14697_s9 + $0x1c] ss:$12 sps:$4 sm:$0xff]   ;;  %v11742_v8 = vld [vmem:[%s14697_s9 + $0x18] ss:$12 sps:$4 sm:$0xff]  }
 0x7d1   :  { %v11748_v9 = vld [vmem:[%s14697_s9 + $0x20] ss:$12 sps:$4 sm:$0xff]  }
 0x7d2   :  { %8639 = vmatpush3.bf16.msra.mxu0 %v8638_v14 }
 0x7d3   :  { %v877_v16 = vpop.permute.xlu1 %876  ;;  %8640 = vmatprep.subr.bf16.mxu0 %v14720_v0  ;;  %v886_v17 = vld [vmem:[#allocation3 + $0x90] sm:$0xff] }
 0x7d4   :  { %879 = vst.msk [vmem:[#allocation3 + $0xc0] sm:$0xff] %vm188_vm3, %v877_v16 }
 0x7d7   :  { %v887_v19 = vld [vmem:[#allocation3 + $0xa8] sm:$0xff] }
 0x7d8   :  { %v8641_v20 = vpack.c.bf16 %v887_v19, %v886_v17 }
 0x7da   :  { %8642 = vmatpush3.bf16.msra.mxu0 %v8641_v20 }
 0x7db   :  { %8242 = vmatprep.subr.mxu0 %v11260_v2  ;;  %v888_v22 = vld [vmem:[#allocation3 + $0xc0] sm:$0xff] }
 0x7de   :  { %8243 = vmatpush3.msra.mxu0 %v888_v22 }
 0x7df   :  { %8245 = vmatmul.mubr.msk.f32.vlgmr.msra.gmra.mrb[6].mxu0 %vm247_vm7, %v11640_v21  ;;  %8659 = vmatprep.subr.bf16.mxu0 %v14720_v0 }
 0x7e0   :  { %8661 = vmatpush3.bf16.msra.mxu0 %v11395_v1  ;;  %8286 = vmatprep.mubr.msk.f32.mxu0 %vm11259_vm0, %v11260_v2  ;;  %v718_v1 = vmax.f32 %v717_v24, 0.0  ;;  %v1315_v24 = vld [vmem:[%s14699_s8] sm:$0xff] }
 0x7e1   :  { %8662 = vmatprep.subr.bf16.mxu0 %v14720_v0 }
 0x7e4   :  { %8664 = vmatpush3.bf16.msra.mxu0 %v11406_v3 }
 0x7e5   :  { %8665 = vmatprep.subr.bf16.mxu0 %v14720_v0 }
 0x7e8   :  { %8667 = vmatpush3.bf16.msra.mxu0 %v11415_v4 }
 0x7e9   :  { %8668 = vmatprep.subr.bf16.mxu0 %v14720_v0 }
 0x7ec   :  { %8670 = vmatpush3.bf16.msra.mxu0 %v11422_v5 }
 0x7ed   :  { %8683 = vmatprep.subr.bf16.mxu0 %v14720_v0 }
 0x7ef   :  { %8287 = vmatmul.mubr.msk.f32.vlgmr.msra.gmra.mrb[8].mxu0 %vm111_vm1, %v718_v1 }
 0x7f0   :  { %8685 = vmatpush3.bf16.msra.mxu0 %v11448_v10  ;;  %8330 = vmatprep.mubr.msk.f32.mxu0 %vm11259_vm0, %v11260_v2 }
 0x7f1   :  { %8686 = vmatprep.subr.bf16.mxu0 %v14720_v0 }
 0x7f4   :  { %8688 = vmatpush3.bf16.msra.mxu0 %v11455_v11 }
 0x7f5   :  { %8689 = vmatprep.subr.bf16.mxu0 %v14720_v0 }
 0x7f8   :  { %8691 = vmatpush3.bf16.msra.mxu0 %v11462_v12 }
 0x7f9   :  { %8692 = vmatprep.subr.bf16.mxu0 %v14720_v0 }
 0x7fc   :  { %8694 = vmatpush3.bf16.msra.mxu0 %v11469_v13 }
 0x7fd   :  { %8695 = vmatprep.subr.bf16.mxu0 %v14720_v0 }
 0x800   :  { %8698 = vmatpush3.bf16.msk.msra.mxu0 %vm11478_vm6, %v11619_v51 }
 0x801   :  { %8715 = vmatprep.subr.bf16.mxu0 %v14720_v0 }
 0x8b2   :  { %v958_v3 = vpop.f32.mrb[6].mxu0 }
 0x8b3   :  { %v8246_v4 = vpop.f32.mrb[7].mxu0  ;;  %8268 = vmatmul.mubr.msk.f32.vlgmr.msra.gmra.mrb[8].mxu1 %vm188_vm3, %v958_v3  ;;  %v11764_v3 = vld [vmem:[%s14697_s9 + $0x34] ss:$12 sps:$4 sm:$0xff]  }
 0x8b4   :  { %8307 = vmatprep.mubr.msk.f32.mxu1 %vm11259_vm0, %v11260_v2  ;;  %v11769_v4 = vld [vmem:[%s14697_s9 + $0x30] ss:$12 sps:$4 sm:$0xff]  }
 0x8c2   :  { %v1107_v5 = vpop.f32.mrb[8].mxu0 }
 0x8c3   :  { %1111 = vst.msk [vmem:[#allocation2] sm:$0xff] %vm185_vm2, %v1107_v5  ;;  %v8288_v10 = vpop.f32.mrb[9].mxu0  ;;  %v11774_v5 = vld [vmem:[%s14697_s9 + $0x38] ss:$12 sps:$4 sm:$0xff]   ;;  %vm1804_vm2 = vcmask 744448  }
 0x8ca   :  { %v1120_v11 = vld [vmem:[#allocation2] sm:$0xff] }
 0x8cb   :  { %1122 = vrot.lane.b32.xlu1 %v1120_v11, %s11264_s3  ;;  %1116 = vrot.lane.b32.xlu0 %v1120_v11, %s11262_s2  ;;  %1113 = vst.msk [vmem:[#allocation3] sm:$0xff] %vm188_vm3, %v1120_v11  ;;  %4644 = vst [vmem:[#allocation2] sm:$0xff] %v11260_v2 }
 0x8cf   :  { %1134 = vrot.lane.b32.xlu1 %v1120_v11, %s11263_s27  ;;  %1128 = vrot.lane.b32.xlu0 %v1120_v11, %s11261_s26 }
 0x8d2   :  { %v1162_v28 = vld [vmem:[#allocation3] sm:$0xff] }
 0x8d3   :  { %1146 = vrot.lane.b32.xlu1 %v1120_v11, %s11265_s28  ;;  %1140 = vrot.lane.b32.xlu0 %v1120_v11, %s11266_s29 }
 0x8d7   :  { %1158 = vrot.lane.b32.xlu1 %v1120_v11, %s14790_s30  ;;  %1152 = vrot.lane.b32.xlu0 %v1120_v11, %s14787_s24  ;;  %v11783_v11 = vld [vmem:[%s14697_s9 + $0x4c] ss:$12 sps:$4 sm:$0xff]   ;;  %s11273_s30 = smov 109  }
 0x93d   :  { %v1123_v12 = vpop.permute.xlu1 %1122  ;;  %v1117_v13 = vpop.permute.xlu0 %1116 }
 0x93e   :  { %1125 = vst.msk [vmem:[#allocation3 + $0x30] sm:$0xff] %vm188_vm3, %v1123_v12  ;;  %1119 = vst.msk [vmem:[#allocation3 + $0x18] sm:$0xff] %vm188_vm3, %v1117_v13  ;;  %v11788_v12 = vld [vmem:[%s14697_s9 + $0x48] ss:$12 sps:$4 sm:$0xff]   ;;  %v11793_v13 = vld [vmem:[%s14697_s9 + $0x50] ss:$12 sps:$4 sm:$0xff]  }
 0x93f   :  { %s11271_s9 = smov 110  }
 0x941   :  { %v1135_v18 = vpop.permute.xlu1 %1134  ;;  %v1129_v25 = vpop.permute.xlu0 %1128 }
 0x942   :  { %1137 = vst.msk [vmem:[#allocation3 + $0x60] sm:$0xff] %vm188_vm3, %v1135_v18  ;;  %1131 = vst.msk [vmem:[#allocation3 + $0x48] sm:$0xff] %vm188_vm3, %v1129_v25 }
 0x945   :  { %v1147_v26 = vpop.permute.xlu1 %1146  ;;  %v1141_v27 = vpop.permute.xlu0 %1140  ;;  %v1163_v29 = vld [vmem:[#allocation3 + $0x18] sm:$0xff]  ;;  %v1164_v33 = vld [vmem:[#allocation3 + $0x30] sm:$0xff] }
 0x946   :  { %1149 = vst.msk [vmem:[#allocation3 + $0x90] sm:$0xff] %vm188_vm3, %v1147_v26  ;;  %1143 = vst.msk [vmem:[#allocation3 + $0x78] sm:$0xff] %vm188_vm3, %v1141_v27  ;;  %v8672_v30 = vpack.c.bf16 %v1163_v29, %v1162_v28 }
 0x948   :  { %8673 = vmatpush3.bf16.msra.mxu1 %v8672_v30 }
 0x949   :  { %v1159_v31 = vpop.permute.xlu1 %1158  ;;  %v1153_v32 = vpop.permute.xlu0 %1152  ;;  %8674 = vmatprep.subr.bf16.mxu1 %v14720_v0  ;;  %v1165_v34 = vld [vmem:[#allocation3 + $0x48] sm:$0xff]  ;;  %v1166_v36 = vld [vmem:[#allocation3 + $0x60] sm:$0xff] }
 0x94a   :  { %1161 = vst.msk [vmem:[#allocation3 + $0xc0] sm:$0xff] %vm188_vm3, %v1159_v31  ;;  %1155 = vst.msk [vmem:[#allocation3 + $0xa8] sm:$0xff] %vm188_vm3, %v1153_v32  ;;  %v8675_v35 = vpack.c.bf16 %v1165_v34, %v1164_v33 }
 0x94c   :  { %8676 = vmatpush3.bf16.msra.mxu1 %v8675_v35 }
 0x94d   :  { %8677 = vmatprep.subr.bf16.mxu1 %v14720_v0  ;;  %v1167_v37 = vld [vmem:[#allocation3 + $0x78] sm:$0xff]  ;;  %v1168_v39 = vld [vmem:[#allocation3 + $0x90] sm:$0xff] }
 0x94e   :  { %v8678_v38 = vpack.c.bf16 %v1167_v37, %v1166_v36 }
 0x950   :  { %8679 = vmatpush3.bf16.msra.mxu1 %v8678_v38 }
 0x951   :  { %8680 = vmatprep.subr.bf16.mxu1 %v14720_v0  ;;  %v1169_v40 = vld [vmem:[#allocation3 + $0xa8] sm:$0xff]  ;;  %v1170_v42 = vld [vmem:[#allocation3 + $0xc0] sm:$0xff] }
 0x952   :  { %v8681_v41 = vpack.c.bf16 %v1169_v40, %v1168_v39 }
 0x954   :  { %8682 = vmatpush3.bf16.msra.mxu1 %v8681_v41 }
 0x955   :  { %8305 = vmatprep.subr.mxu1 %v11260_v2 }
 0x958   :  { %8306 = vmatpush3.msra.mxu1 %v1170_v42 }
 0x959   :  { %8308 = vmatmul.mubr.msk.f32.vlgmr.msra.gmra.mrb[10].mxu1 %vm247_vm7, %v11640_v21  ;;  %8700 = vmatprep.subr.bf16.mxu1 %v11720_v61  ;;  %v1314_v21 = vld [vmem:[%s14698_s7] sm:$0xff] }
 0x95a   :  { %1578 = vmatprep.mubr.f32.mxu1 %v11260_v2  ;;  %8702 = vmatpush1.bf16.msra.mxu1 %v11725_v62 }
 0x95b   :  { %8704 = vmatprep.subr.bf16.mxu1 %v11737_v7 }
 0x95e   :  { %8706 = vmatpush1.bf16.msra.mxu1 %v11742_v8 }
 0x95f   :  { %8708 = vmatprep.subr.bf16.mxu1 %v11764_v3 }
 0x962   :  { %8710 = vmatpush1.bf16.msra.mxu1 %v11769_v4 }
 0x963   :  { %8712 = vmatprep.subr.bf16.mxu1 %v11783_v11 }
 0x966   :  { %8714 = vmatpush1.bf16.msra.mxu1 %v11788_v12 }
 0x986   :  { %v11702_v43 = vpop.f32.mrb[8].mxu1 }
 0x987   :  { %v8269_v44 = vpop.f32.mrb[9].mxu1  ;;  %v1316_v45 = vsel %vm111_vm1, %v11702_v43, 0.0 }
 0x988   :  { %1317 = vadd.xlane.f32.xlu0 %v1316_v45 }
 0xa15   :  { %v1318_v51 = vpop.xlane.xlu0 %1317 }
 0xa2c   :  { %v1237_v46 = vpop.f32.mrb[10].mxu1 }
 0xa2d   :  { %v8309_v47 = vpop.f32.mrb[11].mxu1  ;;  %8331 = vmatmul.mubr.msk.f32.vlgmr.msra.gmra.mrb[10].mxu0 %vm188_vm3, %v1237_v46  ;;  %vm1825_vm3 = vcmask 736256  }
 0xa2e   :  { %8349 = vmatprep.mubr.msk.f32.mxu0 %vm11259_vm0, %v11260_v2  ;;  %8717 = vmatpush3.bf16.msra.mxu0 %v11731_v63 }
 0xa2f   :  { %8718 = vmatprep.subr.bf16.mxu0 %v14720_v0 }
 0xa32   :  { %8720 = vmatpush3.bf16.msra.mxu0 %v11748_v9 }
 0xa33   :  { %8721 = vmatprep.subr.bf16.mxu0 %v14720_v0 }
 0xa36   :  { %8723 = vmatpush3.bf16.msra.mxu0 %v11774_v5 }
 0xa37   :  { %8724 = vmatprep.subr.bf16.mxu0 %v14720_v0 }
 0xa3a   :  { %8726 = vmatpush3.bf16.msra.mxu0 %v11793_v13 }
 0xa3b   :  { %8743 = vmatprep.subr.bf16.mxu0 %v14720_v0 }
 0xb00   :  { %v11709_v48 = vpop.f32.mrb[10].mxu0 }
 0xb01   :  { %v8332_v49 = vpop.f32.mrb[11].mxu0  ;;  %v1320_v50 = vsel %vm111_vm1, %v11709_v48, 0.0 }
 0xb02   :  { %1321 = vadd.xlane.f32.xlu1 %v1320_v50 }
 0xb8f   :  { %v1322_v52 = vpop.xlane.xlu1 %1321 }
 0xb90   :  { %v1323_v53 = vadd.f32 %v1322_v52, %v1318_v51 }
 0xb92   :  { %v1324_v54 = vmul.f32 0.0078125, %v1323_v53 }
 0xb94   :  { %v1325_v55 = vsub.f32 %v11702_v43, %v1324_v54  ;;  %v1331_v56 = vsub.f32 %v11709_v48, %v1324_v54 }
 0xb96   :  { %v1326_v57 = vmul.f32 %v1325_v55, %v1325_v55  ;;  %v1332_v59 = vmul.f32 %v1331_v56, %v1331_v56 }
 0xb98   :  { %v1327_v58 = vsel %vm111_vm1, %v1326_v57, 0.0  ;;  %v1333_v60 = vsel %vm111_vm1, %v1332_v59, 0.0 }
 0xb99   :  { %1328 = vadd.xlane.f32.xlu0 %v1327_v58 }
 0xb9d   :  { %1334 = vadd.xlane.f32.xlu0 %v1333_v60 }
 0xc26   :  { %v1329_v14 = vpop.xlane.xlu0 %1328 }
 0xc2a   :  { %v1335_v16 = vpop.xlane.xlu0 %1334 }
 0xc2b   :  { %v1336_v17 = vadd.f32 %v1335_v16, %v1329_v14 }
 0xc2d   :  { %v1337_v19 = vmul.f32 0.0078125, %v1336_v17 }
 0xc2f   :  { %v1338_v20 = vadd.f32 1e-05, %v1337_v19  ;;  %v11894_v19 = vld [vmem:[#allocation2 + $0x8] sm:$0xff] }
 0xc31   :  { %11223 = vrsqrt.f32 %v1338_v20  ;;  %v11900_v20 = vld [vmem:[%s14701_s11] sm:$0xff] }
 0xc3b   :  { %v11224_v22 = vpop.eup %11223 }
 0xc3c   :  { %v1340_v23 = vmul.f32 %v11224_v22, %v1314_v21 }
 0xc3e   :  { %1345 = vperm.xlu1 %10793, %v1340_v23   ;;  %v1341_v1 = vmul.f32 %v1340_v23, %v1324_v54 }
 0xc40   :  { %v1342_v10 = vsub.f32 %v1315_v24, %v1341_v1 }
 0xc42   :  { %1351 = vperm.xlu0 %10794, %v1342_v10  }
 0xcbd   :  { %v11799_v18 = vpop.permute.xlu1 %1345 }
 0xcbe   :  { %v1348_v25 = vmul.f32 %v11799_v18, %v11702_v43  ;;  %v1356_v24 = vmul.f32 %v11799_v18, %v11709_v48 }
 0xcc1   :  { %v11803_v26 = vpop.permute.xlu0 %1351 }
 0xcc2   :  { %v1354_v27 = vadd.f32 %v11803_v26, %v1348_v25  ;;  %v1357_v1 = vadd.f32 %v1356_v24, %v11803_v26  ;;  %v12126_v24 = vld [vmem:[%s14700_s10 + $0xe4] ss:$8 sps:$4 sm:$0xff]  }
 0xcc4   :  { %v1355_v28 = vmax.f32 %v1354_v27, 0.0 }
 0xcc6   :  { %v1359_v29 = vadd.f32 %v1355_v28, %v11428_v6 }
 0xcc8   :  { %7532 = vmatmul.mubr.msk.f32.vlgmr.msra.gmra.mrb[12].mxu1 %vm111_vm1, %v1359_v29  ;;  %8350 = vmatmul.mubr.msk.f32.vlgmr.msra.gmra.mrb[12].mxu0 %vm111_vm1, %v1359_v29  ;;  %v1358_v29 = vmax.f32 %v1357_v1, 0.0  ;;  %v12131_v1 = vld [vmem:[%s14700_s10 + $0xe0] ss:$8 sps:$4 sm:$0xff]  }
 0xcc9   :  { %8370 = vmatprep.mubr.msk.f32.mxu0 %vm11259_vm0, %v11260_v2  ;;  %1928 = vmatprep.mubr.f32.mxu1 %v11260_v2 }
 0xd9b   :  { %v11812_v30 = vpop.f32.mrb[12].mxu1  ;;  %v1651_v31 = vpop.f32.mrb[12].mxu0 }
 0xd9c   :  { %1658 = vst.msk [vmem:[#allocation2 + $0x10] sm:$0xff] %vm1657_vm8, %v1651_v31  ;;  %v11815_v32 = vpop.f32.mrb[13].mxu1  ;;  %v8351_v33 = vpop.f32.mrb[13].mxu0 }
 0xda3   :  { %v1661_v6 = vld [vmem:[#allocation2 + $0x10] sm:$0xff] }
 0xda4   :  { %1665 = vst.msk [vmem:[#allocation3 + $0x10] sm:$0xff] %vm1664_vm9, %v1661_v6  ;;  %1718 = vrot.lane.b32.xlu0 %v1661_v6, %s11271_s9  ;;  %1676 = vrot.lane.b32.xlu1 %v1661_v6, %s11262_s2 }
 0xda8   :  { %1760 = vrot.lane.b32.xlu0 %v1661_v6, %s11265_s28  ;;  %1697 = vrot.lane.b32.xlu1 %v1661_v6, %s11264_s3 }
 0xdab   :  { %v1836_v39 = vld [vmem:[#allocation3 + $0x10] sm:$0xff] }
 0xdac   :  { %1802 = vrot.lane.b32.xlu0 %v1661_v6, %s11272_s5  ;;  %1739 = vrot.lane.b32.xlu1 %v1661_v6, %s11273_s30 }
 0xdb0   :  { %1693 = vrot.lane.b32.xlu0 %v11812_v30, %s11264_s3  ;;  %1781 = vrot.lane.b32.xlu1 %v1661_v6, %s11274_s4 }
 0xdb4   :  { %1735 = vrot.lane.b32.xlu0 %v11812_v30, %s11273_s30  ;;  %1823 = vrot.lane.b32.xlu1 %v1661_v6, %s11275_s6 }
 0xdb8   :  { %1674 = vrot.lane.b32.xlu0 %v11815_v32, %s11262_s2  ;;  %1672 = vrot.lane.b32.xlu1 %v11812_v30, %s11262_s2 }
 0xdbc   :  { %1695 = vrot.lane.b32.xlu0 %v11815_v32, %s11264_s3  ;;  %1714 = vrot.lane.b32.xlu1 %v11812_v30, %s11271_s9 }
 0xdc0   :  { %1737 = vrot.lane.b32.xlu0 %v11815_v32, %s11273_s30  ;;  %1756 = vrot.lane.b32.xlu1 %v11812_v30, %s11265_s28 }
 0xdc4   :  { %1779 = vrot.lane.b32.xlu0 %v11815_v32, %s11274_s4  ;;  %1716 = vrot.lane.b32.xlu1 %v11815_v32, %s11271_s9 }
 0xdc8   :  { %1777 = vrot.lane.b32.xlu0 %v11812_v30, %s11274_s4  ;;  %1758 = vrot.lane.b32.xlu1 %v11815_v32, %s11265_s28 }
 0xdcc   :  { %1821 = vrot.lane.b32.xlu0 %v11815_v32, %s11275_s6  ;;  %1800 = vrot.lane.b32.xlu1 %v11815_v32, %s11272_s5 }
 0xdd0   :  { %1798 = vrot.lane.b32.xlu1 %v11812_v30, %s11272_s5 }
 0xdd4   :  { %1819 = vrot.lane.b32.xlu1 %v11812_v30, %s11275_s6 }
 0xe16   :  { %v11858_v2 = vpop.permute.xlu0 %1718  ;;  %v1677_v34 = vpop.permute.xlu1 %1676 }
 0xe17   :  { %1728 = vst.msk [vmem:[#allocation3 + $0x58] sm:$0xff] %vm1664_vm9, %v11858_v2  ;;  %1686 = vst.msk [vmem:[#allocation3 + $0x28] sm:$0xff] %vm1664_vm9, %v1677_v34 }
 0xe1a   :  { %v11863_v35 = vpop.permute.xlu0 %1760  ;;  %v11865_v36 = vpop.permute.xlu1 %1697 }
 0xe1b   :  { %1770 = vst.msk [vmem:[#allocation3 + $0x88] sm:$0xff] %vm1664_vm9, %v11863_v35  ;;  %1707 = vst.msk [vmem:[#allocation3 + $0x40] sm:$0xff] %vm1664_vm9, %v11865_v36 }
 0xe1e   :  { %v11871_v37 = vpop.permute.xlu0 %1802  ;;  %v11873_v38 = vpop.permute.xlu1 %1739  ;;  %v1839_v40 = vld [vmem:[#allocation3 + $0x28] sm:$0xff]  ;;  %v1845_v45 = vld [vmem:[#allocation3 + $0x58] sm:$0xff] }
 0xe1f   :  { %1812 = vst.msk [vmem:[#allocation3 + $0xb8] sm:$0xff] %vm1664_vm9, %v11871_v37  ;;  %1749 = vst.msk [vmem:[#allocation3 + $0x70] sm:$0xff] %vm1664_vm9, %v11873_v38  ;;  %v8744_v41 = vpack.c.bf16 %v1839_v40, %v1836_v39 }
 0xe21   :  { %8745 = vmatpush3.bf16.msra.mxu0 %v8744_v41 }
 0xe22   :  { %v1694_v42 = vpop.permute.xlu0 %1693  ;;  %v11879_v43 = vpop.permute.xlu1 %1781  ;;  %8746 = vmatprep.subr.bf16.mxu0 %v14720_v0  ;;  %v1842_v44 = vld [vmem:[#allocation3 + $0x40] sm:$0xff]  ;;  %v1851_v51 = vld [vmem:[#allocation3 + $0x88] sm:$0xff] }
 0xe23   :  { %1791 = vst.msk [vmem:[#allocation3 + $0xa0] sm:$0xff] %vm1664_vm9, %v11879_v43  ;;  %v8747_v46 = vpack.c.bf16 %v1845_v45, %v1842_v44  ;;  %v11972_v44 = vld [vmem:[%s14700_s10 + $0x10] ss:$8 sps:$4 sm:$0xff]   ;;  %v11985_v45 = vld [vmem:[%s14700_s10 + $0x20] ss:$8 sps:$4 sm:$0xff]  }
 0xe25   :  { %8748 = vmatpush3.bf16.msra.mxu0 %v8747_v46  ;;  %v11992_v46 = vld [vmem:[%s14700_s10 + $0x34] ss:$8 sps:$4 sm:$0xff]  }
 0xe26   :  { %v1736_v47 = vpop.permute.xlu0 %1735  ;;  %v11884_v49 = vpop.permute.xlu1 %1823  ;;  %8749 = vmatprep.subr.bf16.mxu0 %v14720_v0  ;;  %v1848_v50 = vld [vmem:[#allocation3 + $0x70] sm:$0xff]  ;;  %v1857_v56 = vld [vmem:[#allocation3 + $0xb8] sm:$0xff] }
 0xe27   :  { %1833 = vst.msk [vmem:[#allocation3 + $0xd0] sm:$0xff] %vm1664_vm9, %v11884_v49  ;;  %v8750_v52 = vpack.c.bf16 %v1851_v51, %v1848_v50  ;;  %v12017_v50 = vld [vmem:[%s14700_s10 + $0x54] ss:$8 sps:$4 sm:$0xff]   ;;  %v12023_v51 = vld [vmem:[%s14700_s10 + $0x50] ss:$8 sps:$4 sm:$0xff]  }
 0xe29   :  { %8751 = vmatpush3.bf16.msra.mxu0 %v8750_v52  ;;  %v12029_v52 = vld [vmem:[%s14700_s10 + $0x64] ss:$8 sps:$4 sm:$0xff]  }
 0xe2a   :  { %v1675_v53 = vpop.permute.xlu0 %1674  ;;  %v1673_v54 = vpop.permute.xlu1 %1672  ;;  %8752 = vmatprep.subr.bf16.mxu0 %v14720_v0  ;;  %v1854_v55 = vld [vmem:[#allocation3 + $0xa0] sm:$0xff] }
 0xe2b   :  { %v1680_v57 = vsel %vm1678_vm10, %v1675_v53, %v1677_v34  ;;  %v1679_v58 = vsel %vm1678_vm10, %v1673_v54, %v1675_v53  ;;  %v8753_v59 = vpack.c.bf16 %v1857_v56, %v1854_v55  ;;  %v12035_v53 = vld [vmem:[%s14700_s10 + $0x60] ss:$8 sps:$4 sm:$0xff]   ;;  %v12042_v54 = vld [vmem:[%s14700_s10 + $0x74] ss:$8 sps:$4 sm:$0xff]   ;;  %v12047_v55 = vld [vmem:[%s14700_s10 + $0x70] ss:$8 sps:$4 sm:$0xff]  }
 0xe2c   :  { %v8727_v60 = vpack.c.bf16 %v1680_v57, %v11815_v32  ;;  %v8729_v14 = vpack.c.bf16 %v1679_v58, %v11812_v30  ;;  %v12054_v56 = vld [vmem:[%s14700_s10 + $0x84] ss:$8 sps:$4 sm:$0xff]   ;;  %v12059_v57 = vld [vmem:[%s14700_s10 + $0x80] ss:$8 sps:$4 sm:$0xff]   ;;  %v12066_v58 = vld [vmem:[%s14700_s10 + $0x94] ss:$8 sps:$4 sm:$0xff]  }
 0xe2d   :  { %8754 = vmatpush3.bf16.msra.mxu0 %v8753_v59  ;;  %v12071_v59 = vld [vmem:[%s14700_s10 + $0x90] ss:$8 sps:$4 sm:$0xff]  }
 0xe2e   :  { %v1696_v16 = vpop.permute.xlu0 %1695  ;;  %v1715_v17 = vpop.permute.xlu1 %1714  ;;  %8368 = vmatprep.subr.mxu0 %v11894_v19  ;;  %8728 = vmatprep.subr.bf16.mxu1 %v8727_v60  ;;  %v1860_v21 = vld [vmem:[#allocation3 + $0xd0] sm:$0xff] }
 0xe2f   :  { %8730 = vmatpush1.bf16.msra.mxu1 %v8729_v14  ;;  %v1700_v25 = vsel %vm1699_vm11, %v1694_v42, %v1696_v16  ;;  %v12078_v60 = vld [vmem:[%s14700_s10 + $0xa4] ss:$8 sps:$4 sm:$0xff]   ;;  %v12083_v14 = vld [vmem:[%s14700_s10 + $0xa0] ss:$8 sps:$4 sm:$0xff]  }
 0xe31   :  { %8369 = vmatpush3.msra.mxu0 %v1860_v21  ;;  %v12107_v21 = vld [vmem:[%s14700_s10 + $0xc0] ss:$8 sps:$4 sm:$0xff]  }
 0xe32   :  { %v1738_v22 = vpop.permute.xlu0 %1737  ;;  %v1757_v23 = vpop.permute.xlu1 %1756  ;;  %8371 = vmatmul.mubr.msk.f32.vlgmr.msra.gmra.mrb[14].mxu0 %vm247_vm7, %v11900_v20  ;;  %8830 = vmatprep.subr.bf16.mxu0 %v11720_v61  ;;  %v1701_v61 = vsel %vm1699_vm11, %v1696_v16, %v11865_v36  ;;  %v12088_v16 = vld [vmem:[%s14700_s10 + $0xb4] ss:$8 sps:$4 sm:$0xff]  }
 0xe33   :  { %8832 = vmatpush1.bf16.msra.mxu0 %v11725_v62  ;;  %2228 = vmatprep.mubr.f32.mxu0 %v11894_v19  ;;  %v1742_v18 = vsel %vm1741_vm13, %v1736_v47, %v1738_v22  ;;  %v1743_v30 = vsel %vm1741_vm13, %v1738_v22, %v11873_v38  ;;  %v12005_v47 = vld [vmem:[%s14700_s10 + $0x44] ss:$8 sps:$4 sm:$0xff]   ;;  %v12114_v22 = vld [vmem:[%s14700_s10 + $0xd4] ss:$8 sps:$4 sm:$0xff]  }
 0xe34   :  { %8834 = vmatprep.subr.bf16.mxu0 %v11737_v7 }
 0xe36   :  { %v1717_v10 = vpop.permute.xlu1 %1716  ;;  %v1780_v27 = vpop.permute.xlu0 %1779 }
 0xe37   :  { %v1721_v62 = vsel %vm1720_vm12, %v1715_v17, %v1717_v10  ;;  %v1722_v28 = vsel %vm1720_vm12, %v1717_v10, %v11858_v2  ;;  %8836 = vmatpush1.bf16.msra.mxu0 %v11742_v8  ;;  %v1785_v2 = vsel %vm1783_vm15, %v1780_v27, %v11879_v43  ;;  %v11956_v43 = vld [vmem:[%s14700_s10] ss:$8 sps:$4 sm:$0xff]   ;;  %v12095_v17 = vld [vmem:[%s14700_s10 + $0xb0] ss:$8 sps:$4 sm:$0xff]   ;;  %v12138_v10 = vld [vmem:[%s14700_s10 + $0xf4] ss:$8 sps:$4 sm:$0xff]  }
 0xe38   :  { %8838 = vmatprep.subr.bf16.mxu0 %v11764_v3  ;;  %v8731_v48 = vpack.c.bf16 %v1722_v28, %v1701_v61  ;;  %v8733_v7 = vpack.c.bf16 %v1721_v62, %v1700_v25  ;;  %v12143_v25 = vld [vmem:[%s14700_s10 + $0xf0] ss:$8 sps:$4 sm:$0xff]   ;;  %v12150_v61 = vld [vmem:[%s14700_s10 + $0x104] ss:$8 sps:$4 sm:$0xff]  }
 0xe3a   :  { %v1759_v26 = vpop.permute.xlu1 %1758  ;;  %8732 = vmatprep.subr.bf16.mxu1 %v8731_v48  ;;  %v1778_v33 = vpop.permute.xlu0 %1777 }
 0xe3b   :  { %v1763_v31 = vsel %vm1762_vm14, %v1757_v23, %v1759_v26  ;;  %v1764_v32 = vsel %vm1762_vm14, %v1759_v26, %v11863_v35  ;;  %8840 = vmatpush1.bf16.msra.mxu0 %v11769_v4  ;;  %8734 = vmatpush1.bf16.msra.mxu1 %v8733_v7  ;;  %v11230_v4 = vld [vmem:[%s14781_s25 + $0x8] sm:$0xff]  ;;  %v1784_v38 = vsel %vm1783_vm15, %v1778_v33, %v1780_v27  ;;  %v12119_v23 = vld [vmem:[%s14700_s10 + $0xd0] ss:$8 sps:$4 sm:$0xff]  }
 0xe3c   :  { %8842 = vmatprep.subr.bf16.mxu0 %v11783_v11  ;;  %v8735_v8 = vpack.c.bf16 %v1764_v32, %v1743_v30  ;;  %v8737_v3 = vpack.c.bf16 %v1763_v31, %v1742_v18  ;;  %v1360_v35 = vadd.f32 %v11230_v4, %v1358_v29  ;;  %v12172_v18 = vld [vmem:[%s14700_s10 + $0x100] ss:$8 sps:$4 sm:$0xff]   ;;  %v12177_v29 = vld [vmem:[%s14700_s10 + $0x114] ss:$8 sps:$4 sm:$0x7f]  }
 0xe3d   :  { %v12185_v30 = vld [vmem:[%s14700_s10 + $0x110] ss:$8 sps:$4 sm:$0x7f]   ;;  %v10870_v33 = vld [vmem:[%s14702_s13 + $0x1c] ss:$12 sps:$4 sm:$0xff]  }
 0xe3e   :  { %v1801_v6 = vpop.permute.xlu1 %1800  ;;  %8736 = vmatprep.subr.bf16.mxu1 %v8735_v8  ;;  %v1822_v39 = vpop.permute.xlu0 %1821  ;;  %v10875_v4 = vld [vmem:[%s14702_s13 + $0x30] ss:$12 sps:$4 sm:$0xff]  }
 0xe3f   :  { %v1806_v34 = vsel %vm1804_vm2, %v1801_v6, %v11871_v37  ;;  %8844 = vmatpush1.bf16.msra.mxu0 %v11788_v12  ;;  %8738 = vmatpush1.bf16.msra.mxu1 %v8737_v3  ;;  %v1827_v40 = vsel %vm1825_vm3, %v1822_v39, %v11884_v49  ;;  %v12011_v49 = vld [vmem:[%s14700_s10 + $0x40] ss:$8 sps:$4 sm:$0xff]  }
 0xe40   :  { %8845 = vmatprep.subr.bf16.mxu0 %v14720_v0  ;;  %v8739_v11 = vpack.c.bf16 %v1806_v34, %v1785_v2  ;;  %v10869_v3 = vld [vmem:[%s14702_s13] ss:$12 sps:$4 sm:$0xff]  }
 0xe41   :  { %v10873_v2 = vld [vmem:[%s14702_s13 + $0x34] ss:$12 sps:$4 sm:$0xff]  }
 0xe42   :  { %v1799_v36 = vpop.permute.xlu1 %1798  ;;  %7539 = vmatmul.mubr.msk.f32.vlgmr.msra.gmra.mrb[16].mxu0 %vm111_vm1, %v1360_v35  ;;  %8740 = vmatprep.subr.bf16.mxu1 %v8739_v11  ;;  %v1510_v34 = vld [vmem:[%s14703_s12] sm:$0xff]  ;;  %v10878_v11 = vld [vmem:[%s14702_s13 + $0x48] ss:$12 sps:$4 sm:$0xff]  }
 0xe43   :  { %v1805_v37 = vsel %vm1804_vm2, %v1799_v36, %v1801_v6  ;;  %8847 = vmatpush3.bf16.msra.mxu0 %v11731_v63  ;;  %8389 = vmatprep.mubr.msk.f32.mxu0 %vm11259_vm0, %v11894_v19  ;;  %v11950_v63 = vld [vmem:[%s14700_s10 + $0x4] ss:$8 sps:$4 sm:$0xff]  }
 0xe44   :  { %8848 = vmatprep.subr.bf16.mxu0 %v14720_v0  ;;  %v8741_v12 = vpack.c.bf16 %v1805_v37, %v1784_v38  ;;  %v10872_v6 = vld [vmem:[%s14702_s13 + $0x18] ss:$12 sps:$4 sm:$0xff]   ;;  %v10881_v38 = vld [vmem:[%s14702_s13 + $0x60] ss:$12 sps:$4 sm:$0xff]  }
 0xe45   :  { %v10879_v36 = vld [vmem:[%s14702_s13 + $0x64] ss:$12 sps:$4 sm:$0xff]  }
 0xe46   :  { %v1820_v41 = vpop.permute.xlu1 %1819  ;;  %8742 = vmatpush1.bf16.msra.mxu1 %v8741_v12  ;;  %v10884_v37 = vld [vmem:[%s14702_s13 + $0x78] ss:$12 sps:$4 sm:$0xff]   ;;  %v10885_v12 = vld [vmem:[%s14702_s13 + $0x94] ss:$12 sps:$4 sm:$0xff]  }
 0xe47   :  { %8850 = vmatpush3.bf16.msra.mxu0 %v11748_v9  ;;  %1880 = vmatprep.subr.mxu1 %v1827_v40  ;;  %v1826_v42 = vsel %vm1825_vm3, %v1820_v41, %v1822_v39  ;;  %v11961_v9 = vld [vmem:[%s14700_s10 + $0x14] ss:$8 sps:$4 sm:$0xff]   ;;  %v10888_v41 = vld [vmem:[%s14702_s13 + $0xac] ss:$12 sps:$4 sm:$0xff]  }
 0xe48   :  { %8851 = vmatprep.subr.bf16.mxu0 %v14720_v0  ;;  %v10882_v39 = vld [vmem:[%s14702_s13 + $0x7c] ss:$12 sps:$4 sm:$0xff]  }
 0xe49   :  { %v10887_v40 = vld [vmem:[%s14702_s13 + $0x90] ss:$12 sps:$4 sm:$0xff]  }
 0xe4a   :  { %1881 = vmatpush1.msra.mxu1 %v1826_v42  ;;  %v10890_v42 = vld [vmem:[%s14702_s13 + $0xa8] ss:$12 sps:$4 sm:$0xff]  }
 0xe4b   :  { %8853 = vmatpush3.bf16.msra.mxu0 %v11774_v5  ;;  %7534 = vmatmul.mubr.msk.f32.vlgmr.msra.gmra.mrb[14].mxu1 %vm247_vm7, %v11900_v20  ;;  %v11978_v5 = vld [vmem:[%s14700_s10 + $0x24] ss:$8 sps:$4 sm:$0xff]  }
 0xe4c   :  { %8854 = vmatprep.subr.bf16.mxu0 %v14720_v0  ;;  %8756 = vmatprep.subr.bf16.mxu1 %v11950_v63  ;;  %v12102_v20 = vld [vmem:[%s14700_s10 + $0xc4] ss:$8 sps:$4 sm:$0xff]  }
 0xe4d   :  { %8758 = vmatpush1.bf16.msra.mxu1 %v11956_v43 }
 0xe4e   :  { %8760 = vmatprep.subr.bf16.mxu1 %v11961_v9 }
 0xe4f   :  { %8856 = vmatpush3.bf16.msra.mxu0 %v11793_v13  ;;  %v11999_v13 = vld [vmem:[%s14700_s10 + $0x30] ss:$8 sps:$4 sm:$0xff]  }
 0xe51   :  { %8762 = vmatpush1.bf16.msra.mxu1 %v11972_v44 }
 0xe52   :  { %8390 = vmatmul.mubr.msk.f32.vlgmr.msra.gmra.mrb[18].mxu0 %vm111_vm1, %v1360_v35  ;;  %8764 = vmatprep.subr.bf16.mxu1 %v11978_v5  ;;  %v10876_v35 = vld [vmem:[%s14702_s13 + $0x4c] ss:$12 sps:$4 sm:$0xff]   ;;  %vm4313_vm1 = vcmask 1043456  }
 0xe53   :  { %2565 = vmatprep.mubr.f32.mxu0 %v11894_v19 }
 0xe55   :  { %8766 = vmatpush1.bf16.msra.mxu1 %v11985_v45 }
 0xe56   :  { %8768 = vmatprep.subr.bf16.mxu1 %v11992_v46 }
 0xe59   :  { %8770 = vmatpush1.bf16.msra.mxu1 %v11999_v13 }
 0xe5a   :  { %8772 = vmatprep.subr.bf16.mxu1 %v12005_v47 }
 0xe5d   :  { %8774 = vmatpush1.bf16.msra.mxu1 %v12011_v49 }
 0xe5e   :  { %8776 = vmatprep.subr.bf16.mxu1 %v12017_v50 }
 0xe61   :  { %8778 = vmatpush1.bf16.msra.mxu1 %v12023_v51 }
 0xe62   :  { %8780 = vmatprep.subr.bf16.mxu1 %v12029_v52 }
 0xe65   :  { %8782 = vmatpush1.bf16.msra.mxu1 %v12035_v53 }
 0xe66   :  { %8784 = vmatprep.subr.bf16.mxu1 %v12042_v54 }
 0xe69   :  { %8786 = vmatpush1.bf16.msra.mxu1 %v12047_v55 }
 0xe6a   :  { %8788 = vmatprep.subr.bf16.mxu1 %v12054_v56 }
 0xe6d   :  { %8790 = vmatpush1.bf16.msra.mxu1 %v12059_v57 }
 0xe6e   :  { %8792 = vmatprep.subr.bf16.mxu1 %v12066_v58 }
 0xe71   :  { %8794 = vmatpush1.bf16.msra.mxu1 %v12071_v59 }
 0xe72   :  { %8796 = vmatprep.subr.bf16.mxu1 %v12078_v60 }
 0xe75   :  { %8798 = vmatpush1.bf16.msra.mxu1 %v12083_v14 }
 0xe76   :  { %8800 = vmatprep.subr.bf16.mxu1 %v12088_v16 }
 0xe79   :  { %8802 = vmatpush1.bf16.msra.mxu1 %v12095_v17 }
 0xe7a   :  { %8804 = vmatprep.subr.bf16.mxu1 %v12102_v20 }
 0xe7d   :  { %8806 = vmatpush1.bf16.msra.mxu1 %v12107_v21 }
 0xe7e   :  { %8808 = vmatprep.subr.bf16.mxu1 %v12114_v22 }
 0xe81   :  { %8810 = vmatpush1.bf16.msra.mxu1 %v12119_v23 }
 0xe82   :  { %8812 = vmatprep.subr.bf16.mxu1 %v12126_v24 }
 0xe85   :  { %8814 = vmatpush1.bf16.msra.mxu1 %v12131_v1 }
 0xe86   :  { %8816 = vmatprep.subr.bf16.mxu1 %v12138_v10 }
 0xe89   :  { %8818 = vmatpush1.bf16.msra.mxu1 %v12143_v25 }
 0xe8a   :  { %8820 = vmatprep.subr.bf16.mxu1 %v12150_v61 }
 0xf05   :  { %v2001_v27 = vpop.f32.mrb[14].mxu0 }
 0xf06   :  { %v8372_v62 = vpop.f32.mrb[15].mxu0 }
 0xf07   :  { %v10893_v62 = vld [vmem:[%s14702_s13 + $0xc0] ss:$12 sps:$4 sm:$0xff]  }
 0xf15   :  { %v12153_v28 = vpop.f32.mrb[16].mxu0 }
 0xf16   :  { %v12155_v48 = vpop.f32.mrb[17].mxu0  ;;  %2340 = vrot.lane.b32.xlu1 %v12153_v28, %s11264_s3  ;;  %2320 = vrot.lane.b32.xlu0 %v12153_v28, %s11262_s2 }
 0xf1a   :  { %2380 = vrot.lane.b32.xlu1 %v12153_v28, %s11273_s30  ;;  %2360 = vrot.lane.b32.xlu0 %v12153_v28, %s11271_s9 }
 0xf1e   :  { %v1930_v7 = vpop.f32.mrb[14].mxu1  ;;  %2400 = vrot.lane.b32.xlu0 %v12153_v28, %s11265_s28  ;;  %2342 = vrot.lane.b32.xlu1 %v12155_v48, %s11264_s3 }
 0xf1f   :  { %v1932_v26 = vpop.f32.mrb[15].mxu1 }
 0xf20   :  { %2083 = vmatprep.mubr.f32.mxu1 %v1932_v26  ;;  %v10896_v26 = vld [vmem:[%s14702_s13 + $0xd8] ss:$12 sps:$4 sm:$0xff]  }
 0xf21   :  { %2084 = vmatmul.mubr.f32.vlgmr.msra.gmra.mrb[16].mxu1 %v1930_v7  ;;  %v10894_v7 = vld [vmem:[%s14702_s13 + $0xdc] ss:$12 sps:$4 sm:$0xff]  }
 0xf22   :  { %8822 = vmatpush1.bf16.msra.mxu1 %v12172_v18  ;;  %2362 = vrot.lane.b32.xlu1 %v12155_v48, %s11271_s9 }
 0xf23   :  { %2322 = vrot.lane.b32.xlu0 %v12155_v48, %s11262_s2  ;;  %8825 = vmatprep.subr.msk.bf16.mxu1 %vm11478_vm6, %v12177_v29 }
 0xf24   :  { %2154 = vmatprep.mubr.f32.mxu1 %v11894_v19  ;;  %v10867_v19 = vld [vmem:[%s14702_s13 + $0x4] ss:$12 sps:$4 sm:$0xff]  }
 0xf25   :  { %v2301_v31 = vpop.f32.mrb[18].mxu0 }
 0xf26   :  { %2307 = vst.msk [vmem:[#allocation2 + $0x10] sm:$0xff] %vm1657_vm8, %v2301_v31  ;;  %v8391_v32 = vpop.f32.mrb[19].mxu0  ;;  %8828 = vmatpush1.bf16.msk.msra.mxu1 %vm11478_vm6, %v12185_v30  ;;  %2382 = vrot.lane.b32.xlu1 %v12155_v48, %s11273_s30  ;;  %v10897_v31 = vld [vmem:[%s14702_s13 + $0xf4] ss:$12 sps:$4 sm:$0xff]  }
 0xf27   :  { %8960 = vmatprep.subr.bf16.mxu1 %v10867_v19  ;;  %v10899_v32 = vld [vmem:[%s14702_s13 + $0xf0] ss:$12 sps:$4 sm:$0xff]   ;;  %v10902_v19 = vld [vmem:[%s14702_s13 + $0x108] ss:$12 sps:$4 sm:$0xff]  }
 0xf29   :  { %7538 = vmatmul.mubr.msk.f32.vlgmr.msra.gmra.mrb[16].mxu1 %vm1664_vm9, %v2001_v27  ;;  %v10891_v27 = vld [vmem:[%s14702_s13 + $0xc4] ss:$12 sps:$4 sm:$0xff]  }
 0xf2a   :  { %2402 = vrot.lane.b32.xlu1 %v12155_v48, %s11265_s28  ;;  %8962 = vmatpush1.bf16.msra.mxu1 %v10869_v3  ;;  %v12301_v3 = vld [vmem:[%s14702_s13 + $0x124] ss:$12 sps:$4 sm:$0xff]  }
 0xf2b   :  { %8964 = vmatprep.subr.bf16.mxu1 %v10870_v33  ;;  %v12306_v33 = vld [vmem:[%s14702_s13 + $0x120] ss:$12 sps:$4 sm:$0xff]  }
 0xf2d   :  { %v2336_v8 = vld [vmem:[#allocation2 + $0x10] sm:$0xff] }
 0xf2e   :  { %2344 = vrot.lane.b32.xlu0 %v2336_v8, %s11264_s3  ;;  %2324 = vrot.lane.b32.xlu1 %v2336_v8, %s11262_s2  ;;  %2313 = vst.msk [vmem:[#allocation3 + $0x10] sm:$0xff] %vm1664_vm9, %v2336_v8 }
 0xf2f   :  { %8966 = vmatpush1.bf16.msra.mxu1 %v10872_v6  ;;  %v12311_v6 = vld [vmem:[%s14702_s13 + $0x13c] ss:$12 sps:$4 sm:$0xff]  }
 0xf30   :  { %8968 = vmatprep.subr.bf16.mxu1 %v10873_v2  ;;  %v12317_v2 = vld [vmem:[%s14702_s13 + $0x138] ss:$12 sps:$4 sm:$0xff]  }
 0xf31   :  { %14792 = vst [vmem:[#allocation5_spill] sm:$0xff] %v12317_v2 }
 0xf32   :  { %2364 = vrot.lane.b32.xlu0 %v2336_v8, %s11271_s9  ;;  %2422 = vrot.lane.b32.xlu1 %v12155_v48, %s11274_s4 }
 0xf33   :  { %8970 = vmatpush1.bf16.msra.mxu1 %v10875_v4  ;;  %v12329_v4 = vld [vmem:[%s14702_s13 + $0x150] ss:$12 sps:$4 sm:$0xff]  }
 0xf34   :  { %8972 = vmatprep.subr.bf16.mxu1 %v10876_v35  ;;  %14794 = vst [vmem:[#allocation7_spill] sm:$0xff] %v12329_v4  ;;  %v12337_v35 = vld [vmem:[%s14702_s13 + $0x16c] ss:$12 sps:$4 sm:$0xff]  }
 0xf35   :  { %14795 = vst [vmem:[#allocation8_spill] sm:$0xff] %v12337_v35 }
 0xf36   :  { %2384 = vrot.lane.b32.xlu0 %v2336_v8, %s11273_s30  ;;  %2442 = vrot.lane.b32.xlu1 %v12155_v48, %s11272_s5 }
 0xf37   :  { %8974 = vmatpush1.bf16.msra.mxu1 %v10878_v11  ;;  %v12342_v11 = vld [vmem:[%s14702_s13 + $0x168] ss:$12 sps:$4 sm:$0xff]  }
 0xf38   :  { %8976 = vmatprep.subr.bf16.mxu1 %v10879_v36  ;;  %14796 = vst [vmem:[#allocation9_spill] sm:$0xff] %v12342_v11 }
 0xf3a   :  { %2404 = vrot.lane.b32.xlu0 %v2336_v8, %s11265_s28  ;;  %2420 = vrot.lane.b32.xlu1 %v12153_v28, %s11274_s4 }
 0xf3b   :  { %8978 = vmatpush1.bf16.msra.mxu1 %v10881_v38 }
 0xf3c   :  { %8980 = vmatprep.subr.bf16.mxu1 %v10882_v39 }
 0xf3e   :  { %2424 = vrot.lane.b32.xlu0 %v2336_v8, %s11274_s4  ;;  %2462 = vrot.lane.b32.xlu1 %v12155_v48, %s11275_s6 }
 0xf3f   :  { %8982 = vmatpush1.bf16.msra.mxu1 %v10884_v37 }
 0xf40   :  { %8984 = vmatprep.subr.bf16.mxu1 %v10885_v12 }
 0xf42   :  { %2444 = vrot.lane.b32.xlu0 %v2336_v8, %s11272_s5  ;;  %2460 = vrot.lane.b32.xlu1 %v12153_v28, %s11275_s6 }
 0xf43   :  { %8986 = vmatpush1.bf16.msra.mxu1 %v10887_v40 }
 0xf44   :  { %8988 = vmatprep.subr.bf16.mxu1 %v10888_v41 }
 0xf46   :  { %2440 = vrot.lane.b32.xlu0 %v12153_v28, %s11272_s5 }
 0xf47   :  { %8990 = vmatpush1.bf16.msra.mxu1 %v10890_v42 }
 0xf48   :  { %8992 = vmatprep.subr.bf16.mxu1 %v10891_v27 }
 0xf4a   :  { %2464 = vrot.lane.b32.xlu0 %v2336_v8, %s11275_s6  ;;  %v10900_v8 = vld [vmem:[%s14702_s13 + $0x10c] ss:$12 sps:$4 sm:$0xff]  }
 0xf4b   :  { %8994 = vmatpush1.bf16.msra.mxu1 %v10893_v62 }
 0xf4c   :  { %8996 = vmatprep.subr.bf16.mxu1 %v10894_v7 }
 0xf4e   :  { %2007 = vperm.xlu0 %10794, %v1510_v34   ;;  %v12322_v34 = vld [vmem:[%s14702_s13 + $0x154] ss:$12 sps:$4 sm:$0xff]  }
 0xf4f   :  { %8998 = vmatpush1.bf16.msra.mxu1 %v10896_v26  ;;  %14793 = vst [vmem:[#allocation6_spill] sm:$0xff] %v12322_v34 }
 0xf50   :  { %9000 = vmatprep.subr.bf16.mxu1 %v10897_v31 }
 0xf53   :  { %9002 = vmatpush1.bf16.msra.mxu1 %v10899_v32 }
 0xf54   :  { %9004 = vmatprep.subr.bf16.mxu1 %v10900_v8 }
 0xf57   :  { %9006 = vmatpush1.bf16.msra.mxu1 %v10902_v19 }
 0xf58   :  { %9008 = vmatprep.subr.bf16.mxu1 %v12301_v3 }
 0xf5b   :  { %9010 = vmatpush1.bf16.msra.mxu1 %v12306_v33 }
 0xf5c   :  { %9012 = vmatprep.subr.bf16.mxu1 %v12311_v6 }
 0xf5f   :  { %9014 = vmatpush1.bf16.msra.mxu1 %v12317_v2 }
 0xf60   :  { %9016 = vmatprep.subr.bf16.mxu1 %v12322_v34 }
 0xf63   :  { %9018 = vmatpush1.bf16.msra.mxu1 %v12329_v4 }
 0xf64   :  { %9020 = vmatprep.subr.bf16.mxu1 %v12337_v35 }
 0xf67   :  { %9022 = vmatpush1.bf16.msra.mxu1 %v12342_v11 }
 0xf88   :  { %v2341_v36 = vpop.permute.xlu1 %2340  ;;  %v2321_v38 = vpop.permute.xlu0 %2320 }
 0xf8c   :  { %v2381_v39 = vpop.permute.xlu1 %2380  ;;  %v2361_v37 = vpop.permute.xlu0 %2360 }
 0xf90   :  { %v2343_v12 = vpop.permute.xlu1 %2342  ;;  %v2401_v41 = vpop.permute.xlu0 %2400 }
 0xf94   :  { %v2363_v40 = vpop.permute.xlu1 %2362 }
 0xf95   :  { %v2323_v27 = vpop.permute.xlu0 %2322  ;;  %v2366_v0 = vsel %vm1720_vm12, %v2361_v37, %v2363_v40 }
 0xf96   :  { %v2326_v7 = vsel %vm1678_vm10, %v2321_v38, %v2323_v27 }
 0xf97   :  { %v8859_v19 = vpack.c.bf16 %v2326_v7, %v12153_v28 }
 0xf98   :  { %v2383_v42 = vpop.permute.xlu1 %2382 }
 0xf9c   :  { %v2403_v62 = vpop.permute.xlu1 %2402 }
 0xfa0   :  { %v2345_v26 = vpop.permute.xlu0 %2344  ;;  %v2325_v31 = vpop.permute.xlu1 %2324 }
 0xfa1   :  { %2353 = vst.msk [vmem:[#allocation3 + $0x40] sm:$0xff] %vm1664_vm9, %v2345_v26  ;;  %v2327_v32 = vsel %vm1678_vm10, %v2323_v27, %v2325_v31  ;;  %2333 = vst.msk [vmem:[#allocation3 + $0x28] sm:$0xff] %vm1664_vm9, %v2325_v31  ;;  %v2347_v4 = vsel %vm1699_vm11, %v2343_v12, %v2345_v26  ;;  %v2346_v27 = vsel %vm1699_vm11, %v2341_v36, %v2343_v12 }
 0xfa2   :  { %v8857_v8 = vpack.c.bf16 %v2327_v32, %v12155_v48  ;;  %v8863_v31 = vpack.c.bf16 %v2366_v0, %v2346_v27  ;;  %v2406_v48 = vsel %vm1762_vm14, %v2401_v41, %v2403_v62 }
 0xfa4   :  { %v2365_v11 = vpop.permute.xlu0 %2364  ;;  %v2423_v35 = vpop.permute.xlu1 %2422  ;;  %8858 = vmatprep.subr.bf16.mxu0 %v8857_v8 }
 0xfa5   :  { %v2367_v38 = vsel %vm1720_vm12, %v2363_v40, %v2365_v11  ;;  %2373 = vst.msk [vmem:[#allocation3 + $0x58] sm:$0xff] %vm1664_vm9, %v2365_v11  ;;  %8860 = vmatpush1.bf16.msra.mxu0 %v8859_v19  ;;  %v2386_v11 = vsel %vm1741_vm13, %v2381_v39, %v2383_v42 }
 0xfa6   :  { %v8861_v34 = vpack.c.bf16 %v2367_v38, %v2347_v4  ;;  %v8867_v4 = vpack.c.bf16 %v2406_v48, %v2386_v11  ;;  %v12377_v11 = vld [vmem:[#allocation2 + $0x8] sm:$0xff] }
 0xfa8   :  { %v2385_v2 = vpop.permute.xlu0 %2384  ;;  %8862 = vmatprep.subr.bf16.mxu0 %v8861_v34  ;;  %v2443_v28 = vpop.permute.xlu1 %2442 }
 0xfa9   :  { %2393 = vst.msk [vmem:[#allocation3 + $0x70] sm:$0xff] %vm1664_vm9, %v2385_v2  ;;  %8864 = vmatpush1.bf16.msra.mxu0 %v8863_v31  ;;  %v2387_v7 = vsel %vm1741_vm13, %v2383_v42, %v2385_v2  ;;  %v2479_v31 = vld [vmem:[#allocation3 + $0x28] sm:$0xff] }
 0xfac   :  { %v2405_v37 = vpop.permute.xlu0 %2404  ;;  %v2421_v12 = vpop.permute.xlu1 %2420 }
 0xfad   :  { %v2407_v40 = vsel %vm1762_vm14, %v2403_v62, %v2405_v37  ;;  %2413 = vst.msk [vmem:[#allocation3 + $0x88] sm:$0xff] %vm1664_vm9, %v2405_v37  ;;  %v2426_v39 = vsel %vm1783_vm15, %v2421_v12, %v2423_v35  ;;  %v2476_v37 = vld [vmem:[#allocation3 + $0x10] sm:$0xff] }
 0xfae   :  { %v8865_v36 = vpack.c.bf16 %v2407_v40, %v2387_v7  ;;  %v8874_v7 = vpack.c.bf16 %v2479_v31, %v2476_v37  ;;  %v2485_v40 = vld [vmem:[#allocation3 + $0x58] sm:$0xff]  ;;  %v12615_v37 = vld [vmem:[%s14700_s10 + $0x24] ss:$8 sps:$4 sm:$0xff]  }
 0xfb0   :  { %v2425_v0 = vpop.permute.xlu0 %2424  ;;  %8866 = vmatprep.subr.bf16.mxu0 %v8865_v36  ;;  %v2463_v2 = vpop.permute.xlu1 %2462  ;;  %v2482_v36 = vld [vmem:[#allocation3 + $0x40] sm:$0xff]  ;;  %v2488_v12 = vld [vmem:[#allocation3 + $0x70] sm:$0xff] }
 0xfb1   :  { %2433 = vst.msk [vmem:[#allocation3 + $0xa0] sm:$0xff] %vm1664_vm9, %v2425_v0  ;;  %8868 = vmatpush1.bf16.msra.mxu0 %v8867_v4  ;;  %v2427_v41 = vsel %vm1783_vm15, %v2423_v35, %v2425_v0  ;;  %v11231_v35 = vld [vmem:[%s14701_s11] sm:$0xff]  ;;  %v8877_v4 = vpack.c.bf16 %v2485_v40, %v2482_v36 }
 0xfb4   :  { %v2445_v34 = vpop.permute.xlu0 %2444  ;;  %v2461_v38 = vpop.permute.xlu1 %2460  ;;  %v2491_v0 = vld [vmem:[#allocation3 + $0x88] sm:$0xff] }
 0xfb5   :  { %v2447_v26 = vsel %vm1804_vm2, %v2443_v28, %v2445_v34  ;;  %2453 = vst.msk [vmem:[#allocation3 + $0xb8] sm:$0xff] %vm1664_vm9, %v2445_v34  ;;  %v2466_v48 = vsel %vm1825_vm3, %v2461_v38, %v2463_v2  ;;  %v8880_v34 = vpack.c.bf16 %v2491_v0, %v2488_v12  ;;  %v12602_v38 = vld [vmem:[%s14700_s10 + $0x14] ss:$8 sps:$4 sm:$0xff]   ;;  %v12639_v0 = vld [vmem:[%s14700_s10 + $0x44] ss:$8 sps:$4 sm:$0xff]  }
 0xfb6   :  { %v8869_v62 = vpack.c.bf16 %v2447_v26, %v2427_v41 }
 0xfb8   :  { %v2441_v32 = vpop.permute.xlu0 %2440  ;;  %8870 = vmatprep.subr.bf16.mxu0 %v8869_v62  ;;  %v2494_v26 = vld [vmem:[#allocation3 + $0xa0] sm:$0xff] }
 0xfb9   :  { %v2446_v42 = vsel %vm1804_vm2, %v2441_v32, %v2443_v28  ;;  %v14797_v28 = vmov 0.0|0.0  }
 0xfba   :  { %v8871_v8 = vpack.c.bf16 %v2446_v42, %v2426_v39 }
 0xfbc   :  { %v2465_v19 = vpop.permute.xlu0 %2464  ;;  %8872 = vmatpush1.bf16.msra.mxu0 %v8871_v8  ;;  %v2497_v41 = vld [vmem:[#allocation3 + $0xb8] sm:$0xff]  ;;  %v12592_v8 = vld [vmem:[%s14700_s10 + $0x4] ss:$8 sps:$4 sm:$0xff]  }
 0xfbd   :  { %v2467_v27 = vsel %vm1825_vm3, %v2463_v2, %v2465_v19  ;;  %2473 = vst.msk [vmem:[#allocation3 + $0xd0] sm:$0xff] %vm1664_vm9, %v2465_v19  ;;  %v8883_v2 = vpack.c.bf16 %v2497_v41, %v2494_v26  ;;  %v12597_v19 = vld [vmem:[%s14700_s10] ss:$8 sps:$4 sm:$0xff]   ;;  %9084 = vmatprep.subr.bf16.mxu1 %v12592_v8 }
 0xfbe   :  { %2517 = vmatprep.subr.mxu0 %v2467_v27 }
 0xfc0   :  { %2518 = vmatpush1.msra.mxu0 %v2466_v48  ;;  %v12609_v48 = vld [vmem:[%s14700_s10 + $0x10] ss:$8 sps:$4 sm:$0xff]  }
 0xfc1   :  { %7541 = vmatmul.mubr.msk.f32.vlgmr.msra.gmra.mrb[20].mxu0 %vm247_vm7, %v11231_v35  ;;  %8873 = vmatprep.subr.bf16.mxu0 %v14797_v28 }
 0xfc2   :  { %8875 = vmatpush3.bf16.msra.mxu0 %v8874_v7  ;;  %8410 = vmatprep.mubr.msk.f32.mxu0 %vm11259_vm0, %v12377_v11  ;;  %v12621_v7 = vld [vmem:[%s14700_s10 + $0x20] ss:$8 sps:$4 sm:$0xff]  }
 0xfc3   :  { %8876 = vmatprep.subr.bf16.mxu0 %v14797_v28 }
 0xfc4   :  { %v2500_v62 = vld [vmem:[#allocation3 + $0xd0] sm:$0xff] }
 0xfc6   :  { %8878 = vmatpush3.bf16.msra.mxu0 %v8877_v4  ;;  %v12633_v4 = vld [vmem:[%s14700_s10 + $0x30] ss:$8 sps:$4 sm:$0xff]  }
 0xfc7   :  { %8879 = vmatprep.subr.bf16.mxu0 %v14797_v28 }
 0xfca   :  { %8881 = vmatpush3.bf16.msra.mxu0 %v8880_v34 }
 0xfcb   :  { %8882 = vmatprep.subr.bf16.mxu0 %v14797_v28 }
 0xfce   :  { %8884 = vmatpush3.bf16.msra.mxu0 %v8883_v2 }
 0xfcf   :  { %8408 = vmatprep.subr.mxu0 %v12377_v11 }
 0xfd2   :  { %8409 = vmatpush3.msra.mxu0 %v2500_v62  ;;  %v12650_v62 = vld [vmem:[%s14700_s10 + $0x40] ss:$8 sps:$4 sm:$0xff]  }
 0xfd3   :  { %8411 = vmatmul.mubr.msk.f32.vlgmr.msra.gmra.mrb[22].mxu0 %vm247_vm7, %v11231_v35  ;;  %8886 = vmatprep.subr.bf16.mxu0 %v11950_v63  ;;  %v12627_v35 = vld [vmem:[%s14700_s10 + $0x34] ss:$8 sps:$4 sm:$0xff]  }
 0xfd4   :  { %8888 = vmatpush1.bf16.msra.mxu0 %v11956_v43  ;;  %v12408_v43 = vpop.permute.xlu0 %2007 }
 0xfd5   :  { %8890 = vmatprep.subr.bf16.mxu0 %v11961_v9 }
 0xfd8   :  { %8892 = vmatpush1.bf16.msra.mxu0 %v11972_v44 }
 0xfd9   :  { %8894 = vmatprep.subr.bf16.mxu0 %v11978_v5 }
 0xfdc   :  { %8896 = vmatpush1.bf16.msra.mxu0 %v11985_v45 }
 0xfdd   :  { %8898 = vmatprep.subr.bf16.mxu0 %v11992_v46 }
 0xfe0   :  { %8900 = vmatpush1.bf16.msra.mxu0 %v11999_v13  ;;  %v12437_v13 = vld [vmem:[%s14702_s13 + $0xc8] ss:$12 sps:$4 sm:$0xff]  }
 0xfe1   :  { %8902 = vmatprep.subr.bf16.mxu0 %v12005_v47  ;;  %v12446_v47 = vld [vmem:[%s14702_s13 + $0x8] ss:$12 sps:$4 sm:$0xff]  }
 0xfe4   :  { %8904 = vmatpush1.bf16.msra.mxu0 %v12011_v49  ;;  %v12451_v49 = vld [vmem:[%s14702_s13 + $0xe0] ss:$12 sps:$4 sm:$0xff]  }
 0xfe5   :  { %8906 = vmatprep.subr.bf16.mxu0 %v12017_v50 }
 0xfe8   :  { %8908 = vmatpush1.bf16.msra.mxu0 %v12023_v51 }
 0xfe9   :  { %8910 = vmatprep.subr.bf16.mxu0 %v12029_v52  ;;  %v12459_v52 = vld [vmem:[%s14702_s13 + $0x20] ss:$12 sps:$4 sm:$0xff]  }
 0xfec   :  { %8912 = vmatpush1.bf16.msra.mxu0 %v12035_v53  ;;  %v12465_v53 = vld [vmem:[%s14702_s13 + $0xf8] ss:$12 sps:$4 sm:$0xff]  }
 0xfed   :  { %8914 = vmatprep.subr.bf16.mxu0 %v12042_v54  ;;  %v12471_v54 = vld [vmem:[%s14702_s13 + $0x38] ss:$12 sps:$4 sm:$0xff]  }
 0xff0   :  { %8916 = vmatpush1.bf16.msra.mxu0 %v12047_v55  ;;  %v12477_v55 = vld [vmem:[%s14702_s13 + $0x110] ss:$12 sps:$4 sm:$0xff]  }
 0xff1   :  { %8918 = vmatprep.subr.bf16.mxu0 %v12054_v56  ;;  %v12483_v56 = vld [vmem:[%s14702_s13 + $0x50] ss:$12 sps:$4 sm:$0xff]  }
 0xff4   :  { %8920 = vmatpush1.bf16.msra.mxu0 %v12059_v57  ;;  %v12489_v57 = vld [vmem:[%s14702_s13 + $0x128] ss:$12 sps:$4 sm:$0xff]  }
 0xff5   :  { %8922 = vmatprep.subr.bf16.mxu0 %v12066_v58  ;;  %v12495_v58 = vld [vmem:[%s14702_s13 + $0x68] ss:$12 sps:$4 sm:$0xff]  }
 0xff8   :  { %8924 = vmatpush1.bf16.msra.mxu0 %v12071_v59  ;;  %v12501_v59 = vld [vmem:[%s14702_s13 + $0x140] ss:$12 sps:$4 sm:$0xff]  }
 0xff9   :  { %8926 = vmatprep.subr.bf16.mxu0 %v12078_v60  ;;  %v12507_v60 = vld [vmem:[%s14702_s13 + $0x80] ss:$12 sps:$4 sm:$0xff]  }
 0xffc   :  { %v2156_v63 = vpop.f32.mrb[16].mxu1  ;;  %8928 = vmatpush1.bf16.msra.mxu0 %v12083_v14  ;;  %v12513_v14 = vld [vmem:[%s14702_s13 + $0x158] ss:$12 sps:$4 sm:$0xff]  }
 0xffd   :  { %v2158_v9 = vpop.f32.mrb[17].mxu1  ;;  %8930 = vmatprep.subr.bf16.mxu0 %v12088_v16  ;;  %v12415_v5 = vadd.f32 %v2156_v63, %v12408_v43  ;;  %v12519_v16 = vld [vmem:[%s14702_s13 + $0x98] ss:$12 sps:$4 sm:$0xff]  }
 0xffe   :  { %v12412_v44 = vadd.f32 %v2158_v9, %v12408_v43  ;;  %v12657_v9 = vld [vmem:[%s14700_s10 + $0x54] ss:$8 sps:$4 sm:$0xff]  }
 0xfff   :  { %14799 = vst [vmem:[#allocation11_spill] sm:$0xff] %v12415_v5 }
0x1000   :  { %14798 = vst [vmem:[#allocation10_spill] sm:$0xff] %v12412_v44  ;;  %3120 = vmatprep.mubr.f32.mxu1 %v12412_v44  ;;  %8932 = vmatpush1.bf16.msra.mxu0 %v12095_v17  ;;  %v12525_v17 = vld [vmem:[%s14702_s13 + $0x170] ss:$12 sps:$4 sm:$0xff]  }
0x1001   :  { %3121 = vmatmul.mubr.f32.vlgmr.msra.gmra.mrb[18].mxu1 %v12415_v5  ;;  %8934 = vmatprep.subr.bf16.mxu0 %v12102_v20  ;;  %v12531_v20 = vld [vmem:[%s14702_s13 + $0xb0] ss:$12 sps:$4 sm:$0xff]  }
0x1002   :  { %9086 = vmatpush1.bf16.msra.mxu1 %v12597_v19 }
0x1003   :  { %9088 = vmatprep.subr.bf16.mxu1 %v12602_v38 }
0x1004   :  { %8936 = vmatpush1.bf16.msra.mxu0 %v12107_v21 }
0x1005   :  { %8938 = vmatprep.subr.bf16.mxu0 %v12114_v22 }
0x1006   :  { %9090 = vmatpush1.bf16.msra.mxu1 %v12609_v48 }
0x1007   :  { %9092 = vmatprep.subr.bf16.mxu1 %v12615_v37 }
0x1008   :  { %8940 = vmatpush1.bf16.msra.mxu0 %v12119_v23 }
0x1009   :  { %8942 = vmatprep.subr.bf16.mxu0 %v12126_v24 }
0x100a   :  { %9094 = vmatpush1.bf16.msra.mxu1 %v12621_v7 }
0x100b   :  { %9096 = vmatprep.subr.bf16.mxu1 %v12627_v35 }
0x100c   :  { %8944 = vmatpush1.bf16.msra.mxu0 %v12131_v1 }
0x100d   :  { %8946 = vmatprep.subr.bf16.mxu0 %v12138_v10 }
0x100e   :  { %9098 = vmatpush1.bf16.msra.mxu1 %v12633_v4 }
0x100f   :  { %9100 = vmatprep.subr.bf16.mxu1 %v12639_v0 }
0x1010   :  { %8948 = vmatpush1.bf16.msra.mxu0 %v12143_v25 }
0x1011   :  { %8950 = vmatprep.subr.bf16.mxu0 %v12150_v61 }
0x1012   :  { %9102 = vmatpush1.bf16.msra.mxu1 %v12650_v62 }
0x1013   :  { %9104 = vmatprep.subr.bf16.mxu1 %v12657_v9 }
0x1094   :  { %v2567_v45 = vpop.f32.mrb[20].mxu0 }
0x1095   :  { %v2569_v46 = vpop.f32.mrb[21].mxu0 }
0x1096   :  { %2709 = vmatprep.mubr.f32.mxu0 %v2569_v46 }
0x1097   :  { %2710 = vmatmul.mubr.f32.vlgmr.msra.gmra.mrb[24].mxu0 %v2567_v45 }
0x1098   :  { %8952 = vmatpush1.bf16.msra.mxu0 %v12172_v18  ;;  %2780 = vmatprep.mubr.f32.mxu0 %v12377_v11 }
0x1099   :  { %8955 = vmatprep.subr.msk.bf16.mxu0 %vm11478_vm6, %v12177_v29 }
0x109c   :  { %8958 = vmatpush1.bf16.msk.msra.mxu0 %vm11478_vm6, %v12185_v30 }
0x109d   :  { %9024 = vmatprep.subr.bf16.mxu0 %v12437_v13 }
0x10a6   :  { %v2638_v50 = vpop.f32.mrb[22].mxu0 }
0x10a7   :  { %v8412_v51 = vpop.f32.mrb[23].mxu0  ;;  %7545 = vmatmul.mubr.msk.f32.vlgmr.msra.gmra.mrb[24].mxu0 %vm1664_vm9, %v2638_v50 }
0x10a8   :  { %9026 = vmatpush3.bf16.msra.mxu0 %v12446_v47  ;;  %3191 = vmatprep.mubr.f32.mxu0 %v12412_v44  ;;  %v14804_v44 = vld [vmem:[#allocation8_spill] sm:$0xff] }
0x10a9   :  { %9028 = vmatprep.subr.bf16.mxu0 %v12451_v49 }
0x10ac   :  { %9030 = vmatpush3.bf16.msra.mxu0 %v12459_v52 }
0x10ad   :  { %9032 = vmatprep.subr.bf16.mxu0 %v12465_v53 }
0x10b0   :  { %9034 = vmatpush3.bf16.msra.mxu0 %v12471_v54 }
0x10b1   :  { %9036 = vmatprep.subr.bf16.mxu0 %v12477_v55 }
0x10b4   :  { %9038 = vmatpush3.bf16.msra.mxu0 %v12483_v56 }
0x10b5   :  { %9040 = vmatprep.subr.bf16.mxu0 %v12489_v57 }
0x10b8   :  { %9042 = vmatpush3.bf16.msra.mxu0 %v12495_v58 }
0x10b9   :  { %9044 = vmatprep.subr.bf16.mxu0 %v12501_v59 }
0x10bc   :  { %9046 = vmatpush3.bf16.msra.mxu0 %v12507_v60 }
0x10bd   :  { %9048 = vmatprep.subr.bf16.mxu0 %v12513_v14 }
0x10c0   :  { %9050 = vmatpush3.bf16.msra.mxu0 %v12519_v16 }
0x10c1   :  { %9052 = vmatprep.subr.bf16.mxu0 %v12525_v17 }
0x10c4   :  { %9054 = vmatpush3.bf16.msra.mxu0 %v12531_v20 }
0x10c7   :  { %3192 = vmatmul.mubr.f32.vlgmr.msra.gmra.mrb[26].mxu0 %v12415_v5  ;;  %v11240_v5 = vld [vmem:[%s14702_s13 + $0x48] ss:$12 sps:$4 sm:$0xff]  }
0x10c8   :  { %3460 = vmatprep.mubr.f32.mxu0 %v12377_v11 }
0x10d4   :  { %v12537_v21 = vpop.f32.mrb[18].mxu1 }
0x10d5   :  { %v12539_v22 = vpop.f32.mrb[19].mxu1  ;;  %3232 = vrot.lane.b32.xlu0 %v12537_v21, %s11264_s3  ;;  %3212 = vrot.lane.b32.xlu1 %v12537_v21, %s11262_s2 }
0x10d9   :  { %3272 = vrot.lane.b32.xlu0 %v12537_v21, %s11273_s30  ;;  %3252 = vrot.lane.b32.xlu1 %v12537_v21, %s11271_s9 }
0x10dd   :  { %3234 = vrot.lane.b32.xlu0 %v12539_v22, %s11264_s3  ;;  %3292 = vrot.lane.b32.xlu1 %v12537_v21, %s11265_s28 }
0x10e1   :  { %3254 = vrot.lane.b32.xlu0 %v12539_v22, %s11271_s9  ;;  %3214 = vrot.lane.b32.xlu1 %v12539_v22, %s11262_s2 }
0x10e5   :  { %3274 = vrot.lane.b32.xlu0 %v12539_v22, %s11273_s30 }
0x10e9   :  { %3294 = vrot.lane.b32.xlu0 %v12539_v22, %s11265_s28 }
0x1147   :  { %v3233_v18 = vpop.permute.xlu0 %3232  ;;  %v3213_v30 = vpop.permute.xlu1 %3212 }
0x114b   :  { %v12587_v29 = vpop.permute.xlu0 %3272  ;;  %v3253_v39 = vpop.permute.xlu1 %3252 }
0x114f   :  { %v3235_v32 = vpop.permute.xlu0 %3234  ;;  %v3293_v27 = vpop.permute.xlu1 %3292 }
0x1153   :  { %v3255_v42 = vpop.permute.xlu0 %3254  ;;  %v3215_v40 = vpop.permute.xlu1 %3214 }
0x1154   :  { %v3218_v12 = vsel %vm1678_vm10, %v3213_v30, %v3215_v40  ;;  %v3258_v45 = vsel %vm1720_vm12, %v3253_v39, %v3255_v42  ;;  %v12687_v39 = vld [vmem:[%s14700_s10 + $0x74] ss:$8 sps:$4 sm:$0xff]  }
0x1155   :  { %v9057_v63 = vpack.c.bf16 %v3218_v12, %v12537_v21 }
0x1157   :  { %v3275_v31 = vpop.permute.xlu0 %3274 }
0x115b   :  { %v3295_v36 = vpop.permute.xlu0 %3294 }
0x117a   :  { %v12561_v23 = vpop.f32.mrb[24].mxu0 }
0x117b   :  { %v12563_v24 = vpop.f32.mrb[25].mxu0 }
0x119a   :  { %v7843_v1 = vpop.f32.mrb[26].mxu0 }
0x119b   :  { %v7844_v10 = vpop.f32.mrb[27].mxu0 }
0x119c   :  { %v7845_v25 = vadd.f32 %v7844_v10, %v7843_v1  ;;  %v12668_v10 = vld [vmem:[%s14700_s10 + $0x50] ss:$8 sps:$4 sm:$0xff]  }
0x119d   :  { %9106 = vmatpush1.bf16.msra.mxu1 %v12668_v10 }
0x119e   :  { %3199 = vst.msk [vmem:[#allocation2 + $0x10] sm:$0xff] %vm1657_vm8, %v7845_v25 }
0x11a5   :  { %v3228_v61 = vld [vmem:[#allocation2 + $0x10] sm:$0xff] }
0x11a6   :  { %3236 = vrot.lane.b32.xlu1 %v3228_v61, %s11264_s3  ;;  %3216 = vrot.lane.b32.xlu0 %v3228_v61, %s11262_s2  ;;  %3205 = vst.msk [vmem:[#allocation3 + $0x10] sm:$0xff] %vm1664_vm9, %v3228_v61 }
0x11aa   :  { %3256 = vrot.lane.b32.xlu1 %v3228_v61, %s11271_s9  ;;  %3314 = vrot.lane.b32.xlu0 %v12539_v22, %s11274_s4 }
0x11ae   :  { %3276 = vrot.lane.b32.xlu1 %v3228_v61, %s11273_s30  ;;  %3334 = vrot.lane.b32.xlu0 %v12539_v22, %s11272_s5 }
0x11b2   :  { %3296 = vrot.lane.b32.xlu1 %v3228_v61, %s11265_s28  ;;  %3312 = vrot.lane.b32.xlu0 %v12537_v21, %s11274_s4 }
0x11b6   :  { %3316 = vrot.lane.b32.xlu1 %v3228_v61, %s11274_s4  ;;  %3354 = vrot.lane.b32.xlu0 %v12539_v22, %s11275_s6 }
0x11ba   :  { %3336 = vrot.lane.b32.xlu1 %v3228_v61, %s11272_s5  ;;  %3352 = vrot.lane.b32.xlu0 %v12537_v21, %s11275_s6 }
0x11be   :  { %3332 = vrot.lane.b32.xlu1 %v12537_v21, %s11272_s5  ;;  %v3238_v21 = vsel %vm1699_vm11, %v3233_v18, %v3235_v32 }
0x11bf   :  { %v9061_v25 = vpack.c.bf16 %v3258_v45, %v3238_v21 }
0x11c2   :  { %3356 = vrot.lane.b32.xlu1 %v3228_v61, %s11275_s6  ;;  %v12674_v61 = vld [vmem:[%s14700_s10 + $0x64] ss:$8 sps:$4 sm:$0xff]  }
0x11c3   :  { %9108 = vmatprep.subr.bf16.mxu1 %v12674_v61 }
0x1218   :  { %v3237_v34 = vpop.permute.xlu1 %3236  ;;  %v3217_v41 = vpop.permute.xlu0 %3216 }
0x1219   :  { %3245 = vst.msk [vmem:[#allocation3 + $0x40] sm:$0xff] %vm1664_vm9, %v3237_v34  ;;  %v3219_v26 = vsel %vm1678_vm10, %v3215_v40, %v3217_v41  ;;  %3225 = vst.msk [vmem:[#allocation3 + $0x28] sm:$0xff] %vm1664_vm9, %v3217_v41  ;;  %v3239_v51 = vsel %vm1699_vm11, %v3235_v32, %v3237_v34  ;;  %v12681_v32 = vld [vmem:[%s14700_s10 + $0x60] ss:$8 sps:$4 sm:$0xff]   ;;  %v3278_v41 = vsel %vm1741_vm13, %v12587_v29, %v3275_v31 }
0x121a   :  { %v9055_v2 = vpack.c.bf16 %v3219_v26, %v12539_v22  ;;  %9110 = vmatpush1.bf16.msra.mxu1 %v12681_v32  ;;  %v12712_v29 = vld [vmem:[%s14700_s10 + $0x80] ss:$8 sps:$4 sm:$0xff]  }
0x121b   :  { %9112 = vmatprep.subr.bf16.mxu1 %v12687_v39 }
0x121c   :  { %v3257_v46 = vpop.permute.xlu1 %3256  ;;  %v3315_v50 = vpop.permute.xlu0 %3314  ;;  %9056 = vmatprep.subr.bf16.mxu0 %v9055_v2  ;;  %v12699_v2 = vld [vmem:[%s14700_s10 + $0x70] ss:$8 sps:$4 sm:$0xff]  }
0x121d   :  { %v3259_v22 = vsel %vm1720_vm12, %v3255_v42, %v3257_v46  ;;  %3265 = vst.msk [vmem:[#allocation3 + $0x58] sm:$0xff] %vm1664_vm9, %v3257_v46  ;;  %9058 = vmatpush1.bf16.msra.mxu0 %v9057_v63  ;;  %v3298_v42 = vsel %vm1762_vm14, %v3293_v27, %v3295_v36  ;;  %v12705_v27 = vld [vmem:[%s14700_s10 + $0x84] ss:$8 sps:$4 sm:$0xff]  }
0x121e   :  { %v9059_v1 = vpack.c.bf16 %v3259_v22, %v3239_v51  ;;  %v9065_v63 = vpack.c.bf16 %v3298_v42, %v3278_v41  ;;  %9114 = vmatpush1.bf16.msra.mxu1 %v12699_v2  ;;  %v12741_v41 = vld [vmem:[%s14700_s10 + $0xa0] ss:$8 sps:$4 sm:$0xff]  }
0x121f   :  { %9116 = vmatprep.subr.bf16.mxu1 %v12705_v27 }
0x1220   :  { %v3277_v30 = vpop.permute.xlu1 %3276  ;;  %9060 = vmatprep.subr.bf16.mxu0 %v9059_v1  ;;  %v3335_v18 = vpop.permute.xlu0 %3334 }
0x1221   :  { %3285 = vst.msk [vmem:[#allocation3 + $0x70] sm:$0xff] %vm1664_vm9, %v3277_v30  ;;  %9062 = vmatpush1.bf16.msra.mxu0 %v9061_v25  ;;  %v3279_v12 = vsel %vm1741_vm13, %v3275_v31, %v3277_v30  ;;  %v12718_v31 = vld [vmem:[%s14700_s10 + $0x94] ss:$8 sps:$4 sm:$0xff]   ;;  %v12727_v25 = vld [vmem:[%s14700_s10 + $0x90] ss:$8 sps:$4 sm:$0xff]  }
0x1222   :  { %9118 = vmatpush1.bf16.msra.mxu1 %v12712_v29  ;;  %v12733_v30 = vld [vmem:[%s14700_s10 + $0xa4] ss:$8 sps:$4 sm:$0xff]  }
0x1223   :  { %9120 = vmatprep.subr.bf16.mxu1 %v12718_v31 }
0x1224   :  { %v3297_v40 = vpop.permute.xlu1 %3296 }
0x1225   :  { %v3299_v34 = vsel %vm1762_vm14, %v3295_v36, %v3297_v40  ;;  %3305 = vst.msk [vmem:[#allocation3 + $0x88] sm:$0xff] %vm1664_vm9, %v3297_v40  ;;  %v3313_v36 = vpop.permute.xlu0 %3312 }
0x1226   :  { %v9063_v26 = vpack.c.bf16 %v3299_v34, %v3279_v12  ;;  %v3318_v40 = vsel %vm1783_vm15, %v3313_v36, %v3315_v50  ;;  %9122 = vmatpush1.bf16.msra.mxu1 %v12727_v25  ;;  %v12754_v36 = vld [vmem:[%s14704_s14] sm:$0xf] }
0x1227   :  { %9124 = vmatprep.subr.bf16.mxu1 %v12733_v30 }
0x1228   :  { %v3317_v45 = vpop.permute.xlu1 %3316  ;;  %9064 = vmatprep.subr.bf16.mxu0 %v9063_v26  ;;  %v12747_v26 = vld [vmem:[%s14700_s10 + $0xb4] ss:$8 sps:$4 sm:$0xff]  }
0x1229   :  { %3325 = vst.msk [vmem:[#allocation3 + $0xa0] sm:$0xff] %vm1664_vm9, %v3317_v45  ;;  %9066 = vmatpush1.bf16.msra.mxu0 %v9065_v63  ;;  %v3319_v51 = vsel %vm1783_vm15, %v3315_v50, %v3317_v45  ;;  %v3355_v21 = vpop.permute.xlu0 %3354 }
0x122a   :  { %9126 = vmatpush1.bf16.msra.mxu1 %v12741_v41 }
0x122b   :  { %9128 = vmatprep.subr.bf16.mxu1 %v12747_v26 }
0x122c   :  { %v3337_v46 = vpop.permute.xlu1 %3336 }
0x122d   :  { %v3339_v22 = vsel %vm1804_vm2, %v3335_v18, %v3337_v46  ;;  %3345 = vst.msk [vmem:[#allocation3 + $0xb8] sm:$0xff] %vm1664_vm9, %v3337_v46  ;;  %v3353_v63 = vpop.permute.xlu0 %3352 }
0x122e   :  { %v9067_v1 = vpack.c.bf16 %v3339_v22, %v3319_v51  ;;  %v3358_v46 = vsel %vm1825_vm3, %v3353_v63, %v3355_v21  ;;  %v3368_v51 = vld [vmem:[#allocation3 + $0x10] sm:$0xff]  ;;  %v12762_v22 = vld [vmem:[%s14700_s10 + $0xb0] ss:$8 sps:$4 sm:$0xff]   ;;  %v12785_v63 = vld [vmem:[%s14700_s10 + $0xd4] ss:$8 sps:$4 sm:$0xff]  }
0x122f   :  { %9130 = vmatpush1.bf16.msra.mxu1 %v12762_v22 }
0x1230   :  { %v3333_v42 = vpop.permute.xlu1 %3332  ;;  %9068 = vmatprep.subr.bf16.mxu0 %v9067_v1 }
0x1231   :  { %v3338_v12 = vsel %vm1804_vm2, %v3333_v42, %v3335_v18  ;;  %v3371_v18 = vld [vmem:[#allocation3 + $0x28] sm:$0xff] }
0x1232   :  { %v9069_v34 = vpack.c.bf16 %v3338_v12, %v3318_v40  ;;  %v9072_v1 = vpack.c.bf16 %v3371_v18, %v3368_v51  ;;  %v12767_v42 = vld [vmem:[%s14700_s10 + $0xc4] ss:$8 sps:$4 sm:$0xff]   ;;  %v3374_v40 = vld [vmem:[#allocation3 + $0x40] sm:$0xff]  ;;  %v12779_v12 = vld [vmem:[%s14700_s10 + $0xc0] ss:$8 sps:$4 sm:$0xff]  }
0x1233   :  { %9132 = vmatprep.subr.bf16.mxu1 %v12767_v42  ;;  %v12792_v18 = vld [vmem:[%s14700_s10 + $0xd0] ss:$8 sps:$4 sm:$0xff]   ;;  %v12798_v51 = vld [vmem:[%s14700_s10 + $0xe4] ss:$8 sps:$4 sm:$0xff]  }
0x1234   :  { %v3357_v45 = vpop.permute.xlu1 %3356  ;;  %9070 = vmatpush1.bf16.msra.mxu0 %v9069_v34  ;;  %9134 = vmatpush1.bf16.msra.mxu1 %v12779_v12 }
0x1235   :  { %v3359_v50 = vsel %vm1825_vm3, %v3355_v21, %v3357_v45  ;;  %3365 = vst.msk [vmem:[#allocation3 + $0xd0] sm:$0xff] %vm1664_vm9, %v3357_v45  ;;  %v3377_v21 = vld [vmem:[#allocation3 + $0x58] sm:$0xff]  ;;  %v3383_v45 = vld [vmem:[#allocation3 + $0x88] sm:$0xff]  ;;  %9136 = vmatprep.subr.bf16.mxu1 %v12785_v63 }
0x1236   :  { %3412 = vmatprep.subr.mxu0 %v3359_v50  ;;  %v9075_v34 = vpack.c.bf16 %v3377_v21, %v3374_v40  ;;  %v3380_v50 = vld [vmem:[#allocation3 + $0x70] sm:$0xff]  ;;  %v3386_v21 = vld [vmem:[#allocation3 + $0xa0] sm:$0xff] }
0x1237   :  { %v12805_v40 = vld [vmem:[%s14700_s10 + $0xe0] ss:$8 sps:$4 sm:$0xff]  }
0x1238   :  { %3413 = vmatpush1.msra.mxu0 %v3358_v46  ;;  %v9078_v46 = vpack.c.bf16 %v3383_v45, %v3380_v50  ;;  %9138 = vmatpush1.bf16.msra.mxu1 %v12792_v18  ;;  %v12811_v45 = vld [vmem:[%s14700_s10 + $0xf4] ss:$8 sps:$4 sm:$0xff]  }
0x1239   :  { %7546 = vmatmul.mubr.msk.f32.vlgmr.msra.gmra.mrb[28].mxu0 %vm247_vm7, %v12754_v36  ;;  %9071 = vmatprep.subr.bf16.mxu0 %v14797_v28 }
0x123a   :  { %9073 = vmatpush3.bf16.msra.mxu0 %v9072_v1  ;;  %8431 = vmatprep.mubr.msk.f32.mxu0 %vm11259_vm0, %v12377_v11  ;;  %v3389_v1 = vld [vmem:[#allocation3 + $0xb8] sm:$0xff] }
0x123b   :  { %9074 = vmatprep.subr.bf16.mxu0 %v14797_v28  ;;  %9140 = vmatprep.subr.bf16.mxu1 %v12798_v51 }
0x123c   :  { %9142 = vmatpush1.bf16.msra.mxu1 %v12805_v40  ;;  %v3392_v50 = vld [vmem:[#allocation3 + $0xd0] sm:$0xff] }
0x123d   :  { %9144 = vmatprep.subr.bf16.mxu1 %v12811_v45 }
0x123e   :  { %9076 = vmatpush3.bf16.msra.mxu0 %v9075_v34  ;;  %v9081_v34 = vpack.c.bf16 %v3389_v1, %v3386_v21  ;;  %v12823_v1 = vadd.f32 %v12563_v24, %v12408_v43  ;;  %v11233_v21 = vld [vmem:[%s14702_s13 + $0x4] ss:$12 sps:$4 sm:$0xff]   ;;  %v11235_v24 = vld [vmem:[%s14702_s13 + $0x1c] ss:$12 sps:$4 sm:$0xff]  }
0x123f   :  { %9077 = vmatprep.subr.bf16.mxu0 %v14797_v28 }
0x1240   :  { %14800 = vst [vmem:[#allocation12_spill] sm:$0xff] %v12823_v1 }
0x1242   :  { %9079 = vmatpush3.bf16.msra.mxu0 %v9078_v46  ;;  %v12819_v46 = vld [vmem:[%s14700_s10 + $0xf0] ss:$8 sps:$4 sm:$0xff]  }
0x1243   :  { %9080 = vmatprep.subr.bf16.mxu0 %v14797_v28  ;;  %9146 = vmatpush1.bf16.msra.mxu1 %v12819_v46  ;;  %v12911_v28 = vadd.f32 %v12561_v23, %v12408_v43  ;;  %v12929_v43 = vld [vmem:[%s14700_s10 + $0x114] ss:$8 sps:$4 sm:$0x7f]   ;;  %v12935_v23 = vld [vmem:[%s14700_s10 + $0x110] ss:$8 sps:$4 sm:$0x7f]  }
0x1246   :  { %9082 = vmatpush3.bf16.msra.mxu0 %v9081_v34  ;;  %v11234_v34 = vld [vmem:[%s14702_s13] ss:$12 sps:$4 sm:$0xff]  }
0x1247   :  { %8429 = vmatprep.subr.mxu0 %v12377_v11 }
0x124a   :  { %8430 = vmatpush3.msra.mxu0 %v3392_v50  ;;  %v11236_v50 = vld [vmem:[%s14702_s13 + $0x18] ss:$12 sps:$4 sm:$0xff]  }
0x124b   :  { %8432 = vmatmul.mubr.msk.f32.vlgmr.msra.gmra.mrb[30].mxu0 %vm247_vm7, %v12754_v36  ;;  %9158 = vmatprep.subr.bf16.mxu0 %v11233_v21  ;;  %v11237_v21 = vld [vmem:[%s14702_s13 + $0x34] ss:$12 sps:$4 sm:$0xff]  }
0x124c   :  { %9160 = vmatpush1.bf16.msra.mxu0 %v11234_v34  ;;  %3752 = vmatprep.mubr.f32.mxu0 %v12823_v1  ;;  %v11238_v34 = vld [vmem:[%s14702_s13 + $0x30] ss:$12 sps:$4 sm:$0xff]  }
0x124d   :  { %9162 = vmatprep.subr.bf16.mxu0 %v11235_v24  ;;  %v11239_v24 = vld [vmem:[%s14702_s13 + $0x4c] ss:$12 sps:$4 sm:$0xff]  }
0x1250   :  { %9164 = vmatpush1.bf16.msra.mxu0 %v11236_v50  ;;  %v11241_v50 = vld [vmem:[%s14702_s13 + $0x64] ss:$12 sps:$4 sm:$0xff]  }
0x1251   :  { %9166 = vmatprep.subr.bf16.mxu0 %v11237_v21  ;;  %v11242_v21 = vld [vmem:[%s14702_s13 + $0x60] ss:$12 sps:$4 sm:$0xff]  }
0x1254   :  { %9168 = vmatpush1.bf16.msra.mxu0 %v11238_v34  ;;  %v11243_v34 = vld [vmem:[%s14702_s13 + $0x7c] ss:$12 sps:$4 sm:$0xff]  }
0x1255   :  { %9170 = vmatprep.subr.bf16.mxu0 %v11239_v24  ;;  %v11244_v24 = vld [vmem:[%s14702_s13 + $0x78] ss:$12 sps:$4 sm:$0xff]  }
0x1258   :  { %9172 = vmatpush1.bf16.msra.mxu0 %v11240_v5  ;;  %v11245_v5 = vld [vmem:[%s14702_s13 + $0x94] ss:$12 sps:$4 sm:$0xff]  }
0x1259   :  { %9174 = vmatprep.subr.bf16.mxu0 %v11241_v50  ;;  %v11246_v50 = vld [vmem:[%s14702_s13 + $0x90] ss:$12 sps:$4 sm:$0xff]  }
0x125c   :  { %9176 = vmatpush1.bf16.msra.mxu0 %v11242_v21  ;;  %v11247_v21 = vld [vmem:[%s14702_s13 + $0xac] ss:$12 sps:$4 sm:$0xff]  }
0x125d   :  { %9178 = vmatprep.subr.bf16.mxu0 %v11243_v34  ;;  %v11248_v34 = vld [vmem:[%s14702_s13 + $0xa8] ss:$12 sps:$4 sm:$0xff]  }
0x1260   :  { %9180 = vmatpush1.bf16.msra.mxu0 %v11244_v24  ;;  %v11249_v24 = vld [vmem:[%s14702_s13 + $0xc4] ss:$12 sps:$4 sm:$0xff]  }
0x1261   :  { %9182 = vmatprep.subr.bf16.mxu0 %v11245_v5  ;;  %v11250_v5 = vld [vmem:[%s14702_s13 + $0xc0] ss:$12 sps:$4 sm:$0xff]  }
0x1264   :  { %9184 = vmatpush1.bf16.msra.mxu0 %v11246_v50  ;;  %v11251_v50 = vld [vmem:[%s14702_s13 + $0xdc] ss:$12 sps:$4 sm:$0xff]  }
0x1265   :  { %9186 = vmatprep.subr.bf16.mxu0 %v11247_v21  ;;  %v11252_v21 = vld [vmem:[%s14702_s13 + $0xd8] ss:$12 sps:$4 sm:$0xff]  }
0x1268   :  { %9188 = vmatpush1.bf16.msra.mxu0 %v11248_v34  ;;  %v11253_v34 = vld [vmem:[%s14702_s13 + $0xf4] ss:$12 sps:$4 sm:$0xff]  }
0x1269   :  { %9190 = vmatprep.subr.bf16.mxu0 %v11249_v24  ;;  %v11254_v24 = vld [vmem:[%s14702_s13 + $0xf0] ss:$12 sps:$4 sm:$0xff]  }
0x126c   :  { %9192 = vmatpush1.bf16.msra.mxu0 %v11250_v5  ;;  %v11255_v5 = vld [vmem:[%s14702_s13 + $0x10c] ss:$12 sps:$4 sm:$0xff]  }
0x126d   :  { %9194 = vmatprep.subr.bf16.mxu0 %v11251_v50  ;;  %v11256_v50 = vld [vmem:[%s14702_s13 + $0x108] ss:$12 sps:$4 sm:$0xff]  }
0x1270   :  { %9196 = vmatpush1.bf16.msra.mxu0 %v11252_v21  ;;  %v14801_v21 = vld [vmem:[#allocation5_spill] sm:$0xff] }
0x1271   :  { %9198 = vmatprep.subr.bf16.mxu0 %v11253_v34  ;;  %v14802_v34 = vld [vmem:[#allocation6_spill] sm:$0xff]  ;;  %14806 = vst [vmem:[#allocation5_spill] sm:$0xff] %v12911_v28 }
0x1274   :  { %9200 = vmatpush1.bf16.msra.mxu0 %v11254_v24  ;;  %v14803_v24 = vld [vmem:[#allocation7_spill] sm:$0xff] }
0x1275   :  { %9202 = vmatprep.subr.bf16.mxu0 %v11255_v5  ;;  %v14805_v5 = vld [vmem:[#allocation9_spill] sm:$0xff] }
0x1278   :  { %9204 = vmatpush1.bf16.msra.mxu0 %v11256_v50 }
0x1279   :  { %9206 = vmatprep.subr.bf16.mxu0 %v12301_v3  ;;  %v12918_v3 = vld [vmem:[%s14700_s10 + $0x104] ss:$8 sps:$4 sm:$0xff]  }
0x127a   :  { %9148 = vmatprep.subr.bf16.mxu1 %v12918_v3 }
0x127c   :  { %9208 = vmatpush1.bf16.msra.mxu0 %v12306_v33 }
0x127d   :  { %9210 = vmatprep.subr.bf16.mxu0 %v12311_v6  ;;  %v12924_v6 = vld [vmem:[%s14700_s10 + $0x100] ss:$8 sps:$4 sm:$0xff]  }
0x1280   :  { %9212 = vmatpush1.bf16.msra.mxu0 %v14801_v21 }
0x1281   :  { %9214 = vmatprep.subr.bf16.mxu0 %v14802_v34 }
0x1284   :  { %9216 = vmatpush1.bf16.msra.mxu0 %v14803_v24 }
0x1285   :  { %9218 = vmatprep.subr.bf16.mxu0 %v14804_v44 }
0x1288   :  { %9220 = vmatpush1.bf16.msra.mxu0 %v14805_v5 }
0x128b   :  { %3753 = vmatmul.mubr.f32.vlgmr.msra.gmra.mrb[32].mxu0 %v12911_v28 }
0x128c   :  { %4089 = vmatprep.mubr.f32.mxu0 %v12377_v11 }
0x130c   :  { %v3462_v33 = vpop.f32.mrb[28].mxu0 }
0x130d   :  { %v3464_v44 = vpop.f32.mrb[29].mxu0 }
0x130e   :  { %3610 = vmatprep.mubr.f32.mxu1 %v3464_v44 }
0x130f   :  { %3611 = vmatmul.mubr.f32.vlgmr.msra.gmra.mrb[20].mxu1 %v3462_v33 }
0x1310   :  { %9150 = vmatpush1.bf16.msra.mxu1 %v12924_v6  ;;  %3681 = vmatprep.mubr.f32.mxu1 %v12377_v11 }
0x1311   :  { %9153 = vmatprep.subr.msk.bf16.mxu1 %vm11478_vm6, %v12929_v43 }
0x1314   :  { %9156 = vmatpush1.bf16.msk.msra.mxu1 %vm11478_vm6, %v12935_v23 }
0x1315   :  { %9222 = vmatprep.subr.bf16.mxu1 %v12437_v13 }
0x131e   :  { %v3533_v50 = vpop.f32.mrb[30].mxu0 }
0x131f   :  { %v8433_v21 = vpop.f32.mrb[31].mxu0  ;;  %7550 = vmatmul.mubr.msk.f32.vlgmr.msra.gmra.mrb[20].mxu1 %vm1664_vm9, %v3533_v50 }
0x1320   :  { %9224 = vmatpush3.bf16.msra.mxu1 %v12446_v47  ;;  %3823 = vmatprep.mubr.f32.mxu1 %v12823_v1 }
0x1321   :  { %9226 = vmatprep.subr.bf16.mxu1 %v12451_v49 }
0x1324   :  { %9228 = vmatpush3.bf16.msra.mxu1 %v12459_v52 }
0x1325   :  { %9230 = vmatprep.subr.bf16.mxu1 %v12465_v53 }
0x1328   :  { %9232 = vmatpush3.bf16.msra.mxu1 %v12471_v54 }
0x1329   :  { %9234 = vmatprep.subr.bf16.mxu1 %v12477_v55 }
0x132c   :  { %9236 = vmatpush3.bf16.msra.mxu1 %v12483_v56 }
0x132d   :  { %9238 = vmatprep.subr.bf16.mxu1 %v12489_v57 }
0x1330   :  { %9240 = vmatpush3.bf16.msra.mxu1 %v12495_v58 }
0x1331   :  { %9242 = vmatprep.subr.bf16.mxu1 %v12501_v59 }
0x1334   :  { %9244 = vmatpush3.bf16.msra.mxu1 %v12507_v60 }
0x1335   :  { %9246 = vmatprep.subr.bf16.mxu1 %v12513_v14 }
0x1338   :  { %9248 = vmatpush3.bf16.msra.mxu1 %v12519_v16 }
0x1339   :  { %9250 = vmatprep.subr.bf16.mxu1 %v12525_v17 }
0x133c   :  { %9252 = vmatpush3.bf16.msra.mxu1 %v12531_v20 }
0x133d   :  { %9282 = vmatprep.subr.bf16.mxu1 %v12592_v8 }
0x133f   :  { %3824 = vmatmul.mubr.f32.vlgmr.msra.gmra.mrb[22].mxu1 %v12911_v28 }
0x1340   :  { %9284 = vmatpush1.bf16.msra.mxu1 %v12597_v19 }
0x1341   :  { %9286 = vmatprep.subr.bf16.mxu1 %v12602_v38 }
0x1344   :  { %9288 = vmatpush1.bf16.msra.mxu1 %v12609_v48 }
0x1345   :  { %9290 = vmatprep.subr.bf16.mxu1 %v12615_v37 }
0x1348   :  { %9292 = vmatpush1.bf16.msra.mxu1 %v12621_v7 }
0x1349   :  { %9294 = vmatprep.subr.bf16.mxu1 %v12627_v35 }
0x134c   :  { %9296 = vmatpush1.bf16.msra.mxu1 %v12633_v4 }
0x134d   :  { %9298 = vmatprep.subr.bf16.mxu1 %v12639_v0 }
0x1350   :  { %9300 = vmatpush1.bf16.msra.mxu1 %v12650_v62 }
0x1351   :  { %9302 = vmatprep.subr.bf16.mxu1 %v12657_v9 }
0x1354   :  { %9304 = vmatpush1.bf16.msra.mxu1 %v12668_v10 }
0x1355   :  { %9306 = vmatprep.subr.bf16.mxu1 %v12674_v61 }
0x1358   :  { %9308 = vmatpush1.bf16.msra.mxu1 %v12681_v32 }
0x1359   :  { %9310 = vmatprep.subr.bf16.mxu1 %v12687_v39 }
0x135c   :  { %9312 = vmatpush1.bf16.msra.mxu1 %v12699_v2 }
0x135d   :  { %9314 = vmatprep.subr.bf16.mxu1 %v12705_v27 }
0x135e   :  { %v12980_v13 = vpop.f32.mrb[32].mxu0 }
0x135f   :  { %v12982_v47 = vpop.f32.mrb[33].mxu0  ;;  %3864 = vrot.lane.b32.xlu0 %v12980_v13, %s11264_s3  ;;  %3844 = vrot.lane.b32.xlu1 %v12980_v13, %s11262_s2 }
0x1360   :  { %9316 = vmatpush1.bf16.msra.mxu1 %v12712_v29 }
0x1361   :  { %9318 = vmatprep.subr.bf16.mxu1 %v12718_v31 }
0x1363   :  { %3904 = vrot.lane.b32.xlu0 %v12980_v13, %s11273_s30  ;;  %3884 = vrot.lane.b32.xlu1 %v12980_v13, %s11271_s9 }
0x1364   :  { %9320 = vmatpush1.bf16.msra.mxu1 %v12727_v25 }
0x1365   :  { %9322 = vmatprep.subr.bf16.mxu1 %v12733_v30 }
0x1367   :  { %3924 = vrot.lane.b32.xlu1 %v12980_v13, %s11265_s28  ;;  %3866 = vrot.lane.b32.xlu0 %v12982_v47, %s11264_s3 }
0x1368   :  { %9324 = vmatpush1.bf16.msra.mxu1 %v12741_v41 }
0x1369   :  { %9326 = vmatprep.subr.bf16.mxu1 %v12747_v26 }
0x136b   :  { %3886 = vrot.lane.b32.xlu0 %v12982_v47, %s11271_s9  ;;  %3846 = vrot.lane.b32.xlu1 %v12982_v47, %s11262_s2 }
0x136c   :  { %9328 = vmatpush1.bf16.msra.mxu1 %v12762_v22 }
0x136d   :  { %9330 = vmatprep.subr.bf16.mxu1 %v12767_v42 }
0x136f   :  { %3906 = vrot.lane.b32.xlu0 %v12982_v47, %s11273_s30 }
0x1370   :  { %9332 = vmatpush1.bf16.msra.mxu1 %v12779_v12 }
0x1371   :  { %9334 = vmatprep.subr.bf16.mxu1 %v12785_v63 }
0x1373   :  { %3926 = vrot.lane.b32.xlu0 %v12982_v47, %s11265_s28 }
0x1374   :  { %9336 = vmatpush1.bf16.msra.mxu1 %v12792_v18 }
0x1375   :  { %9338 = vmatprep.subr.bf16.mxu1 %v12798_v51 }
0x1378   :  { %9340 = vmatpush1.bf16.msra.mxu1 %v12805_v40 }
0x1379   :  { %9342 = vmatprep.subr.bf16.mxu1 %v12811_v45 }
0x137c   :  { %9344 = vmatpush1.bf16.msra.mxu1 %v12819_v46 }
0x137d   :  { %9346 = vmatprep.subr.bf16.mxu1 %v12918_v3 }
0x13d1   :  { %v3845_v14 = vpop.permute.xlu1 %3844 }
0x13d5   :  { %v3885_v17 = vpop.permute.xlu1 %3884 }
0x13d9   :  { %v3925_v8 = vpop.permute.xlu1 %3924 }
0x13dd   :  { %v3847_v38 = vpop.permute.xlu1 %3846 }
0x13de   :  { %v3850_v37 = vsel %vm1678_vm10, %v3845_v14, %v3847_v38 }
0x13df   :  { %v9255_v62 = vpack.c.bf16 %v3850_v37, %v12980_v13 }
0x13f2   :  { %v13020_v49 = vpop.f32.mrb[20].mxu1 }
0x13f3   :  { %v4314_v52 = vsel %vm4313_vm1, %v13020_v49, 0.0  ;;  %v13024_v53 = vpop.f32.mrb[21].mxu1 }
0x13f4   :  { %v4315_v54 = vsel %vm4313_vm1, %v13024_v53, 0.0 }
0x13f5   :  { %v4316_v55 = vadd.f32 %v4315_v54, %v4314_v52 }
0x1412   :  { %v7888_v56 = vpop.f32.mrb[22].mxu1 }
0x1413   :  { %v7889_v57 = vpop.f32.mrb[23].mxu1 }
0x1414   :  { %v7890_v58 = vadd.f32 %v7889_v57, %v7888_v56  ;;  %v14807_v56 = vmov 0.0|0.0  }
0x1416   :  { %3831 = vst.msk [vmem:[#allocation2 + $0x10] sm:$0xff] %vm1657_vm8, %v7890_v58  ;;  %v13081_v58 = vld [vmem:[#allocation2 + $0x8] sm:$0xff] }
0x141d   :  { %v3840_v59 = vld [vmem:[#allocation2 + $0x10] sm:$0xff] }
0x141e   :  { %3848 = vrot.lane.b32.xlu0 %v3840_v59, %s11262_s2  ;;  %3868 = vrot.lane.b32.xlu1 %v3840_v59, %s11264_s3  ;;  %4646 = vst.msk [vmem:[#allocation2 + $0x10] sm:$0xff] %vm1657_vm8, %v12377_v11  ;;  %v3865_v11 = vpop.permute.xlu0 %3864 }
0x141f   :  { %3837 = vst.msk [vmem:[#allocation3 + $0x10] sm:$0xff] %vm1664_vm9, %v3840_v59 }
0x1422   :  { %3946 = vrot.lane.b32.xlu0 %v12982_v47, %s11274_s4  ;;  %3888 = vrot.lane.b32.xlu1 %v3840_v59, %s11271_s9  ;;  %v3905_v60 = vpop.permute.xlu0 %3904 }
0x1426   :  { %3966 = vrot.lane.b32.xlu0 %v12982_v47, %s11272_s5  ;;  %3908 = vrot.lane.b32.xlu1 %v3840_v59, %s11273_s30  ;;  %v3867_v16 = vpop.permute.xlu0 %3866  ;;  %v4000_v54 = vld [vmem:[#allocation3 + $0x10] sm:$0xff] }
0x1427   :  { %v3870_v2 = vsel %vm1699_vm11, %v3865_v11, %v3867_v16 }
0x142a   :  { %3944 = vrot.lane.b32.xlu0 %v12980_v13, %s11274_s4  ;;  %3928 = vrot.lane.b32.xlu1 %v3840_v59, %s11265_s28  ;;  %v3887_v20 = vpop.permute.xlu0 %3886 }
0x142b   :  { %v3890_v9 = vsel %vm1720_vm12, %v3885_v17, %v3887_v20 }
0x142c   :  { %v9259_v29 = vpack.c.bf16 %v3890_v9, %v3870_v2 }
0x142e   :  { %3986 = vrot.lane.b32.xlu0 %v12982_v47, %s11275_s6  ;;  %3948 = vrot.lane.b32.xlu1 %v3840_v59, %s11274_s4  ;;  %v3907_v19 = vpop.permute.xlu0 %3906 }
0x142f   :  { %v3910_v42 = vsel %vm1741_vm13, %v3905_v60, %v3907_v19 }
0x1432   :  { %3984 = vrot.lane.b32.xlu0 %v12980_v13, %s11275_s6  ;;  %3968 = vrot.lane.b32.xlu1 %v3840_v59, %s11272_s5  ;;  %v3927_v48 = vpop.permute.xlu0 %3926 }
0x1433   :  { %v3930_v30 = vsel %vm1762_vm14, %v3925_v8, %v3927_v48 }
0x1434   :  { %v9263_v63 = vpack.c.bf16 %v3930_v30, %v3910_v42 }
0x1436   :  { %3964 = vrot.lane.b32.xlu1 %v12980_v13, %s11272_s5 }
0x143a   :  { %3988 = vrot.lane.b32.xlu1 %v3840_v59, %s11275_s6 }
0x145e   :  { %4317 = vadd.xlane.f32.xlu1 %v4316_v55 }
0x1490   :  { %v3849_v7 = vpop.permute.xlu0 %3848  ;;  %v3869_v35 = vpop.permute.xlu1 %3868 }
0x1491   :  { %v3851_v4 = vsel %vm1678_vm10, %v3847_v38, %v3849_v7  ;;  %3857 = vst.msk [vmem:[#allocation3 + $0x28] sm:$0xff] %vm1664_vm9, %v3849_v7  ;;  %3877 = vst.msk [vmem:[#allocation3 + $0x40] sm:$0xff] %vm1664_vm9, %v3869_v35  ;;  %v3871_v32 = vsel %vm1699_vm11, %v3867_v16, %v3869_v35 }
0x1492   :  { %v9253_v0 = vpack.c.bf16 %v3851_v4, %v12982_v47 }
0x1494   :  { %v3947_v10 = vpop.permute.xlu0 %3946  ;;  %v3889_v61 = vpop.permute.xlu1 %3888  ;;  %9254 = vmatprep.subr.bf16.mxu0 %v9253_v0 }
0x1495   :  { %v3891_v39 = vsel %vm1720_vm12, %v3887_v20, %v3889_v61  ;;  %3897 = vst.msk [vmem:[#allocation3 + $0x58] sm:$0xff] %vm1664_vm9, %v3889_v61  ;;  %9256 = vmatpush1.bf16.msra.mxu0 %v9255_v62 }
0x1496   :  { %v9257_v27 = vpack.c.bf16 %v3891_v39, %v3871_v32 }
0x1498   :  { %v3909_v31 = vpop.permute.xlu1 %3908  ;;  %9258 = vmatprep.subr.bf16.mxu0 %v9257_v27  ;;  %v3967_v25 = vpop.permute.xlu0 %3966  ;;  %v4003_v47 = vld [vmem:[#allocation3 + $0x28] sm:$0xff]  ;;  %v4006_v59 = vld [vmem:[#allocation3 + $0x40] sm:$0xff] }
0x1499   :  { %3917 = vst.msk [vmem:[#allocation3 + $0x70] sm:$0xff] %vm1664_vm9, %v3909_v31  ;;  %9260 = vmatpush1.bf16.msra.mxu0 %v9259_v29  ;;  %v3911_v26 = vsel %vm1741_vm13, %v3907_v19, %v3909_v31  ;;  %v9270_v55 = vpack.c.bf16 %v4003_v47, %v4000_v54  ;;  %v13221_v47 = vld [vmem:[%s14702_s13 + $0xc4] ss:$12 sps:$4 sm:$0xff]   ;;  %v13233_v54 = vld [vmem:[%s14702_s13 + $0xdc] ss:$12 sps:$4 sm:$0xff]  }
0x149c   :  { %v3929_v41 = vpop.permute.xlu1 %3928  ;;  %v3945_v18 = vpop.permute.xlu0 %3944  ;;  %v4009_v57 = vld [vmem:[#allocation3 + $0x58] sm:$0xff] }
0x149d   :  { %v3931_v22 = vsel %vm1762_vm14, %v3927_v48, %v3929_v41  ;;  %3937 = vst.msk [vmem:[#allocation3 + $0x88] sm:$0xff] %vm1664_vm9, %v3929_v41  ;;  %v3950_v3 = vsel %vm1783_vm15, %v3945_v18, %v3947_v10  ;;  %v9273_v11 = vpack.c.bf16 %v4009_v57, %v4006_v59  ;;  %v13136_v18 = vld [vmem:[%s14702_s13 + $0x1c] ss:$12 sps:$4 sm:$0xff]   ;;  %v13245_v57 = vld [vmem:[%s14702_s13 + $0xf4] ss:$12 sps:$4 sm:$0xff]  }
0x149e   :  { %v9261_v12 = vpack.c.bf16 %v3931_v22, %v3911_v26  ;;  %v13251_v59 = vld [vmem:[%s14702_s13 + $0xf0] ss:$12 sps:$4 sm:$0xff]  }
0x14a0   :  { %v3949_v51 = vpop.permute.xlu1 %3948  ;;  %9262 = vmatprep.subr.bf16.mxu0 %v9261_v12  ;;  %v3987_v34 = vpop.permute.xlu0 %3986  ;;  %v4012_v14 = vld [vmem:[#allocation3 + $0x70] sm:$0xff]  ;;  %v13126_v12 = vld [vmem:[%s14702_s13 + $0x4] ss:$12 sps:$4 sm:$0xff]  }
0x14a1   :  { %3957 = vst.msk [vmem:[#allocation3 + $0xa0] sm:$0xff] %vm1664_vm9, %v3949_v51  ;;  %9264 = vmatpush1.bf16.msra.mxu0 %v9263_v63  ;;  %v3951_v45 = vsel %vm1783_vm15, %v3947_v10, %v3949_v51  ;;  %v13131_v63 = vld [vmem:[%s14702_s13] ss:$12 sps:$4 sm:$0xff]   ;;  %v13143_v51 = vld [vmem:[%s14702_s13 + $0x18] ss:$12 sps:$4 sm:$0xff]  }
0x14a4   :  { %v3969_v40 = vpop.permute.xlu1 %3968  ;;  %v3985_v50 = vpop.permute.xlu0 %3984  ;;  %v4015_v60 = vld [vmem:[#allocation3 + $0x88] sm:$0xff] }
0x14a5   :  { %v3971_v46 = vsel %vm1804_vm2, %v3967_v25, %v3969_v40  ;;  %3977 = vst.msk [vmem:[#allocation3 + $0xb8] sm:$0xff] %vm1664_vm9, %v3969_v40  ;;  %v3990_v52 = vsel %vm1825_vm3, %v3985_v50, %v3987_v34  ;;  %v9276_v16 = vpack.c.bf16 %v4015_v60, %v4012_v14  ;;  %v13149_v40 = vld [vmem:[%s14702_s13 + $0x34] ss:$12 sps:$4 sm:$0xff]   ;;  %v13203_v50 = vld [vmem:[%s14702_s13 + $0x90] ss:$12 sps:$4 sm:$0xff]  }
0x14a6   :  { %v9265_v24 = vpack.c.bf16 %v3971_v46, %v3951_v45  ;;  %v13155_v45 = vld [vmem:[%s14702_s13 + $0x30] ss:$12 sps:$4 sm:$0xff]   ;;  %v13161_v46 = vld [vmem:[%s14702_s13 + $0x4c] ss:$12 sps:$4 sm:$0xff]   ;;  %v13263_v60 = vld [vmem:[%s14702_s13 + $0x108] ss:$12 sps:$4 sm:$0xff]  }
0x14a7   :  { %v13269_v14 = vld [vmem:[%s14702_s13 + $0x124] ss:$12 sps:$4 sm:$0xff]  }
0x14a8   :  { %v3965_v5 = vpop.permute.xlu1 %3964  ;;  %9266 = vmatprep.subr.bf16.mxu0 %v9265_v24  ;;  %v4018_v20 = vld [vmem:[#allocation3 + $0xa0] sm:$0xff]  ;;  %v13173_v24 = vld [vmem:[%s14702_s13 + $0x64] ss:$12 sps:$4 sm:$0xff]  }
0x14a9   :  { %v3970_v33 = vsel %vm1804_vm2, %v3965_v5, %v3967_v25  ;;  %v13179_v5 = vld [vmem:[%s14702_s13 + $0x60] ss:$12 sps:$4 sm:$0xff]  }
0x14aa   :  { %v9267_v44 = vpack.c.bf16 %v3970_v33, %v3950_v3  ;;  %v13185_v3 = vld [vmem:[%s14702_s13 + $0x7c] ss:$12 sps:$4 sm:$0xff]   ;;  %v13191_v33 = vld [vmem:[%s14702_s13 + $0x78] ss:$12 sps:$4 sm:$0xff]  }
0x14ac   :  { %v3989_v21 = vpop.permute.xlu1 %3988  ;;  %9268 = vmatpush1.bf16.msra.mxu0 %v9267_v44  ;;  %v4021_v17 = vld [vmem:[#allocation3 + $0xb8] sm:$0xff] }
0x14ad   :  { %v3991_v13 = vsel %vm1825_vm3, %v3987_v34, %v3989_v21  ;;  %3997 = vst.msk [vmem:[#allocation3 + $0xd0] sm:$0xff] %vm1664_vm9, %v3989_v21  ;;  %v9279_v8 = vpack.c.bf16 %v4021_v17, %v4018_v20  ;;  %v13167_v34 = vld [vmem:[%s14702_s13 + $0x48] ss:$12 sps:$4 sm:$0xff]   ;;  %v13209_v21 = vld [vmem:[%s14702_s13 + $0xac] ss:$12 sps:$4 sm:$0xff]  }
0x14ae   :  { %4041 = vmatprep.subr.mxu0 %v3991_v13  ;;  %v13197_v44 = vld [vmem:[%s14702_s13 + $0x94] ss:$12 sps:$4 sm:$0xff]   ;;  %v13281_v17 = vld [vmem:[%s14702_s13 + $0x13c] ss:$12 sps:$4 sm:$0xff]   ;;  %v13287_v20 = vld [vmem:[%s14702_s13 + $0x138] ss:$12 sps:$4 sm:$0xff]  }
0x14af   :  { %v13215_v13 = vld [vmem:[%s14702_s13 + $0xa8] ss:$12 sps:$4 sm:$0xff]  }
0x14b0   :  { %4042 = vmatpush1.msra.mxu0 %v3990_v52  ;;  %v13227_v52 = vld [vmem:[%s14702_s13 + $0xc0] ss:$12 sps:$4 sm:$0xff]  }
0x14b1   :  { %7551 = vmatmul.mubr.msk.f32.vlgmr.msra.gmra.mrb[34].mxu0 %vm247_vm7, %v12754_v36  ;;  %9269 = vmatprep.subr.bf16.mxu0 %v14807_v56 }
0x14b2   :  { %9271 = vmatpush3.bf16.msra.mxu0 %v9270_v55  ;;  %8452 = vmatprep.mubr.msk.f32.mxu0 %vm11259_vm0, %v13081_v58  ;;  %v13239_v55 = vld [vmem:[%s14702_s13 + $0xd8] ss:$12 sps:$4 sm:$0xff]  }
0x14b3   :  { %9272 = vmatprep.subr.bf16.mxu0 %v14807_v56 }
0x14b4   :  { %v4024_v19 = vld [vmem:[#allocation3 + $0xd0] sm:$0xff] }
0x14b6   :  { %9274 = vmatpush3.bf16.msra.mxu0 %v9273_v11  ;;  %v13257_v11 = vld [vmem:[%s14702_s13 + $0x10c] ss:$12 sps:$4 sm:$0xff]  }
0x14b7   :  { %9275 = vmatprep.subr.bf16.mxu0 %v14807_v56 }
0x14ba   :  { %9277 = vmatpush3.bf16.msra.mxu0 %v9276_v16  ;;  %v13275_v16 = vld [vmem:[%s14702_s13 + $0x120] ss:$12 sps:$4 sm:$0xff]  }
0x14bb   :  { %9278 = vmatprep.subr.bf16.mxu0 %v14807_v56 }
0x14be   :  { %9280 = vmatpush3.bf16.msra.mxu0 %v9279_v8 }
0x14bf   :  { %8450 = vmatprep.subr.mxu0 %v13081_v58 }
0x14c2   :  { %8451 = vmatpush3.msra.mxu0 %v4024_v19 }
0x14c3   :  { %8453 = vmatmul.mubr.msk.f32.vlgmr.msra.gmra.mrb[36].mxu0 %vm247_vm7, %v12754_v36  ;;  %9356 = vmatprep.subr.bf16.mxu0 %v13126_v12 }
0x14c4   :  { %9358 = vmatpush1.bf16.msra.mxu0 %v13131_v63 }
0x14c5   :  { %9360 = vmatprep.subr.bf16.mxu0 %v13136_v18 }
0x14c8   :  { %9362 = vmatpush1.bf16.msra.mxu0 %v13143_v51 }
0x14c9   :  { %9364 = vmatprep.subr.bf16.mxu0 %v13149_v40 }
0x14cc   :  { %9366 = vmatpush1.bf16.msra.mxu0 %v13155_v45 }
0x14cd   :  { %9368 = vmatprep.subr.bf16.mxu0 %v13161_v46 }
0x14d0   :  { %9370 = vmatpush1.bf16.msra.mxu0 %v13167_v34 }
0x14d1   :  { %9372 = vmatprep.subr.bf16.mxu0 %v13173_v24 }
0x14d4   :  { %9374 = vmatpush1.bf16.msra.mxu0 %v13179_v5 }
0x14d5   :  { %9376 = vmatprep.subr.bf16.mxu0 %v13185_v3 }
0x14d8   :  { %9378 = vmatpush1.bf16.msra.mxu0 %v13191_v33 }
0x14d9   :  { %9380 = vmatprep.subr.bf16.mxu0 %v13197_v44 }
0x14dc   :  { %9382 = vmatpush1.bf16.msra.mxu0 %v13203_v50 }
0x14dd   :  { %9384 = vmatprep.subr.bf16.mxu0 %v13209_v21 }
0x14e0   :  { %9386 = vmatpush1.bf16.msra.mxu0 %v13215_v13 }
0x14e1   :  { %9388 = vmatprep.subr.bf16.mxu0 %v13221_v47 }
0x14e4   :  { %9390 = vmatpush1.bf16.msra.mxu0 %v13227_v52 }
0x14e5   :  { %9392 = vmatprep.subr.bf16.mxu0 %v13233_v54 }
0x14e8   :  { %9394 = vmatpush1.bf16.msra.mxu0 %v13239_v55 }
0x14e9   :  { %9396 = vmatprep.subr.bf16.mxu0 %v13245_v57 }
0x14eb   :  { %v4318_v0 = vpop.xlane.xlu1 %4317 }
0x14ec   :  { %9398 = vmatpush1.bf16.msra.mxu0 %v13251_v59 }
0x14ed   :  { %9400 = vmatprep.subr.bf16.mxu0 %v13257_v11 }
0x14f0   :  { %9402 = vmatpush1.bf16.msra.mxu0 %v13263_v60 }
0x14f1   :  { %9404 = vmatprep.subr.bf16.mxu0 %v13269_v14 }
0x14f4   :  { %9406 = vmatpush1.bf16.msra.mxu0 %v13275_v16 }
0x14f5   :  { %9408 = vmatprep.subr.bf16.mxu0 %v13281_v17 }
0x14f8   :  { %9410 = vmatpush1.bf16.msra.mxu0 %v13287_v20 }
0x1584   :  { %v4091_v38 = vpop.f32.mrb[34].mxu0 }
0x1585   :  { %v4093_v48 = vpop.f32.mrb[35].mxu0 }
0x1586   :  { %4233 = vmatprep.mubr.f32.mxu1 %v4093_v48 }
0x1587   :  { %4234 = vmatmul.mubr.f32.vlgmr.msra.gmra.mrb[24].mxu1 %v4091_v38 }
0x1588   :  { %9348 = vmatpush1.bf16.msra.mxu1 %v12924_v6  ;;  %4304 = vmatprep.mubr.f32.mxu1 %v13081_v58 }
0x1589   :  { %9351 = vmatprep.subr.msk.bf16.mxu1 %vm11478_vm6, %v12929_v43 }
0x158c   :  { %9354 = vmatpush1.bf16.msk.msra.mxu1 %vm11478_vm6, %v12935_v23 }
0x1596   :  { %v4162_v37 = vpop.f32.mrb[36].mxu0 }
0x1597   :  { %v8454_v7 = vpop.f32.mrb[37].mxu0  ;;  %7555 = vmatmul.mubr.msk.f32.vlgmr.msra.gmra.mrb[24].mxu1 %vm1664_vm9, %v4162_v37 }
0x1598   :  { %5052 = vmatprep.mubr.f32.mxu1 %v13081_v58  ;;  %v4311_v7 = vld [vmem:[%s14705_s15] sm:$0xf] }
0x166a   :  { %v13101_v36 = vpop.f32.mrb[24].mxu1 }
0x166b   :  { %v4320_v6 = vsel %vm4313_vm1, %v13101_v36, 0.0  ;;  %v13105_v35 = vpop.f32.mrb[25].mxu1 }
0x166c   :  { %v4321_v43 = vsel %vm4313_vm1, %v13105_v35, 0.0 }
0x166d   :  { %v4322_v4 = vadd.f32 %v4321_v43, %v4320_v6 }
0x166f   :  { %4323 = vadd.xlane.f32.xlu0 %v4322_v4  ;;  %v13297_v4 = vld [vmem:[%s14702_s13 + $0x154] ss:$12 sps:$4 sm:$0xff]  }
0x1670   :  { %9412 = vmatprep.subr.bf16.mxu0 %v13297_v4 }
0x16fc   :  { %v4324_v23 = vpop.xlane.xlu0 %4323 }
0x16fd   :  { %v4325_v62 = vadd.f32 %v4324_v23, %v4318_v0  ;;  %v4312_v0 = vld [vmem:[%s14706_s16] sm:$0xf]  ;;  %v13305_v23 = vld [vmem:[%s14702_s13 + $0x150] ss:$12 sps:$4 sm:$0xff]  }
0x16fe   :  { %9414 = vmatpush1.bf16.msra.mxu0 %v13305_v23 }
0x16ff   :  { %v13109_v9 = vmul.f32 0.001953125, %v4325_v62 }
0x1701   :  { %v4337_v10 = vsub.f32 %v13101_v36, %v13109_v9  ;;  %v4338_v61 = vsub.f32 %v13105_v35, %v13109_v9  ;;  %v4327_v32 = vsub.f32 %v13020_v49, %v13109_v9  ;;  %v4328_v39 = vsub.f32 %v13024_v53, %v13109_v9 }
0x1703   :  { %v4339_v2 = vmul.f32 %v4337_v10, %v4337_v10  ;;  %v4340_v27 = vmul.f32 %v4338_v61, %v4338_v61  ;;  %v4329_v29 = vmul.f32 %v4327_v32, %v4327_v32  ;;  %v4330_v31 = vmul.f32 %v4328_v39, %v4328_v39  ;;  %v13313_v61 = vld [vmem:[%s14702_s13 + $0x16c] ss:$12 sps:$4 sm:$0xff]   ;;  %v13318_v32 = vld [vmem:[%s14702_s13 + $0x168] ss:$12 sps:$4 sm:$0xff]  }
0x1704   :  { %9416 = vmatprep.subr.bf16.mxu0 %v13313_v61 }
0x1705   :  { %v4341_v25 = vsel %vm4313_vm1, %v4339_v2, 0.0  ;;  %v4342_v30 = vsel %vm4313_vm1, %v4340_v27, 0.0  ;;  %v4331_v41 = vsel %vm4313_vm1, %v4329_v29, 0.0  ;;  %v4332_v26 = vsel %vm4313_vm1, %v4330_v31, 0.0  ;;  %9418 = vmatpush1.bf16.msra.mxu0 %v13318_v32 }
0x1706   :  { %v4343_v22 = vadd.f32 %v4342_v30, %v4341_v25  ;;  %v4333_v42 = vadd.f32 %v4332_v26, %v4331_v41  ;;  %v13341_v26 = vld [vmem:[%s14702_s13 + $0x8] ss:$12 sps:$4 sm:$0xff]  }
0x1707   :  { %14808 = vst [vmem:[#allocation6_spill] sm:$0xff] %v13341_v26 }
0x1708   :  { %4344 = vadd.xlane.f32.xlu1 %v4343_v22  ;;  %4334 = vadd.xlane.f32.xlu0 %v4333_v42  ;;  %v13358_v22 = vld [vmem:[%s14702_s13 + $0xf8] ss:$12 sps:$4 sm:$0xff]  }
0x1709   :  { %14811 = vst [vmem:[#allocation9_spill] sm:$0xff] %v13358_v22  ;;  %v13364_v42 = vld [vmem:[%s14702_s13 + $0x38] ss:$12 sps:$4 sm:$0xff]  }
0x170a   :  { %14812 = vst [vmem:[#allocation13_spill] sm:$0xff] %v13364_v42 }
0x1795   :  { %v4345_v8 = vpop.xlane.xlu1 %4344  ;;  %v4335_v19 = vpop.xlane.xlu0 %4334 }
0x1796   :  { %v4346_v38 = vadd.f32 %v4345_v8, %v4335_v19  ;;  %v13370_v8 = vld [vmem:[%s14702_s13 + $0x110] ss:$12 sps:$4 sm:$0xff]  }
0x1797   :  { %14813 = vst [vmem:[#allocation14_spill] sm:$0xff] %v13370_v8  ;;  %v13376_v19 = vld [vmem:[%s14702_s13 + $0x50] ss:$12 sps:$4 sm:$0xff]  }
0x1798   :  { %v4347_v48 = vmul.f32 0.001953125, %v4346_v38  ;;  %14814 = vst [vmem:[#allocation15_spill] sm:$0xff] %v13376_v19  ;;  %v13382_v38 = vld [vmem:[%s14702_s13 + $0x128] ss:$12 sps:$4 sm:$0xff]  }
0x1799   :  { %14815 = vst [vmem:[#allocation16_spill] sm:$0xff] %v13382_v38 }
0x179a   :  { %v4348_v37 = vadd.f32 1e-05, %v4347_v48  ;;  %v13388_v48 = vld [vmem:[%s14702_s13 + $0x68] ss:$12 sps:$4 sm:$0xff]  }
0x179b   :  { %14816 = vst [vmem:[#allocation17_spill] sm:$0xff] %v13388_v48 }
0x179c   :  { %11225 = vrsqrt.f32 %v4348_v37  ;;  %v13394_v37 = vld [vmem:[%s14702_s13 + $0x140] ss:$12 sps:$4 sm:$0xff]  }
0x179d   :  { %14817 = vst [vmem:[#allocation18_spill] sm:$0xff] %v13394_v37 }
0x17a6   :  { %v11226_v6 = vpop.eup %11225 }
0x17a7   :  { %v4350_v43 = vmul.f32 %v11226_v6, %v4311_v7  ;;  %v13400_v7 = vld [vmem:[%s14702_s13 + $0x80] ss:$12 sps:$4 sm:$0xff]   ;;  %v13406_v6 = vld [vmem:[%s14702_s13 + $0x158] ss:$12 sps:$4 sm:$0xff]  }
0x17a8   :  { %14818 = vst [vmem:[#allocation19_spill] sm:$0xff] %v13400_v7  ;;  %14819 = vst [vmem:[#allocation20_spill] sm:$0xff] %v13406_v6 }
0x17a9   :  { %4355 = vperm.xlu0 %10794, %v4350_v43   ;;  %v4351_v62 = vmul.f32 %v4350_v43, %v13109_v9  ;;  %v13325_v9 = vld [vmem:[%s14702_s13 + $0xc8] ss:$12 sps:$4 sm:$0xff]   ;;  %v13412_v43 = vld [vmem:[%s14702_s13 + $0x98] ss:$12 sps:$4 sm:$0xff]  }
0x17aa   :  { %9420 = vmatprep.subr.bf16.mxu0 %v13325_v9  ;;  %14820 = vst [vmem:[#allocation21_spill] sm:$0xff] %v13412_v43 }
0x17ab   :  { %v4352_v10 = vsub.f32 %v4312_v0, %v4351_v62  ;;  %v13418_v0 = vld [vmem:[%s14702_s13 + $0x170] ss:$12 sps:$4 sm:$0xff]  }
0x17ac   :  { %14821 = vst [vmem:[#allocation22_spill] sm:$0xff] %v13418_v0  ;;  %v13424_v62 = vld [vmem:[%s14702_s13 + $0xb0] ss:$12 sps:$4 sm:$0xff]  }
0x17ad   :  { %4362 = vperm.xlu1 %10793, %v4352_v10   ;;  %14822 = vst [vmem:[#allocation23_spill] sm:$0xff] %v13424_v62 }
0x1828   :  { %v13328_v39 = vpop.permute.xlu0 %4355 }
0x1829   :  { %v4358_v2 = vmul.f32 %v13328_v39, %v13020_v49  ;;  %v4359_v27 = vmul.f32 %v13328_v39, %v13024_v53  ;;  %v13346_v49 = vld [vmem:[%s14702_s13 + $0xe0] ss:$12 sps:$4 sm:$0xff]  }
0x182a   :  { %14809 = vst [vmem:[#allocation7_spill] sm:$0xff] %v13346_v49  ;;  %v13352_v53 = vld [vmem:[%s14702_s13 + $0x20] ss:$12 sps:$4 sm:$0xff]  }
0x182b   :  { %14810 = vst [vmem:[#allocation8_spill] sm:$0xff] %v13352_v53 }
0x182c   :  { %v13334_v29 = vpop.permute.xlu1 %4362 }
0x182d   :  { %v4366_v31 = vadd.f32 %v13334_v29, %v4359_v27  ;;  %v4365_v25 = vadd.f32 %v13334_v29, %v4358_v2 }
0x182f   :  { %v4368_v30 = vmax.f32 %v4366_v31, 0.0  ;;  %v4367_v41 = vmax.f32 %v4365_v25, 0.0 }
0x1831   :  { %4711 = vmatprep.mubr.f32.mxu0 %v4368_v30 }
0x1832   :  { %4712 = vmatmul.mubr.f32.vlgmr.msra.gmra.mrb[38].mxu0 %v4367_v41 }
0x1833   :  { %9422 = vmatpush3.bf16.msra.mxu0 %v13341_v26  ;;  %4782 = vmatprep.mubr.f32.mxu0 %v4368_v30 }
0x1834   :  { %9424 = vmatprep.subr.bf16.mxu0 %v13346_v49 }
0x1837   :  { %9426 = vmatpush3.bf16.msra.mxu0 %v13352_v53 }
0x1838   :  { %9428 = vmatprep.subr.bf16.mxu0 %v13358_v22 }
0x183b   :  { %9430 = vmatpush3.bf16.msra.mxu0 %v13364_v42 }
0x183c   :  { %9432 = vmatprep.subr.bf16.mxu0 %v13370_v8 }
0x183f   :  { %9434 = vmatpush3.bf16.msra.mxu0 %v13376_v19 }
0x1840   :  { %9436 = vmatprep.subr.bf16.mxu0 %v13382_v38 }
0x1843   :  { %9438 = vmatpush3.bf16.msra.mxu0 %v13388_v48 }
0x1844   :  { %9440 = vmatprep.subr.bf16.mxu0 %v13394_v37 }
0x1847   :  { %9442 = vmatpush3.bf16.msra.mxu0 %v13400_v7 }
0x1848   :  { %9444 = vmatprep.subr.bf16.mxu0 %v13406_v6 }
0x184b   :  { %9446 = vmatpush3.bf16.msra.mxu0 %v13412_v43 }
0x184c   :  { %9448 = vmatprep.subr.bf16.mxu0 %v13418_v0 }
0x184f   :  { %9450 = vmatpush3.bf16.msra.mxu0 %v13424_v62 }
0x1852   :  { %4783 = vmatmul.mubr.f32.vlgmr.msra.gmra.mrb[40].mxu0 %v4367_v41 }
0x1905   :  { %v4713_v10 = vpop.f32.mrb[38].mxu0 }
0x1906   :  { %4788 = vst [vmem:[#allocation2] sm:$0xf] %v4713_v10  ;;  %v4715_v2 = vpop.f32.mrb[39].mxu0 }
0x1907   :  { %4789 = vst [vmem:[#allocation2 + $0x8] sm:$0xf] %v4715_v2 }
0x190d   :  { %v4792_v27 = vld [vmem:[#allocation2] sm:$0xff] }
0x190e   :  { %4824 = vrot.lane.b32.xlu0 %v4792_v27, %s11264_s3  ;;  %4804 = vrot.lane.b32.xlu1 %v4792_v27, %s11262_s2  ;;  %v4793_v31 = vld [vmem:[#allocation2 + $0x8] sm:$0xff] }
0x1912   :  { %4864 = vrot.lane.b32.xlu0 %v4792_v27, %s11273_s30  ;;  %4844 = vrot.lane.b32.xlu1 %v4792_v27, %s11271_s9 }
0x1916   :  { %4884 = vrot.lane.b32.xlu1 %v4792_v27, %s11265_s28  ;;  %4826 = vrot.lane.b32.xlu0 %v4793_v31, %s11264_s3 }
0x191a   :  { %4846 = vrot.lane.b32.xlu0 %v4793_v31, %s11271_s9  ;;  %4806 = vrot.lane.b32.xlu1 %v4793_v31, %s11262_s2 }
0x191e   :  { %4866 = vrot.lane.b32.xlu0 %v4793_v31, %s11273_s30 }
0x1922   :  { %4886 = vrot.lane.b32.xlu0 %v4793_v31, %s11265_s28 }
0x1925   :  { %v7933_v25 = vpop.f32.mrb[40].mxu0 }
0x1926   :  { %v7934_v30 = vpop.f32.mrb[41].mxu0 }
0x1927   :  { %v7935_v41 = vadd.f32 %v7934_v30, %v7933_v25 }
0x1929   :  { %4791 = vst.msk [vmem:[#allocation2 + $0x10] sm:$0xf] %vm4790_vm4, %v7935_v41 }
0x1930   :  { %v4794_v10 = vld [vmem:[#allocation2 + $0x10] sm:$0xff] }
0x1931   :  { %4797 = vst.msk [vmem:[#allocation3 + $0x10] sm:$0xff] %vm1664_vm9, %v4794_v10  ;;  %4828 = vrot.lane.b32.xlu1 %v4794_v10, %s11264_s3  ;;  %4808 = vrot.lane.b32.xlu0 %v4794_v10, %s11262_s2 }
0x1935   :  { %4848 = vrot.lane.b32.xlu1 %v4794_v10, %s11271_s9  ;;  %4906 = vrot.lane.b32.xlu0 %v4793_v31, %s11274_s4 }
0x1939   :  { %4868 = vrot.lane.b32.xlu1 %v4794_v10, %s11273_s30  ;;  %4926 = vrot.lane.b32.xlu0 %v4793_v31, %s11272_s5 }
0x193d   :  { %4888 = vrot.lane.b32.xlu1 %v4794_v10, %s11265_s28  ;;  %4904 = vrot.lane.b32.xlu0 %v4792_v27, %s11274_s4 }
0x1941   :  { %4908 = vrot.lane.b32.xlu1 %v4794_v10, %s11274_s4  ;;  %4946 = vrot.lane.b32.xlu0 %v4793_v31, %s11275_s6 }
0x1945   :  { %4928 = vrot.lane.b32.xlu1 %v4794_v10, %s11272_s5  ;;  %4944 = vrot.lane.b32.xlu0 %v4792_v27, %s11275_s6 }
0x1949   :  { %4924 = vrot.lane.b32.xlu1 %v4792_v27, %s11272_s5 }
0x194d   :  { %4948 = vrot.lane.b32.xlu1 %v4794_v10, %s11275_s6 }
0x1980   :  { %v4825_v2 = vpop.permute.xlu0 %4824  ;;  %v4805_v30 = vpop.permute.xlu1 %4804 }
0x1984   :  { %v4865_v25 = vpop.permute.xlu0 %4864  ;;  %v4845_v28 = vpop.permute.xlu1 %4844 }
0x1988   :  { %v4827_v41 = vpop.permute.xlu0 %4826  ;;  %v4885_v15 = vpop.permute.xlu1 %4884 }
0x198c   :  { %v4847_v1 = vpop.permute.xlu0 %4846  ;;  %v4807_v0 = vpop.permute.xlu1 %4806 }
0x198d   :  { %v4810_v6 = vsel %vm1678_vm10, %v4805_v30, %v4807_v0  ;;  %v4850_v19 = vsel %vm1720_vm12, %v4845_v28, %v4847_v1  ;;  %v4830_v30 = vsel %vm1699_vm11, %v4825_v2, %v4827_v41  ;;  %v13493_v2 = vld [vmem:[%s14700_s10 + $0x10] ss:$8 sps:$4 sm:$0xff]  }
0x198e   :  { %v9453_v38 = vpack.c.bf16 %v4810_v6, %v4792_v27 }
0x1990   :  { %v4867_v62 = vpop.permute.xlu0 %4866 }
0x1994   :  { %v4887_v43 = vpop.permute.xlu0 %4886 }
0x19a3   :  { %v4829_v7 = vpop.permute.xlu1 %4828  ;;  %v4809_v37 = vpop.permute.xlu0 %4808 }
0x19a4   :  { %4837 = vst.msk [vmem:[#allocation3 + $0x40] sm:$0xff] %vm1664_vm9, %v4829_v7  ;;  %v4811_v48 = vsel %vm1678_vm10, %v4807_v0, %v4809_v37  ;;  %4817 = vst.msk [vmem:[#allocation3 + $0x28] sm:$0xff] %vm1664_vm9, %v4809_v37  ;;  %v4831_v22 = vsel %vm1699_vm11, %v4827_v41, %v4829_v7  ;;  %v9457_v0 = vpack.c.bf16 %v4850_v19, %v4830_v30 }
0x19a5   :  { %v9451_v10 = vpack.c.bf16 %v4811_v48, %v4793_v31  ;;  %v4890_v48 = vsel %vm1762_vm14, %v4885_v15, %v4887_v43  ;;  %v13473_v15 = vld [vmem:[%s14700_s10 + $0x4] ss:$8 sps:$4 sm:$0xff]  }
0x19a6   :  { %9480 = vmatprep.subr.bf16.mxu0 %v13473_v15 }
0x19a7   :  { %v4849_v8 = vpop.permute.xlu1 %4848  ;;  %v4907_v42 = vpop.permute.xlu0 %4906  ;;  %9452 = vmatprep.subr.bf16.mxu1 %v9451_v10 }
0x19a8   :  { %v4851_v53 = vsel %vm1720_vm12, %v4847_v1, %v4849_v8  ;;  %4857 = vst.msk [vmem:[#allocation3 + $0x58] sm:$0xff] %vm1664_vm9, %v4849_v8  ;;  %9454 = vmatpush1.bf16.msra.mxu1 %v9453_v38  ;;  %v4870_v8 = vsel %vm1741_vm13, %v4865_v25, %v4867_v62  ;;  %v13499_v25 = vld [vmem:[%s14700_s10 + $0x24] ss:$8 sps:$4 sm:$0xff]  }
0x19a9   :  { %v9455_v49 = vpack.c.bf16 %v4851_v53, %v4831_v22  ;;  %v9461_v53 = vpack.c.bf16 %v4890_v48, %v4870_v8  ;;  %v13507_v48 = vld [vmem:[%s14700_s10 + $0x20] ss:$8 sps:$4 sm:$0xff]  }
0x19aa   :  { %v13520_v8 = vld [vmem:[%s14707_s17] sm:$0xf] }
0x19ab   :  { %v4869_v26 = vpop.permute.xlu1 %4868  ;;  %9456 = vmatprep.subr.bf16.mxu1 %v9455_v49  ;;  %v4927_v28 = vpop.permute.xlu0 %4926  ;;  %v13483_v49 = vld [vmem:[%s14700_s10 + $0x14] ss:$8 sps:$4 sm:$0xff]  }
0x19ac   :  { %4877 = vst.msk [vmem:[#allocation3 + $0x70] sm:$0xff] %vm1664_vm9, %v4869_v26  ;;  %9458 = vmatpush1.bf16.msra.mxu1 %v9457_v0  ;;  %v4871_v7 = vsel %vm1741_vm13, %v4867_v62, %v4869_v26  ;;  %v13478_v26 = vld [vmem:[%s14700_s10] ss:$8 sps:$4 sm:$0xff]  }
0x19ad   :  { %9482 = vmatpush1.bf16.msra.mxu0 %v13478_v26 }
0x19ae   :  { %9484 = vmatprep.subr.bf16.mxu0 %v13483_v49 }
0x19af   :  { %v4889_v37 = vpop.permute.xlu1 %4888  ;;  %v4905_v22 = vpop.permute.xlu0 %4904 }
0x19b0   :  { %v4891_v1 = vsel %vm1762_vm14, %v4887_v43, %v4889_v37  ;;  %4897 = vst.msk [vmem:[#allocation3 + $0x88] sm:$0xff] %vm1664_vm9, %v4889_v37  ;;  %v4910_v10 = vsel %vm1783_vm15, %v4905_v22, %v4907_v42  ;;  %v13513_v37 = vld [vmem:[%s14700_s10 + $0x34] ss:$8 sps:$4 sm:$0xff]   ;;  %v13528_v22 = vld [vmem:[%s14700_s10 + $0x30] ss:$8 sps:$4 sm:$0xff]  }
0x19b1   :  { %v9459_v38 = vpack.c.bf16 %v4891_v1, %v4871_v7  ;;  %9486 = vmatpush1.bf16.msra.mxu0 %v13493_v2 }
0x19b2   :  { %9488 = vmatprep.subr.bf16.mxu0 %v13499_v25 }
0x19b3   :  { %v4909_v19 = vpop.permute.xlu1 %4908  ;;  %9460 = vmatprep.subr.bf16.mxu1 %v9459_v38  ;;  %v4947_v27 = vpop.permute.xlu0 %4946 }
0x19b4   :  { %4917 = vst.msk [vmem:[#allocation3 + $0xa0] sm:$0xff] %vm1664_vm9, %v4909_v19  ;;  %9462 = vmatpush1.bf16.msra.mxu1 %v9461_v53  ;;  %v4911_v43 = vsel %vm1783_vm15, %v4907_v42, %v4909_v19  ;;  %v4960_v53 = vld [vmem:[#allocation3 + $0x10] sm:$0xff] }
0x19b5   :  { %9490 = vmatpush1.bf16.msra.mxu0 %v13507_v48 }
0x19b6   :  { %9492 = vmatprep.subr.bf16.mxu0 %v13513_v37 }
0x19b7   :  { %v4929_v6 = vpop.permute.xlu1 %4928  ;;  %v4945_v7 = vpop.permute.xlu0 %4944 }
0x19b8   :  { %v4931_v62 = vsel %vm1804_vm2, %v4927_v28, %v4929_v6  ;;  %4937 = vst.msk [vmem:[#allocation3 + $0xb8] sm:$0xff] %vm1664_vm9, %v4929_v6  ;;  %v4950_v38 = vsel %vm1825_vm3, %v4945_v7, %v4947_v27  ;;  %v13533_v6 = vld [vmem:[%s14700_s10 + $0x44] ss:$8 sps:$4 sm:$0xff]  }
0x19b9   :  { %v9463_v31 = vpack.c.bf16 %v4931_v62, %v4911_v43  ;;  %v4969_v43 = vld [vmem:[#allocation3 + $0x58] sm:$0xff]  ;;  %v4966_v62 = vld [vmem:[#allocation3 + $0x40] sm:$0xff]  ;;  %9494 = vmatpush1.bf16.msra.mxu0 %v13528_v22 }
0x19ba   :  { %9496 = vmatprep.subr.bf16.mxu0 %v13533_v6 }
0x19bb   :  { %v4925_v41 = vpop.permute.xlu1 %4924  ;;  %9464 = vmatprep.subr.bf16.mxu1 %v9463_v31  ;;  %v9471_v31 = vpack.c.bf16 %v4969_v43, %v4966_v62  ;;  %v13579_v43 = vld [vmem:[%s14700_s10 + $0x74] ss:$8 sps:$4 sm:$0xff]  }
0x19bc   :  { %v4930_v30 = vsel %vm1804_vm2, %v4925_v41, %v4927_v28  ;;  %v4963_v28 = vld [vmem:[#allocation3 + $0x28] sm:$0xff]  ;;  %v13551_v41 = vld [vmem:[%s14700_s10 + $0x54] ss:$8 sps:$4 sm:$0xff]  }
0x19bd   :  { %v9465_v0 = vpack.c.bf16 %v4930_v30, %v4910_v10  ;;  %v9468_v19 = vpack.c.bf16 %v4963_v28, %v4960_v53  ;;  %v4975_v10 = vld [vmem:[#allocation3 + $0x88] sm:$0xff]  ;;  %v4972_v30 = vld [vmem:[#allocation3 + $0x70] sm:$0xff]  ;;  %v4978_v28 = vld [vmem:[#allocation3 + $0xa0] sm:$0xff] }
0x19be   :  { %v9474_v7 = vpack.c.bf16 %v4975_v10, %v4972_v30  ;;  %v13596_v30 = vld [vmem:[%s14700_s10 + $0x84] ss:$8 sps:$4 sm:$0xff]  }
0x19bf   :  { %v4949_v1 = vpop.permute.xlu1 %4948  ;;  %9466 = vmatpush1.bf16.msra.mxu1 %v9465_v0  ;;  %v13558_v0 = vld [vmem:[%s14700_s10 + $0x50] ss:$8 sps:$4 sm:$0xff]  }
0x19c0   :  { %v4951_v42 = vsel %vm1825_vm3, %v4947_v27, %v4949_v1  ;;  %4957 = vst.msk [vmem:[#allocation3 + $0xd0] sm:$0xff] %vm1664_vm9, %v4949_v1  ;;  %v13545_v27 = vld [vmem:[%s14700_s10 + $0x40] ss:$8 sps:$4 sm:$0xff]   ;;  %v13564_v1 = vld [vmem:[%s14700_s10 + $0x64] ss:$8 sps:$4 sm:$0xff]  }
0x19c1   :  { %5004 = vmatprep.subr.mxu1 %v4951_v42  ;;  %9498 = vmatpush1.bf16.msra.mxu0 %v13545_v27  ;;  %v4981_v42 = vld [vmem:[#allocation3 + $0xb8] sm:$0xff] }
0x19c2   :  { %9500 = vmatprep.subr.bf16.mxu0 %v13551_v41  ;;  %v9477_v53 = vpack.c.bf16 %v4981_v42, %v4978_v28 }
0x19c3   :  { %5005 = vmatpush1.msra.mxu1 %v4950_v38  ;;  %v13571_v38 = vld [vmem:[%s14700_s10 + $0x60] ss:$8 sps:$4 sm:$0xff]  }
0x19c4   :  { %7556 = vmatmul.mubr.msk.f32.vlgmr.msra.gmra.mrb[26].mxu1 %vm247_vm7, %v13520_v8  ;;  %9467 = vmatprep.subr.bf16.mxu1 %v14807_v56 }
0x19c5   :  { %9469 = vmatpush3.bf16.msra.mxu1 %v9468_v19  ;;  %8473 = vmatprep.mubr.msk.f32.mxu1 %vm11259_vm0, %v13081_v58  ;;  %v4370_v19 = vmul.f32 %v13328_v39, %v13105_v35  ;;  %v13590_v35 = vld [vmem:[%s14700_s10 + $0x70] ss:$8 sps:$4 sm:$0xff]  }
0x19c6   :  { %9470 = vmatprep.subr.bf16.mxu1 %v14807_v56  ;;  %9502 = vmatpush1.bf16.msra.mxu0 %v13558_v0 }
0x19c7   :  { %9504 = vmatprep.subr.bf16.mxu0 %v13564_v1  ;;  %v13582_v62 = vadd.f32 %v4370_v19, %v13334_v29 }
0x19c9   :  { %9472 = vmatpush3.bf16.msra.mxu1 %v9471_v31  ;;  %v4984_v31 = vld [vmem:[#allocation3 + $0xd0] sm:$0xff]  ;;  %v4374_v10 = vmax.f32 %v13582_v62, 0.0 }
0x19ca   :  { %9473 = vmatprep.subr.bf16.mxu1 %v14807_v56  ;;  %9506 = vmatpush1.bf16.msra.mxu0 %v13571_v38 }
0x19cb   :  { %9508 = vmatprep.subr.bf16.mxu0 %v13579_v43 }
0x19cd   :  { %9475 = vmatpush3.bf16.msra.mxu1 %v9474_v7  ;;  %v13609_v7 = vld [vmem:[%s14700_s10 + $0x80] ss:$8 sps:$4 sm:$0xff]  }
0x19ce   :  { %9476 = vmatprep.subr.bf16.mxu1 %v14807_v56  ;;  %9510 = vmatpush1.bf16.msra.mxu0 %v13590_v35 }
0x19cf   :  { %9512 = vmatprep.subr.bf16.mxu0 %v13596_v30 }
0x19d1   :  { %9478 = vmatpush3.bf16.msra.mxu1 %v9477_v53 }
0x19d2   :  { %8471 = vmatprep.subr.mxu1 %v13081_v58  ;;  %9514 = vmatpush1.bf16.msra.mxu0 %v13609_v7 }
0x19d5   :  { %8472 = vmatpush3.msra.mxu1 %v4984_v31 }
0x19d6   :  { %8474 = vmatmul.mubr.msk.f32.vlgmr.msra.gmra.mrb[28].mxu1 %vm247_vm7, %v13520_v8  ;;  %9554 = vmatprep.subr.bf16.mxu1 %v13126_v12  ;;  %v13615_v12 = vld [vmem:[%s14700_s10 + $0x94] ss:$8 sps:$4 sm:$0xff]  }
0x19d7   :  { %9556 = vmatpush1.bf16.msra.mxu1 %v13131_v63  ;;  %5344 = vmatprep.mubr.f32.mxu1 %v4374_v10  ;;  %v13623_v63 = vld [vmem:[%s14700_s10 + $0x90] ss:$8 sps:$4 sm:$0xff]  }
0x19d8   :  { %9558 = vmatprep.subr.bf16.mxu1 %v13136_v18  ;;  %9516 = vmatprep.subr.bf16.mxu0 %v13615_v12  ;;  %v13629_v18 = vld [vmem:[%s14700_s10 + $0xa4] ss:$8 sps:$4 sm:$0xff]  }
0x19d9   :  { %9518 = vmatpush1.bf16.msra.mxu0 %v13623_v63 }
0x19da   :  { %9520 = vmatprep.subr.bf16.mxu0 %v13629_v18 }
0x19db   :  { %9560 = vmatpush1.bf16.msra.mxu1 %v13143_v51  ;;  %v13637_v51 = vld [vmem:[%s14700_s10 + $0xa0] ss:$8 sps:$4 sm:$0xff]  }
0x19dc   :  { %9562 = vmatprep.subr.bf16.mxu1 %v13149_v40  ;;  %v13643_v40 = vld [vmem:[%s14700_s10 + $0xb4] ss:$8 sps:$4 sm:$0xff]  }
0x19dd   :  { %9522 = vmatpush1.bf16.msra.mxu0 %v13637_v51 }
0x19de   :  { %9524 = vmatprep.subr.bf16.mxu0 %v13643_v40 }
0x19df   :  { %9564 = vmatpush1.bf16.msra.mxu1 %v13155_v45  ;;  %v13651_v45 = vld [vmem:[%s14700_s10 + $0xb0] ss:$8 sps:$4 sm:$0xff]  }
0x19e0   :  { %9566 = vmatprep.subr.bf16.mxu1 %v13161_v46  ;;  %v13657_v46 = vld [vmem:[%s14700_s10 + $0xc4] ss:$8 sps:$4 sm:$0xff]  }
0x19e1   :  { %9526 = vmatpush1.bf16.msra.mxu0 %v13651_v45 }
0x19e2   :  { %9528 = vmatprep.subr.bf16.mxu0 %v13657_v46 }
0x19e3   :  { %9568 = vmatpush1.bf16.msra.mxu1 %v13167_v34  ;;  %v13665_v34 = vld [vmem:[%s14700_s10 + $0xc0] ss:$8 sps:$4 sm:$0xff]  }
0x19e4   :  { %9570 = vmatprep.subr.bf16.mxu1 %v13173_v24  ;;  %v13671_v24 = vld [vmem:[%s14700_s10 + $0xd4] ss:$8 sps:$4 sm:$0xff]  }
0x19e5   :  { %9530 = vmatpush1.bf16.msra.mxu0 %v13665_v34 }
0x19e6   :  { %9532 = vmatprep.subr.bf16.mxu0 %v13671_v24 }
0x19e7   :  { %9572 = vmatpush1.bf16.msra.mxu1 %v13179_v5  ;;  %v13679_v5 = vld [vmem:[%s14700_s10 + $0xd0] ss:$8 sps:$4 sm:$0xff]  }
0x19e8   :  { %9574 = vmatprep.subr.bf16.mxu1 %v13185_v3  ;;  %v13685_v3 = vld [vmem:[%s14700_s10 + $0xe4] ss:$8 sps:$4 sm:$0xff]  }
0x19e9   :  { %9534 = vmatpush1.bf16.msra.mxu0 %v13679_v5 }
0x19ea   :  { %9536 = vmatprep.subr.bf16.mxu0 %v13685_v3 }
0x19eb   :  { %9576 = vmatpush1.bf16.msra.mxu1 %v13191_v33  ;;  %v13693_v33 = vld [vmem:[%s14700_s10 + $0xe0] ss:$8 sps:$4 sm:$0xff]  }
0x19ec   :  { %9578 = vmatprep.subr.bf16.mxu1 %v13197_v44  ;;  %v13699_v44 = vld [vmem:[%s14700_s10 + $0xf4] ss:$8 sps:$4 sm:$0xff]  }
0x19ed   :  { %9538 = vmatpush1.bf16.msra.mxu0 %v13693_v33 }
0x19ee   :  { %9540 = vmatprep.subr.bf16.mxu0 %v13699_v44 }
0x19ef   :  { %9580 = vmatpush1.bf16.msra.mxu1 %v13203_v50  ;;  %v13707_v50 = vld [vmem:[%s14700_s10 + $0xf0] ss:$8 sps:$4 sm:$0xff]  }
0x19f0   :  { %9582 = vmatprep.subr.bf16.mxu1 %v13209_v21  ;;  %v4369_v21 = vmul.f32 %v13328_v39, %v13101_v36  ;;  %v11097_v36 = vld [vmem:[%s14700_s10 + $0x104] ss:$8 sps:$4 sm:$0xff]   ;;  %v13785_v39 = vld [vmem:[%s14700_s10 + $0x100] ss:$8 sps:$4 sm:$0xff]  }
0x19f1   :  { %9542 = vmatpush1.bf16.msra.mxu0 %v13707_v50 }
0x19f2   :  { %9544 = vmatprep.subr.bf16.mxu0 %v11097_v36 }
0x19f3   :  { %9584 = vmatpush1.bf16.msra.mxu1 %v13215_v13  ;;  %v4371_v13 = vadd.f32 %v4369_v21, %v13334_v29 }
0x19f4   :  { %9586 = vmatprep.subr.bf16.mxu1 %v13221_v47 }
0x19f5   :  { %v4373_v47 = vmax.f32 %v4371_v13, 0.0 }
0x19f7   :  { %9588 = vmatpush1.bf16.msra.mxu1 %v13227_v52  ;;  %v14823_v52 = vld [vmem:[#allocation6_spill] sm:$0xff] }
0x19f8   :  { %9590 = vmatprep.subr.bf16.mxu1 %v13233_v54  ;;  %v14824_v54 = vld [vmem:[#allocation7_spill] sm:$0xff] }
0x19fb   :  { %9592 = vmatpush1.bf16.msra.mxu1 %v13239_v55  ;;  %v14825_v55 = vld [vmem:[#allocation8_spill] sm:$0xff] }
0x19fc   :  { %9594 = vmatprep.subr.bf16.mxu1 %v13245_v57  ;;  %v14826_v57 = vld [vmem:[#allocation9_spill] sm:$0xff] }
0x19ff   :  { %9596 = vmatpush1.bf16.msra.mxu1 %v13251_v59  ;;  %v14827_v59 = vld [vmem:[#allocation13_spill] sm:$0xff] }
0x1a00   :  { %9598 = vmatprep.subr.bf16.mxu1 %v13257_v11  ;;  %v14828_v11 = vld [vmem:[#allocation14_spill] sm:$0xff] }
0x1a03   :  { %9600 = vmatpush1.bf16.msra.mxu1 %v13263_v60  ;;  %v14829_v60 = vld [vmem:[#allocation15_spill] sm:$0xff] }
0x1a04   :  { %9602 = vmatprep.subr.bf16.mxu1 %v13269_v14  ;;  %v14830_v14 = vld [vmem:[#allocation16_spill] sm:$0xff] }
0x1a07   :  { %9604 = vmatpush1.bf16.msra.mxu1 %v13275_v16  ;;  %v14831_v16 = vld [vmem:[#allocation17_spill] sm:$0xff] }
0x1a08   :  { %9606 = vmatprep.subr.bf16.mxu1 %v13281_v17  ;;  %v14832_v17 = vld [vmem:[#allocation18_spill] sm:$0xff] }
0x1a0b   :  { %9608 = vmatpush1.bf16.msra.mxu1 %v13287_v20  ;;  %v14833_v20 = vld [vmem:[#allocation19_spill] sm:$0xff] }
0x1a0c   :  { %9610 = vmatprep.subr.bf16.mxu1 %v13297_v4  ;;  %v14834_v4 = vld [vmem:[#allocation20_spill] sm:$0xff] }
0x1a0f   :  { %9612 = vmatpush1.bf16.msra.mxu1 %v13305_v23  ;;  %v14835_v23 = vld [vmem:[#allocation21_spill] sm:$0xff] }
0x1a10   :  { %9614 = vmatprep.subr.bf16.mxu1 %v13313_v61  ;;  %v14836_v61 = vld [vmem:[#allocation22_spill] sm:$0xff] }
0x1a13   :  { %9616 = vmatpush1.bf16.msra.mxu1 %v13318_v32  ;;  %v14837_v32 = vld [vmem:[#allocation23_spill] sm:$0xff] }
0x1a14   :  { %9618 = vmatprep.subr.bf16.mxu1 %v13325_v9 }
0x1a16   :  { %5345 = vmatmul.mubr.f32.vlgmr.msra.gmra.mrb[30].mxu1 %v4373_v47 }
0x1a17   :  { %9620 = vmatpush3.bf16.msra.mxu1 %v14823_v52  ;;  %5415 = vmatprep.mubr.f32.mxu1 %v4374_v10 }
0x1a18   :  { %9622 = vmatprep.subr.bf16.mxu1 %v14824_v54 }
0x1a1b   :  { %9624 = vmatpush3.bf16.msra.mxu1 %v14825_v55 }
0x1a1c   :  { %9626 = vmatprep.subr.bf16.mxu1 %v14826_v57 }
0x1a1f   :  { %9628 = vmatpush3.bf16.msra.mxu1 %v14827_v59 }
0x1a20   :  { %9630 = vmatprep.subr.bf16.mxu1 %v14828_v11 }
0x1a23   :  { %9632 = vmatpush3.bf16.msra.mxu1 %v14829_v60 }
0x1a24   :  { %9634 = vmatprep.subr.bf16.mxu1 %v14830_v14 }
0x1a27   :  { %9636 = vmatpush3.bf16.msra.mxu1 %v14831_v16 }
0x1a28   :  { %9638 = vmatprep.subr.bf16.mxu1 %v14832_v17 }
0x1a2b   :  { %9640 = vmatpush3.bf16.msra.mxu1 %v14833_v20 }
0x1a2c   :  { %9642 = vmatprep.subr.bf16.mxu1 %v14834_v4 }
0x1a2f   :  { %9644 = vmatpush3.bf16.msra.mxu1 %v14835_v23 }
0x1a30   :  { %9646 = vmatprep.subr.bf16.mxu1 %v14836_v61 }
0x1a33   :  { %9648 = vmatpush3.bf16.msra.mxu1 %v14837_v32 }
0x1a34   :  { %9678 = vmatprep.subr.bf16.mxu1 %v13473_v15  ;;  %v13790_v15 = vld [vmem:[%s14700_s10 + $0x114] ss:$8 sps:$4 sm:$0x7f]  }
0x1a36   :  { %5416 = vmatmul.mubr.f32.vlgmr.msra.gmra.mrb[32].mxu1 %v4373_v47 }
0x1a37   :  { %9680 = vmatpush1.bf16.msra.mxu1 %v13478_v26  ;;  %v13796_v26 = vld [vmem:[%s14700_s10 + $0x110] ss:$8 sps:$4 sm:$0x7f]  }
0x1a38   :  { %9682 = vmatprep.subr.bf16.mxu1 %v13483_v49 }
0x1a3b   :  { %9684 = vmatpush1.bf16.msra.mxu1 %v13493_v2 }
0x1a3c   :  { %9686 = vmatprep.subr.bf16.mxu1 %v13499_v25 }
0x1a3f   :  { %9688 = vmatpush1.bf16.msra.mxu1 %v13507_v48 }
0x1a40   :  { %9690 = vmatprep.subr.bf16.mxu1 %v13513_v37 }
0x1a43   :  { %9692 = vmatpush1.bf16.msra.mxu1 %v13528_v22 }
0x1a44   :  { %9694 = vmatprep.subr.bf16.mxu1 %v13533_v6 }
0x1a47   :  { %9696 = vmatpush1.bf16.msra.mxu1 %v13545_v27 }
0x1a48   :  { %9698 = vmatprep.subr.bf16.mxu1 %v13551_v41 }
0x1a4b   :  { %9700 = vmatpush1.bf16.msra.mxu1 %v13558_v0 }
0x1a4c   :  { %9702 = vmatprep.subr.bf16.mxu1 %v13564_v1 }
0x1a4f   :  { %9704 = vmatpush1.bf16.msra.mxu1 %v13571_v38 }
0x1a50   :  { %9706 = vmatprep.subr.bf16.mxu1 %v13579_v43 }
0x1a53   :  { %9708 = vmatpush1.bf16.msra.mxu1 %v13590_v35 }
0x1a54   :  { %9710 = vmatprep.subr.bf16.mxu1 %v13596_v30 }
0x1a57   :  { %9712 = vmatpush1.bf16.msra.mxu1 %v13609_v7 }
0x1a58   :  { %9714 = vmatprep.subr.bf16.mxu1 %v13615_v12 }
0x1a5b   :  { %9716 = vmatpush1.bf16.msra.mxu1 %v13623_v63 }
0x1a5c   :  { %9718 = vmatprep.subr.bf16.mxu1 %v13629_v18 }
0x1a5f   :  { %9720 = vmatpush1.bf16.msra.mxu1 %v13637_v51 }
0x1a60   :  { %9722 = vmatprep.subr.bf16.mxu1 %v13643_v40 }
0x1a63   :  { %9724 = vmatpush1.bf16.msra.mxu1 %v13651_v45 }
0x1a64   :  { %9726 = vmatprep.subr.bf16.mxu1 %v13657_v46 }
0x1a67   :  { %9728 = vmatpush1.bf16.msra.mxu1 %v13665_v34 }
0x1a68   :  { %9730 = vmatprep.subr.bf16.mxu1 %v13671_v24 }
0x1a6b   :  { %9732 = vmatpush1.bf16.msra.mxu1 %v13679_v5 }
0x1a6c   :  { %9734 = vmatprep.subr.bf16.mxu1 %v13685_v3 }
0x1a6f   :  { %9736 = vmatpush1.bf16.msra.mxu1 %v13693_v33 }
0x1a70   :  { %9738 = vmatprep.subr.bf16.mxu1 %v13699_v44 }
0x1a73   :  { %9740 = vmatpush1.bf16.msra.mxu1 %v13707_v50 }
0x1a74   :  { %9742 = vmatprep.subr.bf16.mxu1 %v11097_v36 }
0x1a97   :  { %v5054_v9 = vpop.f32.mrb[26].mxu1 }
0x1a98   :  { %v5056_v29 = vpop.f32.mrb[27].mxu1 }
0x1a99   :  { %5202 = vmatprep.mubr.f32.mxu0 %v5056_v29 }
0x1a9a   :  { %5203 = vmatmul.mubr.f32.vlgmr.msra.gmra.mrb[42].mxu0 %v5054_v9 }
0x1a9b   :  { %9546 = vmatpush1.bf16.msra.mxu0 %v13785_v39  ;;  %5273 = vmatprep.mubr.f32.mxu0 %v13081_v58 }
0x1a9c   :  { %9549 = vmatprep.subr.msk.bf16.mxu0 %vm11478_vm6, %v13790_v15 }
0x1a9f   :  { %9552 = vmatpush1.bf16.msk.msra.mxu0 %vm11478_vm6, %v13796_v26 }
0x1aa9   :  { %v5125_v2 = vpop.f32.mrb[28].mxu1 }
0x1aaa   :  { %v8475_v25 = vpop.f32.mrb[29].mxu1  ;;  %7560 = vmatmul.mubr.msk.f32.vlgmr.msra.gmra.mrb[42].mxu0 %vm1664_vm9, %v5125_v2 }
0x1aab   :  { %5681 = vmatprep.mubr.f32.mxu0 %v13081_v58 }
0x1ae9   :  { %v5346_v48 = vpop.f32.mrb[30].mxu1 }
0x1aea   :  { %5421 = vst [vmem:[#allocation2] sm:$0xf] %v5346_v48  ;;  %v5348_v37 = vpop.f32.mrb[31].mxu1 }
0x1aeb   :  { %5422 = vst [vmem:[#allocation2 + $0x8] sm:$0xf] %v5348_v37 }
0x1af1   :  { %v5450_v22 = vld [vmem:[#allocation2] sm:$0xff] }
0x1af2   :  { %5456 = vrot.lane.b32.xlu0 %v5450_v22, %s11264_s3  ;;  %5436 = vrot.lane.b32.xlu1 %v5450_v22, %s11262_s2  ;;  %v5451_v6 = vld [vmem:[#allocation2 + $0x8] sm:$0xff] }
0x1af6   :  { %5496 = vrot.lane.b32.xlu0 %v5450_v22, %s11273_s30  ;;  %5476 = vrot.lane.b32.xlu1 %v5450_v22, %s11271_s9 }
0x1afa   :  { %5516 = vrot.lane.b32.xlu1 %v5450_v22, %s11265_s28  ;;  %5458 = vrot.lane.b32.xlu0 %v5451_v6, %s11264_s3 }
0x1afe   :  { %5478 = vrot.lane.b32.xlu0 %v5451_v6, %s11271_s9  ;;  %5438 = vrot.lane.b32.xlu1 %v5451_v6, %s11262_s2 }
0x1b02   :  { %5498 = vrot.lane.b32.xlu0 %v5451_v6, %s11273_s30 }
0x1b06   :  { %5518 = vrot.lane.b32.xlu0 %v5451_v6, %s11265_s28 }
0x1b09   :  { %v7978_v27 = vpop.f32.mrb[32].mxu1 }
0x1b0a   :  { %v7979_v41 = vpop.f32.mrb[33].mxu1 }
0x1b0b   :  { %v7980_v0 = vadd.f32 %v7979_v41, %v7978_v27 }
0x1b0d   :  { %5423 = vst.msk [vmem:[#allocation2 + $0x10] sm:$0xf] %vm4790_vm4, %v7980_v0 }
0x1b14   :  { %v5452_v1 = vld [vmem:[#allocation2 + $0x10] sm:$0xff] }
0x1b15   :  { %5460 = vrot.lane.b32.xlu1 %v5452_v1, %s11264_s3  ;;  %5440 = vrot.lane.b32.xlu0 %v5452_v1, %s11262_s2  ;;  %5429 = vst.msk [vmem:[#allocation3 + $0x10] sm:$0xff] %vm1664_vm9, %v5452_v1 }
0x1b19   :  { %5480 = vrot.lane.b32.xlu1 %v5452_v1, %s11271_s9  ;;  %5538 = vrot.lane.b32.xlu0 %v5451_v6, %s11274_s4 }
0x1b1c   :  { %v5592_v41 = vld [vmem:[#allocation3 + $0x10] sm:$0xff] }
0x1b1d   :  { %5500 = vrot.lane.b32.xlu1 %v5452_v1, %s11273_s30  ;;  %5558 = vrot.lane.b32.xlu0 %v5451_v6, %s11272_s5 }
0x1b21   :  { %5520 = vrot.lane.b32.xlu1 %v5452_v1, %s11265_s28  ;;  %5536 = vrot.lane.b32.xlu0 %v5450_v22, %s11274_s4 }
0x1b25   :  { %5540 = vrot.lane.b32.xlu1 %v5452_v1, %s11274_s4  ;;  %5578 = vrot.lane.b32.xlu0 %v5451_v6, %s11275_s6 }
0x1b29   :  { %5560 = vrot.lane.b32.xlu1 %v5452_v1, %s11272_s5  ;;  %5576 = vrot.lane.b32.xlu0 %v5450_v22, %s11275_s6 }
0x1b2d   :  { %5556 = vrot.lane.b32.xlu1 %v5450_v22, %s11272_s5 }
0x1b31   :  { %5580 = vrot.lane.b32.xlu1 %v5452_v1, %s11275_s6 }
0x1b64   :  { %v5457_v42 = vpop.permute.xlu0 %5456  ;;  %v5437_v38 = vpop.permute.xlu1 %5436 }
0x1b68   :  { %v5497_v28 = vpop.permute.xlu0 %5496  ;;  %v5477_v19 = vpop.permute.xlu1 %5476 }
0x1b6c   :  { %v5459_v53 = vpop.permute.xlu0 %5458  ;;  %v5517_v62 = vpop.permute.xlu1 %5516 }
0x1b6d   :  { %v5462_v21 = vsel %vm1699_vm11, %v5457_v42, %v5459_v53 }
0x1b70   :  { %v5479_v43 = vpop.permute.xlu0 %5478  ;;  %v5439_v63 = vpop.permute.xlu1 %5438 }
0x1b71   :  { %v5442_v51 = vsel %vm1678_vm10, %v5437_v38, %v5439_v63  ;;  %v5482_v5 = vsel %vm1720_vm12, %v5477_v19, %v5479_v43 }
0x1b72   :  { %v9651_v24 = vpack.c.bf16 %v5442_v51, %v5450_v22  ;;  %v9655_v47 = vpack.c.bf16 %v5482_v5, %v5462_v21  ;;  %v14842_v51 = vld [vmem:[#allocation10_spill] sm:$0xff]  ;;  %v13965_v21 = vld [vmem:[%s14702_s13 + $0xac] ss:$12 sps:$4 sm:$0xff]  }
0x1b73   :  { %v13935_v5 = vld [vmem:[%s14702_s13 + $0x60] ss:$12 sps:$4 sm:$0xff]  }
0x1b74   :  { %v5499_v31 = vpop.permute.xlu0 %5498 }
0x1b75   :  { %v5502_v11 = vsel %vm1741_vm13, %v5497_v28, %v5499_v31 }
0x1b78   :  { %v5519_v18 = vpop.permute.xlu0 %5518 }
0x1b79   :  { %v5522_v36 = vsel %vm1762_vm14, %v5517_v62, %v5519_v18 }
0x1b7a   :  { %v9659_v14 = vpack.c.bf16 %v5522_v36, %v5502_v11  ;;  %v13995_v36 = vld [vmem:[%s14702_s13 + $0xd8] ss:$12 sps:$4 sm:$0xff]   ;;  %v14019_v11 = vld [vmem:[%s14702_s13 + $0x108] ss:$12 sps:$4 sm:$0xff]  }
0x1b7d   :  { %v13833_v35 = vpop.f32.mrb[42].mxu0 }
0x1b7e   :  { %14839 = vst [vmem:[#allocation6_spill] sm:$0xff] %v13833_v35  ;;  %v5905_v10 = vsel %vm4313_vm1, %v13833_v35, 0.0  ;;  %v13837_v30 = vpop.f32.mrb[43].mxu0 }
0x1b7f   :  { %14840 = vst [vmem:[#allocation7_spill] sm:$0xff] %v13837_v30  ;;  %v5906_v7 = vsel %vm4313_vm1, %v13837_v30, 0.0 }
0x1b80   :  { %v13841_v12 = vadd.f32 %v5906_v7, %v5905_v10  ;;  %v13879_v10 = vld [vmem:[%s14702_s13 + $0x4] ss:$12 sps:$4 sm:$0xff]   ;;  %v13884_v7 = vld [vmem:[%s14702_s13] ss:$12 sps:$4 sm:$0xff]  }
0x1b82   :  { %14841 = vst [vmem:[#allocation8_spill] sm:$0xff] %v13841_v12 }
0x1b87   :  { %v5461_v40 = vpop.permute.xlu1 %5460  ;;  %v5441_v45 = vpop.permute.xlu0 %5440 }
0x1b88   :  { %5469 = vst.msk [vmem:[#allocation3 + $0x40] sm:$0xff] %vm1664_vm9, %v5461_v40  ;;  %v5443_v46 = vsel %vm1678_vm10, %v5439_v63, %v5441_v45  ;;  %5449 = vst.msk [vmem:[#allocation3 + $0x28] sm:$0xff] %vm1664_vm9, %v5441_v45  ;;  %v5463_v44 = vsel %vm1699_vm11, %v5459_v53, %v5461_v40  ;;  %v13899_v40 = vld [vmem:[%s14702_s13 + $0x18] ss:$12 sps:$4 sm:$0xff]   ;;  %v13905_v45 = vld [vmem:[%s14702_s13 + $0x34] ss:$12 sps:$4 sm:$0xff]  }
0x1b89   :  { %v9649_v34 = vpack.c.bf16 %v5443_v46, %v5451_v6  ;;  %v13917_v46 = vld [vmem:[%s14702_s13 + $0x4c] ss:$12 sps:$4 sm:$0xff]  }
0x1b8b   :  { %v5481_v3 = vpop.permute.xlu1 %5480  ;;  %v5539_v33 = vpop.permute.xlu0 %5538  ;;  %9650 = vmatprep.subr.bf16.mxu0 %v9649_v34  ;;  %v13923_v34 = vld [vmem:[%s14702_s13 + $0x48] ss:$12 sps:$4 sm:$0xff]  }
0x1b8c   :  { %v5483_v50 = vsel %vm1720_vm12, %v5479_v43, %v5481_v3  ;;  %5489 = vst.msk [vmem:[#allocation3 + $0x58] sm:$0xff] %vm1664_vm9, %v5481_v3  ;;  %9652 = vmatpush1.bf16.msra.mxu0 %v9651_v24  ;;  %v13929_v24 = vld [vmem:[%s14702_s13 + $0x64] ss:$12 sps:$4 sm:$0xff]   ;;  %v13941_v3 = vld [vmem:[%s14702_s13 + $0x7c] ss:$12 sps:$4 sm:$0xff]  }
0x1b8d   :  { %v9653_v13 = vpack.c.bf16 %v5483_v50, %v5463_v44  ;;  %v13953_v44 = vld [vmem:[%s14702_s13 + $0x94] ss:$12 sps:$4 sm:$0xff]   ;;  %v13959_v50 = vld [vmem:[%s14702_s13 + $0x90] ss:$12 sps:$4 sm:$0xff]  }
0x1b8f   :  { %v5501_v52 = vpop.permute.xlu1 %5500  ;;  %9654 = vmatprep.subr.bf16.mxu0 %v9653_v13  ;;  %v5559_v54 = vpop.permute.xlu0 %5558  ;;  %v5595_v6 = vld [vmem:[#allocation3 + $0x28] sm:$0xff]  ;;  %v5598_v42 = vld [vmem:[#allocation3 + $0x40] sm:$0xff]  ;;  %v13971_v13 = vld [vmem:[%s14702_s13 + $0xa8] ss:$12 sps:$4 sm:$0xff]  }
0x1b90   :  { %5509 = vst.msk [vmem:[#allocation3 + $0x70] sm:$0xff] %vm1664_vm9, %v5501_v52  ;;  %9656 = vmatpush1.bf16.msra.mxu0 %v9655_v47  ;;  %v5503_v57 = vsel %vm1741_vm13, %v5499_v31, %v5501_v52  ;;  %v9666_v0 = vpack.c.bf16 %v5595_v6, %v5592_v41  ;;  %v13977_v47 = vld [vmem:[%s14702_s13 + $0xc4] ss:$12 sps:$4 sm:$0xff]   ;;  %v13983_v52 = vld [vmem:[%s14702_s13 + $0xc0] ss:$12 sps:$4 sm:$0xff]  }
0x1b91   :  { %v14117_v6 = vld [vmem:[%s14702_s13 + $0x50] ss:$12 sps:$4 sm:$0xff]   ;;  %v14129_v41 = vld [vmem:[%s14702_s13 + $0x68] ss:$12 sps:$4 sm:$0xff]  }
0x1b92   :  { %14846 = vst [vmem:[#allocation14_spill] sm:$0xff] %v14117_v6  ;;  %14848 = vst [vmem:[#allocation16_spill] sm:$0xff] %v14129_v41 }
0x1b93   :  { %v5521_v55 = vpop.permute.xlu1 %5520  ;;  %v5537_v16 = vpop.permute.xlu0 %5536  ;;  %v5601_v1 = vld [vmem:[#allocation3 + $0x58] sm:$0xff] }
0x1b94   :  { %v5523_v59 = vsel %vm1762_vm14, %v5519_v18, %v5521_v55  ;;  %5529 = vst.msk [vmem:[#allocation3 + $0x88] sm:$0xff] %vm1664_vm9, %v5521_v55  ;;  %v5542_v29 = vsel %vm1783_vm15, %v5537_v16, %v5539_v33  ;;  %v9669_v28 = vpack.c.bf16 %v5601_v1, %v5598_v42  ;;  %v13889_v18 = vld [vmem:[%s14702_s13 + $0x1c] ss:$12 sps:$4 sm:$0xff]   ;;  %v14001_v55 = vld [vmem:[%s14702_s13 + $0xf4] ss:$12 sps:$4 sm:$0xff]  }
0x1b95   :  { %v9657_v60 = vpack.c.bf16 %v5523_v59, %v5503_v57  ;;  %v14007_v57 = vld [vmem:[%s14702_s13 + $0xf0] ss:$12 sps:$4 sm:$0xff]   ;;  %v14013_v59 = vld [vmem:[%s14702_s13 + $0x10c] ss:$12 sps:$4 sm:$0xff]  }
0x1b96   :  { %v14037_v16 = vld [vmem:[%s14702_s13 + $0x13c] ss:$12 sps:$4 sm:$0xff]   ;;  %v14141_v1 = vld [vmem:[%s14702_s13 + $0x80] ss:$12 sps:$4 sm:$0xff]   ;;  %v14147_v42 = vld [vmem:[%s14702_s13 + $0x158] ss:$12 sps:$4 sm:$0xff]  }
0x1b97   :  { %v5541_v17 = vpop.permute.xlu1 %5540  ;;  %9658 = vmatprep.subr.bf16.mxu0 %v9657_v60  ;;  %v5579_v61 = vpop.permute.xlu0 %5578  ;;  %v5604_v53 = vld [vmem:[#allocation3 + $0x70] sm:$0xff]  ;;  %v14025_v60 = vld [vmem:[%s14702_s13 + $0x124] ss:$12 sps:$4 sm:$0xff]   ;;  %14850 = vst [vmem:[#allocation18_spill] sm:$0xff] %v14141_v1  ;;  %14851 = vst [vmem:[#allocation19_spill] sm:$0xff] %v14147_v42 }
0x1b98   :  { %5549 = vst.msk [vmem:[#allocation3 + $0xa0] sm:$0xff] %vm1664_vm9, %v5541_v17  ;;  %9660 = vmatpush1.bf16.msra.mxu0 %v9659_v14  ;;  %v5543_v4 = vsel %vm1783_vm15, %v5539_v33, %v5541_v17  ;;  %v13947_v33 = vld [vmem:[%s14702_s13 + $0x78] ss:$12 sps:$4 sm:$0xff]   ;;  %v14031_v14 = vld [vmem:[%s14702_s13 + $0x120] ss:$12 sps:$4 sm:$0xff]  }
0x1b99   :  { %v14043_v17 = vld [vmem:[%s14702_s13 + $0x138] ss:$12 sps:$4 sm:$0xff]  }
0x1b9b   :  { %v5561_v20 = vpop.permute.xlu1 %5560  ;;  %v5577_v48 = vpop.permute.xlu0 %5576  ;;  %v5607_v38 = vld [vmem:[#allocation3 + $0x88] sm:$0xff] }
0x1b9c   :  { %v5563_v23 = vsel %vm1804_vm2, %v5559_v54, %v5561_v20  ;;  %5569 = vst.msk [vmem:[#allocation3 + $0xb8] sm:$0xff] %vm1664_vm9, %v5561_v20  ;;  %v5582_v27 = vsel %vm1825_vm3, %v5577_v48, %v5579_v61  ;;  %v9672_v19 = vpack.c.bf16 %v5607_v38, %v5604_v53  ;;  %v14049_v20 = vld [vmem:[%s14702_s13 + $0x154] ss:$12 sps:$4 sm:$0xff]   ;;  %v14099_v48 = vld [vmem:[%s14702_s13 + $0xf8] ss:$12 sps:$4 sm:$0xff]  }
0x1b9d   :  { %v9661_v32 = vpack.c.bf16 %v5563_v23, %v5543_v4  ;;  %v14055_v4 = vld [vmem:[%s14702_s13 + $0x150] ss:$12 sps:$4 sm:$0xff]   ;;  %v14061_v23 = vld [vmem:[%s14702_s13 + $0x16c] ss:$12 sps:$4 sm:$0xff]  }
0x1b9e   :  { %v14159_v38 = vld [vmem:[%s14702_s13 + $0x170] ss:$12 sps:$4 sm:$0xff]  }
0x1b9f   :  { %v5557_v9 = vpop.permute.xlu1 %5556  ;;  %9662 = vmatprep.subr.bf16.mxu0 %v9661_v32  ;;  %v5610_v62 = vld [vmem:[#allocation3 + $0xa0] sm:$0xff]  ;;  %v14073_v32 = vld [vmem:[%s14702_s13 + $0xc8] ss:$12 sps:$4 sm:$0xff]   ;;  %14853 = vst [vmem:[#allocation21_spill] sm:$0xff] %v14159_v38 }
0x1ba0   :  { %v5562_v2 = vsel %vm1804_vm2, %v5557_v9, %v5559_v54  ;;  %v13989_v54 = vld [vmem:[%s14702_s13 + $0xdc] ss:$12 sps:$4 sm:$0xff]  }
0x1ba1   :  { %v9663_v25 = vpack.c.bf16 %v5562_v2, %v5542_v29  ;;  %v14079_v9 = vld [vmem:[%s14702_s13 + $0x8] ss:$12 sps:$4 sm:$0xff]   ;;  %v14085_v29 = vld [vmem:[%s14702_s13 + $0xe0] ss:$12 sps:$4 sm:$0xff]   ;;  %v14165_v53 = vld [vmem:[%s14702_s13 + $0xb0] ss:$12 sps:$4 sm:$0xff]  }
0x1ba2   :  { %v14843_v2 = vld [vmem:[#allocation11_spill] sm:$0xff]  ;;  %14854 = vst [vmem:[#allocation22_spill] sm:$0xff] %v14165_v53 }
0x1ba3   :  { %v5581_v37 = vpop.permute.xlu1 %5580  ;;  %9664 = vmatpush1.bf16.msra.mxu0 %v9663_v25  ;;  %v5613_v43 = vld [vmem:[#allocation3 + $0xb8] sm:$0xff]  ;;  %v14093_v25 = vld [vmem:[%s14702_s13 + $0x20] ss:$12 sps:$4 sm:$0xff]  }
0x1ba4   :  { %v5583_v22 = vsel %vm1825_vm3, %v5579_v61, %v5581_v37  ;;  %5589 = vst.msk [vmem:[#allocation3 + $0xd0] sm:$0xff] %vm1664_vm9, %v5581_v37  ;;  %v9675_v31 = vpack.c.bf16 %v5613_v43, %v5610_v62  ;;  %v14067_v61 = vld [vmem:[%s14702_s13 + $0x168] ss:$12 sps:$4 sm:$0xff]   ;;  %v14105_v37 = vld [vmem:[%s14702_s13 + $0x38] ss:$12 sps:$4 sm:$0xff]  }
0x1ba5   :  { %5633 = vmatprep.subr.mxu0 %v5583_v22  ;;  %14844 = vst [vmem:[#allocation9_spill] sm:$0xff] %v14105_v37  ;;  %v14111_v22 = vld [vmem:[%s14702_s13 + $0x110] ss:$12 sps:$4 sm:$0xff]  }
0x1ba6   :  { %14845 = vst [vmem:[#allocation13_spill] sm:$0xff] %v14111_v22 }
0x1ba7   :  { %5634 = vmatpush1.msra.mxu0 %v5582_v27  ;;  %v14123_v27 = vld [vmem:[%s14702_s13 + $0x128] ss:$12 sps:$4 sm:$0xff]  }
0x1ba8   :  { %7561 = vmatmul.mubr.msk.f32.vlgmr.msra.gmra.mrb[44].mxu0 %vm247_vm7, %v13520_v8  ;;  %9665 = vmatprep.subr.bf16.mxu0 %v14807_v56  ;;  %14847 = vst [vmem:[#allocation15_spill] sm:$0xff] %v14123_v27 }
0x1ba9   :  { %9667 = vmatpush3.bf16.msra.mxu0 %v9666_v0  ;;  %8494 = vmatprep.mubr.msk.f32.mxu0 %vm11259_vm0, %v13081_v58  ;;  %v14135_v0 = vld [vmem:[%s14702_s13 + $0x140] ss:$12 sps:$4 sm:$0xff]  }
0x1baa   :  { %9668 = vmatprep.subr.bf16.mxu0 %v14807_v56  ;;  %14849 = vst [vmem:[#allocation17_spill] sm:$0xff] %v14135_v0 }
0x1bab   :  { %v5616_v63 = vld [vmem:[#allocation3 + $0xd0] sm:$0xff] }
0x1bad   :  { %9670 = vmatpush3.bf16.msra.mxu0 %v9669_v28  ;;  %v14153_v28 = vld [vmem:[%s14702_s13 + $0x98] ss:$12 sps:$4 sm:$0xff]  }
0x1bae   :  { %9671 = vmatprep.subr.bf16.mxu0 %v14807_v56  ;;  %14852 = vst [vmem:[#allocation20_spill] sm:$0xff] %v14153_v28 }
0x1bb1   :  { %9673 = vmatpush3.bf16.msra.mxu0 %v9672_v19 }
0x1bb2   :  { %9674 = vmatprep.subr.bf16.mxu0 %v14807_v56 }
0x1bb5   :  { %9676 = vmatpush3.bf16.msra.mxu0 %v9675_v31 }
0x1bb6   :  { %8492 = vmatprep.subr.mxu0 %v13081_v58 }
0x1bb9   :  { %8493 = vmatpush3.msra.mxu0 %v5616_v63 }
0x1bba   :  { %8495 = vmatmul.mubr.msk.f32.vlgmr.msra.gmra.mrb[46].mxu0 %vm247_vm7, %v13520_v8  ;;  %9752 = vmatprep.subr.bf16.mxu0 %v13879_v10  ;;  %v13911_v8 = vld [vmem:[%s14702_s13 + $0x30] ss:$12 sps:$4 sm:$0xff]  }
0x1bbb   :  { %9754 = vmatpush1.bf16.msra.mxu0 %v13884_v7  ;;  %6300 = vmatprep.mubr.f32.mxu0 %v14842_v51 }
0x1bbc   :  { %9756 = vmatprep.subr.bf16.mxu0 %v13889_v18 }
0x1bbf   :  { %9758 = vmatpush1.bf16.msra.mxu0 %v13899_v40 }
0x1bc0   :  { %9760 = vmatprep.subr.bf16.mxu0 %v13905_v45 }
0x1bc3   :  { %9762 = vmatpush1.bf16.msra.mxu0 %v13911_v8 }
0x1bc4   :  { %9764 = vmatprep.subr.bf16.mxu0 %v13917_v46 }
0x1bc7   :  { %9766 = vmatpush1.bf16.msra.mxu0 %v13923_v34 }
0x1bc8   :  { %9768 = vmatprep.subr.bf16.mxu0 %v13929_v24 }
0x1bcb   :  { %9770 = vmatpush1.bf16.msra.mxu0 %v13935_v5 }
0x1bcc   :  { %9772 = vmatprep.subr.bf16.mxu0 %v13941_v3 }
0x1bcf   :  { %9774 = vmatpush1.bf16.msra.mxu0 %v13947_v33 }
0x1bd0   :  { %9776 = vmatprep.subr.bf16.mxu0 %v13953_v44 }
0x1bd3   :  { %9778 = vmatpush1.bf16.msra.mxu0 %v13959_v50 }
0x1bd4   :  { %9780 = vmatprep.subr.bf16.mxu0 %v13965_v21 }
0x1bd7   :  { %9782 = vmatpush1.bf16.msra.mxu0 %v13971_v13 }
0x1bd8   :  { %9784 = vmatprep.subr.bf16.mxu0 %v13977_v47 }
0x1bdb   :  { %9786 = vmatpush1.bf16.msra.mxu0 %v13983_v52 }
0x1bdc   :  { %9788 = vmatprep.subr.bf16.mxu0 %v13989_v54 }
0x1bdf   :  { %9790 = vmatpush1.bf16.msra.mxu0 %v13995_v36 }
0x1be0   :  { %9792 = vmatprep.subr.bf16.mxu0 %v14001_v55 }
0x1be3   :  { %9794 = vmatpush1.bf16.msra.mxu0 %v14007_v57 }
0x1be4   :  { %9796 = vmatprep.subr.bf16.mxu0 %v14013_v59 }
0x1be7   :  { %9798 = vmatpush1.bf16.msra.mxu0 %v14019_v11 }
0x1be8   :  { %9800 = vmatprep.subr.bf16.mxu0 %v14025_v60 }
0x1beb   :  { %9802 = vmatpush1.bf16.msra.mxu0 %v14031_v14 }
0x1bec   :  { %9804 = vmatprep.subr.bf16.mxu0 %v14037_v16 }
0x1bef   :  { %9806 = vmatpush1.bf16.msra.mxu0 %v14043_v17 }
0x1bf0   :  { %9808 = vmatprep.subr.bf16.mxu0 %v14049_v20 }
0x1bf3   :  { %9810 = vmatpush1.bf16.msra.mxu0 %v14055_v4 }
0x1bf4   :  { %9812 = vmatprep.subr.bf16.mxu0 %v14061_v23 }
0x1bf7   :  { %9814 = vmatpush1.bf16.msra.mxu0 %v14067_v61 }
0x1bf8   :  { %9816 = vmatprep.subr.bf16.mxu0 %v14073_v32 }
0x1bfa   :  { %6301 = vmatmul.mubr.f32.vlgmr.msra.gmra.mrb[48].mxu0 %v14843_v2 }
0x1bfb   :  { %9818 = vmatpush3.bf16.msra.mxu0 %v14079_v9  ;;  %6371 = vmatprep.mubr.f32.mxu0 %v14842_v51 }
0x1bfc   :  { %9820 = vmatprep.subr.bf16.mxu0 %v14085_v29 }
0x1bff   :  { %9822 = vmatpush3.bf16.msra.mxu0 %v14093_v25 }
0x1c00   :  { %9824 = vmatprep.subr.bf16.mxu0 %v14099_v48 }
0x1c03   :  { %9826 = vmatpush3.bf16.msra.mxu0 %v14105_v37 }
0x1c04   :  { %9828 = vmatprep.subr.bf16.mxu0 %v14111_v22 }
0x1c07   :  { %9830 = vmatpush3.bf16.msra.mxu0 %v14117_v6 }
0x1c08   :  { %9832 = vmatprep.subr.bf16.mxu0 %v14123_v27 }
0x1c0b   :  { %9834 = vmatpush3.bf16.msra.mxu0 %v14129_v41 }
0x1c0c   :  { %9836 = vmatprep.subr.bf16.mxu0 %v14135_v0 }
0x1c0f   :  { %9838 = vmatpush3.bf16.msra.mxu0 %v14141_v1 }
0x1c10   :  { %9840 = vmatprep.subr.bf16.mxu0 %v14147_v42 }
0x1c13   :  { %9842 = vmatpush3.bf16.msra.mxu0 %v14153_v28 }
0x1c14   :  { %9844 = vmatprep.subr.bf16.mxu0 %v14159_v38 }
0x1c17   :  { %9846 = vmatpush3.bf16.msra.mxu0 %v14165_v53 }
0x1c1a   :  { %6372 = vmatmul.mubr.f32.vlgmr.msra.gmra.mrb[50].mxu0 %v14843_v2 }
0x1c7b   :  { %v5683_v19 = vpop.f32.mrb[44].mxu0 }
0x1c7c   :  { %v5685_v43 = vpop.f32.mrb[45].mxu0 }
0x1c7d   :  { %5825 = vmatprep.mubr.f32.mxu1 %v5685_v43 }
0x1c7e   :  { %5826 = vmatmul.mubr.f32.vlgmr.msra.gmra.mrb[34].mxu1 %v5683_v19 }
0x1c7f   :  { %9744 = vmatpush1.bf16.msra.mxu1 %v13785_v39  ;;  %5896 = vmatprep.mubr.f32.mxu1 %v13081_v58 }
0x1c80   :  { %9747 = vmatprep.subr.msk.bf16.mxu1 %vm11478_vm6, %v13790_v15 }
0x1c83   :  { %9750 = vmatpush1.bf16.msk.msra.mxu1 %vm11478_vm6, %v13796_v26 }
0x1c8d   :  { %v5754_v62 = vpop.f32.mrb[46].mxu0 }
0x1c8e   :  { %v8496_v31 = vpop.f32.mrb[47].mxu0  ;;  %7565 = vmatmul.mubr.msk.f32.vlgmr.msra.gmra.mrb[34].mxu1 %vm1664_vm9, %v5754_v62 }
0x1c8f   :  { %6640 = vmatprep.mubr.f32.mxu1 %v13081_v58 }
0x1ccd   :  { %v6302_v63 = vpop.f32.mrb[48].mxu0 }
0x1cce   :  { %v6304_v51 = vpop.f32.mrb[49].mxu0  ;;  %6412 = vrot.lane.b32.xlu0 %v6302_v63, %s11264_s3  ;;  %6392 = vrot.lane.b32.xlu1 %v6302_v63, %s11262_s2 }
0x1cd2   :  { %6452 = vrot.lane.b32.xlu0 %v6302_v63, %s11273_s30  ;;  %6432 = vrot.lane.b32.xlu1 %v6302_v63, %s11271_s9 }
0x1cd6   :  { %6472 = vrot.lane.b32.xlu1 %v6302_v63, %s11265_s28  ;;  %6414 = vrot.lane.b32.xlu0 %v6304_v51, %s11264_s3 }
0x1cda   :  { %6434 = vrot.lane.b32.xlu0 %v6304_v51, %s11271_s9  ;;  %6394 = vrot.lane.b32.xlu1 %v6304_v51, %s11262_s2 }
0x1cde   :  { %6454 = vrot.lane.b32.xlu0 %v6304_v51, %s11273_s30 }
0x1ce2   :  { %6474 = vrot.lane.b32.xlu0 %v6304_v51, %s11265_s28 }
0x1ced   :  { %v8023_v39 = vpop.f32.mrb[50].mxu0 }
0x1cee   :  { %v8024_v15 = vpop.f32.mrb[51].mxu0 }
0x1cef   :  { %v8025_v26 = vadd.f32 %v8024_v15, %v8023_v39 }
0x1cf1   :  { %6379 = vst.msk [vmem:[#allocation2 + $0x10] sm:$0xff] %vm1657_vm8, %v8025_v26 }
0x1cf8   :  { %v6408_v2 = vld [vmem:[#allocation2 + $0x10] sm:$0xff] }
0x1cf9   :  { %6416 = vrot.lane.b32.xlu1 %v6408_v2, %s11264_s3  ;;  %6396 = vrot.lane.b32.xlu0 %v6408_v2, %s11262_s2  ;;  %6385 = vst.msk [vmem:[#allocation3 + $0x10] sm:$0xff] %vm1664_vm9, %v6408_v2 }
0x1cfd   :  { %6436 = vrot.lane.b32.xlu1 %v6408_v2, %s11271_s9  ;;  %6494 = vrot.lane.b32.xlu0 %v6304_v51, %s11274_s4 }
0x1d01   :  { %6456 = vrot.lane.b32.xlu1 %v6408_v2, %s11273_s30  ;;  %6514 = vrot.lane.b32.xlu0 %v6304_v51, %s11272_s5 }
0x1d05   :  { %6476 = vrot.lane.b32.xlu1 %v6408_v2, %s11265_s28  ;;  %6492 = vrot.lane.b32.xlu0 %v6302_v63, %s11274_s4 }
0x1d09   :  { %6496 = vrot.lane.b32.xlu1 %v6408_v2, %s11274_s4  ;;  %6534 = vrot.lane.b32.xlu0 %v6304_v51, %s11275_s6 }
0x1d0d   :  { %6516 = vrot.lane.b32.xlu1 %v6408_v2, %s11272_s5  ;;  %6532 = vrot.lane.b32.xlu0 %v6302_v63, %s11275_s6 }
0x1d11   :  { %6512 = vrot.lane.b32.xlu1 %v6302_v63, %s11272_s5 }
0x1d15   :  { %6536 = vrot.lane.b32.xlu1 %v6408_v2, %s11275_s6 }
0x1d40   :  { %v6413_v19 = vpop.permute.xlu0 %6412  ;;  %v6393_v62 = vpop.permute.xlu1 %6392 }
0x1d44   :  { %v6453_v43 = vpop.permute.xlu0 %6452  ;;  %v6433_v39 = vpop.permute.xlu1 %6432 }
0x1d48   :  { %v6415_v31 = vpop.permute.xlu0 %6414  ;;  %v6473_v26 = vpop.permute.xlu1 %6472 }
0x1d4c   :  { %v6435_v15 = vpop.permute.xlu0 %6434  ;;  %v6395_v2 = vpop.permute.xlu1 %6394 }
0x1d4d   :  { %v6398_v42 = vsel %vm1678_vm10, %v6393_v62, %v6395_v2  ;;  %v6438_v6 = vsel %vm1720_vm12, %v6433_v39, %v6435_v15  ;;  %v6418_v62 = vsel %vm1699_vm11, %v6413_v19, %v6415_v31 }
0x1d4e   :  { %v9849_v27 = vpack.c.bf16 %v6398_v42, %v6302_v63 }
0x1d50   :  { %v6455_v30 = vpop.permute.xlu0 %6454 }
0x1d54   :  { %v6475_v28 = vpop.permute.xlu0 %6474 }
0x1d61   :  { %v14206_v35 = vpop.f32.mrb[34].mxu1 }
0x1d62   :  { %14855 = vst [vmem:[#allocation23_spill] sm:$0xff] %v14206_v35  ;;  %v5911_v12 = vsel %vm4313_vm1, %v14206_v35, 0.0  ;;  %v14210_v49 = vpop.f32.mrb[35].mxu1 }
0x1d63   :  { %14856 = vst [vmem:[#allocation10_spill] sm:$0xff] %v14210_v49  ;;  %v5912_v53 = vsel %vm4313_vm1, %v14210_v49, 0.0 }
0x1d64   :  { %v14214_v38 = vadd.f32 %v5912_v53, %v5911_v12 }
0x1d66   :  { %14857 = vst [vmem:[#allocation11_spill] sm:$0xff] %v14214_v38 }
0x1d6b   :  { %v6417_v1 = vpop.permute.xlu1 %6416  ;;  %v6397_v0 = vpop.permute.xlu0 %6396 }
0x1d6c   :  { %6425 = vst.msk [vmem:[#allocation3 + $0x40] sm:$0xff] %vm1664_vm9, %v6417_v1  ;;  %v6399_v41 = vsel %vm1678_vm10, %v6395_v2, %v6397_v0  ;;  %6405 = vst.msk [vmem:[#allocation3 + $0x28] sm:$0xff] %vm1664_vm9, %v6397_v0  ;;  %v6419_v12 = vsel %vm1699_vm11, %v6415_v31, %v6417_v1  ;;  %v9853_v2 = vpack.c.bf16 %v6438_v6, %v6418_v62 }
0x1d6d   :  { %v9847_v35 = vpack.c.bf16 %v6399_v41, %v6304_v51  ;;  %v6478_v0 = vsel %vm1762_vm14, %v6473_v26, %v6475_v28  ;;  %v14261_v26 = vld [vmem:[%s14700_s10 + $0x24] ss:$8 sps:$4 sm:$0xff]  }
0x1d6f   :  { %v6437_v22 = vpop.permute.xlu1 %6436  ;;  %v6495_v49 = vpop.permute.xlu0 %6494  ;;  %9848 = vmatprep.subr.bf16.mxu1 %v9847_v35 }
0x1d70   :  { %v6439_v53 = vsel %vm1720_vm12, %v6435_v15, %v6437_v22  ;;  %6445 = vst.msk [vmem:[#allocation3 + $0x58] sm:$0xff] %vm1664_vm9, %v6437_v22  ;;  %9850 = vmatpush1.bf16.msra.mxu1 %v9849_v27  ;;  %v6458_v22 = vsel %vm1741_vm13, %v6453_v43, %v6455_v30  ;;  %v14255_v15 = vld [vmem:[%s14700_s10 + $0x10] ss:$8 sps:$4 sm:$0xff]  }
0x1d71   :  { %v9851_v38 = vpack.c.bf16 %v6439_v53, %v6419_v12  ;;  %v9857_v63 = vpack.c.bf16 %v6478_v0, %v6458_v22  ;;  %v14269_v0 = vld [vmem:[%s14700_s10 + $0x20] ss:$8 sps:$4 sm:$0xff]  }
0x1d72   :  { %v14282_v22 = vld [vmem:[%s14708_s20] sm:$0xf] }
0x1d73   :  { %v6457_v37 = vpop.permute.xlu1 %6456  ;;  %9852 = vmatprep.subr.bf16.mxu1 %v9851_v38  ;;  %v6515_v41 = vpop.permute.xlu0 %6514  ;;  %v14235_v38 = vld [vmem:[%s14700_s10 + $0x4] ss:$8 sps:$4 sm:$0xff]  }
0x1d74   :  { %6465 = vst.msk [vmem:[#allocation3 + $0x70] sm:$0xff] %vm1664_vm9, %v6457_v37  ;;  %9854 = vmatpush1.bf16.msra.mxu1 %v9853_v2  ;;  %v6459_v1 = vsel %vm1741_vm13, %v6455_v30, %v6457_v37  ;;  %v14240_v37 = vld [vmem:[%s14700_s10] ss:$8 sps:$4 sm:$0xff]   ;;  %v14245_v30 = vld [vmem:[%s14700_s10 + $0x14] ss:$8 sps:$4 sm:$0xff]   ;;  %9876 = vmatprep.subr.bf16.mxu0 %v14235_v38 }
0x1d75   :  { %9878 = vmatpush1.bf16.msra.mxu0 %v14240_v37 }
0x1d76   :  { %9880 = vmatprep.subr.bf16.mxu0 %v14245_v30 }
0x1d77   :  { %v6477_v35 = vpop.permute.xlu1 %6476  ;;  %v6493_v6 = vpop.permute.xlu0 %6492 }
0x1d78   :  { %v6479_v42 = vsel %vm1762_vm14, %v6475_v28, %v6477_v35  ;;  %6485 = vst.msk [vmem:[#allocation3 + $0x88] sm:$0xff] %vm1664_vm9, %v6477_v35  ;;  %v6498_v53 = vsel %vm1783_vm15, %v6493_v6, %v6495_v49  ;;  %v14275_v35 = vld [vmem:[%s14700_s10 + $0x34] ss:$8 sps:$4 sm:$0xff]   ;;  %v14290_v6 = vld [vmem:[%s14700_s10 + $0x30] ss:$8 sps:$4 sm:$0xff]  }
0x1d79   :  { %v9855_v27 = vpack.c.bf16 %v6479_v42, %v6459_v1  ;;  %9882 = vmatpush1.bf16.msra.mxu0 %v14255_v15 }
0x1d7a   :  { %9884 = vmatprep.subr.bf16.mxu0 %v14261_v26 }
0x1d7b   :  { %v6497_v51 = vpop.permute.xlu1 %6496  ;;  %9856 = vmatprep.subr.bf16.mxu1 %v9855_v27  ;;  %v6535_v31 = vpop.permute.xlu0 %6534 }
0x1d7c   :  { %6505 = vst.msk [vmem:[#allocation3 + $0xa0] sm:$0xff] %vm1664_vm9, %v6497_v51  ;;  %9858 = vmatpush1.bf16.msra.mxu1 %v9857_v63  ;;  %v6499_v19 = vsel %vm1783_vm15, %v6495_v49, %v6497_v51  ;;  %v6548_v63 = vld [vmem:[#allocation3 + $0x10] sm:$0xff] }
0x1d7d   :  { %9886 = vmatpush1.bf16.msra.mxu0 %v14269_v0 }
0x1d7e   :  { %9888 = vmatprep.subr.bf16.mxu0 %v14275_v35 }
0x1d7f   :  { %v6517_v28 = vpop.permute.xlu1 %6516  ;;  %v6533_v1 = vpop.permute.xlu0 %6532 }
0x1d80   :  { %v6519_v43 = vsel %vm1804_vm2, %v6515_v41, %v6517_v28  ;;  %6525 = vst.msk [vmem:[#allocation3 + $0xb8] sm:$0xff] %vm1664_vm9, %v6517_v28  ;;  %v6538_v27 = vsel %vm1825_vm3, %v6533_v1, %v6535_v31  ;;  %v14295_v28 = vld [vmem:[%s14700_s10 + $0x44] ss:$8 sps:$4 sm:$0xff]  }
0x1d81   :  { %v9859_v39 = vpack.c.bf16 %v6519_v43, %v6499_v19  ;;  %v6557_v19 = vld [vmem:[#allocation3 + $0x58] sm:$0xff]  ;;  %v6554_v43 = vld [vmem:[#allocation3 + $0x40] sm:$0xff]  ;;  %9890 = vmatpush1.bf16.msra.mxu0 %v14290_v6 }
0x1d82   :  { %9892 = vmatprep.subr.bf16.mxu0 %v14295_v28 }
0x1d83   :  { %v6513_v12 = vpop.permute.xlu1 %6512  ;;  %9860 = vmatprep.subr.bf16.mxu1 %v9859_v39  ;;  %v9867_v39 = vpack.c.bf16 %v6557_v19, %v6554_v43  ;;  %v14347_v43 = vld [vmem:[%s14700_s10 + $0x70] ss:$8 sps:$4 sm:$0xff]  }
0x1d84   :  { %v6518_v62 = vsel %vm1804_vm2, %v6513_v12, %v6515_v41  ;;  %v6551_v41 = vld [vmem:[#allocation3 + $0x28] sm:$0xff]  ;;  %v14313_v12 = vld [vmem:[%s14700_s10 + $0x54] ss:$8 sps:$4 sm:$0xff]  }
0x1d85   :  { %v9861_v2 = vpack.c.bf16 %v6518_v62, %v6498_v53  ;;  %v9864_v51 = vpack.c.bf16 %v6551_v41, %v6548_v63  ;;  %v6563_v53 = vld [vmem:[#allocation3 + $0x88] sm:$0xff]  ;;  %v6560_v62 = vld [vmem:[#allocation3 + $0x70] sm:$0xff]  ;;  %v6566_v41 = vld [vmem:[#allocation3 + $0xa0] sm:$0xff] }
0x1d86   :  { %v9870_v1 = vpack.c.bf16 %v6563_v53, %v6560_v62  ;;  %v14858_v53 = vld [vmem:[#allocation12_spill] sm:$0xff]  ;;  %v14364_v62 = vld [vmem:[%s14700_s10 + $0x80] ss:$8 sps:$4 sm:$0xff]  }
0x1d87   :  { %v6537_v42 = vpop.permute.xlu1 %6536  ;;  %9862 = vmatpush1.bf16.msra.mxu1 %v9861_v2  ;;  %v14320_v2 = vld [vmem:[%s14700_s10 + $0x50] ss:$8 sps:$4 sm:$0xff]  }
0x1d88   :  { %v6539_v49 = vsel %vm1825_vm3, %v6535_v31, %v6537_v42  ;;  %6545 = vst.msk [vmem:[#allocation3 + $0xd0] sm:$0xff] %vm1664_vm9, %v6537_v42  ;;  %v14307_v31 = vld [vmem:[%s14700_s10 + $0x40] ss:$8 sps:$4 sm:$0xff]   ;;  %v14326_v42 = vld [vmem:[%s14700_s10 + $0x64] ss:$8 sps:$4 sm:$0xff]  }
0x1d89   :  { %6592 = vmatprep.subr.mxu1 %v6539_v49  ;;  %9894 = vmatpush1.bf16.msra.mxu0 %v14307_v31  ;;  %v6569_v49 = vld [vmem:[#allocation3 + $0xb8] sm:$0xff] }
0x1d8a   :  { %9896 = vmatprep.subr.bf16.mxu0 %v14313_v12  ;;  %v9873_v63 = vpack.c.bf16 %v6569_v49, %v6566_v41 }
0x1d8b   :  { %6593 = vmatpush1.msra.mxu1 %v6538_v27  ;;  %v14333_v27 = vld [vmem:[%s14700_s10 + $0x60] ss:$8 sps:$4 sm:$0xff]  }
0x1d8c   :  { %7566 = vmatmul.mubr.msk.f32.vlgmr.msra.gmra.mrb[36].mxu1 %vm247_vm7, %v14282_v22  ;;  %9863 = vmatprep.subr.bf16.mxu1 %v14807_v56 }
0x1d8d   :  { %9865 = vmatpush3.bf16.msra.mxu1 %v9864_v51  ;;  %8515 = vmatprep.mubr.msk.f32.mxu1 %vm11259_vm0, %v13081_v58  ;;  %v14339_v51 = vld [vmem:[%s14700_s10 + $0x74] ss:$8 sps:$4 sm:$0xff]  }
0x1d8e   :  { %9866 = vmatprep.subr.bf16.mxu1 %v14807_v56  ;;  %9898 = vmatpush1.bf16.msra.mxu0 %v14320_v2 }
0x1d8f   :  { %9900 = vmatprep.subr.bf16.mxu0 %v14326_v42  ;;  %v6572_v19 = vld [vmem:[#allocation3 + $0xd0] sm:$0xff] }
0x1d91   :  { %9868 = vmatpush3.bf16.msra.mxu1 %v9867_v39  ;;  %v14352_v39 = vld [vmem:[%s14700_s10 + $0x84] ss:$8 sps:$4 sm:$0xff]  }
0x1d92   :  { %9869 = vmatprep.subr.bf16.mxu1 %v14807_v56  ;;  %9902 = vmatpush1.bf16.msra.mxu0 %v14333_v27 }
0x1d93   :  { %9904 = vmatprep.subr.bf16.mxu0 %v14339_v51 }
0x1d95   :  { %9871 = vmatpush3.bf16.msra.mxu1 %v9870_v1  ;;  %v14370_v1 = vld [vmem:[%s14700_s10 + $0x94] ss:$8 sps:$4 sm:$0xff]  }
0x1d96   :  { %9872 = vmatprep.subr.bf16.mxu1 %v14807_v56  ;;  %9906 = vmatpush1.bf16.msra.mxu0 %v14347_v43 }
0x1d97   :  { %9908 = vmatprep.subr.bf16.mxu0 %v14352_v39 }
0x1d99   :  { %9874 = vmatpush3.bf16.msra.mxu1 %v9873_v63 }
0x1d9a   :  { %8513 = vmatprep.subr.mxu1 %v13081_v58  ;;  %9910 = vmatpush1.bf16.msra.mxu0 %v14364_v62 }
0x1d9b   :  { %9912 = vmatprep.subr.bf16.mxu0 %v14370_v1 }
0x1d9d   :  { %8514 = vmatpush3.msra.mxu1 %v6572_v19 }
0x1d9e   :  { %8516 = vmatmul.mubr.msk.f32.vlgmr.msra.gmra.mrb[38].mxu1 %vm247_vm7, %v14282_v22  ;;  %9950 = vmatprep.subr.bf16.mxu1 %v13879_v10  ;;  %v14378_v10 = vld [vmem:[%s14700_s10 + $0x90] ss:$8 sps:$4 sm:$0xff]  }
0x1d9f   :  { %9952 = vmatpush1.bf16.msra.mxu1 %v13884_v7  ;;  %6937 = vmatprep.mubr.f32.mxu1 %v14858_v53  ;;  %v14384_v7 = vld [vmem:[%s14700_s10 + $0xa4] ss:$8 sps:$4 sm:$0xff]  }
0x1da0   :  { %9954 = vmatprep.subr.bf16.mxu1 %v13889_v18  ;;  %9914 = vmatpush1.bf16.msra.mxu0 %v14378_v10  ;;  %v14392_v18 = vld [vmem:[%s14700_s10 + $0xa0] ss:$8 sps:$4 sm:$0xff]  }
0x1da1   :  { %9916 = vmatprep.subr.bf16.mxu0 %v14384_v7 }
0x1da3   :  { %9956 = vmatpush1.bf16.msra.mxu1 %v13899_v40  ;;  %v14398_v40 = vld [vmem:[%s14700_s10 + $0xb4] ss:$8 sps:$4 sm:$0xff]  }
0x1da4   :  { %9958 = vmatprep.subr.bf16.mxu1 %v13905_v45  ;;  %9918 = vmatpush1.bf16.msra.mxu0 %v14392_v18  ;;  %v14406_v45 = vld [vmem:[%s14700_s10 + $0xb0] ss:$8 sps:$4 sm:$0xff]  }
0x1da5   :  { %9920 = vmatprep.subr.bf16.mxu0 %v14398_v40 }
0x1da7   :  { %9960 = vmatpush1.bf16.msra.mxu1 %v13911_v8  ;;  %v14412_v8 = vld [vmem:[%s14700_s10 + $0xc4] ss:$8 sps:$4 sm:$0xff]  }
0x1da8   :  { %9962 = vmatprep.subr.bf16.mxu1 %v13917_v46  ;;  %9922 = vmatpush1.bf16.msra.mxu0 %v14406_v45  ;;  %v14420_v46 = vld [vmem:[%s14700_s10 + $0xc0] ss:$8 sps:$4 sm:$0xff]  }
0x1da9   :  { %9924 = vmatprep.subr.bf16.mxu0 %v14412_v8 }
0x1dab   :  { %9964 = vmatpush1.bf16.msra.mxu1 %v13923_v34  ;;  %v14426_v34 = vld [vmem:[%s14700_s10 + $0xd4] ss:$8 sps:$4 sm:$0xff]  }
0x1dac   :  { %9966 = vmatprep.subr.bf16.mxu1 %v13929_v24  ;;  %9926 = vmatpush1.bf16.msra.mxu0 %v14420_v46  ;;  %v14434_v24 = vld [vmem:[%s14700_s10 + $0xd0] ss:$8 sps:$4 sm:$0xff]  }
0x1dad   :  { %9928 = vmatprep.subr.bf16.mxu0 %v14426_v34 }
0x1daf   :  { %9968 = vmatpush1.bf16.msra.mxu1 %v13935_v5  ;;  %v14440_v5 = vld [vmem:[%s14700_s10 + $0xe4] ss:$8 sps:$4 sm:$0xff]  }
0x1db0   :  { %9970 = vmatprep.subr.bf16.mxu1 %v13941_v3  ;;  %9930 = vmatpush1.bf16.msra.mxu0 %v14434_v24  ;;  %v14448_v3 = vld [vmem:[%s14700_s10 + $0xe0] ss:$8 sps:$4 sm:$0xff]  }
0x1db1   :  { %9932 = vmatprep.subr.bf16.mxu0 %v14440_v5 }
0x1db3   :  { %9972 = vmatpush1.bf16.msra.mxu1 %v13947_v33  ;;  %v14454_v33 = vld [vmem:[%s14700_s10 + $0xf4] ss:$8 sps:$4 sm:$0xff]  }
0x1db4   :  { %9974 = vmatprep.subr.bf16.mxu1 %v13953_v44  ;;  %9934 = vmatpush1.bf16.msra.mxu0 %v14448_v3  ;;  %v14462_v44 = vld [vmem:[%s14700_s10 + $0xf0] ss:$8 sps:$4 sm:$0xff]  }
0x1db5   :  { %9936 = vmatprep.subr.bf16.mxu0 %v14454_v33 }
0x1db7   :  { %9976 = vmatpush1.bf16.msra.mxu1 %v13959_v50  ;;  %v14859_v50 = vld [vmem:[#allocation5_spill] sm:$0xff] }
0x1db8   :  { %9978 = vmatprep.subr.bf16.mxu1 %v13965_v21  ;;  %9938 = vmatpush1.bf16.msra.mxu0 %v14462_v44  ;;  %v11215_v21 = vld [vmem:[%s14700_s10 + $0x104] ss:$8 sps:$4 sm:$0xff]  }
0x1db9   :  { %9940 = vmatprep.subr.bf16.mxu0 %v11215_v21 }
0x1dbb   :  { %9980 = vmatpush1.bf16.msra.mxu1 %v13971_v13  ;;  %v14860_v13 = vld [vmem:[#allocation9_spill] sm:$0xff] }
0x1dbc   :  { %9982 = vmatprep.subr.bf16.mxu1 %v13977_v47  ;;  %v14861_v47 = vld [vmem:[#allocation13_spill] sm:$0xff] }
0x1dbf   :  { %9984 = vmatpush1.bf16.msra.mxu1 %v13983_v52  ;;  %v14862_v52 = vld [vmem:[#allocation14_spill] sm:$0xff] }
0x1dc0   :  { %9986 = vmatprep.subr.bf16.mxu1 %v13989_v54  ;;  %v14863_v54 = vld [vmem:[#allocation15_spill] sm:$0xff] }
0x1dc3   :  { %9988 = vmatpush1.bf16.msra.mxu1 %v13995_v36  ;;  %v14864_v36 = vld [vmem:[#allocation16_spill] sm:$0xff] }
0x1dc4   :  { %9990 = vmatprep.subr.bf16.mxu1 %v14001_v55  ;;  %v14865_v55 = vld [vmem:[#allocation17_spill] sm:$0xff] }
0x1dc7   :  { %9992 = vmatpush1.bf16.msra.mxu1 %v14007_v57  ;;  %v14866_v57 = vld [vmem:[#allocation18_spill] sm:$0xff] }
0x1dc8   :  { %9994 = vmatprep.subr.bf16.mxu1 %v14013_v59  ;;  %v14867_v59 = vld [vmem:[#allocation19_spill] sm:$0xff] }
0x1dcb   :  { %9996 = vmatpush1.bf16.msra.mxu1 %v14019_v11  ;;  %v14868_v11 = vld [vmem:[#allocation20_spill] sm:$0xff] }
0x1dcc   :  { %9998 = vmatprep.subr.bf16.mxu1 %v14025_v60  ;;  %v14869_v60 = vld [vmem:[#allocation21_spill] sm:$0xff] }
0x1dcf   :  { %10000 = vmatpush1.bf16.msra.mxu1 %v14031_v14  ;;  %v14870_v14 = vld [vmem:[#allocation22_spill] sm:$0xff] }
0x1dd0   :  { %10002 = vmatprep.subr.bf16.mxu1 %v14037_v16 }
0x1dd3   :  { %10004 = vmatpush1.bf16.msra.mxu1 %v14043_v17  ;;  %v14538_v17 = vld [vmem:[%s14700_s10 + $0x100] ss:$8 sps:$4 sm:$0xff]  }
0x1dd4   :  { %10006 = vmatprep.subr.bf16.mxu1 %v14049_v20 }
0x1dd7   :  { %10008 = vmatpush1.bf16.msra.mxu1 %v14055_v4  ;;  %v14543_v4 = vld [vmem:[%s14700_s10 + $0x114] ss:$8 sps:$4 sm:$0x7f]  }
0x1dd8   :  { %10010 = vmatprep.subr.bf16.mxu1 %v14061_v23  ;;  %v14549_v23 = vld [vmem:[%s14700_s10 + $0x110] ss:$8 sps:$4 sm:$0x7f]  }
0x1ddb   :  { %10012 = vmatpush1.bf16.msra.mxu1 %v14067_v61 }
0x1ddc   :  { %10014 = vmatprep.subr.bf16.mxu1 %v14073_v32 }
0x1dde   :  { %6938 = vmatmul.mubr.f32.vlgmr.msra.gmra.mrb[40].mxu1 %v14859_v50 }
0x1ddf   :  { %10016 = vmatpush3.bf16.msra.mxu1 %v14079_v9  ;;  %7008 = vmatprep.mubr.f32.mxu1 %v14858_v53 }
0x1de0   :  { %10018 = vmatprep.subr.bf16.mxu1 %v14085_v29 }
0x1de3   :  { %10020 = vmatpush3.bf16.msra.mxu1 %v14093_v25 }
0x1de4   :  { %10022 = vmatprep.subr.bf16.mxu1 %v14099_v48 }
0x1de7   :  { %10024 = vmatpush3.bf16.msra.mxu1 %v14860_v13 }
0x1de8   :  { %10026 = vmatprep.subr.bf16.mxu1 %v14861_v47 }
0x1deb   :  { %10028 = vmatpush3.bf16.msra.mxu1 %v14862_v52 }
0x1dec   :  { %10030 = vmatprep.subr.bf16.mxu1 %v14863_v54 }
0x1def   :  { %10032 = vmatpush3.bf16.msra.mxu1 %v14864_v36 }
0x1df0   :  { %10034 = vmatprep.subr.bf16.mxu1 %v14865_v55 }
0x1df3   :  { %10036 = vmatpush3.bf16.msra.mxu1 %v14866_v57 }
0x1df4   :  { %10038 = vmatprep.subr.bf16.mxu1 %v14867_v59 }
0x1df7   :  { %10040 = vmatpush3.bf16.msra.mxu1 %v14868_v11 }
0x1df8   :  { %10042 = vmatprep.subr.bf16.mxu1 %v14869_v60 }
0x1dfb   :  { %10044 = vmatpush3.bf16.msra.mxu1 %v14870_v14 }
0x1dfc   :  { %10074 = vmatprep.subr.bf16.mxu1 %v14235_v38 }
0x1dfe   :  { %7009 = vmatmul.mubr.f32.vlgmr.msra.gmra.mrb[42].mxu1 %v14859_v50 }
0x1dff   :  { %10076 = vmatpush1.bf16.msra.mxu1 %v14240_v37 }
0x1e00   :  { %10078 = vmatprep.subr.bf16.mxu1 %v14245_v30 }
0x1e03   :  { %10080 = vmatpush1.bf16.msra.mxu1 %v14255_v15  ;;  %v14872_v15 = vld [vmem:[#allocation11_spill] sm:$0xff] }
0x1e04   :  { %10082 = vmatprep.subr.bf16.mxu1 %v14261_v26  ;;  %v14873_v26 = vld [vmem:[#allocation8_spill] sm:$0xff] }
0x1e07   :  { %10084 = vmatpush1.bf16.msra.mxu1 %v14269_v0 }
0x1e08   :  { %10086 = vmatprep.subr.bf16.mxu1 %v14275_v35 }
0x1e0b   :  { %10088 = vmatpush1.bf16.msra.mxu1 %v14290_v6 }
0x1e0c   :  { %10090 = vmatprep.subr.bf16.mxu1 %v14295_v28 }
0x1e0f   :  { %10092 = vmatpush1.bf16.msra.mxu1 %v14307_v31 }
0x1e10   :  { %10094 = vmatprep.subr.bf16.mxu1 %v14313_v12 }
0x1e13   :  { %10096 = vmatpush1.bf16.msra.mxu1 %v14320_v2 }
0x1e14   :  { %10098 = vmatprep.subr.bf16.mxu1 %v14326_v42 }
0x1e17   :  { %10100 = vmatpush1.bf16.msra.mxu1 %v14333_v27 }
0x1e18   :  { %10102 = vmatprep.subr.bf16.mxu1 %v14339_v51 }
0x1e1b   :  { %10104 = vmatpush1.bf16.msra.mxu1 %v14347_v43 }
0x1e1c   :  { %10106 = vmatprep.subr.bf16.mxu1 %v14352_v39 }
0x1e1f   :  { %10108 = vmatpush1.bf16.msra.mxu1 %v14364_v62 }
0x1e20   :  { %10110 = vmatprep.subr.bf16.mxu1 %v14370_v1 }
0x1e23   :  { %10112 = vmatpush1.bf16.msra.mxu1 %v14378_v10 }
0x1e24   :  { %10114 = vmatprep.subr.bf16.mxu1 %v14384_v7 }
0x1e27   :  { %10116 = vmatpush1.bf16.msra.mxu1 %v14392_v18 }
0x1e28   :  { %10118 = vmatprep.subr.bf16.mxu1 %v14398_v40 }
0x1e2b   :  { %10120 = vmatpush1.bf16.msra.mxu1 %v14406_v45 }
0x1e2c   :  { %10122 = vmatprep.subr.bf16.mxu1 %v14412_v8 }
0x1e2f   :  { %10124 = vmatpush1.bf16.msra.mxu1 %v14420_v46 }
0x1e30   :  { %10126 = vmatprep.subr.bf16.mxu1 %v14426_v34 }
0x1e33   :  { %10128 = vmatpush1.bf16.msra.mxu1 %v14434_v24 }
0x1e34   :  { %10130 = vmatprep.subr.bf16.mxu1 %v14440_v5 }
0x1e37   :  { %10132 = vmatpush1.bf16.msra.mxu1 %v14448_v3 }
0x1e38   :  { %10134 = vmatprep.subr.bf16.mxu1 %v14454_v33 }
0x1e3b   :  { %10136 = vmatpush1.bf16.msra.mxu1 %v14462_v44 }
0x1e3c   :  { %10138 = vmatprep.subr.bf16.mxu1 %v11215_v21 }
0x1e5f   :  { %v6642_v16 = vpop.f32.mrb[36].mxu1 }
0x1e60   :  { %v6644_v20 = vpop.f32.mrb[37].mxu1 }
0x1e61   :  { %6795 = vmatprep.mubr.f32.mxu0 %v6644_v20 }
0x1e62   :  { %6796 = vmatmul.mubr.f32.vlgmr.msra.gmra.mrb[52].mxu0 %v6642_v16 }
0x1e63   :  { %9942 = vmatpush1.bf16.msra.mxu0 %v14538_v17  ;;  %6866 = vmatprep.mubr.f32.mxu0 %v13081_v58 }
0x1e64   :  { %9945 = vmatprep.subr.msk.bf16.mxu0 %vm11478_vm6, %v14543_v4 }
0x1e67   :  { %9948 = vmatpush1.bf16.msk.msra.mxu0 %vm11478_vm6, %v14549_v23 }
0x1e71   :  { %v6713_v32 = vpop.f32.mrb[38].mxu1 }
0x1e72   :  { %v8517_v9 = vpop.f32.mrb[39].mxu1  ;;  %7570 = vmatmul.mubr.msk.f32.vlgmr.msra.gmra.mrb[52].mxu0 %vm1664_vm9, %v6713_v32 }
0x1e73   :  { %7274 = vmatprep.mubr.f32.mxu0 %v13081_v58 }
0x1eb1   :  { %v14560_v29 = vpop.f32.mrb[40].mxu1 }
0x1eb2   :  { %7014 = vst [vmem:[#allocation2] sm:$0xff] %v14560_v29  ;;  %v14563_v25 = vpop.f32.mrb[41].mxu1  ;;  %7049 = vrot.lane.b32.xlu0 %v14560_v29, %s11264_s3  ;;  %7029 = vrot.lane.b32.xlu1 %v14560_v29, %s11262_s2  ;;  %7020 = vst [vmem:[#allocation3] sm:$0xff] %v14560_v29 }
0x1eb3   :  { %7015 = vst [vmem:[#allocation2 + $0x8] sm:$0xff] %v14563_v25 }
0x1eb6   :  { %7089 = vrot.lane.b32.xlu0 %v14560_v29, %s11273_s30  ;;  %7069 = vrot.lane.b32.xlu1 %v14560_v29, %s11271_s9 }
0x1eba   :  { %7109 = vrot.lane.b32.xlu1 %v14560_v29, %s11265_s28  ;;  %7051 = vrot.lane.b32.xlu0 %v14563_v25, %s11264_s3 }
0x1ebe   :  { %7071 = vrot.lane.b32.xlu0 %v14563_v25, %s11271_s9  ;;  %7031 = vrot.lane.b32.xlu1 %v14563_v25, %s11262_s2 }
0x1ec2   :  { %7091 = vrot.lane.b32.xlu0 %v14563_v25, %s11273_s30 }
0x1ec6   :  { %7111 = vrot.lane.b32.xlu0 %v14563_v25, %s11265_s28 }
0x1ed1   :  { %v8068_v48 = vpop.f32.mrb[42].mxu1 }
0x1ed2   :  { %v8069_v38 = vpop.f32.mrb[43].mxu1 }
0x1ed3   :  { %v8070_v37 = vadd.f32 %v8069_v38, %v8068_v48 }
0x1ed5   :  { %7016 = vst.msk [vmem:[#allocation2 + $0x10] sm:$0xff] %vm1657_vm8, %v8070_v37 }
0x1edc   :  { %v7045_v30 = vld [vmem:[#allocation2 + $0x10] sm:$0xff] }
0x1edd   :  { %7053 = vrot.lane.b32.xlu1 %v7045_v30, %s11264_s3  ;;  %7033 = vrot.lane.b32.xlu0 %v7045_v30, %s11262_s2  ;;  %7022 = vst.msk [vmem:[#allocation3 + $0x10] sm:$0xff] %vm1664_vm9, %v7045_v30 }
0x1ee1   :  { %7073 = vrot.lane.b32.xlu1 %v7045_v30, %s11271_s9  ;;  %7131 = vrot.lane.b32.xlu0 %v14563_v25, %s11274_s4 }
0x1ee4   :  { %v7185_v48 = vld [vmem:[#allocation3 + $0x10] sm:$0xff] }
0x1ee5   :  { %7093 = vrot.lane.b32.xlu1 %v7045_v30, %s11273_s30  ;;  %7151 = vrot.lane.b32.xlu0 %v14563_v25, %s11272_s5 }
0x1ee9   :  { %7113 = vrot.lane.b32.xlu1 %v7045_v30, %s11265_s28  ;;  %7129 = vrot.lane.b32.xlu0 %v14560_v29, %s11274_s4 }
0x1eed   :  { %7133 = vrot.lane.b32.xlu1 %v7045_v30, %s11274_s4  ;;  %7171 = vrot.lane.b32.xlu0 %v14563_v25, %s11275_s6 }
0x1ef1   :  { %7153 = vrot.lane.b32.xlu1 %v7045_v30, %s11272_s5  ;;  %7169 = vrot.lane.b32.xlu0 %v14560_v29, %s11275_s6 }
0x1ef5   :  { %7149 = vrot.lane.b32.xlu1 %v14560_v29, %s11272_s5 }
0x1ef9   :  { %7173 = vrot.lane.b32.xlu1 %v7045_v30, %s11275_s6 }
0x1f10   :  { %5914 = vadd.xlane.f32.xlu0 %v14872_v15 }
0x1f1d   :  { %5908 = vadd.xlane.f32.xlu1 %v14873_v26 }
0x1f24   :  { %v7050_v0 = vpop.permute.xlu0 %7049  ;;  %v7030_v35 = vpop.permute.xlu1 %7029 }
0x1f28   :  { %v7090_v6 = vpop.permute.xlu0 %7089  ;;  %v7070_v28 = vpop.permute.xlu1 %7069 }
0x1f2c   :  { %v7110_v31 = vpop.permute.xlu1 %7109  ;;  %v7052_v12 = vpop.permute.xlu0 %7051 }
0x1f2d   :  { %v7055_v2 = vsel %vm1699_vm11, %v7050_v0, %v7052_v12 }
0x1f2e   :  { %7060 = vst [vmem:[#allocation3 + $0x30] sm:$0xff] %v7055_v2 }
0x1f30   :  { %v7072_v42 = vpop.permute.xlu0 %7071  ;;  %v7032_v49 = vpop.permute.xlu1 %7031 }
0x1f31   :  { %v7075_v41 = vsel %vm1720_vm12, %v7070_v28, %v7072_v42  ;;  %v7035_v27 = vsel %vm1678_vm10, %v7030_v35, %v7032_v49 }
0x1f32   :  { %7080 = vst [vmem:[#allocation3 + $0x48] sm:$0xff] %v7075_v41  ;;  %7040 = vst [vmem:[#allocation3 + $0x18] sm:$0xff] %v7035_v27  ;;  %v10047_v40 = vpack.c.bf16 %v7035_v27, %v14560_v29  ;;  %v10051_v24 = vpack.c.bf16 %v7075_v41, %v7055_v2  ;;  %v14874_v27 = vld [vmem:[#allocation23_spill] sm:$0xff] }
0x1f34   :  { %v7092_v63 = vpop.permute.xlu0 %7091 }
0x1f35   :  { %v7095_v51 = vsel %vm1741_vm13, %v7090_v6, %v7092_v63 }
0x1f36   :  { %7100 = vst [vmem:[#allocation3 + $0x60] sm:$0xff] %v7095_v51 }
0x1f38   :  { %v7112_v19 = vpop.permute.xlu0 %7111 }
0x1f39   :  { %v7115_v43 = vsel %vm1762_vm14, %v7110_v31, %v7112_v19 }
0x1f3a   :  { %7120 = vst [vmem:[#allocation3 + $0x78] sm:$0xff] %v7115_v43  ;;  %v10055_v52 = vpack.c.bf16 %v7115_v43, %v7095_v51  ;;  %v14875_v51 = vld [vmem:[#allocation10_spill] sm:$0xff] }
0x1f3b   :  { %v14876_v43 = vld [vmem:[#allocation6_spill] sm:$0xff] }
0x1f45   :  { %v14616_v39 = vpop.f32.mrb[52].mxu0 }
0x1f46   :  { %v14618_v53 = vpop.f32.mrb[53].mxu0 }
0x1f4f   :  { %v7054_v62 = vpop.permute.xlu1 %7053  ;;  %v7034_v1 = vpop.permute.xlu0 %7033 }
0x1f50   :  { %v7056_v10 = vsel %vm1699_vm11, %v7052_v12, %v7054_v62  ;;  %7062 = vst.msk [vmem:[#allocation3 + $0x40] sm:$0xff] %vm1664_vm9, %v7054_v62  ;;  %v7036_v7 = vsel %vm1678_vm10, %v7032_v49, %v7034_v1  ;;  %7042 = vst.msk [vmem:[#allocation3 + $0x28] sm:$0xff] %vm1664_vm9, %v7034_v1  ;;  %v14877_v62 = vld [vmem:[#allocation7_spill] sm:$0xff] }
0x1f51   :  { %v10045_v18 = vpack.c.bf16 %v7036_v7, %v14563_v25 }
0x1f53   :  { %v7074_v45 = vpop.permute.xlu1 %7073  ;;  %v7132_v8 = vpop.permute.xlu0 %7131  ;;  %10046 = vmatprep.subr.bf16.mxu0 %v10045_v18 }
0x1f54   :  { %v7076_v46 = vsel %vm1720_vm12, %v7072_v42, %v7074_v45  ;;  %7082 = vst.msk [vmem:[#allocation3 + $0x58] sm:$0xff] %vm1664_vm9, %v7074_v45  ;;  %10048 = vmatpush1.bf16.msra.mxu0 %v10047_v40 }
0x1f55   :  { %v10049_v34 = vpack.c.bf16 %v7076_v46, %v7056_v10 }
0x1f57   :  { %v7094_v5 = vpop.permute.xlu1 %7093  ;;  %v7152_v3 = vpop.permute.xlu0 %7151  ;;  %10050 = vmatprep.subr.bf16.mxu0 %v10049_v34  ;;  %v7188_v25 = vld [vmem:[#allocation3 + $0x28] sm:$0xff]  ;;  %v7191_v30 = vld [vmem:[#allocation3 + $0x40] sm:$0xff] }
0x1f58   :  { %v7096_v33 = vsel %vm1741_vm13, %v7092_v63, %v7094_v5  ;;  %7102 = vst.msk [vmem:[#allocation3 + $0x70] sm:$0xff] %vm1664_vm9, %v7094_v5  ;;  %10052 = vmatpush1.bf16.msra.mxu0 %v10051_v24  ;;  %v10062_v38 = vpack.c.bf16 %v7188_v25, %v7185_v48 }
0x1f5b   :  { %v7114_v44 = vpop.permute.xlu1 %7113  ;;  %v7130_v50 = vpop.permute.xlu0 %7129  ;;  %v7194_v37 = vld [vmem:[#allocation3 + $0x58] sm:$0xff] }
0x1f5c   :  { %v7116_v21 = vsel %vm1762_vm14, %v7112_v19, %v7114_v44  ;;  %7122 = vst.msk [vmem:[#allocation3 + $0x88] sm:$0xff] %vm1664_vm9, %v7114_v44  ;;  %v7135_v13 = vsel %vm1783_vm15, %v7130_v50, %v7132_v8  ;;  %v10065_v15 = vpack.c.bf16 %v7194_v37, %v7191_v30 }
0x1f5d   :  { %7140 = vst [vmem:[#allocation3 + $0x90] sm:$0xff] %v7135_v13  ;;  %v10053_v47 = vpack.c.bf16 %v7116_v21, %v7096_v33 }
0x1f5f   :  { %v7134_v54 = vpop.permute.xlu1 %7133  ;;  %v7172_v36 = vpop.permute.xlu0 %7171  ;;  %10054 = vmatprep.subr.bf16.mxu0 %v10053_v47  ;;  %v7197_v0 = vld [vmem:[#allocation3 + $0x70] sm:$0xff]  ;;  %v5903_v47 = vld [vmem:[%s14709_s18] sm:$0xf] }
0x1f60   :  { %v7136_v55 = vsel %vm1783_vm15, %v7132_v8, %v7134_v54  ;;  %7142 = vst.msk [vmem:[#allocation3 + $0xa0] sm:$0xff] %vm1664_vm9, %v7134_v54  ;;  %10056 = vmatpush1.bf16.msra.mxu0 %v10055_v52 }
0x1f63   :  { %v7154_v57 = vpop.permute.xlu1 %7153  ;;  %v7170_v59 = vpop.permute.xlu0 %7169  ;;  %v7200_v26 = vld [vmem:[#allocation3 + $0x88] sm:$0xff] }
0x1f64   :  { %v7156_v11 = vsel %vm1804_vm2, %v7152_v3, %v7154_v57  ;;  %7162 = vst.msk [vmem:[#allocation3 + $0xb8] sm:$0xff] %vm1664_vm9, %v7154_v57  ;;  %v7175_v60 = vsel %vm1825_vm3, %v7170_v59, %v7172_v36  ;;  %v10068_v35 = vpack.c.bf16 %v7200_v26, %v7197_v0 }
0x1f65   :  { %7180 = vst [vmem:[#allocation3 + $0xc0] sm:$0xff] %v7175_v60  ;;  %v10057_v14 = vpack.c.bf16 %v7156_v11, %v7136_v55 }
0x1f67   :  { %v7150_v16 = vpop.permute.xlu1 %7149  ;;  %10058 = vmatprep.subr.bf16.mxu0 %v10057_v14  ;;  %v7203_v28 = vld [vmem:[#allocation3 + $0xa0] sm:$0xff] }
0x1f68   :  { %v7155_v20 = vsel %vm1804_vm2, %v7150_v16, %v7152_v3 }
0x1f69   :  { %7160 = vst [vmem:[#allocation3 + $0xa8] sm:$0xff] %v7155_v20  ;;  %v10059_v32 = vpack.c.bf16 %v7155_v20, %v7135_v13 }
0x1f6b   :  { %v7174_v9 = vpop.permute.xlu1 %7173  ;;  %10060 = vmatpush1.bf16.msra.mxu0 %v10059_v32  ;;  %v7206_v6 = vld [vmem:[#allocation3 + $0xb8] sm:$0xff] }
0x1f6c   :  { %v7176_v29 = vsel %vm1825_vm3, %v7172_v36, %v7174_v9  ;;  %7182 = vst.msk [vmem:[#allocation3 + $0xd0] sm:$0xff] %vm1664_vm9, %v7174_v9  ;;  %v10071_v31 = vpack.c.bf16 %v7206_v6, %v7203_v28 }
0x1f6d   :  { %7226 = vmatprep.subr.mxu0 %v7176_v29 }
0x1f6f   :  { %7227 = vmatpush1.msra.mxu0 %v7175_v60 }
0x1f70   :  { %7571 = vmatmul.mubr.msk.f32.vlgmr.msra.gmra.mrb[54].mxu0 %vm247_vm7, %v14282_v22  ;;  %10061 = vmatprep.subr.bf16.mxu0 %v14807_v56 }
0x1f71   :  { %10063 = vmatpush3.bf16.msra.mxu0 %v10062_v38  ;;  %8536 = vmatprep.mubr.msk.f32.mxu0 %vm11259_vm0, %v13081_v58 }
0x1f72   :  { %10064 = vmatprep.subr.bf16.mxu0 %v14807_v56 }
0x1f73   :  { %v7209_v12 = vld [vmem:[#allocation3 + $0xd0] sm:$0xff] }
0x1f75   :  { %10066 = vmatpush3.bf16.msra.mxu0 %v10065_v15 }
0x1f76   :  { %10067 = vmatprep.subr.bf16.mxu0 %v14807_v56 }
0x1f79   :  { %10069 = vmatpush3.bf16.msra.mxu0 %v10068_v35 }
0x1f7a   :  { %10070 = vmatprep.subr.bf16.mxu0 %v14807_v56 }
0x1f7d   :  { %10072 = vmatpush3.bf16.msra.mxu0 %v10071_v31 }
0x1f7e   :  { %8534 = vmatprep.subr.mxu0 %v13081_v58 }
0x1f81   :  { %8535 = vmatpush3.msra.mxu0 %v7209_v12 }
0x1f82   :  { %8537 = vmatmul.mubr.msk.f32.vlgmr.msra.gmra.mrb[56].mxu0 %vm247_vm7, %v14282_v22 }
0x1f9d   :  { %v5915_v2 = vpop.xlane.xlu0 %5914 }
0x1faa   :  { %v5909_v42 = vpop.xlane.xlu1 %5908 }
0x1fab   :  { %v5916_v49 = vadd.f32 %v5915_v2, %v5909_v42 }
0x1fad   :  { %v5917_v41 = vmul.f32 0.001953125, %v5916_v49 }
0x1faf   :  { %v5928_v63 = vsub.f32 %v14874_v27, %v5917_v41  ;;  %v5929_v19 = vsub.f32 %v14875_v51, %v5917_v41  ;;  %v5918_v56 = vsub.f32 %v14876_v43, %v5917_v41  ;;  %v5919_v1 = vsub.f32 %v14877_v62, %v5917_v41 }
0x1fb1   :  { %v5930_v10 = vmul.f32 %v5928_v63, %v5928_v63  ;;  %v5931_v7 = vmul.f32 %v5929_v19, %v5929_v19  ;;  %v5920_v18 = vmul.f32 %v5918_v56, %v5918_v56  ;;  %v5921_v40 = vmul.f32 %v5919_v1, %v5919_v1 }
0x1fb3   :  { %v5932_v45 = vsel %vm4313_vm1, %v5930_v10, 0.0  ;;  %v5933_v22 = vsel %vm4313_vm1, %v5931_v7, 0.0  ;;  %v5922_v8 = vsel %vm4313_vm1, %v5920_v18, 0.0  ;;  %v5923_v46 = vsel %vm4313_vm1, %v5921_v40, 0.0 }
0x1fb4   :  { %v5934_v34 = vadd.f32 %v5933_v22, %v5932_v45  ;;  %v5924_v24 = vadd.f32 %v5923_v46, %v5922_v8 }
0x1fb6   :  { %5935 = vadd.xlane.f32.xlu1 %v5934_v34  ;;  %5925 = vadd.xlane.f32.xlu0 %v5924_v24 }
0x2043   :  { %v5936_v5 = vpop.xlane.xlu1 %5935  ;;  %v5926_v3 = vpop.xlane.xlu0 %5925 }
0x2044   :  { %v5937_v33 = vadd.f32 %v5936_v5, %v5926_v3  ;;  %v7276_v44 = vpop.f32.mrb[54].mxu0 }
0x2045   :  { %v7278_v50 = vpop.f32.mrb[55].mxu0 }
0x2046   :  { %v5938_v21 = vmul.f32 0.001953125, %v5937_v33  ;;  %7418 = vmatprep.mubr.f32.mxu1 %v7278_v50 }
0x2047   :  { %7419 = vmatmul.mubr.f32.vlgmr.msra.gmra.mrb[44].mxu1 %v7276_v44 }
0x2048   :  { %v5939_v13 = vadd.f32 1e-05, %v5938_v21  ;;  %10140 = vmatpush1.bf16.msra.mxu1 %v14538_v17  ;;  %7489 = vmatprep.mubr.f32.mxu1 %v13081_v58  ;;  %v5904_v58 = vld [vmem:[%s14710_s19] sm:$0xf] }
0x2049   :  { %10143 = vmatprep.subr.msk.bf16.mxu1 %vm11478_vm6, %v14543_v4 }
0x204a   :  { %11227 = vrsqrt.f32 %v5939_v13 }
0x204c   :  { %10146 = vmatpush1.bf16.msk.msra.mxu1 %vm11478_vm6, %v14549_v23  ;;  %v6235_v23 = vld [vmem:[%s14711_s21] sm:$0xf] }
0x2054   :  { %v11228_v52 = vpop.eup %11227 }
0x2055   :  { %v5941_v54 = vmul.f32 %v11228_v52, %v5903_v47  ;;  %v7347_v36 = vpop.f32.mrb[56].mxu0 }
0x2056   :  { %v8538_v17 = vpop.f32.mrb[57].mxu0  ;;  %7575 = vmatmul.mubr.msk.f32.vlgmr.msra.gmra.mrb[44].mxu1 %vm1664_vm9, %v7347_v36 }
0x2057   :  { %5946 = vperm.xlu0 %10794, %v5941_v54   ;;  %v5942_v4 = vmul.f32 %v5941_v54, %v5917_v41 }
0x2059   :  { %v5943_v55 = vsub.f32 %v5904_v58, %v5942_v4 }
0x205b   :  { %5953 = vperm.xlu1 %10793, %v5943_v55  }
0x205f   :  { %6719 = vperm.xlu1 %10793, %v6235_v23  }
0x20d6   :  { %v5947_v61 = vpop.permute.xlu0 %5946 }
0x20d7   :  { %v5960_v57 = vmul.f32 %v5947_v61, %v14874_v27  ;;  %v5961_v59 = vmul.f32 %v5947_v61, %v14875_v51  ;;  %v5949_v11 = vmul.f32 %v5947_v61, %v14876_v43  ;;  %v5950_v60 = vmul.f32 %v5947_v61, %v14877_v62 }
0x20da   :  { %v5954_v14 = vpop.permute.xlu1 %5953 }
0x20db   :  { %v5956_v16 = vadd.f32 %v5954_v14, %v5949_v11  ;;  %v5957_v20 = vadd.f32 %v5954_v14, %v5950_v60  ;;  %v5962_v32 = vadd.f32 %v5960_v57, %v5954_v14  ;;  %v5963_v9 = vadd.f32 %v5961_v59, %v5954_v14 }
0x20dd   :  { %v5958_v25 = vmax.f32 %v5956_v16, 0.0  ;;  %v5959_v48 = vmax.f32 %v5957_v20, 0.0  ;;  %v5964_v35 = vmax.f32 %v5962_v32, 0.0  ;;  %v5965_v31 = vmax.f32 %v5963_v9, 0.0 }
0x20de   :  { %v6720_v29 = vpop.permute.xlu1 %6719 }
0x20df   :  { %v10151_v38 = vadd.f32 %v14616_v39, %v6720_v29  ;;  %v10152_v37 = vadd.f32 %v14618_v53, %v6720_v29 }
0x20e1   :  { %v7496_v30 = vadd.f32 %v10151_v38, %v5958_v25  ;;  %v7497_v15 = vadd.f32 %v10152_v37, %v5959_v48 }
0x20e3   :  { %v7502_v26 = vcombine.low %v7496_v30, %v7497_v15 }
0x20e5   :  { %7504 = vst [vmem:[%s14712_s22] sm:$0xff] %v7502_v26 }
0x2129   :  { %v7491_v0 = vpop.f32.mrb[44].mxu1 }
0x212a   :  { %v10153_v6 = vadd.f32 %v7491_v0, %v6720_v29  ;;  %v7493_v28 = vpop.f32.mrb[45].mxu1 }
0x212b   :  { %v10154_v12 = vadd.f32 %v7493_v28, %v6720_v29 }
0x212c   :  { %v7498_v2 = vadd.f32 %v10153_v6, %v5964_v35 }
0x212d   :  { %v7499_v42 = vadd.f32 %v10154_v12, %v5965_v31 }
0x212f   :  { %v7507_v49 = vcombine.low %v7498_v2, %v7499_v42 }
0x2131   :  { %7576 = vst [vmem:[%s14712_s22 + $0x8] sm:$0xff] %v7507_v49 }

</bundles_post_ra>
